<compile_context>
chip_gen: v5e
topology: v5e:2x2
jax: 0.10.0
libtpu: 0.0.40
codegen_flags: <defaults>
</compile_context>

<pallas_src>
import jax
import jax.numpy as jnp
from jax.experimental import pallas as pl
from jax.experimental.pallas import tpu as pltpu

IN_CH = 512      # per-part feature width (the module hardcodes 512-wide slices -> C must be 1536)
NLANES = 128     # fused logit-matmul output width (native MXU N on all generations)
HIGHEST = jax.lax.Precision.HIGHEST


def project_head_kernel(x_ref, mask_ref, wf_ref, bf_ref, fcw_ref, fcb_ref,
                        pred_ref, hand_ref, body_ref):
    Bb, T, C = x_ref.shape
    nl = wf_ref.shape[1]

    x = x_ref[...].astype(jnp.float32)                      # (Bb, T, 1536), keep math in f32

    # --- fused attention logits: one K=1536, N=128 MXU matmul for right/left/body ---
    x2d = x.reshape(Bb * T, C)                               # leading-dim merge (T % 8 == 0 -> no relayout)
    logits = jnp.dot(x2d, wf_ref[...], precision=HIGHEST,
                     preferred_element_type=jnp.float32) + bf_ref[...]      # (Bb*T, 128)
    logits = logits.reshape(Bb, T, nl)
    lr = logits[:, :, 0:1]                                   # (Bb, T, 1) right-hand logits (+ b_hand)
    ll = logits[:, :, 1:2]                                   # (Bb, T, 1) left-hand logits  (+ b_hand)
    lb = logits[:, :, 2:3]                                   # (Bb, T, 1) body logits       (+ b_body)

    # --- mask (concatenated [right; left] order along the 2T axis) ---
    mask = mask_ref[...]                                     # (Bb, 2T, 1)
    neg = jnp.float32(-10000.0)
    lr = jnp.where(mask[:, :T, :] == 0, neg, lr)             # masked_fill(mask==0, -1e4)
    ll = jnp.where(mask[:, T:, :] == 0, neg, ll)

    # --- hand softmax over the concatenated 2T axis (shared max & denominator, no concat buffer) ---
    m_h = jnp.maximum(jnp.max(lr, axis=1, keepdims=True),
                      jnp.max(ll, axis=1, keepdims=True))    # (Bb, 1, 1)
    er = jnp.exp(lr - m_h)
    el = jnp.exp(ll - m_h)
    inv_h = pl.reciprocal(jnp.sum(er, axis=1, keepdims=True)
                          + jnp.sum(el, axis=1, keepdims=True), approx=True)
    att_r = er * inv_h                                       # (Bb, T, 1)
    att_l = el * inv_h

    # --- body softmax (no mask) ---
    m_b = jnp.max(lb, axis=1, keepdims=True)
    eb = jnp.exp(lb - m_b)
    inv_b = pl.reciprocal(jnp.sum(eb, axis=1, keepdims=True), approx=True)
    att_b = eb * inv_b

    # --- attention pooling (weighted sum over time, exact f32 on the VPU) ---
    right = x[:, :, 0:IN_CH]
    left = x[:, :, IN_CH:2 * IN_CH]
    body = x[:, :, 2 * IN_CH:3 * IN_CH]
    hand_pool = jnp.sum(right * att_r, axis=1) + jnp.sum(left * att_l, axis=1)   # (Bb, 512)
    body_pool = jnp.sum(body * att_b, axis=1)                                    # (Bb, 512)

    feat = hand_pool + body_pool
    # TODO(synk): nn.Dropout is identity at inference; training-mode dropout not implemented.
    pred = jnp.dot(feat, fcw_ref[...], precision=HIGHEST,
                   preferred_element_type=jnp.float32) + fcb_ref[...]            # (Bb, NC_PAD)

    pred_ref[...] = pred.astype(pred_ref.dtype)
    hand_ref[...] = hand_pool.astype(hand_ref.dtype)
    body_ref[...] = body_pool.astype(body_ref.dtype)


def project_head(x, mask, params, *, num_class, block_b=None):
    B, T, C = x.shape
    assert C == 3 * IN_CH, "module hardcodes 512-wide slices -> C must be 1536"
    assert T % 8 == 0, "T must be a multiple of 8 for TPU sublane tiling"

    f32 = jnp.float32
    NC_PAD = max(NLANES, ((num_class + NLANES - 1) // NLANES) * NLANES)

    wh = params["w_hand"].astype(f32).reshape(IN_CH)
    wb = params["w_body"].astype(f32).reshape(IN_CH)
    bh = params["b_hand"].astype(f32).reshape(())
    bb = params["b_body"].astype(f32).reshape(())

    # Fused logit weight: lane 0 = right-hand, lane 1 = left-hand, lane 2 = body; biases folded in.
    wf = jnp.zeros((C, NLANES), f32)
    wf = wf.at[0:IN_CH, 0].set(wh)
    wf = wf.at[IN_CH:2 * IN_CH, 1].set(wh)
    wf = wf.at[2 * IN_CH:3 * IN_CH, 2].set(wb)
    bf = jnp.zeros((1, NLANES), f32).at[0, 0].set(bh).at[0, 1].set(bh).at[0, 2].set(bb)

    # fc weight/bias padded to a lane-dense 128-multiple output width (sliced back afterwards).
    fcw = jnp.zeros((IN_CH, NC_PAD), f32).at[:, :num_class].set(params["fc_w"].astype(f32))
    fcb = jnp.zeros((1, NC_PAD), f32).at[0, :num_class].set(params["fc_b"].astype(f32))

    # Batch blocking: target ~2 MiB x tiles; multiple of 8 rows so output stores are sublane-dense.
    bytes_per_b = T * C * jnp.dtype(x.dtype).itemsize
    if block_b is None:
        block_b = max(1, (2 * 1024 * 1024) // bytes_per_b)
    if block_b >= B:
        B_BLK, Bp = B, B
    else:
        B_BLK = max(8, (block_b // 8) * 8)
        Bp = ((B + B_BLK - 1) // B_BLK) * B_BLK

    xin = x
    mask_in = mask.astype(f32)
    if Bp != B:
        xin = jnp.pad(xin, ((0, Bp - B), (0, 0), (0, 0)))
        mask_in = jnp.pad(mask_in, ((0, Bp - B), (0, 0), (0, 0)), constant_values=1.0)

    out_shapes = (
        jax.ShapeDtypeStruct((Bp, NC_PAD), x.dtype),
        jax.ShapeDtypeStruct((Bp, IN_CH), x.dtype),
        jax.ShapeDtypeStruct((Bp, IN_CH), x.dtype),
    )

    pred, hand_pool, body_pool = pl.pallas_call(
        project_head_kernel,
        out_shape=out_shapes,
        grid_spec=pltpu.PrefetchScalarGridSpec(
            num_scalar_prefetch=0,
            grid=(Bp // B_BLK,),
            in_specs=[
                pl.BlockSpec((B_BLK, T, C), lambda b: (b, 0, 0)),          # x tile
                pl.BlockSpec((B_BLK, 2 * T, 1), lambda b: (b, 0, 0)),      # mask tile
                pl.BlockSpec((C, NLANES), lambda b: (0, 0)),               # fused logit weight (resident)
                pl.BlockSpec((1, NLANES), lambda b: (0, 0)),               # fused logit bias
                pl.BlockSpec((IN_CH, NC_PAD), lambda b: (0, 0)),           # fc weight (padded, resident)
                pl.BlockSpec((1, NC_PAD), lambda b: (0, 0)),               # fc bias (padded)
            ],
            out_specs=[
                pl.BlockSpec((B_BLK, NC_PAD), lambda b: (b, 0)),
                pl.BlockSpec((B_BLK, IN_CH), lambda b: (b, 0)),
                pl.BlockSpec((B_BLK, IN_CH), lambda b: (b, 0)),
            ],
        ),
        compiler_params=pltpu.CompilerParams(
            dimension_semantics=("parallel",),   # batch blocks are independent -> shard across TCs (v7x)
        ),
    )(xin, mask_in, wf, bf, fcw, fcb)

    return pred[:B, :num_class], hand_pool[:B], body_pool[:B]


def project_head_reference(x, mask, params):
    """Pure-JAX replica of the PyTorch forward (inter_dist=False, eval mode), f32-precision matmuls."""
    right = x[:, :, 0:IN_CH]
    left = x[:, :, IN_CH:2 * IN_CH]
    body = x[:, :, 2 * IN_CH:3 * IN_CH]
    hand = jnp.concatenate([right, left], axis=1)                                       # (B, 2T, 512)
    wh = jnp.matmul(hand, params["w_hand"], precision=HIGHEST) + params["b_hand"]       # (B, 2T, 1)
    wh = jnp.where(mask == 0, -10000.0, wh)
    wh = jax.nn.softmax(wh, axis=1)
    hand_pool = jnp.einsum("btc,bto->bc", hand, wh, precision=HIGHEST)
    wb = jnp.matmul(body, params["w_body"], precision=HIGHEST) + params["b_body"]
    wb = jax.nn.softmax(wb, axis=1)
    body_pool = jnp.einsum("btc,bto->bc", body, wb, precision=HIGHEST)
    feat = hand_pool + body_pool
    pred = jnp.matmul(feat, params["fc_w"], precision=HIGHEST) + params["fc_b"]
    return pred, hand_pool, body_pool


def _check_one(name, got, want, rtol=5e-3, atol=5e-3):
    # Tolerance leaves margin for pl.reciprocal(approx=True) in the softmax denominators and
    # for MXU-pass / summation-order differences vs the XLA reference.
    err = float(jnp.max(jnp.abs(got - want)))
    assert jnp.allclose(got, want, rtol=rtol, atol=atol), f"{name} mismatch, max abs err={err}"


def _check(pred, hand, body, pred_r, hand_r, body_r):
    _check_one("pred", pred, pred_r)
    _check_one("hand_pool", hand, hand_r)
    _check_one("body_pool", body, body_r)


if __name__ == "__main__":
    num_class = 16
    C = 3 * IN_CH
    key = jax.random.PRNGKey(0)
    k1, k2, k3, k4, k5, k6 = jax.random.split(key, 6)

    params = dict(
        w_hand=0.05 * jax.random.normal(k2, (IN_CH, 1), jnp.float32),
        b_hand=jnp.zeros((1,), jnp.float32),
        w_body=0.05 * jax.random.normal(k3, (IN_CH, 1), jnp.float32),
        b_body=jnp.zeros((1,), jnp.float32),
        fc_w=0.05 * jax.random.normal(k4, (IN_CH, num_class), jnp.float32),
        fc_b=0.01 * jax.random.normal(k5, (num_class,), jnp.float32),
    )

    # --- test 1: small batch, single grid step ---
    B, T = 2, 8
    x = jax.random.normal(k1, (B, T, C), jnp.float32)
    mask = jnp.ones((B, 2 * T, 1), jnp.float32).at[:, -3:, :].set(0.0)

    pred, hand_pool, body_pool = project_head(x, mask, params, num_class=num_class)
    jax.block_until_ready((pred, hand_pool, body_pool))
    pred_r, hand_r, body_r = project_head_reference(x, mask, params)
    _check(pred, hand_pool, body_pool, pred_r, hand_r, body_r)

    # --- test 2: larger batch exercising batch blocking + padding (B_BLK=8, Bp=24, grid=3) ---
    B2 = 20
    x2 = jax.random.normal(k6, (B2, T, C), jnp.float32)
    mask2 = jnp.ones((B2, 2 * T, 1), jnp.float32).at[:, -5:, :].set(0.0)

    pred2, hand2, body2 = project_head(x2, mask2, params, num_class=num_class, block_b=8)
    jax.block_until_ready((pred2, hand2, body2))
    pred2_r, hand2_r, body2_r = project_head_reference(x2, mask2, params)
    _check(pred2, hand2, body2, pred2_r, hand2_r, body2_r)

    print("KERNEL_OK")
</pallas_src>

<mosaic_0001>
module attributes {stable_mosaic.version = 11 : i64} {
  func.func @project_head_kernel(%arg0: i32, %arg1: memref<2x8x1536xf32, #tpu.memory_space<vmem>>, %arg2: memref<2x16x1xf32, #tpu.memory_space<vmem>>, %arg3: memref<1536x128xf32, #tpu.memory_space<vmem>>, %arg4: memref<1x128xf32, #tpu.memory_space<vmem>>, %arg5: memref<512x128xf32, #tpu.memory_space<vmem>>, %arg6: memref<1x128xf32, #tpu.memory_space<vmem>>, %arg7: memref<2x128xf32, #tpu.memory_space<vmem>>, %arg8: memref<2x512xf32, #tpu.memory_space<vmem>>, %arg9: memref<2x512xf32, #tpu.memory_space<vmem>>) attributes {dimension_semantics = [#tpu.dimension_semantics<parallel>], iteration_bounds = array<i64: 1>, scalar_prefetch = 0 : i64, scratch_operands = 0 : i64, tpu.core_type = #tpu.core_type<tc>, window_params = [{transform_indices = @transform_0, window_bounds = array<i64: 2, 8, 1536>}, {transform_indices = @transform_1, window_bounds = array<i64: 2, 16, 1>}, {pipeline_mode = #tpu.pipeline_mode<synchronous>, transform_indices = @transform_2, window_bounds = array<i64: 1536, 128>}, {pipeline_mode = #tpu.pipeline_mode<synchronous>, transform_indices = @transform_3, window_bounds = array<i64: 1, 128>}, {pipeline_mode = #tpu.pipeline_mode<synchronous>, transform_indices = @transform_4, window_bounds = array<i64: 512, 128>}, {pipeline_mode = #tpu.pipeline_mode<synchronous>, transform_indices = @transform_5, window_bounds = array<i64: 1, 128>}, {transform_indices = @transform_6, window_bounds = array<i64: 2, 128>}, {transform_indices = @transform_7, window_bounds = array<i64: 2, 512>}, {transform_indices = @transform_8, window_bounds = array<i64: 2, 512>}]} {
    %c0 = arith.constant 0 : index
    %c0_0 = arith.constant 0 : index
    %c0_1 = arith.constant 0 : index
    %0 = vector.load %arg1[%c0, %c0_0, %c0_1] : memref<2x8x1536xf32, #tpu.memory_space<vmem>>, vector<2x8x1536xf32>
    %1 = vector.shape_cast %0 : vector<2x8x1536xf32> to vector<16x1536xf32>
    %c0_2 = arith.constant 0 : index
    %c0_3 = arith.constant 0 : index
    %2 = vector.load %arg3[%c0_2, %c0_3] : memref<1536x128xf32, #tpu.memory_space<vmem>>, vector<1536x128xf32>
    %cst = arith.constant dense<0.000000e+00> : vector<16x128xf32>
    %3 = tpu.matmul %1, %2, %cst {dimension_numbers = #tpu.dot_dimension_numbers<[1], [0], [0], [1], [0, 0, 1, 1], [], []>, precision = #tpu.contract_precision<fp32>} : vector<16x1536xf32>, vector<1536x128xf32>, vector<16x128xf32> -> vector<16x128xf32>
    %c0_4 = arith.constant 0 : index
    %c0_5 = arith.constant 0 : index
    %4 = vector.load %arg4[%c0_4, %c0_5] : memref<1x128xf32, #tpu.memory_space<vmem>>, vector<1x128xf32>
    %5 = vector.broadcast %4 : vector<1x128xf32> to vector<16x128xf32>
    %6 = arith.addf %3, %5 : vector<16x128xf32>
    %7 = vector.shape_cast %6 : vector<16x128xf32> to vector<2x8x128xf32>
    %8 = vector.extract_strided_slice %7 {offsets = [0, 0, 0], sizes = [2, 8, 1], strides = [1, 1, 1]} : vector<2x8x128xf32> to vector<2x8x1xf32>
    %9 = vector.extract_strided_slice %7 {offsets = [0, 0, 1], sizes = [2, 8, 1], strides = [1, 1, 1]} : vector<2x8x128xf32> to vector<2x8x1xf32>
    %10 = vector.extract_strided_slice %7 {offsets = [0, 0, 2], sizes = [2, 8, 1], strides = [1, 1, 1]} : vector<2x8x128xf32> to vector<2x8x1xf32>
    %c0_6 = arith.constant 0 : index
    %c0_7 = arith.constant 0 : index
    %c0_8 = arith.constant 0 : index
    %11 = vector.load %arg2[%c0_6, %c0_7, %c0_8] : memref<2x16x1xf32, #tpu.memory_space<vmem>>, vector<2x16x1xf32>
    %12 = vector.extract_strided_slice %11 {offsets = [0, 0, 0], sizes = [2, 8, 1], strides = [1, 1, 1]} : vector<2x16x1xf32> to vector<2x8x1xf32>
    %cst_9 = arith.constant 0.000000e+00 : f32
    %13 = vector.broadcast %cst_9 : f32 to vector<2x8x1xf32>
    %14 = arith.cmpf oeq, %12, %13 : vector<2x8x1xf32>
    %cst_10 = arith.constant -1.000000e+04 : f32
    %15 = vector.broadcast %cst_10 : f32 to vector<2x8x1xf32>
    %16 = arith.select %14, %15, %8 : vector<2x8x1xi1>, vector<2x8x1xf32>
    %17 = vector.extract_strided_slice %11 {offsets = [0, 8, 0], sizes = [2, 8, 1], strides = [1, 1, 1]} : vector<2x16x1xf32> to vector<2x8x1xf32>
    %cst_11 = arith.constant 0.000000e+00 : f32
    %18 = vector.broadcast %cst_11 : f32 to vector<2x8x1xf32>
    %19 = arith.cmpf oeq, %17, %18 : vector<2x8x1xf32>
    %cst_12 = arith.constant -1.000000e+04 : f32
    %20 = vector.broadcast %cst_12 : f32 to vector<2x8x1xf32>
    %21 = arith.select %19, %20, %9 : vector<2x8x1xi1>, vector<2x8x1xf32>
    %cst_13 = arith.constant dense<0xFF800000> : vector<2x1xf32>
    %22 = vector.multi_reduction <maximumf>, %16, %cst_13 [1] : vector<2x8x1xf32> to vector<2x1xf32>
    %23 = vector.shape_cast %22 : vector<2x1xf32> to vector<2x1x1xf32>
    %cst_14 = arith.constant dense<0xFF800000> : vector<2x1xf32>
    %24 = vector.multi_reduction <maximumf>, %21, %cst_14 [1] : vector<2x8x1xf32> to vector<2x1xf32>
    %25 = vector.shape_cast %24 : vector<2x1xf32> to vector<2x1x1xf32>
    %26 = arith.maximumf %23, %25 : vector<2x1x1xf32>
    %27 = vector.broadcast %26 : vector<2x1x1xf32> to vector<2x8x1xf32>
    %28 = arith.subf %16, %27 : vector<2x8x1xf32>
    %29 = math.exp %28 : vector<2x8x1xf32>
    %30 = vector.broadcast %26 : vector<2x1x1xf32> to vector<2x8x1xf32>
    %31 = arith.subf %21, %30 : vector<2x8x1xf32>
    %32 = math.exp %31 : vector<2x8x1xf32>
    %cst_15 = arith.constant dense<0.000000e+00> : vector<2x1xf32>
    %33 = vector.multi_reduction <add>, %29, %cst_15 [1] : vector<2x8x1xf32> to vector<2x1xf32>
    %34 = vector.shape_cast %33 : vector<2x1xf32> to vector<2x1x1xf32>
    %cst_16 = arith.constant dense<0.000000e+00> : vector<2x1xf32>
    %35 = vector.multi_reduction <add>, %32, %cst_16 [1] : vector<2x8x1xf32> to vector<2x1xf32>
    %36 = vector.shape_cast %35 : vector<2x1xf32> to vector<2x1x1xf32>
    %37 = arith.addf %34, %36 : vector<2x1x1xf32>
    %38 = tpu.reciprocal %37 {approx = true} : vector<2x1x1xf32> -> vector<2x1x1xf32>
    %39 = vector.broadcast %38 : vector<2x1x1xf32> to vector<2x8x1xf32>
    %40 = arith.mulf %29, %39 : vector<2x8x1xf32>
    %41 = vector.broadcast %38 : vector<2x1x1xf32> to vector<2x8x1xf32>
    %42 = arith.mulf %32, %41 : vector<2x8x1xf32>
    %cst_17 = arith.constant dense<0xFF800000> : vector<2x1xf32>
    %43 = vector.multi_reduction <maximumf>, %10, %cst_17 [1] : vector<2x8x1xf32> to vector<2x1xf32>
    %44 = vector.shape_cast %43 : vector<2x1xf32> to vector<2x1x1xf32>
    %45 = vector.broadcast %44 : vector<2x1x1xf32> to vector<2x8x1xf32>
    %46 = arith.subf %10, %45 : vector<2x8x1xf32>
    %47 = math.exp %46 : vector<2x8x1xf32>
    %cst_18 = arith.constant dense<0.000000e+00> : vector<2x1xf32>
    %48 = vector.multi_reduction <add>, %47, %cst_18 [1] : vector<2x8x1xf32> to vector<2x1xf32>
    %49 = vector.shape_cast %48 : vector<2x1xf32> to vector<2x1x1xf32>
    %50 = tpu.reciprocal %49 {approx = true} : vector<2x1x1xf32> -> vector<2x1x1xf32>
    %51 = vector.broadcast %50 : vector<2x1x1xf32> to vector<2x8x1xf32>
    %52 = arith.mulf %47, %51 : vector<2x8x1xf32>
    %53 = vector.extract_strided_slice %0 {offsets = [0, 0, 0], sizes = [2, 8, 512], strides = [1, 1, 1]} : vector<2x8x1536xf32> to vector<2x8x512xf32>
    %54 = vector.extract_strided_slice %0 {offsets = [0, 0, 512], sizes = [2, 8, 512], strides = [1, 1, 1]} : vector<2x8x1536xf32> to vector<2x8x512xf32>
    %55 = vector.extract_strided_slice %0 {offsets = [0, 0, 1024], sizes = [2, 8, 512], strides = [1, 1, 1]} : vector<2x8x1536xf32> to vector<2x8x512xf32>
    %56 = vector.broadcast %40 : vector<2x8x1xf32> to vector<2x8x512xf32>
    %57 = arith.mulf %53, %56 : vector<2x8x512xf32>
    %cst_19 = arith.constant dense<0.000000e+00> : vector<2x512xf32>
    %58 = vector.multi_reduction <add>, %57, %cst_19 [1] : vector<2x8x512xf32> to vector<2x512xf32>
    %59 = vector.broadcast %42 : vector<2x8x1xf32> to vector<2x8x512xf32>
    %60 = arith.mulf %54, %59 : vector<2x8x512xf32>
    %cst_20 = arith.constant dense<0.000000e+00> : vector<2x512xf32>
    %61 = vector.multi_reduction <add>, %60, %cst_20 [1] : vector<2x8x512xf32> to vector<2x512xf32>
    %62 = arith.addf %58, %61 : vector<2x512xf32>
    %63 = vector.broadcast %52 : vector<2x8x1xf32> to vector<2x8x512xf32>
    %64 = arith.mulf %55, %63 : vector<2x8x512xf32>
    %cst_21 = arith.constant dense<0.000000e+00> : vector<2x512xf32>
    %65 = vector.multi_reduction <add>, %64, %cst_21 [1] : vector<2x8x512xf32> to vector<2x512xf32>
    %66 = arith.addf %62, %65 : vector<2x512xf32>
    %c0_22 = arith.constant 0 : index
    %c0_23 = arith.constant 0 : index
    %67 = vector.load %arg5[%c0_22, %c0_23] : memref<512x128xf32, #tpu.memory_space<vmem>>, vector<512x128xf32>
    %cst_24 = arith.constant dense<0.000000e+00> : vector<2x128xf32>
    %68 = tpu.matmul %66, %67, %cst_24 {dimension_numbers = #tpu.dot_dimension_numbers<[1], [0], [0], [1], [0, 0, 1, 1], [], []>, precision = #tpu.contract_precision<fp32>} : vector<2x512xf32>, vector<512x128xf32>, vector<2x128xf32> -> vector<2x128xf32>
    %c0_25 = arith.constant 0 : index
    %c0_26 = arith.constant 0 : index
    %69 = vector.load %arg6[%c0_25, %c0_26] : memref<1x128xf32, #tpu.memory_space<vmem>>, vector<1x128xf32>
    %70 = vector.broadcast %69 : vector<1x128xf32> to vector<2x128xf32>
    %71 = arith.addf %68, %70 : vector<2x128xf32>
    %c0_27 = arith.constant 0 : index
    %c0_28 = arith.constant 0 : index
    %72 = vector.load %arg7[%c0_27, %c0_28] : memref<2x128xf32, #tpu.memory_space<vmem>>, vector<2x128xf32>
    tpu.vector_store %arg7[%c0_27, %c0_28], %71 {strides = array<i32>} : memref<2x128xf32, #tpu.memory_space<vmem>>, vector<2x128xf32>,
    %c0_29 = arith.constant 0 : index
    %c0_30 = arith.constant 0 : index
    %73 = vector.load %arg8[%c0_29, %c0_30] : memref<2x512xf32, #tpu.memory_space<vmem>>, vector<2x512xf32>
    tpu.vector_store %arg8[%c0_29, %c0_30], %62 {strides = array<i32>} : memref<2x512xf32, #tpu.memory_space<vmem>>, vector<2x512xf32>,
    %c0_31 = arith.constant 0 : index
    %c0_32 = arith.constant 0 : index
    %74 = vector.load %arg9[%c0_31, %c0_32] : memref<2x512xf32, #tpu.memory_space<vmem>>, vector<2x512xf32>
    tpu.vector_store %arg9[%c0_31, %c0_32], %65 {strides = array<i32>} : memref<2x512xf32, #tpu.memory_space<vmem>>, vector<2x512xf32>,
    return
  }
  func.func @transform_0(%arg0: i32) -> (i32, i32, i32) {
    %c0_i32 = arith.constant 0 : i32
    %c0_i32_0 = arith.constant 0 : i32
    %c0_i32_1 = arith.constant 0 : i32
    return %arg0, %c0_i32, %c0_i32_0 : i32, i32, i32
  }
  func.func @transform_1(%arg0: i32) -> (i32, i32, i32) {
    %c0_i32 = arith.constant 0 : i32
    %c0_i32_0 = arith.constant 0 : i32
    %c0_i32_1 = arith.constant 0 : i32
    return %arg0, %c0_i32, %c0_i32_0 : i32, i32, i32
  }
  func.func @transform_2(%arg0: i32) -> (i32, i32) {
    %c0_i32 = arith.constant 0 : i32
    %c0_i32_0 = arith.constant 0 : i32
    %c0_i32_1 = arith.constant 0 : i32
    return %c0_i32, %c0_i32_0 : i32, i32
  }
  func.func @transform_3(%arg0: i32) -> (i32, i32) {
    %c0_i32 = arith.constant 0 : i32
    %c0_i32_0 = arith.constant 0 : i32
    %c0_i32_1 = arith.constant 0 : i32
    return %c0_i32, %c0_i32_0 : i32, i32
  }
  func.func @transform_4(%arg0: i32) -> (i32, i32) {
    %c0_i32 = arith.constant 0 : i32
    %c0_i32_0 = arith.constant 0 : i32
    %c0_i32_1 = arith.constant 0 : i32
    return %c0_i32, %c0_i32_0 : i32, i32
  }
  func.func @transform_5(%arg0: i32) -> (i32, i32) {
    %c0_i32 = arith.constant 0 : i32
    %c0_i32_0 = arith.constant 0 : i32
    %c0_i32_1 = arith.constant 0 : i32
    return %c0_i32, %c0_i32_0 : i32, i32
  }
  func.func @transform_6(%arg0: i32) -> (i32, i32) {
    %c0_i32 = arith.constant 0 : i32
    %c0_i32_0 = arith.constant 0 : i32
    return %arg0, %c0_i32 : i32, i32
  }
  func.func @transform_7(%arg0: i32) -> (i32, i32) {
    %c0_i32 = arith.constant 0 : i32
    %c0_i32_0 = arith.constant 0 : i32
    return %arg0, %c0_i32 : i32, i32
  }
  func.func @transform_8(%arg0: i32) -> (i32, i32) {
    %c0_i32 = arith.constant 0 : i32
    %c0_i32_0 = arith.constant 0 : i32
    return %arg0, %c0_i32 : i32, i32
  }
}

</mosaic_0001>

<bundles_post_ra>
// kernel: tpu_custom_call.1
= control target key start
LH: loop header
LB: loop body
LE: loop exit
PB: predicated region body
PF: predicated region fallthrough
CT: control target
= control target key end

     0   :  { %14 = vsyncpa [#allocation3], 0  ;;  %s11612_s0 = inlined_call_operand.hbm [shape: f32[2,8,1536], index: 0, kind: input, shape index: {}]   ;;  %s11613_s1 = inlined_call_operand.vmem [shape: f32[2,16,1], index: 1, kind: input, shape index: {}]   ;;  %s11614_s2 = inlined_call_operand.hbm [shape: f32[1536,128], index: 2, kind: input, shape index: {}]   ;;  %s11615_s3 = inlined_call_operand.vmem [shape: f32[1,128], index: 3, kind: input, shape index: {}]   ;;  %s11616_s4 = inlined_call_operand.hbm [shape: f32[512,128], index: 4, kind: input, shape index: {}]   ;;  %s11617_s5 = inlined_call_operand.vmem [shape: f32[1,128], index: 5, kind: input, shape index: {}]   ;;  %s11618_s6 = inlined_call_operand.hbm [shape: f32[2,128], index: 6, kind: output, shape index: {0}]   ;;  %s11619_s7 = inlined_call_operand.hbm [shape: f32[2,512], index: 7, kind: output, shape index: {1}]   ;;  %s11620_s8 = inlined_call_operand.hbm [shape: f32[2,512], index: 8, kind: output, shape index: {2}]  }
   0x1   :  { %15 = vsyncpa [#allocation6], 0 }
   0x2   :  { %16 = vsyncpa [#allocation4], 0  ;;  %s37_s29 = sshll.u32 %s11614_s2, 4  ;;  %s38_s29 = int_to_ptr.hbm [resolvable:$true] %s37_s29 }
   0x3   :  { %17 = vsyncpa [#allocation10], 0  ;;  %s6891_s30 = smov [#allocation5]   ;;  %s22_s12 = sshll.u32 %s11612_s0, 4  ;;  %s23_s12 = int_to_ptr.hbm [resolvable:$true] %s22_s12 }
   0x4   :  { %s39_s9 = sshll.u32 %s6891_s30, 4  ;;  %s6892_s13 = smov 128   ;;  %s40_s9 = int_to_ptr.vmem [resolvable:$true] %s39_s9 }
   0x5   :  { %s6893_s14 = smov 8   ;;  %s6894_s15 = smov [#allocation2]  }
   0x6   :  { %45 = dma.hbm_to_vmem [thread:$0]  %s38_s29, 24576, %s40_s9, [#allocation6], %s6892_s13, %s6892_s13, %s6893_s14  }
   0x7   :  { %s24_s16 = sshll.u32 %s6894_s15, 4  ;;  %s6895_s17 = smov 1536   ;;  %s25_s16 = int_to_ptr.vmem [resolvable:$true] %s24_s16 }
   0x8   :  { %s6896_s18 = smov 96   ;;  %s52_s20 = sshll.u32 %s11616_s4, 4  ;;  %s53_s20 = int_to_ptr.hbm [resolvable:$true] %s52_s20 }
   0x9   :  { %30 = dma.hbm_to_vmem [thread:$0]  %s23_s12, 3072, %s25_s16, [#allocation3], %s6895_s17, %s6895_s17, %s6896_s18  }
   0xa   :  { %s6897_s21 = smov [#allocation7]  }
   0xb   :  { %s54_s22 = sshll.u32 %s6897_s21, 4  ;;  %s55_s22 = int_to_ptr.vmem [resolvable:$true] %s54_s22 }
   0xc   :  { %60 = dma.hbm_to_vmem [thread:$0]  %s53_s20, 8192, %s55_s22, [#allocation6], %s6892_s13, %s6892_s13, %s6893_s14  }
   0xd   :  { %6883 = dma.done.wait [#allocation3], 3072  }
   0xe   :  { %6884 = vsyncadd [#allocation3], 4294964224 }
   0xf   :  { %6885 = dma.done.wait [#allocation6], 32768  }
  0x10   :  { %6886 = vsyncadd [#allocation6], 4294934528  ;;  %v114_v0 = vld [vmem:[#allocation5 + $0x78] sm:$0xff]  ;;  %v113_v1 = vld [vmem:[#allocation5 + $0x70] sm:$0xff]  ;;  %vm4858_vm0 = vcmask 23568   ;;  %vm4779_vm2 = vcmask 7168  }
  0x11   :  { %v112_v2 = vld [vmem:[#allocation5 + $0x68] sm:$0xff]  ;;  %v6958_v3 = vand.u32 4294901760, %v114_v0  ;;  %v6960_v4 = vand.u32 4294901760, %v113_v1  ;;  %v111_v6 = vld [vmem:[#allocation5 + $0x60] sm:$0xff]  ;;  %v110_v7 = vld [vmem:[#allocation5 + $0x58] sm:$0xff]  ;;  %vm5187_vm6 = vcmask 1041409  }
  0x12   :  { %v6962_v5 = vand.u32 4294901760, %v112_v2  ;;  %v109_v8 = vld [vmem:[#allocation5 + $0x50] sm:$0xff]  ;;  %v6964_v9 = vand.u32 4294901760, %v111_v6  ;;  %v6966_v10 = vand.u32 4294901760, %v110_v7  ;;  %v108_v12 = vld [vmem:[#allocation5 + $0x48] sm:$0xff]  ;;  %v107_v13 = vld [vmem:[#allocation5 + $0x40] sm:$0xff] }
  0x13   :  { %v6968_v11 = vand.u32 4294901760, %v109_v8  ;;  %296 = vmatpush.msra.mxu0 %v6958_v3  ;;  %v6972_v14 = vsub.f32 %v114_v0, %v6958_v3  ;;  %v6975_v15 = vsub.f32 %v113_v1, %v6960_v4  ;;  %509 = vmatpush.msra.mxu3 %v6958_v3  ;;  %v6981_v17 = vand.u32 4294901760, %v108_v12  ;;  %v106_v18 = vld [vmem:[#allocation5 + $0x38] sm:$0xff]  ;;  %v105_v26 = vld [vmem:[#allocation5 + $0x30] sm:$0xff]  ;;  %v104_v36 = vld [vmem:[#allocation5 + $0x28] sm:$0xff]  ;;  %s6645_s10 = sshll.u32 %s11619_s7, 4  ;;  %s6646_s10 = int_to_ptr.hbm [resolvable:$true] %s6645_s10 }
  0x14   :  { %v6979_v16 = vsub.f32 %v112_v2, %v6962_v5  ;;  %v6984_v19 = vsub.f32 %v111_v6, %v6964_v9  ;;  %v6987_v20 = vsub.f32 %v110_v7, %v6966_v10  ;;  %v6989_v21 = vand.u32 4294901760, %v107_v13  ;;  %v103_v42 = vld [vmem:[#allocation5 + $0x20] sm:$0xff]  ;;  %v102_v48 = vld [vmem:[#allocation5 + $0x18] sm:$0xff]  ;;  %v101_v54 = vld [vmem:[#allocation5 + $0x10] sm:$0xff]  ;;  %s6901_s11 = smov [#allocation9]   ;;  %s6656_s15 = sshll.u32 %s11620_s8, 4  ;;  %s6657_s15 = int_to_ptr.hbm [resolvable:$true] %s6656_s15 }
  0x15   :  { %298 = vmatpush.msra.mxu0 %v6960_v4  ;;  %451 = vmatpush.msra.mxu2 %v6972_v14  ;;  %v346_v22 = vand.u32 4294901760, %v6972_v14  ;;  %v11636_v23 = vand.u32 4294901760, %v6975_v15  ;;  %v6997_v25 = vsub.f32 %v109_v8, %v6968_v11  ;;  %v7001_v28 = vand.u32 4294901760, %v106_v18  ;;  %v130_v59 = vld [vmem:[#allocation5 + $0xf8] sm:$0xff]  ;;  %v100_v61 = vld [vmem:[#allocation5 + $0x8] sm:$0xff]  ;;  %v129_v2 = vld [vmem:[#allocation5 + $0xf0] sm:$0xff] }
  0x16   :  { %v11634_v24 = vand.u32 4294901760, %v6979_v16  ;;  %511 = vmatpush.msra.mxu3 %v6960_v4  ;;  %v11633_v27 = vand.u32 4294901760, %v6984_v19  ;;  %v7004_v29 = vsub.f32 %v108_v12, %v6981_v17  ;;  %v11630_v33 = vand.u32 4294901760, %v6987_v20  ;;  %v99_v7 = vld [vmem:[#allocation5] sm:$0xff]  ;;  %s6643_s12 = sshll.u32 %s6901_s11, 4  ;;  %s6902_s16 = smov [#allocation11]   ;;  %s6644_s12 = int_to_ptr.vmem [resolvable:$true] %s6643_s12 }
  0x17   :  { %300 = vmatpush.msra.mxu0 %v6962_v5  ;;  %454 = vmatpush.msra.mxu2 %v6975_v15  ;;  %v347_v30 = vsub.f32 %v6972_v14, %v346_v22  ;;  %v353_v31 = vsub.f32 %v6975_v15, %v11636_v23  ;;  %v7019_v34 = vand.u32 4294901760, %v105_v26  ;;  %v7022_v35 = vsub.f32 %v107_v13, %v6989_v21  ;;  %v121_v23 = vld [vmem:[#allocation5 + $0xb0] sm:$0xff]  ;;  %s6654_s17 = sshll.u32 %s6902_s16, 4  ;;  %s6634_s20 = sshll.u32 %s11618_s6, 4  ;;  %s6655_s17 = int_to_ptr.vmem [resolvable:$true] %s6654_s17  ;;  %s6635_s20 = int_to_ptr.hbm [resolvable:$true] %s6634_s20 }
  0x18   :  { %v359_v32 = vsub.f32 %v6979_v16, %v11634_v24  ;;  %513 = vmatpush.msra.mxu3 %v6962_v5  ;;  %v365_v39 = vsub.f32 %v6984_v19, %v11633_v27  ;;  %v11629_v40 = vand.u32 4294901760, %v6997_v25  ;;  %v7032_v41 = vsub.f32 %v106_v18, %v7001_v28 }
  0x19   :  { %302 = vmatpush.msra.mxu0 %v6964_v9  ;;  %v348_v37 = vand.u32 4294901760, %v347_v30  ;;  %457 = vmatpush.msra.mxu2 %v6979_v16  ;;  %v354_v38 = vand.u32 4294901760, %v353_v31  ;;  %v371_v44 = vsub.f32 %v6987_v20, %v11630_v33  ;;  %v7038_v45 = vand.u32 4294901760, %v104_v36 }
  0x1a   :  { %515 = vmatpush.msra.mxu3 %v6964_v9  ;;  %v360_v43 = vand.u32 4294901760, %v359_v32  ;;  %v11627_v46 = vand.u32 4294901760, %v7004_v29  ;;  %v11626_v47 = vand.u32 4294901760, %v7022_v35  ;;  %v366_v49 = vand.u32 4294901760, %v365_v39  ;;  %v128_v32 = vld [vmem:[#allocation5 + $0xe8] sm:$0xff] }
  0x1b   :  { %304 = vmatpush.msra.mxu0 %v6966_v10  ;;  %349 = vmatpush.msra.mxu1 %v348_v37  ;;  %v377_v50 = vsub.f32 %v6997_v25, %v11629_v40  ;;  %v7048_v51 = vand.u32 4294901760, %v103_v42  ;;  %v7051_v52 = vsub.f32 %v105_v26, %v7019_v34  ;;  %v11624_v53 = vand.u32 4294901760, %v7032_v41 }
  0x1c   :  { %460 = vmatpush.msra.mxu2 %v6984_v19  ;;  %517 = vmatpush.msra.mxu3 %v6966_v10  ;;  %v372_v55 = vand.u32 4294901760, %v371_v44  ;;  %v383_v56 = vsub.f32 %v7004_v29, %v11627_v46  ;;  %v7060_v57 = vand.u32 4294901760, %v102_v48  ;;  %v7063_v58 = vsub.f32 %v104_v36, %v7038_v45 }
  0x1d   :  { %306 = vmatpush.msra.mxu0 %v6968_v11  ;;  %355 = vmatpush.msra.mxu1 %v354_v38  ;;  %v389_v60 = vsub.f32 %v7022_v35, %v11626_v47  ;;  %v378_v62 = vand.u32 4294901760, %v377_v50  ;;  %v7071_v63 = vand.u32 4294901760, %v101_v54  ;;  %v11623_v0 = vand.u32 4294901760, %v7051_v52 }
  0x1e   :  { %463 = vmatpush.msra.mxu2 %v6987_v20  ;;  %519 = vmatpush.msra.mxu3 %v6968_v11  ;;  %v7075_v1 = vsub.f32 %v103_v42, %v7048_v51  ;;  %v395_v6 = vsub.f32 %v7032_v41, %v11624_v53  ;;  %v7082_v8 = vand.u32 4294901760, %v130_v59  ;;  %v384_v12 = vand.u32 4294901760, %v383_v56  ;;  %v127_v42 = vld [vmem:[#allocation5 + $0xe0] sm:$0xff] }
  0x1f   :  { %308 = vmatpush.msra.mxu0 %v6981_v17  ;;  %361 = vmatpush.msra.mxu1 %v360_v43  ;;  %v7085_v13 = vand.u32 4294901760, %v100_v61  ;;  %v11621_v18 = vand.u32 4294901760, %v7063_v58  ;;  %v7089_v26 = vsub.f32 %v102_v48, %v7060_v57  ;;  %v390_v30 = vand.u32 4294901760, %v389_v60 }
  0x20   :  { %466 = vmatpush.msra.mxu2 %v6997_v25  ;;  %521 = vmatpush.msra.mxu3 %v6981_v17  ;;  %v7093_v31 = vand.u32 4294901760, %v129_v2  ;;  %v401_v36 = vsub.f32 %v7051_v52, %v11623_v0  ;;  %v7099_v37 = vand.u32 4294901760, %v99_v7  ;;  %v11622_v38 = vand.u32 4294901760, %v7075_v1 }
  0x21   :  { %310 = vmatpush.msra.mxu0 %v6989_v21  ;;  %367 = vmatpush.msra.mxu1 %v366_v49  ;;  %v7103_v39 = vsub.f32 %v101_v54, %v7071_v63  ;;  %v396_v43 = vand.u32 4294901760, %v395_v6  ;;  %v7108_v44 = vsub.f32 %v130_v59, %v7082_v8  ;;  %v407_v48 = vsub.f32 %v7063_v58, %v11621_v18  ;;  %v125_v18 = vld [vmem:[#allocation5 + $0xd0] sm:$0xff] }
  0x22   :  { %469 = vmatpush.msra.mxu2 %v7004_v29  ;;  %523 = vmatpush.msra.mxu3 %v6989_v21  ;;  %11841 = vst [vmem:[#allocation16_spill] sm:$0xff] %v7099_v37  ;;  %v11625_v49 = vand.u32 4294901760, %v7089_v26  ;;  %v7116_v50 = vsub.f32 %v100_v61, %v7085_v13  ;;  %v7118_v54 = vand.u32 4294901760, %v128_v32  ;;  %v7123_v56 = vsub.f32 %v129_v2, %v7093_v31 }
  0x23   :  { %312 = vmatpush.msra.mxu0 %v7001_v28  ;;  %373 = vmatpush.msra.mxu1 %v372_v55  ;;  %v126_v55 = vld [vmem:[#allocation5 + $0xd8] sm:$0xff]  ;;  %v7125_v59 = vand.u32 4294901760, %v127_v42  ;;  %v402_v60 = vand.u32 4294901760, %v401_v36  ;;  %v413_v61 = vsub.f32 %v7075_v1, %v11622_v38  ;;  %v7133_v6 = vsub.f32 %v99_v7, %v7099_v37 }
  0x24   :  { %472 = vmatpush.msra.mxu2 %v7022_v35  ;;  %525 = vmatpush.msra.mxu3 %v7001_v28  ;;  %v11631_v2 = vand.u32 4294901760, %v7108_v44  ;;  %v419_v36 = vsub.f32 %v7089_v26, %v11625_v49  ;;  %v11632_v7 = vand.u32 4294901760, %v7116_v50  ;;  %v7146_v38 = vsub.f32 %v128_v32, %v7118_v54 }
  0x25   :  { %314 = vmatpush.msra.mxu0 %v7019_v34  ;;  %379 = vmatpush.msra.mxu1 %v378_v62  ;;  %v11628_v62 = vand.u32 4294901760, %v7103_v39  ;;  %v11635_v0 = vand.u32 4294901760, %v7123_v56  ;;  %v7152_v53 = vsub.f32 %v127_v42, %v7125_v59  ;;  %v11637_v32 = vand.u32 4294901760, %v7133_v6 }
  0x26   :  { %475 = vmatpush.msra.mxu2 %v7032_v41  ;;  %527 = vmatpush.msra.mxu3 %v7019_v34  ;;  %v7159_v47 = vand.u32 4294901760, %v125_v18  ;;  %v719_v42 = vsub.f32 %v7108_v44, %v11631_v2  ;;  %v11638_v40 = vand.u32 4294901760, %v7146_v38  ;;  %v11842_v14 = vand.u32 4294901760, %v6975_v15 }
  0x27   :  { %316 = vmatpush.msra.mxu0 %v7038_v45  ;;  %385 = vmatpush.msra.mxu1 %v384_v12  ;;  %v7138_v12 = vand.u32 4294901760, %v126_v55  ;;  %v425_v49 = vsub.f32 %v7103_v39, %v11628_v62  ;;  %v431_v62 = vsub.f32 %v7116_v50, %v11632_v7  ;;  %v437_v7 = vsub.f32 %v7133_v6, %v11637_v32 }
  0x28   :  { %478 = vmatpush.msra.mxu2 %v7051_v52  ;;  %529 = vmatpush.msra.mxu3 %v7038_v45  ;;  %v7187_v27 = vsub.f32 %v125_v18, %v7159_v47  ;;  %v731_v18 = vsub.f32 %v7146_v38, %v11638_v40  ;;  %v11844_v15 = vand.u32 4294901760, %v6979_v16  ;;  %v11846_v16 = vand.u32 4294901760, %v6984_v19 }
  0x29   :  { %318 = vmatpush.msra.mxu0 %v7048_v51  ;;  %391 = vmatpush.msra.mxu1 %v390_v30  ;;  %v408_v30 = vand.u32 4294901760, %v407_v48  ;;  %v414_v48 = vand.u32 4294901760, %v413_v61  ;;  %v7167_v46 = vsub.f32 %v126_v55, %v7138_v12  ;;  %v420_v61 = vand.u32 4294901760, %v419_v36 }
  0x2a   :  { %481 = vmatpush.msra.mxu2 %v7063_v58  ;;  %531 = vmatpush.msra.mxu3 %v7048_v51  ;;  %v725_v55 = vsub.f32 %v7123_v56, %v11635_v0  ;;  %v426_v36 = vand.u32 4294901760, %v425_v49  ;;  %v720_v0 = vand.u32 4294901760, %v719_v42  ;;  %v432_v49 = vand.u32 4294901760, %v431_v62 }
  0x2b   :  { %320 = vmatpush.msra.mxu0 %v7060_v57  ;;  %397 = vmatpush.msra.mxu1 %v396_v43  ;;  %v124_v43 = vld [vmem:[#allocation5 + $0xc8] sm:$0xff]  ;;  %v11843_v42 = vand.u32 4294901760, %v7152_v53  ;;  %v438_v40 = vand.u32 4294901760, %v437_v7  ;;  %v732_v7 = vand.u32 4294901760, %v731_v18  ;;  %v11848_v19 = vand.u32 4294901760, %v6987_v20 }
  0x2c   :  { %484 = vmatpush.msra.mxu2 %v7075_v1  ;;  %533 = vmatpush.msra.mxu3 %v7060_v57  ;;  %v7174_v33 = vand.u32 4294901760, %v124_v43  ;;  %v11850_v20 = vand.u32 4294901760, %v6997_v25  ;;  %vm6575_vm7 = vcmask 1041408   ;;  %vm6577_vm8 = vcmask 1045508  }
  0x2d   :  { %322 = vmatpush.msra.mxu0 %v7071_v63  ;;  %403 = vmatpush.msra.mxu1 %v402_v60  ;;  %v123_v60 = vld [vmem:[#allocation5 + $0xc0] sm:$0xff]  ;;  %v737_v62 = vsub.f32 %v7152_v53, %v11843_v42  ;;  %vm6579_vm9 = vcmask 1043456   ;;  %vm6590_vm10 = vcmask 1043459   ;;  %vm6592_vm11 = vcmask 1045509  }
  0x2e   :  { %487 = vmatpush.msra.mxu2 %v7089_v26  ;;  %535 = vmatpush.msra.mxu3 %v7071_v63  ;;  %v7189_v24 = vand.u32 4294901760, %v123_v60  ;;  %v119_v42 = vld [vmem:[#allocation5 + $0xa0] sm:$0xff]  ;;  %vm6594_vm12 = vcmask 1047559  }
  0x2f   :  { %324 = vmatpush.msra.mxu0 %v7085_v13  ;;  %409 = vmatpush.msra.mxu1 %v408_v30  ;;  %v122_v30 = vld [vmem:[#allocation5 + $0xb8] sm:$0xff] }
  0x30   :  { %490 = vmatpush.msra.mxu2 %v7103_v39  ;;  %537 = vmatpush.msra.mxu3 %v7085_v13  ;;  %v7202_v32 = vand.u32 4294901760, %v122_v30  ;;  %v7213_v2 = vsub.f32 %v123_v60, %v7189_v24 }
  0x31   :  { %326 = vmatpush.msra.mxu0 %v7099_v37  ;;  %415 = vmatpush.msra.mxu1 %v414_v48  ;;  %v7200_v48 = vsub.f32 %v124_v43, %v7174_v33 }
  0x32   :  { %493 = vmatpush.msra.mxu2 %v7116_v50  ;;  %539 = vmatpush.msra.mxu3 %v7099_v37  ;;  %v7215_v37 = vand.u32 4294901760, %v121_v23  ;;  %v7225_v60 = vsub.f32 %v122_v30, %v7202_v32 }
  0x33   :  { %556 = vmatpush.msrb.mxu0 %v346_v22  ;;  %421 = vmatpush.msra.mxu1 %v420_v61  ;;  %v726_v22 = vand.u32 4294901760, %v725_v55  ;;  %v120_v61 = vld [vmem:[#allocation5 + $0xa8] sm:$0xff]  ;;  %v11845_v55 = vand.u32 4294901760, %v7167_v46 }
  0x34   :  { %496 = vmatpush.msra.mxu2 %v7133_v6  ;;  %721 = vmatpush.msrb.mxu3 %v720_v0  ;;  %v7227_v43 = vand.u32 4294901760, %v120_v61  ;;  %v738_v0 = vand.u32 4294901760, %v737_v62  ;;  %v7237_v30 = vsub.f32 %v121_v23, %v7215_v37 }
  0x35   :  { %560 = vmatpush.msrb.mxu0 %v11842_v14  ;;  %427 = vmatpush.msra.mxu1 %v426_v36  ;;  %v743_v14 = vsub.f32 %v7167_v46, %v11845_v55  ;;  %v7239_v36 = vand.u32 4294901760, %v119_v42  ;;  %v118_v55 = vld [vmem:[#allocation5 + $0x98] sm:$0xff] }
  0x36   :  { %668 = vmatpush.msrb.mxu2 %v7082_v8  ;;  %727 = vmatpush.msrb.mxu3 %v726_v22  ;;  %v7250_v23 = vsub.f32 %v120_v61, %v7227_v43 }
  0x37   :  { %564 = vmatpush.msrb.mxu0 %v11844_v15  ;;  %433 = vmatpush.msra.mxu1 %v432_v49  ;;  %v75_v15 = vld [vmem:[#allocation2] sm:$0xff]  ;;  %v11847_v49 = vand.u32 4294901760, %v7187_v27  ;;  %v744_v22 = vand.u32 4294901760, %v743_v14  ;;  %v11851_v14 = vand.u32 4294901760, %v7213_v2  ;;  %v7263_v61 = vsub.f32 %v119_v42, %v7239_v36 }
  0x38   :  { %670 = vmatpush.msrb.mxu2 %v7093_v31  ;;  %733 = vmatpush.msrb.mxu3 %v732_v7 }
  0x39   :  { %568 = vmatpush.msrb.mxu0 %v11846_v16  ;;  %439 = vmatpush.msra.mxu1 %v438_v40  ;;  %v749_v18 = vsub.f32 %v7187_v27, %v11847_v49  ;;  %v11849_v40 = vand.u32 4294901760, %v7200_v48  ;;  %v7252_v49 = vand.u32 4294901760, %v75_v15  ;;  %v761_v7 = vsub.f32 %v7213_v2, %v11851_v14  ;;  %v116_v14 = vld [vmem:[#allocation5 + $0x88] sm:$0xff] }
  0x3a   :  { %672 = vmatpush.msrb.mxu2 %v7118_v54  ;;  %739 = vmatpush.msrb.mxu3 %v738_v0  ;;  %v11852_v16 = vand.u32 4294901760, %v7004_v29  ;;  %v11853_v0 = vand.u32 4294901760, %v7225_v60  ;;  %v11854_v29 = vand.u32 4294901760, %v7022_v35 }
  0x3b   :  { %572 = vmatpush.msrb.mxu0 %v11848_v19  ;;  %627 = vmatpush.msrb.mxu1 %v6958_v3  ;;  %v755_v62 = vsub.f32 %v7200_v48, %v11849_v40  ;;  %v750_v3 = vand.u32 4294901760, %v749_v18  ;;  %v772_v19 = vand.u32 4294901760, %v7237_v30  ;;  %v117_v40 = vld [vmem:[#allocation5 + $0x90] sm:$0xff]  ;;  %v7276_v42 = vsub.f32 %v75_v15, %v7252_v49 }
  0x3c   :  { %674 = vmatpush.msrb.mxu2 %v7125_v59  ;;  %745 = vmatpush.msrb.mxu3 %v744_v22  ;;  %v767_v18 = vsub.f32 %v7225_v60, %v11853_v0  ;;  %v762_v22 = vand.u32 4294901760, %v761_v7  ;;  %v11855_v15 = vand.u32 4294901760, %v7032_v41  ;;  %v115_v0 = vld [vmem:[#allocation5 + $0x80] sm:$0xff] }
  0x3d   :  { %576 = vmatpush.msrb.mxu0 %v11850_v20  ;;  %629 = vmatpush.msrb.mxu1 %v6960_v4  ;;  %v7268_v4 = vand.u32 4294901760, %v118_v55  ;;  %v756_v25 = vand.u32 4294901760, %v755_v62  ;;  %v11640_v20 = vand.u32 4294901760, %v7250_v23  ;;  %v773_v62 = vsub.f32 %v7237_v30, %v772_v19 }
  0x3e   :  { %676 = vmatpush.msrb.mxu2 %v7138_v12  ;;  %751 = vmatpush.msrb.mxu3 %v750_v3  ;;  %v768_v3 = vand.u32 4294901760, %v767_v18  ;;  %v329_v41 = vand.u32 4294901760, %v7276_v42  ;;  %v7311_v18 = vand.u32 4294901760, %v115_v0 }
  0x3f   :  { %580 = vmatpush.msrb.mxu0 %v11852_v16  ;;  %631 = vmatpush.msrb.mxu1 %v6962_v5  ;;  %v7281_v5 = vand.u32 4294901760, %v117_v40  ;;  %v784_v16 = vand.u32 4294901760, %v7263_v61  ;;  %v7292_v35 = vsub.f32 %v118_v55, %v7268_v4  ;;  %v779_v7 = vsub.f32 %v7250_v23, %v11640_v20 }
  0x40   :  { %678 = vmatpush.msrb.mxu2 %v7159_v47  ;;  %757 = vmatpush.msrb.mxu3 %v756_v25  ;;  %v774_v55 = vand.u32 4294901760, %v773_v62  ;;  %v330_v62 = vsub.f32 %v7276_v42, %v329_v41 }
  0x41   :  { %584 = vmatpush.msrb.mxu0 %v11854_v29  ;;  %633 = vmatpush.msrb.mxu1 %v6964_v9  ;;  %v7294_v9 = vand.u32 4294901760, %v116_v14  ;;  %v87_v29 = vld [vmem:[#allocation2 + $0x60] sm:$0xff]  ;;  %v785_v25 = vsub.f32 %v7263_v61, %v784_v16 }
  0x42   :  { %680 = vmatpush.msrb.mxu2 %v7174_v33  ;;  %763 = vmatpush.msrb.mxu3 %v762_v22  ;;  %v7313_v20 = vand.u32 4294901760, %v87_v29  ;;  %v780_v22 = vand.u32 4294901760, %v779_v7  ;;  %v76_v7 = vld [vmem:[#allocation2 + $0x8] sm:$0xff] }
  0x43   :  { %588 = vmatpush.msrb.mxu0 %v11855_v15  ;;  %635 = vmatpush.msrb.mxu1 %v6966_v10  ;;  %v11856_v15 = vand.u32 4294901760, %v7051_v52  ;;  %v7305_v10 = vsub.f32 %v117_v40, %v7281_v5  ;;  %v11857_v52 = vand.u32 4294901760, %v7063_v58  ;;  %v7320_v40 = vsub.f32 %v116_v14, %v7294_v9 }
  0x44   :  { %682 = vmatpush.msrb.mxu2 %v7189_v24  ;;  %769 = vmatpush.msrb.mxu3 %v768_v3  ;;  %v336_v14 = vsub.f32 %v87_v29, %v7313_v20  ;;  %v11859_v3 = vand.u32 4294901760, %v7089_v26  ;;  %v11860_v29 = vand.u32 4294901760, %v7103_v39 }
  0x45   :  { %592 = vmatpush.msrb.mxu0 %v11856_v15  ;;  %637 = vmatpush.msrb.mxu1 %v6968_v11  ;;  %v790_v11 = vand.u32 4294901760, %v7292_v35  ;;  %v11858_v15 = vand.u32 4294901760, %v7075_v1  ;;  %v796_v58 = vand.u32 4294901760, %v7305_v10  ;;  %v802_v1 = vand.u32 4294901760, %v7320_v40 }
  0x46   :  { %684 = vmatpush.msrb.mxu2 %v7202_v32  ;;  %775 = vmatpush.msrb.mxu3 %v774_v55  ;;  %v331_v55 = vand.u32 4294901760, %v330_v62 }
  0x47   :  { %596 = vmatpush.msrb.mxu0 %v11857_v52  ;;  %639 = vmatpush.msrb.mxu1 %v6981_v17  ;;  %v786_v17 = vand.u32 4294901760, %v785_v25  ;;  %v7331_v52 = vsub.f32 %v115_v0, %v7311_v18  ;;  %v337_v0 = vand.u32 4294901760, %v336_v14  ;;  %v7349_v25 = vand.u32 4294901760, %v76_v7 }
  0x48   :  { %686 = vmatpush.msrb.mxu2 %v7215_v37  ;;  %781 = vmatpush.msrb.mxu3 %v780_v22  ;;  %v11861_v22 = vand.u32 4294901760, %v7116_v50 }
  0x49   :  { %600 = vmatpush.msrb.mxu0 %v11858_v15  ;;  %641 = vmatpush.msrb.mxu1 %v6989_v21  ;;  %v791_v21 = vsub.f32 %v7292_v35, %v790_v11  ;;  %v808_v26 = vand.u32 4294901760, %v7331_v52  ;;  %v338_v50 = vsub.f32 %v336_v14, %v337_v0  ;;  %v7366_v15 = vsub.f32 %v76_v7, %v7349_v25 }
  0x4a   :  { %688 = vmatpush.msrb.mxu2 %v7227_v43  ;;  %787 = vmatpush.msrb.mxu3 %v786_v17 }
  0x4b   :  { %604 = vmatpush.msrb.mxu0 %v11859_v3  ;;  %643 = vmatpush.msrb.mxu1 %v7001_v28  ;;  %v797_v28 = vsub.f32 %v7305_v10, %v796_v58  ;;  %v792_v39 = vand.u32 4294901760, %v791_v21  ;;  %v701_v17 = vand.u32 4294901760, %v7366_v15  ;;  %v11863_v3 = vand.u32 4294901760, %v7108_v44 }
  0x4c   :  { %690 = vmatpush.msrb.mxu2 %v7239_v36  ;;  %332 = vmatmul.f32.vlgmr.msra.gmra.mxu0 %v331_v55 }
  0x4d   :  { %608 = vmatpush.msrb.mxu0 %v11860_v29  ;;  %645 = vmatpush.msrb.mxu1 %v7019_v34  ;;  %v803_v34 = vsub.f32 %v7320_v40, %v802_v1  ;;  %v798_v62 = vand.u32 4294901760, %v797_v28  ;;  %v138_v29 = vld [vmem:[#allocation5 + $0x138] sm:$0xff] }
  0x4e   :  { %499 = vmatmul.f32.vlgmr.msra.gmra.mxu2 %v7276_v42  ;;  %543 = vmatmul.f32.vlgmr.msra.gmra.mxu3 %v329_v41  ;;  %v11862_v42 = vand.u32 4294901760, %v7133_v6  ;;  %v339_v6 = vand.u32 4294901760, %v338_v50 }
  0x4f   :  { %612 = vmatpush.msrb.mxu0 %v11861_v22  ;;  %647 = vmatpush.msrb.mxu1 %v7038_v45  ;;  %v809_v45 = vsub.f32 %v7331_v52, %v808_v26  ;;  %v804_v41 = vand.u32 4294901760, %v803_v34  ;;  %v137_v34 = vld [vmem:[#allocation5 + $0x130] sm:$0xff] }
  0x50   :  { %692 = vmatpush.msrb.mxu2 %v7268_v4  ;;  %793 = vmatpush.msrb.mxu3 %v792_v39 }
  0x51   :  { %616 = vmatpush.msrb.mxu0 %v11862_v42  ;;  %649 = vmatpush.msrb.mxu1 %v7048_v51  ;;  %v810_v51 = vand.u32 4294901760, %v809_v45  ;;  %v136_v45 = vld [vmem:[#allocation5 + $0x128] sm:$0xff] }
  0x52   :  { %694 = vmatpush.msrb.mxu2 %v7281_v5  ;;  %441 = vmatmul.f32.vlgmr.msra.gmra.mxu1 %v7252_v49 }
  0x53   :  { %823 = vmatpush.msra.mxu0 %v7108_v44  ;;  %651 = vmatpush.msrb.mxu1 %v7060_v57  ;;  %v702_v57 = vsub.f32 %v7366_v15, %v701_v17  ;;  %v88_v44 = vld [vmem:[#allocation2 + $0x68] sm:$0xff] }
  0x54   :  { %696 = vmatpush.msrb.mxu2 %v7294_v9  ;;  %799 = vmatpush.msrb.mxu3 %v798_v62  ;;  %v7397_v7 = vand.u32 4294901760, %v88_v44 }
  0x55   :  { %826 = vmatpush.msra.mxu0 %v7123_v56  ;;  %653 = vmatpush.msrb.mxu1 %v7071_v63  ;;  %v11864_v63 = vand.u32 4294901760, %v7123_v56  ;;  %v703_v21 = vand.u32 4294901760, %v702_v57  ;;  %v11867_v56 = vand.u32 4294901760, %v7152_v53 }
  0x56   :  { %698 = vmatpush.msrb.mxu2 %v7311_v18  ;;  %805 = vmatpush.msrb.mxu3 %v804_v41  ;;  %v7548_v41 = vand.u32 4294901760, %v137_v34 }
  0x57   :  { %504 = vmatmul.f32.gmra.mxu2 %v336_v14  ;;  %829 = vmatpush.msra.mxu0 %v7146_v38  ;;  %v11865_v14 = vld [vmem:[#allocation16_spill] sm:$0xff] }
  0x58   :  { %928 = vmatpush.msra.mxu2 %v11863_v3  ;;  %655 = vmatpush.msrb.mxu1 %v7085_v13  ;;  %v11866_v13 = vand.u32 4294901760, %v7146_v38  ;;  %v11870_v38 = vand.u32 4294901760, %v7200_v48 }
  0x59   :  { %811 = vmatpush.msrb.mxu3 %v810_v51  ;;  %340 = vmatmul.f32.gmra.mxu0 %v339_v6 }
  0x5a   :  { %549 = vmatmul.f32.gmra.mxu3 %v337_v0  ;;  %832 = vmatpush.msra.mxu0 %v7152_v53  ;;  %v7408_v53 = vsub.f32 %v88_v44, %v7397_v7  ;;  %v134_v44 = vld [vmem:[#allocation5 + $0x118] sm:$0xff] }
  0x5b   :  { %932 = vmatpush.msra.mxu2 %v11864_v63  ;;  %999 = vmatpush.msra.mxu3 %v7082_v8  ;;  %v77_v63 = vld [vmem:[#allocation2 + $0x10] sm:$0xff] }
  0x5c   :  { %657 = vmatpush.msrb.mxu1 %v11865_v14  ;;  %835 = vmatpush.msra.mxu0 %v7167_v46 }
  0x5d   :  { %445 = vmatmul.f32.gmra.mxu1 %v7313_v20  ;;  %936 = vmatpush.msra.mxu2 %v11866_v13 }
  0x5e   :  { %881 = vmatpush.msra.mxu1 %v7082_v8  ;;  %1001 = vmatpush.msra.mxu3 %v7093_v31  ;;  %v11868_v8 = vand.u32 4294901760, %v7167_v46  ;;  %v709_v46 = vand.u32 4294901760, %v7408_v53 }
  0x5f   :  { %838 = vmatpush.msra.mxu0 %v7187_v27  ;;  %940 = vmatpush.msra.mxu2 %v11867_v56 }
  0x60   :  { %883 = vmatpush.msra.mxu1 %v7093_v31  ;;  %1003 = vmatpush.msra.mxu3 %v7118_v54  ;;  %v11869_v31 = vand.u32 4294901760, %v7187_v27  ;;  %v11871_v27 = vand.u32 4294901760, %v7213_v2 }
  0x61   :  { %704 = vmatmul.f32.vlgmr.msrb.gmra.mxu2 %v703_v21  ;;  %841 = vmatpush.msra.mxu0 %v7200_v48 }
  0x62   :  { %885 = vmatpush.msra.mxu1 %v7118_v54  ;;  %944 = vmatpush.msra.mxu2 %v11868_v8  ;;  %v710_v54 = vsub.f32 %v7408_v53, %v709_v46  ;;  %v7573_v8 = vsub.f32 %v137_v34, %v7548_v41 }
  0x63   :  { %1005 = vmatpush.msra.mxu3 %v7125_v59  ;;  %618 = vmatmul.f32.vlgmr.msrb.gmra.mxu0 %v7252_v49 }
  0x64   :  { %813 = vmatmul.f32.vlgmr.msrb.gmra.mxu3 %v7349_v25  ;;  %844 = vmatpush.msra.mxu0 %v7213_v2  ;;  %v145_v2 = vld [vmem:[#allocation5 + $0x170] sm:$0xff] }
  0x65   :  { %887 = vmatpush.msra.mxu1 %v7125_v59  ;;  %948 = vmatpush.msra.mxu2 %v11869_v31  ;;  %v11872_v59 = vand.u32 4294901760, %v7225_v60 }
  0x66   :  { %1007 = vmatpush.msra.mxu3 %v7138_v12  ;;  %659 = vmatmul.f32.vlgmr.msrb.gmra.mxu1 %v7252_v49 }
  0x67   :  { %847 = vmatpush.msra.mxu0 %v7225_v60  ;;  %889 = vmatpush.msra.mxu1 %v7138_v12  ;;  %v11873_v12 = vand.u32 4294901760, %v7250_v23 }
  0x68   :  { %952 = vmatpush.msra.mxu2 %v11870_v38  ;;  %1009 = vmatpush.msra.mxu3 %v7159_v47  ;;  %v133_v38 = vld [vmem:[#allocation5 + $0x110] sm:$0xff] }
  0x69   :  { %850 = vmatpush.msra.mxu0 %v7237_v30  ;;  %891 = vmatpush.msra.mxu1 %v7159_v47  ;;  %v146_v47 = vld [vmem:[#allocation5 + $0x178] sm:$0xff] }
  0x6a   :  { %956 = vmatpush.msra.mxu2 %v11871_v27  ;;  %1011 = vmatpush.msra.mxu3 %v7174_v33  ;;  %v7446_v48 = vand.u32 4294901760, %v146_v47  ;;  %v7576_v27 = vand.u32 4294901760, %v77_v63 }
  0x6b   :  { %853 = vmatpush.msra.mxu0 %v7250_v23  ;;  %893 = vmatpush.msra.mxu1 %v7174_v33  ;;  %v711_v33 = vand.u32 4294901760, %v710_v54  ;;  %v142_v23 = vld [vmem:[#allocation5 + $0x158] sm:$0xff] }
  0x6c   :  { %960 = vmatpush.msra.mxu2 %v11872_v59  ;;  %1013 = vmatpush.msra.mxu3 %v7189_v24  ;;  %v7461_v30 = vsub.f32 %v146_v47, %v7446_v48  ;;  %v7583_v59 = vand.u32 4294901760, %v134_v44 }
  0x6d   :  { %856 = vmatpush.msra.mxu0 %v7263_v61  ;;  %895 = vmatpush.msra.mxu1 %v7189_v24  ;;  %v144_v24 = vld [vmem:[#allocation5 + $0x168] sm:$0xff] }
  0x6e   :  { %964 = vmatpush.msra.mxu2 %v772_v19  ;;  %1015 = vmatpush.msra.mxu3 %v7202_v32  ;;  %v7458_v60 = vand.u32 4294901760, %v144_v24  ;;  %v7478_v19 = vand.u32 4294901760, %v142_v23  ;;  %v1090_v61 = vand.u32 4294901760, %v7461_v30 }
  0x6f   :  { %622 = vmatmul.f32.gmra.mxu0 %v7313_v20  ;;  %897 = vmatpush.msra.mxu1 %v7202_v32  ;;  %v7453_v32 = vand.u32 4294901760, %v145_v2 }
  0x70   :  { %859 = vmatpush.msra.mxu0 %v7292_v35  ;;  %968 = vmatpush.msra.mxu2 %v11873_v12  ;;  %v141_v35 = vld [vmem:[#allocation5 + $0x150] sm:$0xff] }
  0x71   :  { %1017 = vmatpush.msra.mxu3 %v7215_v37  ;;  %899 = vmatpush.msra.mxu1 %v7215_v37  ;;  %v143_v37 = vld [vmem:[#allocation5 + $0x160] sm:$0xff]  ;;  %v7469_v49 = vsub.f32 %v145_v2, %v7453_v32 }
  0x72   :  { %862 = vmatpush.msra.mxu0 %v7305_v10  ;;  %972 = vmatpush.msra.mxu2 %v784_v16  ;;  %v7482_v16 = vsub.f32 %v144_v24, %v7458_v60  ;;  %v7492_v10 = vand.u32 4294901760, %v141_v35  ;;  %v7595_v24 = vand.u32 4294901760, %v133_v38 }
  0x73   :  { %1019 = vmatpush.msra.mxu3 %v7227_v43  ;;  %712 = vmatmul.f32.gmra.mxu2 %v711_v33 }
  0x74   :  { %865 = vmatpush.msra.mxu0 %v7320_v40  ;;  %901 = vmatpush.msra.mxu1 %v7227_v43  ;;  %v7474_v43 = vand.u32 4294901760, %v143_v37  ;;  %v1102_v40 = vand.u32 4294901760, %v7482_v16 }
  0x75   :  { %976 = vmatpush.msra.mxu2 %v790_v11  ;;  %1021 = vmatpush.msra.mxu3 %v7239_v36 }
  0x76   :  { %817 = vmatmul.f32.gmra.mxu3 %v7397_v7  ;;  %868 = vmatpush.msra.mxu0 %v7331_v52  ;;  %v7495_v11 = vsub.f32 %v143_v37, %v7474_v43  ;;  %v1103_v22 = vsub.f32 %v7482_v16, %v1102_v40  ;;  %v11644_v37 = vand.u32 4294901760, %v7573_v8 }
  0x77   :  { %903 = vmatpush.msra.mxu1 %v7239_v36  ;;  %980 = vmatpush.msra.mxu2 %v796_v58  ;;  %v1096_v36 = vand.u32 4294901760, %v7469_v49  ;;  %v139_v58 = vld [vmem:[#allocation5 + $0x140] sm:$0xff] }
  0x78   :  { %1023 = vmatpush.msra.mxu3 %v7268_v4  ;;  %663 = vmatmul.f32.gmra.mxu1 %v7313_v20  ;;  %v140_v20 = vld [vmem:[#allocation5 + $0x148] sm:$0xff]  ;;  %v7516_v55 = vand.u32 4294901760, %v139_v58  ;;  %v11655_v28 = vand.u32 4294901760, %v7495_v11  ;;  %v1104_v51 = vand.u32 4294901760, %v1103_v22  ;;  %v131_v22 = vld [vmem:[#allocation5 + $0x100] sm:$0xff] }
  0x79   :  { %871 = vmatmul.f32.vlgmr.msra.gmra.mxu0 %v7366_v15  ;;  %905 = vmatpush.msra.mxu1 %v7268_v4  ;;  %v1091_v4 = vsub.f32 %v7461_v30, %v1090_v61  ;;  %v1097_v52 = vsub.f32 %v7469_v49, %v1096_v36  ;;  %v135_v15 = vld [vmem:[#allocation5 + $0x120] sm:$0xff] }
  0x7a   :  { %1040 = vmatpush.msrb.mxu0 %v7446_v48  ;;  %984 = vmatpush.msra.mxu2 %v802_v1  ;;  %v7505_v1 = vsub.f32 %v142_v23, %v7478_v19  ;;  %v7540_v62 = vsub.f32 %v139_v58, %v7516_v55  ;;  %v1109_v50 = vsub.f32 %v7495_v11, %v11655_v28  ;;  %v7570_v56 = vand.u32 4294901760, %v135_v15 }
  0x7b   :  { %1025 = vmatpush.msra.mxu3 %v7281_v5  ;;  %907 = vmatpush.msra.mxu1 %v7281_v5  ;;  %v7509_v5 = vand.u32 4294901760, %v140_v20  ;;  %v1092_v0 = vand.u32 4294901760, %v1091_v4 }
  0x7c   :  { %1042 = vmatpush.msrb.mxu0 %v7453_v32  ;;  %988 = vmatpush.msra.mxu2 %v808_v26  ;;  %v7522_v26 = vsub.f32 %v141_v35, %v7492_v10  ;;  %v11652_v39 = vand.u32 4294901760, %v7505_v1  ;;  %v11647_v14 = vand.u32 4294901760, %v7540_v62  ;;  %v1110_v13 = vand.u32 4294901760, %v1109_v50 }
  0x7d   :  { %1027 = vmatpush.msra.mxu3 %v7294_v9  ;;  %990 = vmatmul.f32.vlgmr.msra.gmra.mxu2 %v7349_v25  ;;  %v7535_v42 = vsub.f32 %v140_v20, %v7509_v5  ;;  %v7599_v23 = vsub.f32 %v135_v15, %v7570_v56  ;;  %v7605_v35 = vsub.f32 %v77_v63, %v7576_v27 }
  0x7e   :  { %1044 = vmatpush.msrb.mxu0 %v7458_v60  ;;  %1195 = vmatpush.msrb.mxu2 %v7461_v30  ;;  %v1115_v6 = vsub.f32 %v7505_v1, %v11652_v39  ;;  %v1133_v2 = vsub.f32 %v7540_v62, %v11647_v14 }
  0x7f   :  { %909 = vmatpush.msra.mxu1 %v7294_v9  ;;  %1029 = vmatpush.msra.mxu3 %v7311_v18  ;;  %v7532_v9 = vand.u32 4294901760, %v138_v29  ;;  %v11648_v3 = vand.u32 4294901760, %v7535_v42  ;;  %v11641_v34 = vand.u32 4294901760, %v7599_v23  ;;  %v11656_v50 = vand.u32 4294901760, %v7605_v35 }
  0x80   :  { %1031 = vmatmul.f32.vlgmr.msra.gmra.mxu3 %v7349_v25  ;;  %1046 = vmatpush.msrb.mxu0 %v7474_v43  ;;  %v1098_v25 = vand.u32 4294901760, %v1097_v52  ;;  %v1116_v31 = vand.u32 4294901760, %v1115_v6  ;;  %v7613_v52 = vsub.f32 %v134_v44, %v7583_v59  ;;  %v7639_v44 = vand.u32 4294901760, %v131_v22 }
  0x81   :  { %1198 = vmatpush.msrb.mxu2 %v7469_v49  ;;  %1253 = vmatpush.msrb.mxu3 %v7446_v48  ;;  %v7561_v57 = vsub.f32 %v138_v29, %v7532_v9  ;;  %v1127_v54 = vsub.f32 %v7535_v42, %v11648_v3  ;;  %v1145_v29 = vsub.f32 %v7573_v8, %v11644_v37 }
  0x82   :  { %911 = vmatpush.msra.mxu1 %v7311_v18  ;;  %1048 = vmatpush.msrb.mxu0 %v7478_v19  ;;  %v11649_v18 = vand.u32 4294901760, %v7522_v26  ;;  %v11643_v15 = vand.u32 4294901760, %v7613_v52 }
  0x83   :  { %915 = vmatmul.f32.vlgmr.msra.gmra.mxu1 %v701_v17  ;;  %1201 = vmatpush.msrb.mxu2 %v7482_v16  ;;  %v7557_v17 = vand.u32 4294901760, %v136_v45  ;;  %v11645_v47 = vand.u32 4294901760, %v7561_v57  ;;  %v1128_v20 = vand.u32 4294901760, %v1127_v54  ;;  %v153_v16 = vld [vmem:[#allocation5 + $0x1b0] sm:$0xff] }
  0x84   :  { %1093 = vmatpush.msrb.mxu1 %v1092_v0  ;;  %1255 = vmatpush.msrb.mxu3 %v7453_v32  ;;  %v1121_v21 = vsub.f32 %v7522_v26, %v11649_v18  ;;  %v157_v18 = vld [vmem:[#allocation5 + $0x1d0] sm:$0xff] }
  0x85   :  { %1050 = vmatpush.msrb.mxu0 %v7492_v10  ;;  %1204 = vmatpush.msrb.mxu2 %v7495_v11  ;;  %v7587_v33 = vsub.f32 %v136_v45, %v7557_v17  ;;  %v1139_v58 = vsub.f32 %v7561_v57, %v11645_v47  ;;  %v89_v45 = vld [vmem:[#allocation2 + $0x70] sm:$0xff] }
  0x86   :  { %1099 = vmatpush.msrb.mxu1 %v1098_v25  ;;  %1257 = vmatpush.msrb.mxu3 %v7458_v60  ;;  %v1122_v12 = vand.u32 4294901760, %v1121_v21  ;;  %v7625_v25 = vsub.f32 %v133_v38, %v7595_v24  ;;  %v7641_v21 = vand.u32 4294901760, %v89_v45  ;;  %v1157_v38 = vsub.f32 %v7599_v23, %v11641_v34 }
  0x87   :  { %994 = vmatmul.f32.gmra.mxu2 %v7397_v7  ;;  %1052 = vmatpush.msrb.mxu0 %v7509_v5  ;;  %v11642_v4 = vand.u32 4294901760, %v7587_v33  ;;  %v7668_v34 = vsub.f32 %v131_v22, %v7639_v44 }
  0x88   :  { %1105 = vmatpush.msrb.mxu1 %v1104_v51  ;;  %1207 = vmatpush.msrb.mxu2 %v7505_v1  ;;  %v1140_v51 = vand.u32 4294901760, %v1139_v58 }
  0x89   :  { %1259 = vmatpush.msrb.mxu3 %v7474_v43  ;;  %876 = vmatmul.f32.gmra.mxu0 %v7408_v53  ;;  %v1134_v53 = vand.u32 4294901760, %v1133_v2  ;;  %v1151_v6 = vsub.f32 %v7587_v33, %v11642_v4  ;;  %v11646_v2 = vand.u32 4294901760, %v7625_v25  ;;  %v7671_v4 = vsub.f32 %v89_v45, %v7641_v21  ;;  %v158_v45 = vld [vmem:[#allocation5 + $0x1d8] sm:$0xff] }
  0x8a   :  { %1035 = vmatmul.f32.gmra.mxu3 %v7397_v7  ;;  %1054 = vmatpush.msrb.mxu0 %v7516_v55  ;;  %v132_v7 = vld [vmem:[#allocation5 + $0x108] sm:$0xff]  ;;  %v11653_v14 = vand.u32 4294901760, %v7668_v34  ;;  %v7700_v3 = vand.u32 4294901760, %v158_v45 }
  0x8b   :  { %1111 = vmatpush.msrb.mxu1 %v1110_v13  ;;  %1210 = vmatpush.msrb.mxu2 %v7522_v26  ;;  %v7621_v0 = vand.u32 4294901760, %v132_v7  ;;  %v161_v13 = vld [vmem:[#allocation5 + $0x1f0] sm:$0xff]  ;;  %v1152_v58 = vand.u32 4294901760, %v1151_v6  ;;  %v1158_v6 = vand.u32 4294901760, %v1157_v38 }
  0x8c   :  { %1261 = vmatpush.msrb.mxu3 %v7478_v19  ;;  %921 = vmatmul.f32.gmra.mxu1 %v709_v46  ;;  %v162_v46 = vld [vmem:[#allocation5 + $0x1f8] sm:$0xff]  ;;  %v7725_v30 = vsub.f32 %v158_v45, %v7700_v3 }
  0x8d   :  { %1056 = vmatpush.msrb.mxu0 %v7532_v9  ;;  %1117 = vmatpush.msrb.mxu1 %v1116_v31  ;;  %v7635_v63 = vand.u32 4294901760, %v162_v46  ;;  %v1146_v31 = vand.u32 4294901760, %v1145_v29  ;;  %v7648_v54 = vsub.f32 %v132_v7, %v7621_v0  ;;  %v1163_v7 = vsub.f32 %v7613_v52, %v11643_v15 }
  0x8e   :  { %1213 = vmatpush.msrb.mxu2 %v7535_v42  ;;  %1263 = vmatpush.msrb.mxu3 %v7492_v10  ;;  %v7663_v29 = vand.u32 4294901760, %v161_v13 }
  0x8f   :  { %1058 = vmatpush.msrb.mxu0 %v7548_v41  ;;  %1123 = vmatpush.msrb.mxu1 %v1122_v12  ;;  %v1074_v12 = vsub.f32 %v7605_v35, %v11656_v50  ;;  %v11650_v15 = vand.u32 4294901760, %v7648_v54  ;;  %v1164_v47 = vand.u32 4294901760, %v1163_v7 }
  0x90   :  { %1216 = vmatpush.msrb.mxu2 %v7540_v62  ;;  %1265 = vmatpush.msrb.mxu3 %v7509_v5  ;;  %v7685_v38 = vsub.f32 %v161_v13, %v7663_v29 }
  0x91   :  { %1060 = vmatpush.msrb.mxu0 %v7557_v17  ;;  %1129 = vmatpush.msrb.mxu1 %v1128_v20  ;;  %v160_v20 = vld [vmem:[#allocation5 + $0x1e8] sm:$0xff]  ;;  %v1075_v22 = vand.u32 4294901760, %v1074_v12  ;;  %v11654_v12 = vand.u32 4294901760, %v7671_v4  ;;  %v1175_v7 = vsub.f32 %v7648_v54, %v11650_v15 }
  0x92   :  { %1219 = vmatpush.msrb.mxu2 %v7561_v57  ;;  %1267 = vmatpush.msrb.mxu3 %v7516_v55  ;;  %v7678_v37 = vand.u32 4294901760, %v160_v20 }
  0x93   :  { %1062 = vmatpush.msrb.mxu0 %v7570_v56  ;;  %1135 = vmatpush.msrb.mxu1 %v1134_v53  ;;  %v7661_v53 = vsub.f32 %v162_v46, %v7635_v63  ;;  %v1169_v46 = vsub.f32 %v7625_v25, %v11646_v2 }
  0x94   :  { %1222 = vmatpush.msrb.mxu2 %v7573_v8  ;;  %1269 = vmatpush.msrb.mxu3 %v7532_v9  ;;  %v7698_v13 = vsub.f32 %v160_v20, %v7678_v37  ;;  %v156_v20 = vld [vmem:[#allocation5 + $0x1c8] sm:$0xff] }
  0x95   :  { %1064 = vmatpush.msrb.mxu0 %v7583_v59  ;;  %1141 = vmatpush.msrb.mxu1 %v1140_v51  ;;  %v159_v51 = vld [vmem:[#allocation5 + $0x1e0] sm:$0xff] }
  0x96   :  { %1225 = vmatpush.msrb.mxu2 %v7587_v33  ;;  %1271 = vmatpush.msrb.mxu3 %v7548_v41  ;;  %v7687_v2 = vand.u32 4294901760, %v159_v51  ;;  %v11658_v39 = vand.u32 4294901760, %v7698_v13 }
  0x97   :  { %1066 = vmatpush.msrb.mxu0 %v7595_v24  ;;  %1147 = vmatpush.msrb.mxu1 %v1146_v31  ;;  %v11651_v31 = vand.u32 4294901760, %v7661_v53 }
  0x98   :  { %1228 = vmatpush.msrb.mxu2 %v7599_v23  ;;  %1273 = vmatpush.msrb.mxu3 %v7557_v17  ;;  %11874 = vst [vmem:[#allocation16_spill] sm:$0xff] %v7687_v2  ;;  %v7709_v15 = vsub.f32 %v159_v51, %v7687_v2  ;;  %v1176_v51 = vand.u32 4294901760, %v1175_v7  ;;  %v154_v7 = vld [vmem:[#allocation5 + $0x1b8] sm:$0xff] }
  0x99   :  { %1068 = vmatpush.msrb.mxu0 %v7621_v0  ;;  %1153 = vmatpush.msrb.mxu1 %v1152_v58  ;;  %v1170_v58 = vand.u32 4294901760, %v1169_v46  ;;  %v11657_v46 = vand.u32 4294901760, %v7685_v38 }
  0x9a   :  { %1231 = vmatpush.msrb.mxu2 %v7613_v52  ;;  %1275 = vmatpush.msrb.mxu3 %v7570_v56  ;;  %v11659_v45 = vand.u32 4294901760, %v7709_v15 }
  0x9b   :  { %1070 = vmatpush.msrb.mxu0 %v7639_v44  ;;  %1159 = vmatpush.msrb.mxu1 %v1158_v6  ;;  %v1463_v6 = vsub.f32 %v7661_v53, %v11651_v31  ;;  %v7720_v31 = vand.u32 4294901760, %v157_v18 }
  0x9c   :  { %1234 = vmatpush.msrb.mxu2 %v7625_v25  ;;  %1277 = vmatpush.msrb.mxu3 %v7583_v59 }
  0x9d   :  { %1076 = vmatmul.f32.vlgmr.msrb.gmra.mxu0 %v1075_v22  ;;  %1165 = vmatpush.msrb.mxu1 %v1164_v47  ;;  %v1181_v22 = vsub.f32 %v7668_v34, %v11653_v14  ;;  %v1082_v47 = vsub.f32 %v7671_v4, %v11654_v12  ;;  %v7730_v14 = vand.u32 4294901760, %v156_v20  ;;  %v1464_v12 = vand.u32 4294901760, %v1463_v6 }
  0x9e   :  { %1300 = vmatpush.msra.mxu0 %v1090_v61  ;;  %1237 = vmatpush.msrb.mxu2 %v7648_v54  ;;  %v155_v61 = vld [vmem:[#allocation5 + $0x1c0] sm:$0xff]  ;;  %v7742_v28 = vsub.f32 %v157_v18, %v7720_v31  ;;  %v1475_v6 = vsub.f32 %v7698_v13, %v11658_v39  ;;  %v1481_v39 = vsub.f32 %v7709_v15, %v11659_v45 }
  0x9f   :  { %1279 = vmatpush.msrb.mxu3 %v7595_v24  ;;  %1171 = vmatpush.msrb.mxu1 %v1170_v58  ;;  %v1469_v58 = vsub.f32 %v7685_v38, %v11657_v46  ;;  %v1182_v49 = vand.u32 4294901760, %v1181_v22  ;;  %v7744_v50 = vand.u32 4294901760, %v155_v61  ;;  %v11876_v22 = vand.u32 4294901760, %v7495_v11  ;;  %v152_v46 = vld [vmem:[#allocation5 + $0x1a8] sm:$0xff]  ;;  %v151_v45 = vld [vmem:[#allocation5 + $0x1a0] sm:$0xff] }
  0xa0   :  { %1304 = vmatpush.msra.mxu0 %v1096_v36  ;;  %1240 = vmatpush.msrb.mxu2 %v7668_v34  ;;  %v1083_v36 = vand.u32 4294901760, %v1082_v47  ;;  %v7756_v18 = vsub.f32 %v156_v20, %v7730_v14  ;;  %v7758_v47 = vand.u32 4294901760, %v154_v7  ;;  %v7768_v20 = vand.u32 4294901760, %v153_v16 }
  0xa1   :  { %1281 = vmatpush.msrb.mxu3 %v7621_v0  ;;  %1243 = vmatmul.f32.vlgmr.msrb.gmra.mxu2 %v7605_v35  ;;  %v7766_v11 = vsub.f32 %v155_v61, %v7744_v50  ;;  %v7795_v61 = vand.u32 4294901760, %v151_v45 }
  0xa2   :  { %1308 = vmatpush.msra.mxu0 %v1102_v40  ;;  %1412 = vmatpush.msra.mxu2 %v7635_v63  ;;  %v11875_v40 = vand.u32 4294901760, %v7605_v35  ;;  %v11660_v35 = vand.u32 4294901760, %v7742_v28 }
  0xa3   :  { %1177 = vmatpush.msrb.mxu1 %v1176_v51  ;;  %1283 = vmatpush.msrb.mxu3 %v7639_v44  ;;  %v1470_v51 = vand.u32 4294901760, %v1469_v58  ;;  %v11878_v58 = vand.u32 4294901760, %v7725_v30 }
  0xa4   :  { %1287 = vmatmul.f32.vlgmr.msrb.gmra.mxu3 %v11875_v40  ;;  %1312 = vmatpush.msra.mxu0 %v11876_v22  ;;  %v11877_v40 = vand.u32 4294901760, %v7505_v1  ;;  %v11879_v1 = vand.u32 4294901760, %v7522_v26 }
  0xa5   :  { %1414 = vmatpush.msra.mxu2 %v7663_v29  ;;  %1465 = vmatpush.msra.mxu3 %v1464_v12  ;;  %v1476_v12 = vand.u32 4294901760, %v1475_v6  ;;  %v1487_v22 = vsub.f32 %v7725_v30, %v11878_v58  ;;  %v1482_v6 = vand.u32 4294901760, %v1481_v39  ;;  %v11663_v58 = vand.u32 4294901760, %v7766_v11 }
  0xa6   :  { %1183 = vmatpush.msrb.mxu1 %v1182_v49  ;;  %1084 = vmatmul.f32.gmra.mxu0 %v1083_v36  ;;  %v7780_v49 = vsub.f32 %v154_v7, %v7758_v47  ;;  %v7782_v36 = vand.u32 4294901760, %v152_v46  ;;  %v7793_v7 = vsub.f32 %v153_v16, %v7768_v20  ;;  %v11880_v39 = vand.u32 4294901760, %v7535_v42 }
  0xa7   :  { %1185 = vmatmul.f32.vlgmr.msrb.gmra.mxu1 %v7576_v27  ;;  %1316 = vmatpush.msra.mxu0 %v11877_v40  ;;  %v150_v40 = vld [vmem:[#allocation5 + $0x198] sm:$0xff]  ;;  %v1488_v26 = vand.u32 4294901760, %v1487_v22  ;;  %v11882_v42 = vand.u32 4294901760, %v7671_v4 }
  0xa8   :  { %1371 = vmatpush.msra.mxu1 %v7446_v48  ;;  %1416 = vmatpush.msra.mxu2 %v7678_v37  ;;  %v1493_v48 = vsub.f32 %v7742_v28, %v11660_v35  ;;  %v7806_v16 = vsub.f32 %v152_v46, %v7782_v36  ;;  %v7808_v35 = vand.u32 4294901760, %v150_v40  ;;  %v11664_v46 = vand.u32 4294901760, %v7793_v7 }
  0xa9   :  { %1471 = vmatpush.msra.mxu3 %v1470_v51  ;;  %1320 = vmatpush.msra.mxu0 %v11879_v1  ;;  %v148_v1 = vld [vmem:[#allocation5 + $0x188] sm:$0xff] }
  0xaa   :  { %1373 = vmatpush.msra.mxu1 %v7453_v32  ;;  %1418 = vmatpush.msra.mxu2 %v7687_v2  ;;  %v11881_v32 = vand.u32 4294901760, %v7756_v18  ;;  %v1494_v22 = vand.u32 4294901760, %v1493_v48  ;;  %v78_v2 = vld [vmem:[#allocation2 + $0x18] sm:$0xff] }
  0xab   :  { %1477 = vmatpush.msra.mxu3 %v1476_v12  ;;  %1248 = vmatmul.f32.gmra.mxu2 %v7671_v4  ;;  %v149_v12 = vld [vmem:[#allocation5 + $0x190] sm:$0xff] }
  0xac   :  { %1324 = vmatpush.msra.mxu0 %v11880_v39  ;;  %1375 = vmatpush.msra.mxu1 %v7458_v60  ;;  %v1499_v51 = vsub.f32 %v7756_v18, %v11881_v32  ;;  %v11883_v60 = vand.u32 4294901760, %v7540_v62  ;;  %v1505_v39 = vsub.f32 %v7766_v11, %v11663_v58  ;;  %v7820_v32 = vsub.f32 %v151_v45, %v7795_v61 }
  0xad   :  { %1420 = vmatpush.msra.mxu2 %v7700_v3  ;;  %1483 = vmatpush.msra.mxu3 %v1482_v6  ;;  %v7824_v4 = vand.u32 4294901760, %v149_v12  ;;  %v11884_v6 = vand.u32 4294901760, %v7780_v49  ;;  %v7832_v45 = vsub.f32 %v150_v40, %v7808_v35  ;;  %v7837_v58 = vand.u32 4294901760, %v148_v1 }
  0xae   :  { %1293 = vmatmul.f32.gmra.mxu3 %v11882_v42  ;;  %1328 = vmatpush.msra.mxu0 %v11883_v60  ;;  %v1500_v62 = vand.u32 4294901760, %v1499_v51  ;;  %v147_v60 = vld [vmem:[#allocation5 + $0x180] sm:$0xff]  ;;  %v1506_v51 = vand.u32 4294901760, %v1505_v39  ;;  %v1528_v40 = vand.u32 4294901760, %v7820_v32  ;;  %v11886_v42 = vand.u32 4294901760, %v7573_v8 }
  0xaf   :  { %1377 = vmatpush.msra.mxu1 %v7474_v43  ;;  %1422 = vmatpush.msra.mxu2 %v7720_v31  ;;  %v1511_v48 = vsub.f32 %v7780_v49, %v11884_v6  ;;  %v11885_v43 = vand.u32 4294901760, %v7561_v57  ;;  %v1517_v6 = vsub.f32 %v7793_v7, %v11664_v46  ;;  %v7852_v57 = vand.u32 4294901760, %v147_v60 }
  0xb0   :  { %1489 = vmatpush.msra.mxu3 %v1488_v26  ;;  %1189 = vmatmul.f32.gmra.mxu1 %v7641_v21  ;;  %v7839_v26 = vand.u32 4294901760, %v78_v2  ;;  %v11887_v39 = vand.u32 4294901760, %v7806_v16  ;;  %v1534_v46 = vand.u32 4294901760, %v7832_v45  ;;  %v11888_v8 = vand.u32 4294901760, %v7587_v33 }
  0xb1   :  { %1332 = vmatpush.msra.mxu0 %v11885_v43  ;;  %1379 = vmatpush.msra.mxu1 %v7478_v19  ;;  %v7850_v19 = vsub.f32 %v149_v12, %v7824_v4  ;;  %v7877_v33 = vsub.f32 %v147_v60, %v7852_v57 }
  0xb2   :  { %1424 = vmatpush.msra.mxu2 %v7730_v14  ;;  %1495 = vmatpush.msra.mxu3 %v1494_v22  ;;  %v1512_v22 = vand.u32 4294901760, %v1511_v48  ;;  %v1523_v43 = vsub.f32 %v7806_v16, %v11887_v39  ;;  %v7866_v12 = vsub.f32 %v78_v2, %v7839_v26  ;;  %v1529_v48 = vsub.f32 %v7820_v32, %v1528_v40 }
  0xb3   :  { %1336 = vmatpush.msra.mxu0 %v11886_v42  ;;  %1381 = vmatpush.msra.mxu1 %v7492_v10  ;;  %v7863_v10 = vsub.f32 %v148_v1, %v7837_v58  ;;  %v11889_v42 = vand.u32 4294901760, %v7599_v23  ;;  %v1535_v1 = vsub.f32 %v7832_v45, %v1534_v46  ;;  %v1552_v39 = vand.u32 4294901760, %v7877_v33 }
  0xb4   :  { %1426 = vmatpush.msra.mxu2 %v7744_v50  ;;  %1501 = vmatpush.msra.mxu3 %v1500_v62  ;;  %v1518_v62 = vand.u32 4294901760, %v1517_v6  ;;  %v1524_v2 = vand.u32 4294901760, %v1523_v43  ;;  %v11890_v6 = vand.u32 4294901760, %v7613_v52  ;;  %v1445_v23 = vand.u32 4294901760, %v7866_v12 }
  0xb5   :  { %1340 = vmatpush.msra.mxu0 %v11888_v8  ;;  %1383 = vmatpush.msra.mxu1 %v7509_v5  ;;  %v1540_v5 = vand.u32 4294901760, %v7850_v19  ;;  %v1530_v60 = vand.u32 4294901760, %v1529_v48  ;;  %v1536_v43 = vand.u32 4294901760, %v1535_v1  ;;  %v11892_v8 = vand.u32 4294901760, %v7648_v54 }
  0xb6   :  { %1428 = vmatpush.msra.mxu2 %v7758_v47  ;;  %1507 = vmatpush.msra.mxu3 %v1506_v51  ;;  %v90_v51 = vld [vmem:[#allocation2 + $0x78] sm:$0xff]  ;;  %v11895_v1 = vand.u32 4294901760, %v7685_v38 }
  0xb7   :  { %1344 = vmatpush.msra.mxu0 %v11889_v42  ;;  %1385 = vmatpush.msra.mxu1 %v7516_v55  ;;  %v1546_v55 = vand.u32 4294901760, %v7863_v10  ;;  %v1541_v52 = vsub.f32 %v7850_v19, %v1540_v5 }
  0xb8   :  { %1430 = vmatpush.msra.mxu2 %v7768_v20  ;;  %1513 = vmatpush.msra.mxu3 %v1512_v22  ;;  %v11891_v22 = vand.u32 4294901760, %v7625_v25  ;;  %v1446_v25 = vsub.f32 %v7866_v12, %v1445_v23 }
  0xb9   :  { %1348 = vmatpush.msra.mxu0 %v11890_v6  ;;  %1387 = vmatpush.msra.mxu1 %v7532_v9  ;;  %v7896_v9 = vand.u32 4294901760, %v90_v51  ;;  %v1542_v54 = vand.u32 4294901760, %v1541_v52  ;;  %v170_v6 = vld [vmem:[#allocation5 + $0x238] sm:$0xff] }
  0xba   :  { %1432 = vmatpush.msra.mxu2 %v7782_v36  ;;  %1519 = vmatpush.msra.mxu3 %v1518_v62  ;;  %v11893_v62 = vand.u32 4294901760, %v7668_v34  ;;  %v1447_v34 = vand.u32 4294901760, %v1446_v25  ;;  %v168_v25 = vld [vmem:[#allocation5 + $0x228] sm:$0xff] }
  0xbb   :  { %1352 = vmatpush.msra.mxu0 %v11891_v22  ;;  %1389 = vmatpush.msra.mxu1 %v7548_v41  ;;  %v1547_v41 = vsub.f32 %v7863_v10, %v1546_v55  ;;  %v7916_v48 = vsub.f32 %v90_v51, %v7896_v9 }
  0xbc   :  { %1434 = vmatpush.msra.mxu2 %v7795_v61  ;;  %1525 = vmatpush.msra.mxu3 %v1524_v2 }
  0xbd   :  { %1356 = vmatpush.msra.mxu0 %v11892_v8  ;;  %1391 = vmatpush.msra.mxu1 %v7557_v17  ;;  %v1553_v17 = vsub.f32 %v7877_v33, %v1552_v39  ;;  %v1548_v42 = vand.u32 4294901760, %v1547_v41  ;;  %v1453_v2 = vand.u32 4294901760, %v7916_v48 }
  0xbe   :  { %1436 = vmatpush.msra.mxu2 %v7808_v35  ;;  %1531 = vmatpush.msra.mxu3 %v1530_v60 }
  0xbf   :  { %1360 = vmatpush.msra.mxu0 %v11893_v62  ;;  %1393 = vmatpush.msra.mxu1 %v7570_v56  ;;  %v1554_v56 = vand.u32 4294901760, %v1553_v17 }
  0xc0   :  { %1438 = vmatpush.msra.mxu2 %v7824_v4  ;;  %1537 = vmatpush.msra.mxu3 %v1536_v43  ;;  %v169_v43 = vld [vmem:[#allocation5 + $0x230] sm:$0xff] }
  0xc1   :  { %1362 = vmatmul.f32.vlgmr.msra.gmra.mxu0 %v7576_v27  ;;  %1395 = vmatpush.msra.mxu1 %v7583_v59  ;;  %v11894_v59 = vand.u32 4294901760, %v7661_v53 }
  0xc2   :  { %1567 = vmatpush.msrb.mxu0 %v7661_v53  ;;  %1440 = vmatpush.msra.mxu2 %v7837_v58  ;;  %v11896_v53 = vand.u32 4294901760, %v7698_v13 }
  0xc3   :  { %1543 = vmatpush.msra.mxu3 %v1542_v54  ;;  %1397 = vmatpush.msra.mxu1 %v7595_v24  ;;  %v1454_v24 = vsub.f32 %v7916_v48, %v1453_v2  ;;  %v8088_v54 = vand.u32 4294901760, %v169_v43 }
  0xc4   :  { %1570 = vmatpush.msrb.mxu0 %v7685_v38  ;;  %1442 = vmatpush.msra.mxu2 %v7852_v57 }
  0xc5   :  { %1549 = vmatpush.msra.mxu3 %v1548_v42  ;;  %1448 = vmatmul.f32.vlgmr.msra.gmra.mxu2 %v1447_v34 }
  0xc6   :  { %1573 = vmatpush.msrb.mxu0 %v7698_v13  ;;  %1672 = vmatpush.msrb.mxu2 %v11894_v59  ;;  %v11905_v13 = vand.u32 4294901760, %v7806_v16  ;;  %v79_v59 = vld [vmem:[#allocation2 + $0x20] sm:$0xff] }
  0xc7   :  { %1399 = vmatpush.msra.mxu1 %v7621_v0  ;;  %1555 = vmatpush.msra.mxu3 %v1554_v56  ;;  %v1455_v0 = vand.u32 4294901760, %v1454_v24 }
  0xc8   :  { %1557 = vmatmul.f32.vlgmr.msra.gmra.mxu3 %v7839_v26  ;;  %1576 = vmatpush.msrb.mxu0 %v7709_v15 }
  0xc9   :  { %1676 = vmatpush.msrb.mxu2 %v11895_v1  ;;  %1743 = vmatpush.msrb.mxu3 %v7635_v63  ;;  %v166_v1 = vld [vmem:[#allocation5 + $0x218] sm:$0xff] }
  0xca   :  { %1401 = vmatpush.msra.mxu1 %v7639_v44  ;;  %1366 = vmatmul.f32.gmra.mxu0 %v7641_v21  ;;  %v11897_v44 = vand.u32 4294901760, %v7709_v15  ;;  %v11900_v15 = vand.u32 4294901760, %v7742_v28 }
  0xcb   :  { %1403 = vmatmul.f32.vlgmr.msra.gmra.mxu1 %v7576_v27  ;;  %1579 = vmatpush.msrb.mxu0 %v7725_v30  ;;  %v11898_v27 = vand.u32 4294901760, %v7725_v30 }
  0xcc   :  { %1625 = vmatpush.msrb.mxu1 %v7635_v63  ;;  %1680 = vmatpush.msrb.mxu2 %v11896_v53  ;;  %v11899_v63 = vld [vmem:[#allocation16_spill] sm:$0xff] }
  0xcd   :  { %1745 = vmatpush.msrb.mxu3 %v7663_v29  ;;  %1582 = vmatpush.msrb.mxu0 %v7742_v28  ;;  %v11902_v28 = vand.u32 4294901760, %v7766_v11 }
  0xce   :  { %1627 = vmatpush.msrb.mxu1 %v7663_v29  ;;  %1684 = vmatpush.msrb.mxu2 %v11897_v44  ;;  %v177_v29 = vld [vmem:[#allocation5 + $0x270] sm:$0xff] }
  0xcf   :  { %1747 = vmatpush.msrb.mxu3 %v7678_v37  ;;  %1456 = vmatmul.f32.gmra.mxu2 %v1455_v0  ;;  %v7991_v30 = vand.u32 4294901760, %v177_v29 }
  0xd0   :  { %1585 = vmatpush.msrb.mxu0 %v7756_v18  ;;  %1629 = vmatpush.msrb.mxu1 %v7678_v37  ;;  %v11901_v37 = vand.u32 4294901760, %v7756_v18 }
  0xd1   :  { %1688 = vmatpush.msrb.mxu2 %v11898_v27  ;;  %1749 = vmatpush.msrb.mxu3 %v11899_v63  ;;  %v8113_v27 = vsub.f32 %v169_v43, %v8088_v54 }
  0xd2   :  { %1561 = vmatmul.f32.gmra.mxu3 %v7896_v9  ;;  %1588 = vmatpush.msrb.mxu0 %v7766_v11  ;;  %v174_v11 = vld [vmem:[#allocation5 + $0x258] sm:$0xff] }
  0xd3   :  { %1631 = vmatpush.msrb.mxu1 %v11899_v63  ;;  %1692 = vmatpush.msrb.mxu2 %v11900_v15  ;;  %v165_v15 = vld [vmem:[#allocation5 + $0x210] sm:$0xff] }
  0xd4   :  { %1751 = vmatpush.msrb.mxu3 %v7700_v3  ;;  %1407 = vmatmul.f32.gmra.mxu1 %v7641_v21  ;;  %v178_v21 = vld [vmem:[#allocation5 + $0x278] sm:$0xff] }
  0xd5   :  { %1591 = vmatpush.msrb.mxu0 %v7780_v49  ;;  %1633 = vmatpush.msrb.mxu1 %v7700_v3  ;;  %v11903_v3 = vand.u32 4294901760, %v7780_v49  ;;  %v7984_v38 = vand.u32 4294901760, %v178_v21 }
  0xd6   :  { %1696 = vmatpush.msrb.mxu2 %v11901_v37  ;;  %1753 = vmatpush.msrb.mxu3 %v7720_v31  ;;  %v8116_v37 = vand.u32 4294901760, %v79_v59 }
  0xd7   :  { %1594 = vmatpush.msrb.mxu0 %v7793_v7  ;;  %1635 = vmatpush.msrb.mxu1 %v7720_v31  ;;  %v11904_v31 = vand.u32 4294901760, %v7793_v7  ;;  %v8001_v18 = vsub.f32 %v178_v21, %v7984_v38  ;;  %v8123_v21 = vand.u32 4294901760, %v166_v1 }
  0xd8   :  { %1700 = vmatpush.msrb.mxu2 %v11902_v28  ;;  %1755 = vmatpush.msrb.mxu3 %v7730_v14 }
  0xd9   :  { %1597 = vmatpush.msrb.mxu0 %v7806_v16  ;;  %1637 = vmatpush.msrb.mxu1 %v7730_v14  ;;  %v176_v14 = vld [vmem:[#allocation5 + $0x268] sm:$0xff]  ;;  %v1834_v7 = vand.u32 4294901760, %v8001_v18 }
  0xda   :  { %1704 = vmatpush.msrb.mxu2 %v11903_v3  ;;  %1757 = vmatpush.msrb.mxu3 %v7744_v50 }
  0xdb   :  { %1600 = vmatpush.msrb.mxu0 %v7820_v32  ;;  %1639 = vmatpush.msrb.mxu1 %v7744_v50  ;;  %v7998_v50 = vand.u32 4294901760, %v176_v14  ;;  %v172_v32 = vld [vmem:[#allocation5 + $0x248] sm:$0xff] }
  0xdc   :  { %1708 = vmatpush.msrb.mxu2 %v11904_v31  ;;  %1759 = vmatpush.msrb.mxu3 %v7758_v47 }
  0xdd   :  { %1603 = vmatpush.msrb.mxu0 %v7832_v45  ;;  %1641 = vmatpush.msrb.mxu1 %v7758_v47  ;;  %v175_v47 = vld [vmem:[#allocation5 + $0x260] sm:$0xff]  ;;  %v8022_v16 = vsub.f32 %v176_v14, %v7998_v50 }
  0xde   :  { %1712 = vmatpush.msrb.mxu2 %v11905_v13  ;;  %1761 = vmatpush.msrb.mxu3 %v7768_v20  ;;  %v8013_v49 = vand.u32 4294901760, %v175_v47  ;;  %v8135_v13 = vand.u32 4294901760, %v165_v15 }
  0xdf   :  { %1606 = vmatpush.msrb.mxu0 %v7850_v19  ;;  %1643 = vmatpush.msrb.mxu1 %v7768_v20  ;;  %v8009_v20 = vsub.f32 %v177_v29, %v7991_v30  ;;  %v171_v19 = vld [vmem:[#allocation5 + $0x240] sm:$0xff] }
  0xe0   :  { %1716 = vmatpush.msrb.mxu2 %v1528_v40  ;;  %1763 = vmatpush.msrb.mxu3 %v7782_v36  ;;  %v8035_v40 = vsub.f32 %v175_v47, %v8013_v49  ;;  %v8056_v51 = vand.u32 4294901760, %v171_v19  ;;  %v11668_v47 = vand.u32 4294901760, %v8113_v27 }
  0xe1   :  { %1609 = vmatpush.msrb.mxu0 %v7863_v10  ;;  %1645 = vmatpush.msrb.mxu1 %v7782_v36  ;;  %v8018_v36 = vand.u32 4294901760, %v174_v11  ;;  %v1846_v10 = vand.u32 4294901760, %v8022_v16 }
  0xe2   :  { %1720 = vmatpush.msrb.mxu2 %v1534_v46  ;;  %1765 = vmatpush.msrb.mxu3 %v7795_v61  ;;  %v173_v46 = vld [vmem:[#allocation5 + $0x250] sm:$0xff]  ;;  %v8080_v41 = vsub.f32 %v171_v19, %v8056_v51 }
  0xe3   :  { %1612 = vmatpush.msrb.mxu0 %v7877_v33  ;;  %1647 = vmatpush.msrb.mxu1 %v7795_v61  ;;  %v1840_v61 = vand.u32 4294901760, %v8009_v20  ;;  %v8032_v45 = vand.u32 4294901760, %v173_v46  ;;  %v1847_v52 = vsub.f32 %v8022_v16, %v1846_v10 }
  0xe4   :  { %1724 = vmatpush.msrb.mxu2 %v1540_v5  ;;  %1767 = vmatpush.msrb.mxu3 %v7808_v35  ;;  %v8045_v5 = vsub.f32 %v174_v11, %v8018_v36  ;;  %v11671_v24 = vand.u32 4294901760, %v8080_v41 }
  0xe5   :  { %1615 = vmatmul.f32.vlgmr.msrb.gmra.mxu0 %v7866_v12  ;;  %1649 = vmatpush.msrb.mxu1 %v7808_v35  ;;  %v1835_v35 = vsub.f32 %v8001_v18, %v1834_v7  ;;  %v1841_v33 = vsub.f32 %v8009_v20, %v1840_v61  ;;  %v8062_v60 = vsub.f32 %v173_v46, %v8032_v45  ;;  %v1848_v17 = vand.u32 4294901760, %v1847_v52  ;;  %v167_v12 = vld [vmem:[#allocation5 + $0x220] sm:$0xff] }
  0xe6   :  { %1784 = vmatpush.msra.mxu0 %v7984_v38  ;;  %1728 = vmatpush.msrb.mxu2 %v1546_v55  ;;  %v11679_v55 = vand.u32 4294901760, %v8035_v40  ;;  %v8110_v44 = vand.u32 4294901760, %v167_v12  ;;  %v1877_v31 = vsub.f32 %v8080_v41, %v11671_v24  ;;  %v8145_v46 = vsub.f32 %v79_v59, %v8116_v37  ;;  %v163_v52 = vld [vmem:[#allocation5 + $0x200] sm:$0xff] }
  0xe7   :  { %1769 = vmatpush.msrb.mxu3 %v7824_v4  ;;  %1651 = vmatpush.msrb.mxu1 %v7824_v4  ;;  %v8049_v4 = vand.u32 4294901760, %v172_v32  ;;  %v1836_v22 = vand.u32 4294901760, %v1835_v35 }
  0xe8   :  { %1786 = vmatpush.msra.mxu0 %v7991_v30  ;;  %1732 = vmatpush.msrb.mxu2 %v1552_v39  ;;  %v11676_v39 = vand.u32 4294901760, %v8045_v5  ;;  %v1853_v62 = vsub.f32 %v8035_v40, %v11679_v55  ;;  %v8139_v11 = vsub.f32 %v167_v12, %v8110_v44 }
  0xe9   :  { %1771 = vmatpush.msrb.mxu3 %v7837_v58  ;;  %1734 = vmatmul.f32.vlgmr.msrb.gmra.mxu2 %v7839_v26  ;;  %v8075_v8 = vsub.f32 %v172_v32, %v8049_v4 }
  0xea   :  { %1788 = vmatpush.msra.mxu0 %v7998_v50  ;;  %1939 = vmatpush.msra.mxu2 %v8001_v18  ;;  %v1859_v42 = vsub.f32 %v8045_v5, %v11676_v39  ;;  %v1854_v0 = vand.u32 4294901760, %v1853_v62  ;;  %v11665_v43 = vand.u32 4294901760, %v8139_v11  ;;  %v11680_v62 = vand.u32 4294901760, %v8145_v46 }
  0xeb   :  { %1653 = vmatpush.msrb.mxu1 %v7837_v58  ;;  %1773 = vmatpush.msrb.mxu3 %v7852_v57  ;;  %v8072_v58 = vand.u32 4294901760, %v170_v6  ;;  %v11672_v34 = vand.u32 4294901760, %v8075_v8 }
  0xec   :  { %1775 = vmatmul.f32.vlgmr.msrb.gmra.mxu3 %v7839_v26  ;;  %1790 = vmatpush.msra.mxu0 %v8013_v49  ;;  %v1842_v26 = vand.u32 4294901760, %v1841_v33  ;;  %v1860_v63 = vand.u32 4294901760, %v1859_v42  ;;  %v8153_v33 = vsub.f32 %v166_v1, %v8123_v21  ;;  %v8179_v1 = vand.u32 4294901760, %v163_v52 }
  0xed   :  { %1942 = vmatpush.msra.mxu2 %v8009_v20  ;;  %1997 = vmatpush.msra.mxu3 %v7984_v38  ;;  %v8101_v56 = vsub.f32 %v170_v6, %v8072_v58  ;;  %v1871_v28 = vsub.f32 %v8075_v8, %v11672_v34  ;;  %v1889_v6 = vsub.f32 %v8113_v27, %v11668_v47 }
  0xee   :  { %1655 = vmatpush.msrb.mxu1 %v7852_v57  ;;  %1620 = vmatmul.f32.gmra.mxu0 %v7916_v48  ;;  %v11673_v57 = vand.u32 4294901760, %v8062_v60  ;;  %v1878_v48 = vand.u32 4294901760, %v1877_v31  ;;  %v11667_v12 = vand.u32 4294901760, %v8153_v33 }
  0xef   :  { %1659 = vmatmul.f32.vlgmr.msrb.gmra.mxu1 %v1445_v23  ;;  %1792 = vmatpush.msra.mxu0 %v8018_v36  ;;  %v8097_v23 = vand.u32 4294901760, %v168_v25  ;;  %v11669_v3 = vand.u32 4294901760, %v8101_v56  ;;  %v1872_v32 = vand.u32 4294901760, %v1871_v28 }
  0xf0   :  { %1837 = vmatpush.msra.mxu1 %v1836_v22  ;;  %1945 = vmatpush.msra.mxu2 %v8022_v16  ;;  %v1865_v53 = vsub.f32 %v8062_v60, %v11673_v57  ;;  %v189_v57 = vld [vmem:[#allocation5 + $0x2d0] sm:$0xff] }
  0xf1   :  { %1999 = vmatpush.msra.mxu3 %v7991_v30  ;;  %1794 = vmatpush.msra.mxu0 %v8032_v45  ;;  %v8127_v29 = vsub.f32 %v168_v25, %v8097_v23  ;;  %v1883_v19 = vsub.f32 %v8101_v56, %v11669_v3  ;;  %v91_v25 = vld [vmem:[#allocation2 + $0x80] sm:$0xff]  ;;  %v185_v16 = vld [vmem:[#allocation5 + $0x2b0] sm:$0xff] }
  0xf2   :  { %1843 = vmatpush.msra.mxu1 %v1842_v26  ;;  %1948 = vmatpush.msra.mxu2 %v8035_v40  ;;  %v1866_v14 = vand.u32 4294901760, %v1865_v53  ;;  %v8165_v26 = vsub.f32 %v165_v15, %v8135_v13  ;;  %v8181_v53 = vand.u32 4294901760, %v91_v25  ;;  %v1901_v15 = vsub.f32 %v8139_v11, %v11665_v43 }
  0xf3   :  { %2001 = vmatpush.msra.mxu3 %v7998_v50  ;;  %1738 = vmatmul.f32.gmra.mxu2 %v7896_v9  ;;  %v11666_v35 = vand.u32 4294901760, %v8127_v29  ;;  %v8208_v43 = vsub.f32 %v163_v52, %v8179_v1 }
  0xf4   :  { %1796 = vmatpush.msra.mxu0 %v8049_v4  ;;  %1849 = vmatpush.msra.mxu1 %v1848_v17  ;;  %v1884_v17 = vand.u32 4294901760, %v1883_v19  ;;  %v11670_v31 = vand.u32 4294901760, %v8165_v26 }
  0xf5   :  { %1951 = vmatpush.msra.mxu2 %v8045_v5  ;;  %2003 = vmatpush.msra.mxu3 %v8013_v49  ;;  %v1895_v42 = vsub.f32 %v8127_v29, %v11666_v35  ;;  %v8211_v35 = vsub.f32 %v91_v25, %v8181_v53  ;;  %v190_v25 = vld [vmem:[#allocation5 + $0x2d8] sm:$0xff]  ;;  %v11677_v24 = vand.u32 4294901760, %v8208_v43 }
  0xf6   :  { %1779 = vmatmul.f32.gmra.mxu3 %v7896_v9  ;;  %1798 = vmatpush.msra.mxu0 %v8056_v51  ;;  %v164_v9 = vld [vmem:[#allocation5 + $0x208] sm:$0xff]  ;;  %v8240_v34 = vand.u32 4294901760, %v190_v25 }
  0xf7   :  { %1855 = vmatpush.msra.mxu1 %v1854_v0  ;;  %1954 = vmatpush.msra.mxu2 %v8062_v60  ;;  %v8161_v22 = vand.u32 4294901760, %v164_v9  ;;  %v193_v0 = vld [vmem:[#allocation5 + $0x2f0] sm:$0xff]  ;;  %v1896_v19 = vand.u32 4294901760, %v1895_v42  ;;  %v1902_v42 = vand.u32 4294901760, %v1901_v15 }
  0xf8   :  { %2005 = vmatpush.msra.mxu3 %v8018_v36  ;;  %1665 = vmatmul.f32.gmra.mxu1 %v1453_v2  ;;  %v194_v2 = vld [vmem:[#allocation5 + $0x2f8] sm:$0xff]  ;;  %v8265_v18 = vsub.f32 %v190_v25, %v8240_v34 }
  0xf9   :  { %1800 = vmatpush.msra.mxu0 %v8072_v58  ;;  %1861 = vmatpush.msra.mxu1 %v1860_v63  ;;  %v8175_v59 = vand.u32 4294901760, %v194_v2  ;;  %v1890_v63 = vand.u32 4294901760, %v1889_v6  ;;  %v8188_v28 = vsub.f32 %v164_v9, %v8161_v22  ;;  %v1907_v9 = vsub.f32 %v8153_v33, %v11667_v12 }
  0xfa   :  { %1957 = vmatpush.msra.mxu2 %v8075_v8  ;;  %2007 = vmatpush.msra.mxu3 %v8032_v45  ;;  %v8203_v6 = vand.u32 4294901760, %v193_v0 }
  0xfb   :  { %1802 = vmatpush.msra.mxu0 %v8088_v54  ;;  %1867 = vmatpush.msra.mxu1 %v1866_v14  ;;  %v1818_v14 = vsub.f32 %v8145_v46, %v11680_v62  ;;  %v11674_v12 = vand.u32 4294901760, %v8188_v28  ;;  %v1908_v3 = vand.u32 4294901760, %v1907_v9 }
  0xfc   :  { %1960 = vmatpush.msra.mxu2 %v8080_v41  ;;  %2009 = vmatpush.msra.mxu3 %v8049_v4  ;;  %v8225_v15 = vsub.f32 %v193_v0, %v8203_v6 }
  0xfd   :  { %1804 = vmatpush.msra.mxu0 %v8097_v23  ;;  %1873 = vmatpush.msra.mxu1 %v1872_v32  ;;  %v192_v32 = vld [vmem:[#allocation5 + $0x2e8] sm:$0xff]  ;;  %v1819_v52 = vand.u32 4294901760, %v1818_v14  ;;  %v11678_v14 = vand.u32 4294901760, %v8211_v35  ;;  %v1919_v9 = vsub.f32 %v8188_v28, %v11674_v12 }
  0xfe   :  { %1963 = vmatpush.msra.mxu2 %v8101_v56  ;;  %2011 = vmatpush.msra.mxu3 %v8056_v51  ;;  %v8218_v47 = vand.u32 4294901760, %v192_v32 }
  0xff   :  { %1806 = vmatpush.msra.mxu0 %v8110_v44  ;;  %1879 = vmatpush.msra.mxu1 %v1878_v48  ;;  %v8201_v48 = vsub.f32 %v194_v2, %v8175_v59  ;;  %v1913_v2 = vsub.f32 %v8165_v26, %v11670_v31 }
 0x100   :  { %1966 = vmatpush.msra.mxu2 %v8113_v27  ;;  %2013 = vmatpush.msra.mxu3 %v8072_v58  ;;  %v8238_v0 = vsub.f32 %v192_v32, %v8218_v47  ;;  %v188_v32 = vld [vmem:[#allocation5 + $0x2c8] sm:$0xff] }
 0x101   :  { %1808 = vmatpush.msra.mxu0 %v8123_v21  ;;  %1885 = vmatpush.msra.mxu1 %v1884_v17  ;;  %v191_v17 = vld [vmem:[#allocation5 + $0x2e0] sm:$0xff] }
 0x102   :  { %1969 = vmatpush.msra.mxu2 %v8127_v29  ;;  %2015 = vmatpush.msra.mxu3 %v8088_v54  ;;  %v8227_v31 = vand.u32 4294901760, %v191_v17  ;;  %v11682_v39 = vand.u32 4294901760, %v8238_v0 }
 0x103   :  { %1810 = vmatpush.msra.mxu0 %v8135_v13  ;;  %1891 = vmatpush.msra.mxu1 %v1890_v63  ;;  %v11675_v63 = vand.u32 4294901760, %v8201_v48 }
 0x104   :  { %1972 = vmatpush.msra.mxu2 %v8139_v11  ;;  %2017 = vmatpush.msra.mxu3 %v8097_v23  ;;  %11906 = vst [vmem:[#allocation16_spill] sm:$0xff] %v8227_v31  ;;  %v8249_v12 = vsub.f32 %v191_v17, %v8227_v31  ;;  %v1920_v17 = vand.u32 4294901760, %v1919_v9  ;;  %v186_v9 = vld [vmem:[#allocation5 + $0x2b8] sm:$0xff] }
 0x105   :  { %1812 = vmatpush.msra.mxu0 %v8161_v22  ;;  %1897 = vmatpush.msra.mxu1 %v1896_v19  ;;  %v1914_v19 = vand.u32 4294901760, %v1913_v2  ;;  %v11681_v2 = vand.u32 4294901760, %v8225_v15 }
 0x106   :  { %1975 = vmatpush.msra.mxu2 %v8153_v33  ;;  %2019 = vmatpush.msra.mxu3 %v8110_v44  ;;  %v11683_v25 = vand.u32 4294901760, %v8249_v12 }
 0x107   :  { %1814 = vmatpush.msra.mxu0 %v8179_v1  ;;  %1903 = vmatpush.msra.mxu1 %v1902_v42  ;;  %v2207_v42 = vsub.f32 %v8201_v48, %v11675_v63  ;;  %v8260_v63 = vand.u32 4294901760, %v189_v57 }
 0x108   :  { %1978 = vmatpush.msra.mxu2 %v8165_v26  ;;  %2021 = vmatpush.msra.mxu3 %v8123_v21 }
 0x109   :  { %1820 = vmatmul.f32.vlgmr.msra.gmra.mxu0 %v1819_v52  ;;  %1909 = vmatpush.msra.mxu1 %v1908_v3  ;;  %v1925_v52 = vsub.f32 %v8208_v43, %v11677_v24  ;;  %v1826_v3 = vsub.f32 %v8211_v35, %v11678_v14  ;;  %v8270_v24 = vand.u32 4294901760, %v188_v32  ;;  %v2208_v14 = vand.u32 4294901760, %v2207_v42 }
 0x10a   :  { %2044 = vmatpush.msrb.mxu0 %v1834_v7  ;;  %1981 = vmatpush.msra.mxu2 %v8188_v28  ;;  %v187_v7 = vld [vmem:[#allocation5 + $0x2c0] sm:$0xff]  ;;  %v8282_v55 = vsub.f32 %v189_v57, %v8260_v63  ;;  %v2219_v42 = vsub.f32 %v8238_v0, %v11682_v39  ;;  %v2225_v39 = vsub.f32 %v8249_v12, %v11683_v25 }
 0x10b   :  { %2023 = vmatpush.msra.mxu3 %v8135_v13  ;;  %1915 = vmatpush.msra.mxu1 %v1914_v19  ;;  %v2213_v19 = vsub.f32 %v8225_v15, %v11681_v2  ;;  %v1926_v20 = vand.u32 4294901760, %v1925_v52  ;;  %v8284_v62 = vand.u32 4294901760, %v187_v7  ;;  %v11908_v52 = vand.u32 4294901760, %v8035_v40  ;;  %v184_v2 = vld [vmem:[#allocation5 + $0x2a8] sm:$0xff]  ;;  %v183_v25 = vld [vmem:[#allocation5 + $0x2a0] sm:$0xff] }
 0x10c   :  { %2048 = vmatpush.msrb.mxu0 %v1840_v61  ;;  %1984 = vmatpush.msra.mxu2 %v8208_v43  ;;  %v1827_v61 = vand.u32 4294901760, %v1826_v3  ;;  %v8296_v57 = vsub.f32 %v188_v32, %v8270_v24  ;;  %v8298_v3 = vand.u32 4294901760, %v186_v9  ;;  %v8308_v32 = vand.u32 4294901760, %v185_v16 }
 0x10d   :  { %2025 = vmatpush.msra.mxu3 %v8161_v22  ;;  %1987 = vmatmul.f32.vlgmr.msra.gmra.mxu2 %v8145_v46  ;;  %v8306_v40 = vsub.f32 %v187_v7, %v8284_v62  ;;  %v8335_v7 = vand.u32 4294901760, %v183_v25 }
 0x10e   :  { %2052 = vmatpush.msrb.mxu0 %v1846_v10  ;;  %2156 = vmatpush.msrb.mxu2 %v8175_v59  ;;  %v11907_v10 = vand.u32 4294901760, %v8145_v46  ;;  %v11684_v46 = vand.u32 4294901760, %v8282_v55 }
 0x10f   :  { %1921 = vmatpush.msra.mxu1 %v1920_v17  ;;  %2027 = vmatpush.msra.mxu3 %v8179_v1  ;;  %v2214_v17 = vand.u32 4294901760, %v2213_v19  ;;  %v11910_v19 = vand.u32 4294901760, %v8265_v18 }
 0x110   :  { %2031 = vmatmul.f32.vlgmr.msra.gmra.mxu3 %v11907_v10  ;;  %2056 = vmatpush.msrb.mxu0 %v11908_v52  ;;  %v11909_v10 = vand.u32 4294901760, %v8045_v5  ;;  %v11911_v5 = vand.u32 4294901760, %v8062_v60 }
 0x111   :  { %2158 = vmatpush.msrb.mxu2 %v8203_v6  ;;  %2209 = vmatpush.msrb.mxu3 %v2208_v14  ;;  %v2220_v14 = vand.u32 4294901760, %v2219_v42  ;;  %v2231_v52 = vsub.f32 %v8265_v18, %v11910_v19  ;;  %v2226_v42 = vand.u32 4294901760, %v2225_v39  ;;  %v11687_v19 = vand.u32 4294901760, %v8306_v40 }
 0x112   :  { %1927 = vmatpush.msra.mxu1 %v1926_v20  ;;  %1828 = vmatmul.f32.gmra.mxu0 %v1827_v61  ;;  %v8320_v20 = vsub.f32 %v186_v9, %v8298_v3  ;;  %v8322_v61 = vand.u32 4294901760, %v184_v2  ;;  %v8333_v9 = vsub.f32 %v185_v16, %v8308_v32  ;;  %v11912_v39 = vand.u32 4294901760, %v8075_v8 }
 0x113   :  { %1929 = vmatmul.f32.vlgmr.msra.gmra.mxu1 %v8116_v37  ;;  %2060 = vmatpush.msrb.mxu0 %v11909_v10  ;;  %v182_v10 = vld [vmem:[#allocation5 + $0x298] sm:$0xff]  ;;  %v2232_v60 = vand.u32 4294901760, %v2231_v52  ;;  %v11914_v8 = vand.u32 4294901760, %v8211_v35 }
 0x114   :  { %2115 = vmatpush.msrb.mxu1 %v7984_v38  ;;  %2160 = vmatpush.msrb.mxu2 %v8218_v47  ;;  %v2237_v38 = vsub.f32 %v8282_v55, %v11684_v46  ;;  %v8346_v16 = vsub.f32 %v184_v2, %v8322_v61  ;;  %v8348_v46 = vand.u32 4294901760, %v182_v10  ;;  %v11688_v2 = vand.u32 4294901760, %v8333_v9 }
 0x115   :  { %2215 = vmatpush.msrb.mxu3 %v2214_v17  ;;  %2064 = vmatpush.msrb.mxu0 %v11911_v5  ;;  %v180_v5 = vld [vmem:[#allocation5 + $0x288] sm:$0xff] }
 0x116   :  { %2117 = vmatpush.msrb.mxu1 %v7991_v30  ;;  %2162 = vmatpush.msrb.mxu2 %v8227_v31  ;;  %v11913_v30 = vand.u32 4294901760, %v8296_v57  ;;  %v2238_v52 = vand.u32 4294901760, %v2237_v38  ;;  %v80_v31 = vld [vmem:[#allocation2 + $0x28] sm:$0xff] }
 0x117   :  { %2221 = vmatpush.msrb.mxu3 %v2220_v14  ;;  %1992 = vmatmul.f32.gmra.mxu2 %v8211_v35  ;;  %v181_v14 = vld [vmem:[#allocation5 + $0x290] sm:$0xff] }
 0x118   :  { %2068 = vmatpush.msrb.mxu0 %v11912_v39  ;;  %2119 = vmatpush.msrb.mxu1 %v7998_v50  ;;  %v2243_v17 = vsub.f32 %v8296_v57, %v11913_v30  ;;  %v11915_v50 = vand.u32 4294901760, %v8080_v41  ;;  %v2249_v39 = vsub.f32 %v8306_v40, %v11687_v19  ;;  %v8360_v30 = vsub.f32 %v183_v25, %v8335_v7 }
 0x119   :  { %2164 = vmatpush.msrb.mxu2 %v8240_v34  ;;  %2227 = vmatpush.msrb.mxu3 %v2226_v42  ;;  %v8364_v35 = vand.u32 4294901760, %v181_v14  ;;  %v11916_v42 = vand.u32 4294901760, %v8320_v20  ;;  %v8372_v25 = vsub.f32 %v182_v10, %v8348_v46  ;;  %v8377_v19 = vand.u32 4294901760, %v180_v5 }
 0x11a   :  { %2037 = vmatmul.f32.gmra.mxu3 %v11914_v8  ;;  %2072 = vmatpush.msrb.mxu0 %v11915_v50  ;;  %v2244_v41 = vand.u32 4294901760, %v2243_v17  ;;  %v179_v50 = vld [vmem:[#allocation5 + $0x280] sm:$0xff]  ;;  %v2250_v17 = vand.u32 4294901760, %v2249_v39  ;;  %v2272_v10 = vand.u32 4294901760, %v8360_v30  ;;  %v11918_v8 = vand.u32 4294901760, %v8113_v27 }
 0x11b   :  { %2121 = vmatpush.msrb.mxu1 %v8013_v49  ;;  %2166 = vmatpush.msrb.mxu2 %v8260_v63  ;;  %v2255_v38 = vsub.f32 %v8320_v20, %v11916_v42  ;;  %v11917_v49 = vand.u32 4294901760, %v8101_v56  ;;  %v2261_v42 = vsub.f32 %v8333_v9, %v11688_v2  ;;  %v8392_v56 = vand.u32 4294901760, %v179_v50 }
 0x11c   :  { %2233 = vmatpush.msrb.mxu3 %v2232_v60  ;;  %1933 = vmatmul.f32.gmra.mxu1 %v8181_v53  ;;  %v8379_v60 = vand.u32 4294901760, %v80_v31  ;;  %v11919_v39 = vand.u32 4294901760, %v8346_v16  ;;  %v2278_v2 = vand.u32 4294901760, %v8372_v25  ;;  %v11920_v27 = vand.u32 4294901760, %v8127_v29 }
 0x11d   :  { %2076 = vmatpush.msrb.mxu0 %v11917_v49  ;;  %2123 = vmatpush.msrb.mxu1 %v8018_v36  ;;  %v8390_v36 = vsub.f32 %v181_v14, %v8364_v35  ;;  %v8417_v29 = vsub.f32 %v179_v50, %v8392_v56 }
 0x11e   :  { %2168 = vmatpush.msrb.mxu2 %v8270_v24  ;;  %2239 = vmatpush.msrb.mxu3 %v2238_v52  ;;  %v2256_v52 = vand.u32 4294901760, %v2255_v38  ;;  %v2267_v49 = vsub.f32 %v8346_v16, %v11919_v39  ;;  %v8406_v14 = vsub.f32 %v80_v31, %v8379_v60  ;;  %v2273_v38 = vsub.f32 %v8360_v30, %v2272_v10 }
 0x11f   :  { %2080 = vmatpush.msrb.mxu0 %v11918_v8  ;;  %2125 = vmatpush.msrb.mxu1 %v8032_v45  ;;  %v8403_v45 = vsub.f32 %v180_v5, %v8377_v19  ;;  %v11921_v8 = vand.u32 4294901760, %v8139_v11  ;;  %v2279_v5 = vsub.f32 %v8372_v25, %v2278_v2  ;;  %v2296_v39 = vand.u32 4294901760, %v8417_v29 }
 0x120   :  { %2170 = vmatpush.msrb.mxu2 %v8284_v62  ;;  %2245 = vmatpush.msrb.mxu3 %v2244_v41  ;;  %v2262_v41 = vand.u32 4294901760, %v2261_v42  ;;  %v2268_v31 = vand.u32 4294901760, %v2267_v49  ;;  %v11922_v42 = vand.u32 4294901760, %v8153_v33  ;;  %v2189_v11 = vand.u32 4294901760, %v8406_v14 }
 0x121   :  { %2084 = vmatpush.msrb.mxu0 %v11920_v27  ;;  %2127 = vmatpush.msrb.mxu1 %v8049_v4  ;;  %v2284_v4 = vand.u32 4294901760, %v8390_v36  ;;  %v2274_v50 = vand.u32 4294901760, %v2273_v38  ;;  %v2280_v49 = vand.u32 4294901760, %v2279_v5  ;;  %v11924_v27 = vand.u32 4294901760, %v8188_v28 }
 0x122   :  { %2172 = vmatpush.msrb.mxu2 %v8298_v3  ;;  %2251 = vmatpush.msrb.mxu3 %v2250_v17  ;;  %v92_v17 = vld [vmem:[#allocation2 + $0x88] sm:$0xff]  ;;  %v11927_v5 = vand.u32 4294901760, %v8225_v15 }
 0x123   :  { %2088 = vmatpush.msrb.mxu0 %v11921_v8  ;;  %2129 = vmatpush.msrb.mxu1 %v8056_v51  ;;  %v2290_v51 = vand.u32 4294901760, %v8403_v45  ;;  %v2285_v33 = vsub.f32 %v8390_v36, %v2284_v4 }
 0x124   :  { %2174 = vmatpush.msrb.mxu2 %v8308_v32  ;;  %2257 = vmatpush.msrb.mxu3 %v2256_v52  ;;  %v11923_v52 = vand.u32 4294901760, %v8165_v26  ;;  %v2190_v26 = vsub.f32 %v8406_v14, %v2189_v11 }
 0x125   :  { %2092 = vmatpush.msrb.mxu0 %v11922_v42  ;;  %2131 = vmatpush.msrb.mxu1 %v8072_v58  ;;  %v8436_v58 = vand.u32 4294901760, %v92_v17  ;;  %v2286_v28 = vand.u32 4294901760, %v2285_v33  ;;  %v8606_v33 = vpop.f32.mrf.mxu1 }
 0x126   :  { %2176 = vmatpush.msrb.mxu2 %v8322_v61  ;;  %2263 = vmatpush.msrb.mxu3 %v2262_v41  ;;  %v11925_v41 = vand.u32 4294901760, %v8208_v43  ;;  %v2191_v43 = vand.u32 4294901760, %v2190_v26 }
 0x127   :  { %2096 = vmatpush.msrb.mxu0 %v11923_v52  ;;  %2133 = vmatpush.msrb.mxu1 %v8088_v54  ;;  %v2291_v54 = vsub.f32 %v8403_v45, %v2290_v51  ;;  %v8456_v38 = vsub.f32 %v92_v17, %v8436_v58 }
 0x128   :  { %2178 = vmatpush.msrb.mxu2 %v8335_v7  ;;  %2269 = vmatpush.msrb.mxu3 %v2268_v31 }
 0x129   :  { %2100 = vmatpush.msrb.mxu0 %v11924_v27  ;;  %2135 = vmatpush.msrb.mxu1 %v8097_v23  ;;  %v2297_v23 = vsub.f32 %v8417_v29, %v2296_v39  ;;  %v2292_v8 = vand.u32 4294901760, %v2291_v54  ;;  %v2197_v31 = vand.u32 4294901760, %v8456_v38  ;;  %v201_v54 = vld [vmem:[#allocation5 + $0x330] sm:$0xff] }
 0x12a   :  { %2180 = vmatpush.msrb.mxu2 %v8348_v46  ;;  %2275 = vmatpush.msrb.mxu3 %v2274_v50 }
 0x12b   :  { %2104 = vmatpush.msrb.mxu0 %v11925_v41  ;;  %2137 = vmatpush.msrb.mxu1 %v8110_v44  ;;  %v2298_v44 = vand.u32 4294901760, %v2297_v23  ;;  %v200_v23 = vld [vmem:[#allocation5 + $0x328] sm:$0xff] }
 0x12c   :  { %2182 = vmatpush.msrb.mxu2 %v8364_v35  ;;  %2281 = vmatpush.msrb.mxu3 %v2280_v49 }
 0x12d   :  { %2106 = vmatmul.f32.vlgmr.msrb.gmra.mxu0 %v8116_v37  ;;  %2139 = vmatpush.msrb.mxu1 %v8123_v21  ;;  %v11926_v21 = vand.u32 4294901760, %v8201_v48 }
 0x12e   :  { %2311 = vmatpush.msra.mxu0 %v8201_v48  ;;  %2184 = vmatpush.msrb.mxu2 %v8377_v19  ;;  %v11928_v48 = vand.u32 4294901760, %v8238_v0 }
 0x12f   :  { %2287 = vmatpush.msrb.mxu3 %v2286_v28  ;;  %2141 = vmatpush.msrb.mxu1 %v8135_v13  ;;  %v2198_v13 = vsub.f32 %v8456_v38, %v2197_v31 }
 0x130   :  { %2314 = vmatpush.msra.mxu0 %v8225_v15  ;;  %2186 = vmatpush.msrb.mxu2 %v8392_v56 }
 0x131   :  { %2293 = vmatpush.msrb.mxu3 %v2292_v8  ;;  %2192 = vmatmul.f32.vlgmr.msrb.gmra.mxu2 %v2191_v43  ;;  %v8628_v8 = vpop.f32.mrf.mxu3 }
 0x132   :  { %2317 = vmatpush.msra.mxu0 %v8238_v0  ;;  %2416 = vmatpush.msra.mxu2 %v11926_v21  ;;  %v11937_v0 = vand.u32 4294901760, %v8346_v16 }
 0x133   :  { %2143 = vmatpush.msrb.mxu1 %v8161_v22  ;;  %2299 = vmatpush.msrb.mxu3 %v2298_v44  ;;  %v2199_v22 = vand.u32 4294901760, %v2198_v13  ;;  %v8636_v44 = vand.u32 4294901760, %v201_v54 }
 0x134   :  { %2301 = vmatmul.f32.vlgmr.msrb.gmra.mxu3 %v8379_v60  ;;  %2320 = vmatpush.msra.mxu0 %v8249_v12 }
 0x135   :  { %2420 = vmatpush.msra.mxu2 %v11927_v5  ;;  %2487 = vmatpush.msra.mxu3 %v8175_v59  ;;  %v8647_v5 = vand.u32 4294901760, %v200_v23 }
 0x136   :  { %2145 = vmatpush.msrb.mxu1 %v8179_v1  ;;  %2110 = vmatmul.f32.gmra.mxu0 %v8181_v53  ;;  %v11929_v1 = vand.u32 4294901760, %v8249_v12  ;;  %v11932_v12 = vand.u32 4294901760, %v8282_v55 }
 0x137   :  { %2147 = vmatmul.f32.vlgmr.msrb.gmra.mxu1 %v8116_v37  ;;  %2323 = vmatpush.msra.mxu0 %v8265_v18  ;;  %v11930_v37 = vand.u32 4294901760, %v8265_v18 }
 0x138   :  { %2369 = vmatpush.msra.mxu1 %v8175_v59  ;;  %2424 = vmatpush.msra.mxu2 %v11928_v48  ;;  %v11931_v59 = vld [vmem:[#allocation16_spill] sm:$0xff] }
 0x139   :  { %2489 = vmatpush.msra.mxu3 %v8203_v6  ;;  %2326 = vmatpush.msra.mxu0 %v8282_v55  ;;  %v11934_v55 = vand.u32 4294901760, %v8306_v40  ;;  %11938 = vst [vmem:[#allocation16_spill] sm:$0xff] %v8647_v5 }
 0x13a   :  { %2371 = vmatpush.msra.mxu1 %v8203_v6  ;;  %2428 = vmatpush.msra.mxu2 %v11929_v1  ;;  %v209_v6 = vld [vmem:[#allocation5 + $0x370] sm:$0xff] }
 0x13b   :  { %2491 = vmatpush.msra.mxu3 %v8218_v47  ;;  %2200 = vmatmul.f32.gmra.mxu2 %v2199_v22  ;;  %v8531_v18 = vand.u32 4294901760, %v209_v6  ;;  %v81_v1 = vld [vmem:[#allocation2 + $0x30] sm:$0xff] }
 0x13c   :  { %2329 = vmatpush.msra.mxu0 %v8296_v57  ;;  %2373 = vmatpush.msra.mxu1 %v8218_v47  ;;  %v11933_v47 = vand.u32 4294901760, %v8296_v57 }
 0x13d   :  { %2432 = vmatpush.msra.mxu2 %v11930_v37  ;;  %2493 = vmatpush.msra.mxu3 %v11931_v59 }
 0x13e   :  { %2305 = vmatmul.f32.gmra.mxu3 %v8436_v58  ;;  %2332 = vmatpush.msra.mxu0 %v8306_v40  ;;  %v206_v40 = vld [vmem:[#allocation5 + $0x358] sm:$0xff] }
 0x13f   :  { %2375 = vmatpush.msra.mxu1 %v11931_v59  ;;  %2436 = vmatpush.msra.mxu2 %v11932_v12  ;;  %v198_v59 = vld [vmem:[#allocation5 + $0x318] sm:$0xff] }
 0x140   :  { %2495 = vmatpush.msra.mxu3 %v8240_v34  ;;  %2151 = vmatmul.f32.gmra.mxu1 %v8181_v53  ;;  %v210_v53 = vld [vmem:[#allocation5 + $0x378] sm:$0xff] }
 0x141   :  { %2335 = vmatpush.msra.mxu0 %v8320_v20  ;;  %2377 = vmatpush.msra.mxu1 %v8240_v34  ;;  %v11935_v34 = vand.u32 4294901760, %v8320_v20  ;;  %v8524_v15 = vand.u32 4294901760, %v210_v53 }
 0x142   :  { %2440 = vmatpush.msra.mxu2 %v11933_v47  ;;  %2497 = vmatpush.msra.mxu3 %v8260_v63 }
 0x143   :  { %2338 = vmatpush.msra.mxu0 %v8333_v9  ;;  %2379 = vmatpush.msra.mxu1 %v8260_v63  ;;  %v11936_v63 = vand.u32 4294901760, %v8333_v9  ;;  %v8541_v57 = vsub.f32 %v210_v53, %v8524_v15  ;;  %v8663_v53 = vsub.f32 %v201_v54, %v8636_v44  ;;  %v8701_v54 = vpop.f32.mrf.mxu3 }
 0x144   :  { %2444 = vmatpush.msra.mxu2 %v11934_v55  ;;  %2499 = vmatpush.msra.mxu3 %v8270_v24  ;;  %11942 = vst [vmem:[#allocation20_spill] sm:$0xff] %v8701_v54  ;;  %v221_v54 = vld [vmem:[#allocation5 + $0x3d0] sm:$0xff] }
 0x145   :  { %2341 = vmatpush.msra.mxu0 %v8346_v16  ;;  %2381 = vmatpush.msra.mxu1 %v8270_v24  ;;  %v208_v24 = vld [vmem:[#allocation5 + $0x368] sm:$0xff]  ;;  %v11701_v9 = vand.u32 4294901760, %v8541_v57 }
 0x146   :  { %2448 = vmatpush.msra.mxu2 %v11935_v34  ;;  %2501 = vmatpush.msra.mxu3 %v8284_v62 }
 0x147   :  { %2344 = vmatpush.msra.mxu0 %v8360_v30  ;;  %2383 = vmatpush.msra.mxu1 %v8284_v62  ;;  %v8538_v62 = vand.u32 4294901760, %v208_v24  ;;  %v204_v30 = vld [vmem:[#allocation5 + $0x348] sm:$0xff] }
 0x148   :  { %2452 = vmatpush.msra.mxu2 %v11936_v63  ;;  %2503 = vmatpush.msra.mxu3 %v8298_v3  ;;  %v8666_v63 = vand.u32 4294901760, %v81_v1 }
 0x149   :  { %2347 = vmatpush.msra.mxu0 %v8372_v25  ;;  %2385 = vmatpush.msra.mxu1 %v8298_v3  ;;  %v207_v3 = vld [vmem:[#allocation5 + $0x360] sm:$0xff]  ;;  %v8562_v16 = vsub.f32 %v208_v24, %v8538_v62  ;;  %v8570_v25 = vpop.f32.mrf.mxu0 }
 0x14a   :  { %2456 = vmatpush.msra.mxu2 %v11937_v0  ;;  %2505 = vmatpush.msra.mxu3 %v8308_v32  ;;  %v8553_v20 = vand.u32 4294901760, %v207_v3  ;;  %v8673_v0 = vand.u32 4294901760, %v198_v59 }
 0x14b   :  { %2350 = vmatpush.msra.mxu0 %v8390_v36  ;;  %2387 = vmatpush.msra.mxu1 %v8308_v32  ;;  %v8549_v32 = vsub.f32 %v209_v6, %v8531_v18  ;;  %v197_v6 = vld [vmem:[#allocation5 + $0x310] sm:$0xff] }
 0x14c   :  { %2460 = vmatpush.msra.mxu2 %v2272_v10  ;;  %2507 = vmatpush.msra.mxu3 %v8322_v61  ;;  %v8577_v36 = vsub.f32 %v207_v3, %v8553_v20  ;;  %11940 = vst [vmem:[#allocation18_spill] sm:$0xff] %v8673_v0 }
 0x14d   :  { %2353 = vmatpush.msra.mxu0 %v8403_v45  ;;  %2389 = vmatpush.msra.mxu1 %v8322_v61  ;;  %v8558_v61 = vand.u32 4294901760, %v206_v40  ;;  %v2579_v45 = vsub.f32 %v8541_v57, %v11701_v9 }
 0x14e   :  { %2464 = vmatpush.msra.mxu2 %v2278_v2  ;;  %2509 = vmatpush.msra.mxu3 %v8335_v7  ;;  %v205_v2 = vld [vmem:[#allocation5 + $0x350] sm:$0xff]  ;;  %v11696_v50 = vand.u32 4294901760, %v8577_v36 }
 0x14f   :  { %2356 = vmatpush.msra.mxu0 %v8417_v29  ;;  %2391 = vmatpush.msra.mxu1 %v8335_v7  ;;  %v11699_v7 = vand.u32 4294901760, %v8549_v32  ;;  %v8574_v10 = vand.u32 4294901760, %v205_v2  ;;  %v8587_v17 = vsub.f32 %v206_v40, %v8558_v61  ;;  %v2580_v49 = vand.u32 4294901760, %v2579_v45 }
 0x150   :  { %2468 = vmatpush.msra.mxu2 %v2284_v4  ;;  %2511 = vmatpush.msra.mxu3 %v8348_v46  ;;  %v11698_v4 = vand.u32 4294901760, %v8562_v16  ;;  %v2597_v43 = vsub.f32 %v8577_v36, %v11696_v50  ;;  %v8677_v40 = vsub.f32 %v200_v23, %v8647_v5 }
 0x151   :  { %2359 = vmatmul.f32.vlgmr.msra.gmra.mxu0 %v8406_v14  ;;  %2393 = vmatpush.msra.mxu1 %v8348_v46  ;;  %v203_v46 = vld [vmem:[#allocation5 + $0x340] sm:$0xff]  ;;  %v2585_v29 = vsub.f32 %v8549_v32, %v11699_v7  ;;  %v8604_v52 = vsub.f32 %v205_v2, %v8574_v10  ;;  %v11695_v27 = vand.u32 4294901760, %v8587_v17  ;;  %v8679_v2 = vpop.f32.mrf.mxu1 }
 0x152   :  { %2528 = vmatpush.msrb.mxu0 %v8524_v15  ;;  %2472 = vmatpush.msra.mxu2 %v2290_v51  ;;  %v8598_v42 = vand.u32 4294901760, %v203_v46  ;;  %v202_v51 = vld [vmem:[#allocation5 + $0x338] sm:$0xff]  ;;  %v199_v14 = vld [vmem:[#allocation5 + $0x320] sm:$0xff]  ;;  %v2598_v12 = vand.u32 4294901760, %v2597_v43  ;;  %v11693_v43 = vand.u32 4294901760, %v8677_v40 }
 0x153   :  { %2513 = vmatpush.msra.mxu3 %v8364_v35  ;;  %2395 = vmatpush.msra.mxu1 %v8364_v35  ;;  %v8591_v35 = vand.u32 4294901760, %v204_v30  ;;  %v8618_v26 = vand.u32 4294901760, %v202_v51  ;;  %v2603_v13 = vsub.f32 %v8587_v17, %v11695_v27  ;;  %v8660_v55 = vand.u32 4294901760, %v199_v14 }
 0x154   :  { %2530 = vmatpush.msrb.mxu0 %v8531_v18  ;;  %2476 = vmatpush.msra.mxu2 %v2296_v39  ;;  %v8608_v39 = vpop.f32.mrf.mxu2  ;;  %v8626_v28 = vsub.f32 %v203_v46, %v8598_v42 }
 0x155   :  { %2515 = vmatpush.msra.mxu3 %v8377_v19  ;;  %2478 = vmatmul.f32.vlgmr.msra.gmra.mxu2 %v8379_v60  ;;  %v8621_v41 = vsub.f32 %v204_v30, %v8591_v35  ;;  %v8651_v48 = vsub.f32 %v202_v51, %v8618_v26  ;;  %11939 = vst [vmem:[#allocation17_spill] sm:$0xff] %v8660_v55  ;;  %v2604_v34 = vand.u32 4294901760, %v2603_v13  ;;  %v11689_v51 = vand.u32 4294901760, %v8663_v53 }
 0x156   :  { %2532 = vmatpush.msrb.mxu0 %v8538_v62  ;;  %2683 = vmatpush.msrb.mxu2 %v8541_v57  ;;  %v11691_v37 = vand.u32 4294901760, %v8626_v28 }
 0x157   :  { %2397 = vmatpush.msra.mxu1 %v8377_v19  ;;  %2517 = vmatpush.msra.mxu3 %v8392_v56  ;;  %v2591_v19 = vsub.f32 %v8562_v16, %v11698_v4  ;;  %v11692_v22 = vand.u32 4294901760, %v8621_v41  ;;  %v11690_v3 = vand.u32 4294901760, %v8651_v48 }
 0x158   :  { %2519 = vmatmul.f32.vlgmr.msra.gmra.mxu3 %v8379_v60  ;;  %2534 = vmatpush.msrb.mxu0 %v8553_v20  ;;  %v2586_v60 = vand.u32 4294901760, %v2585_v29  ;;  %v2621_v46 = vsub.f32 %v8626_v28, %v11691_v37  ;;  %v8689_v29 = vand.u32 4294901760, %v197_v6  ;;  %v225_v37 = vld [vmem:[#allocation5 + $0x3f0] sm:$0xff] }
 0x159   :  { %2686 = vmatpush.msrb.mxu2 %v8549_v32  ;;  %2741 = vmatpush.msrb.mxu3 %v8524_v15  ;;  %v2592_v21 = vand.u32 4294901760, %v2591_v19  ;;  %v2615_v24 = vsub.f32 %v8621_v41, %v11692_v22  ;;  %v8699_v19 = vsub.f32 %v81_v1, %v8666_v63  ;;  %v2627_v23 = vsub.f32 %v8651_v48, %v11690_v3  ;;  %v8749_v27 = vpop.f32.mrf.mxu1 }
 0x15a   :  { %2399 = vmatpush.msra.mxu1 %v8392_v56  ;;  %2364 = vmatmul.f32.gmra.mxu0 %v8456_v38  ;;  %v11694_v56 = vand.u32 4294901760, %v8604_v52  ;;  %11941 = vst [vmem:[#allocation19_spill] sm:$0xff] %v8689_v29  ;;  %v2622_v38 = vand.u32 4294901760, %v2621_v46  ;;  %v8765_v7 = vand.u32 4294901760, %v225_v37 }
 0x15b   :  { %2403 = vmatmul.f32.vlgmr.msra.gmra.mxu1 %v2189_v11  ;;  %2536 = vmatpush.msrb.mxu0 %v8558_v61  ;;  %v8643_v11 = vpop.f32.mrf.mxu0  ;;  %v2628_v46 = vand.u32 4294901760, %v2627_v23  ;;  %11947 = vst [vmem:[#allocation25_spill] sm:$0xff] %v8749_v27 }
 0x15c   :  { %2581 = vmatpush.msrb.mxu1 %v2580_v49  ;;  %2689 = vmatpush.msrb.mxu2 %v8562_v16  ;;  %v2609_v47 = vsub.f32 %v8604_v52, %v11694_v56  ;;  %v8681_v30 = vpop.f32.mrf.mxu2  ;;  %v8693_v49 = vsub.f32 %v199_v14, %v8660_v55  ;;  %v2633_v14 = vsub.f32 %v8663_v53, %v11689_v51 }
 0x15d   :  { %2743 = vmatpush.msrb.mxu3 %v8531_v18  ;;  %2538 = vmatpush.msrb.mxu0 %v8574_v10 }
 0x15e   :  { %2587 = vmatpush.msrb.mxu1 %v2586_v60  ;;  %2692 = vmatpush.msrb.mxu2 %v8577_v36  ;;  %v2610_v45 = vand.u32 4294901760, %v2609_v47  ;;  %v2616_v60 = vand.u32 4294901760, %v2615_v24  ;;  %v8723_v47 = vsub.f32 %v197_v6, %v8689_v29  ;;  %v11700_v24 = vand.u32 4294901760, %v8699_v19 }
 0x15f   :  { %2745 = vmatpush.msrb.mxu3 %v8538_v62  ;;  %2482 = vmatmul.f32.gmra.mxu2 %v8436_v58 }
 0x160   :  { %2540 = vmatpush.msrb.mxu0 %v8591_v35  ;;  %2593 = vmatpush.msrb.mxu1 %v2592_v21  ;;  %v8709_v21 = vsub.f32 %v198_v59, %v8673_v0  ;;  %v11697_v59 = vand.u32 4294901760, %v8693_v49  ;;  %v11703_v56 = vand.u32 4294901760, %v8723_v47 }
 0x161   :  { %2695 = vmatpush.msrb.mxu2 %v8587_v17  ;;  %2747 = vmatpush.msrb.mxu3 %v8553_v20 }
 0x162   :  { %2523 = vmatmul.f32.gmra.mxu3 %v8436_v58  ;;  %2542 = vmatpush.msrb.mxu0 %v8598_v42  ;;  %v196_v58 = vld [vmem:[#allocation5 + $0x308] sm:$0xff]  ;;  %v11702_v51 = vand.u32 4294901760, %v8709_v21  ;;  %v2645_v23 = vsub.f32 %v8693_v49, %v11697_v59 }
 0x163   :  { %2599 = vmatpush.msrb.mxu1 %v2598_v12  ;;  %2698 = vmatpush.msrb.mxu2 %v8604_v52  ;;  %v8713_v13 = vpop.f32.mrf.mxu0  ;;  %v8719_v1 = vand.u32 4294901760, %v196_v58  ;;  %v195_v12 = vld [vmem:[#allocation5 + $0x300] sm:$0xff] }
 0x164   :  { %2749 = vmatpush.msrb.mxu3 %v8558_v61  ;;  %2409 = vmatmul.f32.gmra.mxu1 %v2197_v31  ;;  %v226_v31 = vld [vmem:[#allocation5 + $0x3f8] sm:$0xff]  ;;  %11943 = vst [vmem:[#allocation21_spill] sm:$0xff] %v8713_v13  ;;  %v8737_v6 = vand.u32 4294901760, %v195_v12  ;;  %v8751_v50 = vpop.f32.mrf.mxu2  ;;  %v2651_v59 = vsub.f32 %v8709_v21, %v11702_v51  ;;  %v2657_v51 = vsub.f32 %v8723_v47, %v11703_v56 }
 0x165   :  { %2544 = vmatpush.msrb.mxu0 %v8618_v26  ;;  %2605 = vmatpush.msrb.mxu1 %v2604_v34  ;;  %11944 = vst [vmem:[#allocation22_spill] sm:$0xff] %v8719_v1  ;;  %v93_v34 = vld [vmem:[#allocation2 + $0x90] sm:$0xff]  ;;  %v8733_v3 = vand.u32 4294901760, %v226_v31  ;;  %v8791_v56 = vsub.f32 %v225_v37, %v8765_v7 }
 0x166   :  { %2701 = vmatpush.msrb.mxu2 %v8621_v41  ;;  %2751 = vmatpush.msrb.mxu3 %v8574_v10  ;;  %11946 = vst [vmem:[#allocation24_spill] sm:$0xff] %v8737_v6  ;;  %v8739_v22 = vand.u32 4294901760, %v93_v34 }
 0x167   :  { %2546 = vmatpush.msrb.mxu0 %v8636_v44  ;;  %2611 = vmatpush.msrb.mxu1 %v2610_v45  ;;  %v2639_v45 = vsub.f32 %v8677_v40, %v11693_v43  ;;  %11945 = vst [vmem:[#allocation23_spill] sm:$0xff] %v8733_v3  ;;  %v8746_v43 = vsub.f32 %v196_v58, %v8719_v1 }
 0x168   :  { %2704 = vmatpush.msrb.mxu2 %v8626_v28  ;;  %2753 = vmatpush.msrb.mxu3 %v8591_v35  ;;  %11948 = vst [vmem:[#allocation26_spill] sm:$0xff] %v8751_v50  ;;  %v8763_v4 = vsub.f32 %v226_v31, %v8733_v3  ;;  %v8773_v9 = vsub.f32 %v93_v34, %v8739_v22  ;;  %v2646_v31 = vand.u32 4294901760, %v2645_v23  ;;  %v222_v34 = vld [vmem:[#allocation5 + $0x3d8] sm:$0xff] }
 0x169   :  { %2548 = vmatpush.msrb.mxu0 %v8647_v5  ;;  %2617 = vmatpush.msrb.mxu1 %v2616_v60  ;;  %v2634_v60 = vand.u32 4294901760, %v2633_v14  ;;  %v224_v14 = vld [vmem:[#allocation5 + $0x3e8] sm:$0xff]  ;;  %v2640_v58 = vand.u32 4294901760, %v2639_v45  ;;  %v8775_v45 = vpop.f32.mrf.mxu3 }
 0x16a   :  { %2707 = vmatpush.msrb.mxu2 %v8651_v48  ;;  %2755 = vmatpush.msrb.mxu3 %v8598_v42  ;;  %11949 = vst [vmem:[#allocation27_spill] sm:$0xff] %v8763_v4  ;;  %v8782_v27 = vand.u32 4294901760, %v224_v14 }
 0x16b   :  { %2550 = vmatpush.msrb.mxu0 %v8660_v55  ;;  %2623 = vmatpush.msrb.mxu1 %v2622_v38  ;;  %v2562_v38 = vsub.f32 %v8699_v19, %v11700_v24  ;;  %v8770_v24 = vsub.f32 %v195_v12, %v8737_v6  ;;  %11950 = vst [vmem:[#allocation28_spill] sm:$0xff] %v8775_v45  ;;  %v8786_v13 = vpop.f32.mrf.mxu0  ;;  %v220_v45 = vld [vmem:[#allocation5 + $0x3c8] sm:$0xff] }
 0x16c   :  { %2710 = vmatpush.msrb.mxu2 %v8663_v53  ;;  %2757 = vmatpush.msrb.mxu3 %v8618_v26  ;;  %11951 = vst [vmem:[#allocation29_spill] sm:$0xff] %v8786_v13  ;;  %v8804_v37 = vsub.f32 %v224_v14, %v8782_v27  ;;  %v8806_v13 = vand.u32 4294901760, %v222_v34 }
 0x16d   :  { %2552 = vmatpush.msrb.mxu0 %v8673_v0  ;;  %2629 = vmatpush.msrb.mxu1 %v2628_v46  ;;  %v223_v46 = vld [vmem:[#allocation5 + $0x3e0] sm:$0xff]  ;;  %v2563_v12 = vand.u32 4294901760, %v2562_v38  ;;  %v11957_v38 = vand.u32 4294901760, %v8541_v57  ;;  %v218_v57 = vld [vmem:[#allocation5 + $0x3b8] sm:$0xff] }
 0x16e   :  { %2713 = vmatpush.msrb.mxu2 %v8677_v40  ;;  %2759 = vmatpush.msrb.mxu3 %v8636_v44  ;;  %v8793_v50 = vand.u32 4294901760, %v223_v46 }
 0x16f   :  { %2554 = vmatpush.msrb.mxu0 %v8689_v29  ;;  %2635 = vmatpush.msrb.mxu1 %v2634_v60  ;;  %v2652_v60 = vand.u32 4294901760, %v2651_v59  ;;  %v11953_v59 = vand.u32 4294901760, %v8746_v43 }
 0x170   :  { %2716 = vmatpush.msrb.mxu2 %v8693_v49  ;;  %2761 = vmatpush.msrb.mxu3 %v8647_v5  ;;  %11952 = vst [vmem:[#allocation30_spill] sm:$0xff] %v8793_v50  ;;  %v8808_v5 = vpop.f32.mrf.mxu1 }
 0x171   :  { %2556 = vmatpush.msrb.mxu0 %v8719_v1  ;;  %2641 = vmatpush.msrb.mxu1 %v2640_v58  ;;  %v2658_v58 = vand.u32 4294901760, %v2657_v51  ;;  %v2663_v23 = vsub.f32 %v8746_v43, %v11953_v59  ;;  %11954 = vst [vmem:[#allocation31_spill] sm:$0xff] %v8808_v5  ;;  %v11956_v51 = vand.u32 4294901760, %v8763_v4  ;;  %v8819_v59 = vsub.f32 %v223_v46, %v8793_v50  ;;  %v8832_v14 = vpop.f32.mrf.mxu3 }
 0x172   :  { %2719 = vmatpush.msrb.mxu2 %v8709_v21  ;;  %2763 = vmatpush.msrb.mxu3 %v8660_v55  ;;  %v8810_v55 = vpop.f32.mrf.mxu2  ;;  %11960 = vst [vmem:[#allocation33_spill] sm:$0xff] %v8832_v14 }
 0x173   :  { %2558 = vmatpush.msrb.mxu0 %v8737_v6  ;;  %2647 = vmatpush.msrb.mxu1 %v2646_v31  ;;  %11955 = vst [vmem:[#allocation32_spill] sm:$0xff] %v8810_v55  ;;  %v2951_v31 = vsub.f32 %v8763_v4, %v11956_v51  ;;  %v11958_v55 = vand.u32 4294901760, %v8770_v24  ;;  %v8830_v51 = vand.u32 4294901760, %v221_v54  ;;  %v2664_v46 = vand.u32 4294901760, %v2663_v23  ;;  %v219_v4 = vld [vmem:[#allocation5 + $0x3c0] sm:$0xff] }
 0x174   :  { %2722 = vmatpush.msrb.mxu2 %v8723_v47  ;;  %2765 = vmatpush.msrb.mxu3 %v8673_v0  ;;  %v11962_v23 = vand.u32 4294901760, %v8791_v56 }
 0x175   :  { %2564 = vmatmul.f32.vlgmr.msrb.gmra.mxu0 %v2563_v12  ;;  %2653 = vmatpush.msrb.mxu1 %v2652_v60  ;;  %v2669_v12 = vsub.f32 %v8770_v24, %v11958_v55  ;;  %v11959_v60 = vand.u32 4294901760, %v8773_v9  ;;  %v11961_v55 = vand.u32 4294901760, %v8549_v32  ;;  %v2952_v14 = vand.u32 4294901760, %v2951_v31  ;;  %v8858_v31 = vpop.f32.mrf.mxu0 }
 0x176   :  { %2788 = vmatpush.msra.mxu0 %v11957_v38  ;;  %2725 = vmatpush.msrb.mxu2 %v8746_v43  ;;  %v8837_v38 = vsub.f32 %v222_v34, %v8806_v13  ;;  %v8854_v0 = vsub.f32 %v221_v54, %v8830_v51  ;;  %11964 = vst [vmem:[#allocation34_spill] sm:$0xff] %v8858_v31  ;;  %v8872_v31 = vand.u32 4294901760, %v218_v57 }
 0x177   :  { %v2570_v5 = vsub.f32 %v8773_v9, %v11959_v60  ;;  %2767 = vmatpush.msrb.mxu3 %v8689_v29  ;;  %2659 = vmatpush.msrb.mxu1 %v2658_v58  ;;  %v8842_v60 = vand.u32 4294901760, %v220_v45  ;;  %v2957_v58 = vsub.f32 %v8791_v56, %v11962_v23  ;;  %v11963_v29 = vand.u32 4294901760, %v8562_v16 }
 0x178   :  { %2792 = vmatpush.msra.mxu0 %v11961_v55  ;;  %2728 = vmatpush.msrb.mxu2 %v8770_v24  ;;  %v2670_v32 = vand.u32 4294901760, %v2669_v12  ;;  %v11965_v23 = vand.u32 4294901760, %v8804_v37  ;;  %v11966_v12 = vand.u32 4294901760, %v8699_v19 }
 0x179   :  { %2769 = vmatpush.msrb.mxu3 %v8719_v1  ;;  %2731 = vmatmul.f32.vlgmr.msrb.gmra.mxu2 %v8699_v19  ;;  %v2571_v55 = vand.u32 4294901760, %v2570_v5  ;;  %v8856_v1 = vand.u32 4294901760, %v219_v4  ;;  %v11967_v5 = vand.u32 4294901760, %v8577_v36  ;;  %v8870_v54 = vsub.f32 %v220_v45, %v8842_v60  ;;  %v8902_v36 = vpop.f32.mrf.mxu3 }
 0x17a   :  { %2796 = vmatpush.msra.mxu0 %v11963_v29  ;;  %2900 = vmatpush.msra.mxu2 %v8733_v3  ;;  %v2963_v34 = vsub.f32 %v8804_v37, %v11965_v23  ;;  %v217_v29 = vld [vmem:[#allocation5 + $0x3b0] sm:$0xff]  ;;  %v11969_v23 = vand.u32 4294901760, %v8819_v59  ;;  %v8878_v3 = vpop.f32.mrf.mxu1  ;;  %v8880_v19 = vpop.f32.mrf.mxu2  ;;  %11973 = vst [vmem:[#allocation37_spill] sm:$0xff] %v8902_v36 }
 0x17b   :  { %2665 = vmatpush.msrb.mxu1 %v2664_v46  ;;  %2771 = vmatpush.msrb.mxu3 %v8737_v6  ;;  %11968 = vst [vmem:[#allocation35_spill] sm:$0xff] %v8870_v54  ;;  %v2958_v46 = vand.u32 4294901760, %v2957_v58  ;;  %v216_v6 = vld [vmem:[#allocation5 + $0x3a8] sm:$0xff]  ;;  %v8884_v45 = vsub.f32 %v219_v4, %v8856_v1 }
 0x17c   :  { %2775 = vmatmul.f32.vlgmr.msrb.gmra.mxu3 %v11966_v12  ;;  %2800 = vmatpush.msra.mxu0 %v11967_v5  ;;  %v2969_v16 = vsub.f32 %v8819_v59, %v11969_v23  ;;  %11970 = vst [vmem:[#allocation36_spill] sm:$0xff] %v8880_v19  ;;  %v8886_v12 = vand.u32 4294901760, %v217_v29  ;;  %v2964_v58 = vand.u32 4294901760, %v2963_v34  ;;  %v11972_v5 = vand.u32 4294901760, %v8837_v38  ;;  %v215_v19 = vld [vmem:[#allocation5 + $0x3a0] sm:$0xff] }
 0x17d   :  { %2902 = vmatpush.msra.mxu2 %v8765_v7  ;;  %2953 = vmatpush.msra.mxu3 %v2952_v14  ;;  %v11971_v14 = vand.u32 4294901760, %v8587_v17  ;;  %v11974_v17 = vand.u32 4294901760, %v8604_v52  ;;  %v8915_v36 = vand.u32 4294901760, %v215_v19  ;;  %v6693_v52 = vld [vmem:[%s11615_s3] ss:$0 sm:$0xff]  ;;  %s6899_s3 = smov 127  }
 0x17e   :  { %2671 = vmatpush.msrb.mxu1 %v2670_v32  ;;  %2572 = vmatmul.f32.gmra.mxu0 %v2571_v55  ;;  %v2975_v23 = vsub.f32 %v8837_v38, %v11972_v5  ;;  %v8898_v32 = vsub.f32 %v218_v57, %v8872_v31  ;;  %v8900_v55 = vand.u32 4294901760, %v216_v6  ;;  %v2970_v34 = vand.u32 4294901760, %v2969_v16  ;;  %v8920_v16 = vpop.f32.mrf.mxu0 }
 0x17f   :  { %2673 = vmatmul.f32.vlgmr.msrb.gmra.mxu1 %v8666_v63  ;;  %2804 = vmatpush.msra.mxu0 %v11971_v14  ;;  %v214_v14 = vld [vmem:[#allocation5 + $0x398] sm:$0xff]  ;;  %v8913_v4 = vsub.f32 %v217_v29, %v8886_v12  ;;  %11976 = vst [vmem:[#allocation38_spill] sm:$0xff] %v8920_v16  ;;  %v11978_v29 = vand.u32 4294901760, %v8870_v54  ;;  %v212_v16 = vld [vmem:[#allocation5 + $0x388] sm:$0xff] }
 0x180   :  { %2859 = vmatpush.msra.mxu1 %v8524_v15  ;;  %2904 = vmatpush.msra.mxu2 %v8782_v27  ;;  %v11975_v15 = vand.u32 4294901760, %v8854_v0  ;;  %v8931_v57 = vsub.f32 %v216_v6, %v8900_v55  ;;  %v11985_v6 = vand.u32 4294901760, %v8651_v48 }
 0x181   :  { %2959 = vmatpush.msra.mxu3 %v2958_v46  ;;  %2808 = vmatpush.msra.mxu0 %v11974_v17  ;;  %v11977_v46 = vand.u32 4294901760, %v8621_v41  ;;  %v2987_v17 = vsub.f32 %v8870_v54, %v11978_v29  ;;  %v11979_v41 = vand.u32 4294901760, %v8773_v9  ;;  %v82_v54 = vld [vmem:[#allocation2 + $0x38] sm:$0xff]  ;;  %v8977_v48 = vpop.f32.mrf.mxu3 }
 0x182   :  { %2861 = vmatpush.msra.mxu1 %v8531_v18  ;;  %2906 = vmatpush.msra.mxu2 %v8793_v50  ;;  %v2981_v5 = vsub.f32 %v8854_v0, %v11975_v15  ;;  %v2976_v18 = vand.u32 4294901760, %v2975_v23  ;;  %v8933_v50 = vand.u32 4294901760, %v214_v14  ;;  %v8945_v15 = vsub.f32 %v215_v19, %v8915_v36 }
 0x183   :  { %2965 = vmatpush.msra.mxu3 %v2964_v58  ;;  %2736 = vmatmul.f32.gmra.mxu2 %v8773_v9  ;;  %v213_v58 = vld [vmem:[#allocation5 + $0x390] sm:$0xff]  ;;  %v11984_v19 = vand.u32 4294901760, %v8898_v32 }
 0x184   :  { %2812 = vmatpush.msra.mxu0 %v11977_v46  ;;  %2863 = vmatpush.msra.mxu1 %v8538_v62  ;;  %v11980_v62 = vand.u32 4294901760, %v8626_v28  ;;  %v2982_v23 = vand.u32 4294901760, %v2981_v5  ;;  %v11981_v46 = vand.u32 4294901760, %v8884_v45  ;;  %v8950_v9 = vand.u32 4294901760, %v213_v58  ;;  %v8952_v28 = vpop.f32.mrf.mxu1  ;;  %v8954_v5 = vpop.f32.mrf.mxu2 }
 0x185   :  { %2908 = vmatpush.msra.mxu2 %v8806_v13  ;;  %2971 = vmatpush.msra.mxu3 %v2970_v34  ;;  %v334_v34 = vadd.f32 %v6693_v52, %v8570_v25  ;;  %11982 = vst [vmem:[#allocation39_spill] sm:$0xff] %v8952_v28  ;;  %v342_v28 = vadd.f32 %v6693_v52, %v8643_v11  ;;  %v11988_v52 = vand.u32 4294901760, %v8931_v57 }
 0x186   :  { %2781 = vmatmul.f32.gmra.mxu3 %v11979_v41  ;;  %2816 = vmatpush.msra.mxu0 %v11980_v62  ;;  %v2993_v29 = vsub.f32 %v8884_v45, %v11981_v46  ;;  %11983 = vst [vmem:[#allocation40_spill] sm:$0xff] %v8954_v5  ;;  %v2988_v41 = vand.u32 4294901760, %v2987_v17  ;;  %v2999_v62 = vsub.f32 %v8898_v32, %v11984_v19  ;;  %v211_v46 = vld [vmem:[#allocation5 + $0x380] sm:$0xff]  ;;  %v8967_v5 = vand.u32 4294901760, %v212_v16 }
 0x187   :  { %2865 = vmatpush.msra.mxu1 %v8553_v20  ;;  %2910 = vmatpush.msra.mxu2 %v8830_v51  ;;  %v8962_v20 = vsub.f32 %v214_v14, %v8933_v50  ;;  %v11986_v19 = vand.u32 4294901760, %v8913_v4  ;;  %v3011_v14 = vsub.f32 %v8931_v57, %v11988_v52  ;;  %v11993_v52 = vand.u32 4294901760, %v8723_v47 }
 0x188   :  { %2977 = vmatpush.msra.mxu3 %v2976_v18  ;;  %2677 = vmatmul.f32.gmra.mxu1 %v8739_v22  ;;  %v8969_v18 = vand.u32 4294901760, %v82_v54  ;;  %v2994_v17 = vand.u32 4294901760, %v2993_v29  ;;  %v8987_v29 = vand.u32 4294901760, %v211_v46  ;;  %v3000_v11 = vand.u32 4294901760, %v2999_v62 }
 0x189   :  { %2820 = vmatpush.msra.mxu0 %v11985_v6  ;;  %2867 = vmatpush.msra.mxu1 %v8558_v61  ;;  %v3005_v25 = vsub.f32 %v8913_v4, %v11986_v19  ;;  %v8979_v6 = vpop.f32.mrf.mxu0  ;;  %v11987_v61 = vand.u32 4294901760, %v8663_v53  ;;  %v443_v19 = vadd.f32 %v8606_v33, %v334_v34  ;;  %v3022_v53 = vand.u32 4294901760, %v8962_v20 }
 0x18a   :  { %2912 = vmatpush.msra.mxu2 %v8842_v60  ;;  %2983 = vmatpush.msra.mxu3 %v2982_v23  ;;  %v8985_v23 = vsub.f32 %v213_v58, %v8950_v9  ;;  %v9002_v33 = vsub.f32 %v82_v54, %v8969_v18  ;;  %v11990_v34 = vand.u32 4294901760, %v8945_v15  ;;  %v447_v62 = vadd.f32 %v8679_v2, %v342_v28 }
 0x18b   :  { %2824 = vmatpush.msra.mxu0 %v11987_v61  ;;  %2869 = vmatpush.msra.mxu1 %v8574_v10  ;;  %v11989_v61 = vand.u32 4294901760, %v8677_v40  ;;  %v8999_v10 = vsub.f32 %v212_v16, %v8967_v5  ;;  %v3006_v58 = vand.u32 4294901760, %v3005_v25  ;;  %v11991_v40 = vand.u32 4294901760, %v8693_v49 }
 0x18c   :  { %2914 = vmatpush.msra.mxu2 %v8856_v1  ;;  %2989 = vmatpush.msra.mxu3 %v2988_v41  ;;  %v3017_v41 = vsub.f32 %v8945_v15, %v11990_v34  ;;  %v9014_v54 = vsub.f32 %v211_v46, %v8987_v29  ;;  %v501_v16 = vadd.f32 %v8608_v39, %v443_v19  ;;  %v9019_v25 = vpop.f32.mrf.mxu2  ;;  %v3012_v2 = vand.u32 4294901760, %v3011_v14 }
 0x18d   :  { %2828 = vmatpush.msra.mxu0 %v11989_v61  ;;  %2871 = vmatpush.msra.mxu1 %v8591_v35  ;;  %v3028_v35 = vand.u32 4294901760, %v8985_v23  ;;  %v3023_v49 = vsub.f32 %v8962_v20, %v3022_v53  ;;  %v11992_v28 = vand.u32 4294901760, %v8709_v21  ;;  %v3034_v39 = vand.u32 4294901760, %v8999_v10 }
 0x18e   :  { %2916 = vmatpush.msra.mxu2 %v8872_v31  ;;  %2995 = vmatpush.msra.mxu3 %v2994_v17  ;;  %v9017_v17 = vpop.f32.mrf.mxu1  ;;  %v2933_v46 = vand.u32 4294901760, %v9002_v33  ;;  %v3018_v19 = vand.u32 4294901760, %v3017_v41  ;;  %v506_v14 = vadd.f32 %v8681_v30, %v447_v62  ;;  %v3040_v21 = vand.u32 4294901760, %v9014_v54 }
 0x18f   :  { %2832 = vmatpush.msra.mxu0 %v11991_v40  ;;  %2873 = vmatpush.msra.mxu1 %v8598_v42  ;;  %v94_v42 = vld [vmem:[#allocation2 + $0x98] sm:$0xff]  ;;  %v3024_v30 = vand.u32 4294901760, %v3023_v49  ;;  %v11994_v47 = vand.u32 4294901760, %v8746_v43  ;;  %v3035_v41 = vsub.f32 %v8999_v10, %v3034_v39 }
 0x190   :  { %2918 = vmatpush.msra.mxu2 %v8886_v12  ;;  %3001 = vmatpush.msra.mxu3 %v3000_v11  ;;  %v9032_v11 = vpop.f32.mrf.mxu3  ;;  %v9041_v61 = vand.u32 4294901760, %v94_v42  ;;  %v2934_v62 = vsub.f32 %v9002_v33, %v2933_v46  ;;  %v11998_v43 = vld [vmem:[#allocation17_spill] sm:$0xff]  ;;  %v3041_v49 = vsub.f32 %v9014_v54, %v3040_v21 }
 0x191   :  { %2836 = vmatpush.msra.mxu0 %v11992_v28  ;;  %2875 = vmatpush.msra.mxu1 %v8618_v26  ;;  %v3029_v26 = vsub.f32 %v8985_v23, %v3028_v35  ;;  %v9045_v34 = vpop.f32.mrf.mxu0 }
 0x192   :  { %2920 = vmatpush.msra.mxu2 %v8900_v55  ;;  %3007 = vmatpush.msra.mxu3 %v3006_v58  ;;  %v545_v58 = vadd.f32 %v8628_v8, %v501_v16  ;;  %v11996_v8 = vld [vmem:[#allocation20_spill] sm:$0xff]  ;;  %v11997_v16 = vand.u32 4294901760, %v8770_v24  ;;  %v9065_v28 = vsub.f32 %v94_v42, %v9041_v61  ;;  %v3036_v24 = vand.u32 4294901760, %v3035_v41  ;;  %v12002_v42 = vld [vmem:[#allocation29_spill] sm:$0xff] }
 0x193   :  { %2840 = vmatpush.msra.mxu0 %v11993_v52  ;;  %2877 = vmatpush.msra.mxu1 %v8636_v44  ;;  %v11995_v44 = vld [vmem:[#allocation16_spill] sm:$0xff]  ;;  %v551_v40 = vadd.f32 %v11996_v8, %v506_v14  ;;  %v11999_v52 = vld [vmem:[#allocation21_spill] sm:$0xff]  ;;  %v2935_v14 = vand.u32 4294901760, %v2934_v62  ;;  %v12001_v8 = vld [vmem:[#allocation27_spill] sm:$0xff] }
 0x194   :  { %2922 = vmatpush.msra.mxu2 %v8915_v36  ;;  %3013 = vmatpush.msra.mxu3 %v3012_v2  ;;  %v3030_v2 = vand.u32 4294901760, %v3029_v26  ;;  %v9073_v26 = vpop.f32.mrf.mxu2 }
 0x195   :  { %2844 = vmatpush.msra.mxu0 %v11994_v47  ;;  %2879 = vmatpush.msra.mxu1 %v11995_v44  ;;  %v620_v47 = vadd.f32 %v11999_v52, %v545_v58  ;;  %v12003_v58 = vld [vmem:[#allocation19_spill] sm:$0xff]  ;;  %v12004_v52 = vld [vmem:[#allocation25_spill] sm:$0xff] }
 0x196   :  { %2924 = vmatpush.msra.mxu2 %v8933_v50  ;;  %3019 = vmatpush.msra.mxu3 %v3018_v19  ;;  %v12000_v19 = vld [vmem:[#allocation18_spill] sm:$0xff]  ;;  %v9071_v44 = vpop.f32.mrf.mxu1 }
 0x197   :  { %2848 = vmatpush.msra.mxu0 %v11997_v16  ;;  %2881 = vmatpush.msra.mxu1 %v11998_v43  ;;  %v624_v16 = vadd.f32 %v12002_v42, %v551_v40  ;;  %v2941_v43 = vand.u32 4294901760, %v9065_v28  ;;  %v12005_v40 = vand.u32 4294901760, %v12001_v8  ;;  %v12007_v42 = vld [vmem:[#allocation22_spill] sm:$0xff] }
 0x198   :  { %2926 = vmatpush.msra.mxu2 %v8950_v9  ;;  %3025 = vmatpush.msra.mxu3 %v3024_v30  ;;  %v3042_v30 = vand.u32 4294901760, %v3041_v49  ;;  %v9083_v41 = vpop.f32.mrf.mxu3 }
 0x199   :  { %2850 = vmatmul.f32.vlgmr.msra.gmra.mxu0 %v8666_v63  ;;  %2883 = vmatpush.msra.mxu1 %v12000_v19  ;;  %v661_v19 = vadd.f32 %v12004_v52, %v620_v47  ;;  %v9085_v62 = vpop.f32.mrf.mxu0  ;;  %v2942_v47 = vsub.f32 %v9065_v28, %v2941_v43 }
 0x19a   :  { %3055 = vmatpush.msrb.mxu0 %v12001_v8  ;;  %2928 = vmatpush.msra.mxu2 %v8967_v5 }
 0x19b   :  { %3031 = vmatpush.msra.mxu3 %v3030_v2  ;;  %2885 = vmatpush.msra.mxu1 %v12003_v58  ;;  %v12006_v2 = vld [vmem:[#allocation31_spill] sm:$0xff]  ;;  %v12008_v58 = vld [vmem:[#allocation26_spill] sm:$0xff] }
 0x19c   :  { %3058 = vmatpush.msrb.mxu0 %v8791_v56  ;;  %2930 = vmatpush.msra.mxu2 %v8987_v29  ;;  %v665_v49 = vadd.f32 %v12006_v2, %v624_v16  ;;  %v706_v52 = vadd.f32 %v12008_v58, %v661_v19  ;;  %v9103_v16 = vpop.f32.mrf.mxu2  ;;  %v2943_v19 = vand.u32 4294901760, %v2942_v47  ;;  %v12014_v58 = vand.u32 4294901760, %v8804_v37  ;;  %v12017_v47 = vld [vmem:[#allocation33_spill] sm:$0xff] }
 0x19d   :  { %3037 = vmatpush.msra.mxu3 %v3036_v24  ;;  %2936 = vmatmul.f32.vlgmr.msra.gmra.mxu2 %v2935_v14  ;;  %v12009_v24 = vand.u32 4294901760, %v8791_v56  ;;  %v12010_v14 = vld [vmem:[#allocation23_spill] sm:$0xff] }
 0x19e   :  { %3061 = vmatpush.msrb.mxu0 %v8804_v37  ;;  %3160 = vmatpush.msrb.mxu2 %v12005_v40  ;;  %v9101_v8 = vpop.f32.mrf.mxu1  ;;  %v12012_v40 = vld [vmem:[#allocation32_spill] sm:$0xff] }
 0x19f   :  { %2887 = vmatpush.msra.mxu1 %v12007_v42  ;;  %3043 = vmatpush.msra.mxu3 %v3042_v30  ;;  %v12011_v30 = vld [vmem:[#allocation24_spill] sm:$0xff]  ;;  %v714_v2 = vadd.f32 %v12012_v40, %v665_v49 }
 0x1a0   :  { %3045 = vmatmul.f32.vlgmr.msra.gmra.mxu3 %v8969_v18  ;;  %3064 = vmatpush.msrb.mxu0 %v8819_v59  ;;  %v12013_v42 = vld [vmem:[#allocation28_spill] sm:$0xff] }
 0x1a1   :  { %3164 = vmatpush.msrb.mxu2 %v12009_v24  ;;  %3231 = vmatpush.msrb.mxu3 %v12010_v14  ;;  %v815_v56 = vadd.f32 %v12013_v42, %v706_v52  ;;  %v9114_v24 = vpop.f32.mrf.mxu3  ;;  %v819_v52 = vadd.f32 %v12017_v47, %v714_v2  ;;  %v9123_v40 = vpop.f32.mrf.mxu0  ;;  %v12019_v42 = vand.u32 4294901760, %v8837_v38 }
 0x1a2   :  { %2889 = vmatpush.msra.mxu1 %v12011_v30  ;;  %2854 = vmatmul.f32.gmra.mxu0 %v8739_v22  ;;  %v12015_v30 = vld [vmem:[#allocation34_spill] sm:$0xff] }
 0x1a3   :  { %2891 = vmatmul.f32.vlgmr.msra.gmra.mxu1 %v8666_v63  ;;  %3067 = vmatpush.msrb.mxu0 %v8837_v38  ;;  %v873_v49 = vadd.f32 %v12015_v30, %v815_v56  ;;  %v12016_v63 = vand.u32 4294901760, %v8819_v59  ;;  %v12021_v59 = vld [vmem:[#allocation38_spill] sm:$0xff] }
 0x1a4   :  { %3113 = vmatpush.msrb.mxu1 %v12010_v14  ;;  %3168 = vmatpush.msrb.mxu2 %v12014_v58  ;;  %v12018_v14 = vld [vmem:[#allocation35_spill] sm:$0xff]  ;;  %v878_v2 = vadd.f32 %v12021_v59, %v819_v52  ;;  %v12027_v52 = vand.u32 4294901760, %v8884_v45 }
 0x1a5   :  { %3233 = vmatpush.msrb.mxu3 %v8765_v7  ;;  %3070 = vmatpush.msrb.mxu0 %v8854_v0  ;;  %v917_v37 = vadd.f32 %v8878_v3, %v873_v49  ;;  %v12023_v3 = vld [vmem:[#allocation36_spill] sm:$0xff]  ;;  %v12024_v38 = vand.u32 4294901760, %v12018_v14 }
 0x1a6   :  { %3115 = vmatpush.msrb.mxu1 %v8765_v7  ;;  %3172 = vmatpush.msrb.mxu2 %v12016_v63  ;;  %v12020_v7 = vld [vmem:[#allocation30_spill] sm:$0xff]  ;;  %v9139_v58 = vpop.f32.mrf.mxu1 }
 0x1a7   :  { %3235 = vmatpush.msrb.mxu3 %v8782_v27  ;;  %2944 = vmatmul.f32.gmra.mxu2 %v2943_v19  ;;  %v12022_v19 = vand.u32 4294901760, %v8854_v0  ;;  %v992_v56 = vadd.f32 %v12023_v3, %v917_v37  ;;  %v12025_v0 = vld [vmem:[#allocation39_spill] sm:$0xff] }
 0x1a8   :  { %3073 = vmatpush.msrb.mxu0 %v12018_v14  ;;  %3117 = vmatpush.msrb.mxu1 %v8782_v27  ;;  %v9141_v27 = vpop.f32.mrf.mxu2  ;;  %v923_v30 = vadd.f32 %v12025_v0, %v878_v2  ;;  %v12028_v14 = vand.u32 4294901760, %v8898_v32  ;;  %v240_v2 = vld [vmem:[#allocation5 + $0x468] sm:$0xff] }
 0x1a9   :  { %3176 = vmatpush.msrb.mxu2 %v12019_v42  ;;  %3237 = vmatpush.msrb.mxu3 %v12020_v7  ;;  %v9151_v49 = vpop.f32.mrf.mxu3  ;;  %v9153_v63 = vpop.f32.mrf.mxu0 }
 0x1aa   :  { %3049 = vmatmul.f32.gmra.mxu3 %v9041_v61  ;;  %3076 = vmatpush.msrb.mxu0 %v8884_v45  ;;  %v241_v45 = vld [vmem:[#allocation5 + $0x470] sm:$0xff] }
 0x1ab   :  { %3119 = vmatpush.msrb.mxu1 %v12020_v7  ;;  %3180 = vmatpush.msrb.mxu2 %v12022_v19 }
 0x1ac   :  { %3239 = vmatpush.msrb.mxu3 %v8806_v13  ;;  %2895 = vmatmul.f32.gmra.mxu1 %v8739_v22  ;;  %v12026_v22 = vld [vmem:[#allocation37_spill] sm:$0xff] }
 0x1ad   :  { %3079 = vmatpush.msrb.mxu0 %v8898_v32  ;;  %3121 = vmatpush.msrb.mxu1 %v8806_v13  ;;  %v1033_v47 = vadd.f32 %v12026_v22, %v992_v56  ;;  %v242_v13 = vld [vmem:[#allocation5 + $0x478] sm:$0xff]  ;;  %v236_v22 = vld [vmem:[#allocation5 + $0x448] sm:$0xff] }
 0x1ae   :  { %3184 = vmatpush.msrb.mxu2 %v12024_v38  ;;  %3241 = vmatpush.msrb.mxu3 %v8830_v51  ;;  %v9171_v59 = vpop.f32.mrf.mxu1  ;;  %v9178_v32 = vand.u32 4294901760, %v242_v13  ;;  %v239_v38 = vld [vmem:[#allocation5 + $0x460] sm:$0xff] }
 0x1af   :  { %3082 = vmatpush.msrb.mxu0 %v8913_v4  ;;  %3123 = vmatpush.msrb.mxu1 %v8830_v51  ;;  %v1078_v37 = vadd.f32 %v8979_v6, %v1033_v47  ;;  %v12029_v51 = vld [vmem:[#allocation40_spill] sm:$0xff]  ;;  %v12030_v6 = vand.u32 4294901760, %v8913_v4 }
 0x1b0   :  { %3188 = vmatpush.msrb.mxu2 %v12027_v52  ;;  %3243 = vmatpush.msrb.mxu3 %v8842_v60  ;;  %v996_v42 = vadd.f32 %v12029_v51, %v923_v30  ;;  %v9199_v56 = vsub.f32 %v242_v13, %v9178_v32  ;;  %v235_v52 = vld [vmem:[#allocation5 + $0x440] sm:$0xff] }
 0x1b1   :  { %3085 = vmatpush.msrb.mxu0 %v8931_v57  ;;  %3125 = vmatpush.msrb.mxu1 %v8842_v60  ;;  %v1187_v7 = vadd.f32 %v9017_v17, %v1078_v37  ;;  %v9173_v60 = vpop.f32.mrf.mxu2  ;;  %v9185_v17 = vand.u32 4294901760, %v241_v45  ;;  %v9188_v4 = vpop.f32.mrf.mxu3 }
 0x1b2   :  { %3192 = vmatpush.msrb.mxu2 %v12028_v14  ;;  %3245 = vmatpush.msrb.mxu3 %v8856_v1  ;;  %v1037_v19 = vadd.f32 %v8977_v48, %v996_v42  ;;  %v9202_v0 = vpop.f32.mrf.mxu0  ;;  %v234_v14 = vld [vmem:[#allocation5 + $0x438] sm:$0xff] }
 0x1b3   :  { %3088 = vmatpush.msrb.mxu0 %v8945_v15  ;;  %3127 = vmatpush.msrb.mxu1 %v8856_v1  ;;  %v12031_v1 = vand.u32 4294901760, %v8931_v57  ;;  %v1245_v3 = vadd.f32 %v9019_v25, %v1187_v7  ;;  %v9196_v57 = vand.u32 4294901760, %v240_v2 }
 0x1b4   :  { %3196 = vmatpush.msrb.mxu2 %v12030_v6  ;;  %3247 = vmatpush.msrb.mxu3 %v8872_v31  ;;  %v1086_v48 = vadd.f32 %v9045_v34, %v1037_v19  ;;  %v9215_v34 = vand.u32 4294901760, %v239_v38 }
 0x1b5   :  { %3091 = vmatpush.msrb.mxu0 %v8962_v20  ;;  %3129 = vmatpush.msrb.mxu1 %v8872_v31  ;;  %v12032_v31 = vand.u32 4294901760, %v8945_v15  ;;  %v9210_v15 = vsub.f32 %v241_v45, %v9185_v17  ;;  %v1289_v30 = vadd.f32 %v9032_v11, %v1245_v3  ;;  %v11728_v20 = vand.u32 4294901760, %v9199_v56 }
 0x1b6   :  { %3200 = vmatpush.msrb.mxu2 %v12031_v1  ;;  %3249 = vmatpush.msrb.mxu3 %v8886_v12  ;;  %v1191_v25 = vadd.f32 %v9071_v44, %v1086_v48  ;;  %v237_v44 = vld [vmem:[#allocation5 + $0x450] sm:$0xff]  ;;  %v9230_v11 = vpop.f32.mrf.mxu1  ;;  %v9288_v1 = vand.u32 4294901760, %v234_v14  ;;  %v232_v48 = vld [vmem:[#allocation5 + $0x428] sm:$0xff] }
 0x1b7   :  { %3094 = vmatpush.msrb.mxu0 %v8985_v23  ;;  %3131 = vmatpush.msrb.mxu1 %v8886_v12  ;;  %v238_v12 = vld [vmem:[#allocation5 + $0x458] sm:$0xff] }
 0x1b8   :  { %3204 = vmatpush.msrb.mxu2 %v12032_v31  ;;  %3251 = vmatpush.msrb.mxu3 %v8900_v55  ;;  %v1250_v47 = vadd.f32 %v9073_v26, %v1191_v25  ;;  %12035 = vst [vmem:[#allocation17_spill] sm:$0xff] %v9288_v1 }
 0x1b9   :  { %3097 = vmatpush.msrb.mxu0 %v8999_v10  ;;  %3133 = vmatpush.msrb.mxu1 %v8900_v55  ;;  %v9221_v55 = vand.u32 4294901760, %v238_v12  ;;  %v9232_v23 = vpop.f32.mrf.mxu2  ;;  %v3323_v10 = vsub.f32 %v9199_v56, %v11728_v20  ;;  %v9257_v26 = vpop.f32.mrf.mxu3 }
 0x1ba   :  { %3208 = vmatpush.msrb.mxu2 %v3022_v53  ;;  %3253 = vmatpush.msrb.mxu3 %v8915_v36  ;;  %v9225_v53 = vsub.f32 %v240_v2, %v9196_v57  ;;  %v9259_v37 = vpop.f32.mrf.mxu0  ;;  %v1295_v51 = vadd.f32 %v9083_v41, %v1250_v47  ;;  %v233_v2 = vld [vmem:[#allocation5 + $0x430] sm:$0xff]  ;;  %v83_v47 = vld [vmem:[#allocation2 + $0x40] sm:$0xff] }
 0x1bb   :  { %3100 = vmatpush.msrb.mxu0 %v9014_v54  ;;  %3135 = vmatpush.msrb.mxu1 %v8915_v36  ;;  %v1364_v36 = vadd.f32 %v9085_v62, %v1289_v30  ;;  %v9244_v62 = vsub.f32 %v239_v38, %v9215_v34  ;;  %v3324_v6 = vand.u32 4294901760, %v3323_v10  ;;  %v230_v10 = vld [vmem:[#allocation5 + $0x418] sm:$0xff] }
 0x1bc   :  { %3212 = vmatpush.msrb.mxu2 %v3028_v35  ;;  %3255 = vmatpush.msrb.mxu3 %v8933_v50  ;;  %v11726_v35 = vand.u32 4294901760, %v9210_v15 }
 0x1bd   :  { %3103 = vmatmul.f32.vlgmr.msrb.gmra.mxu0 %v9002_v33  ;;  %3137 = vmatpush.msrb.mxu1 %v8933_v50  ;;  %v9241_v50 = vand.u32 4294901760, %v237_v44  ;;  %v1405_v13 = vadd.f32 %v9101_v8, %v1364_v36  ;;  %v9263_v8 = vand.u32 4294901760, %v236_v22  ;;  %v11723_v42 = vand.u32 4294901760, %v9244_v62 }
 0x1be   :  { %3272 = vmatpush.msra.mxu0 %v9178_v32  ;;  %3216 = vmatpush.msrb.mxu2 %v3034_v39  ;;  %v11725_v39 = vand.u32 4294901760, %v9225_v53  ;;  %v3329_v54 = vsub.f32 %v9210_v15, %v11726_v35  ;;  %v9294_v19 = vpop.f32.mrf.mxu1 }
 0x1bf   :  { %3257 = vmatpush.msrb.mxu3 %v8950_v9  ;;  %3139 = vmatpush.msrb.mxu1 %v8950_v9  ;;  %v9255_v9 = vsub.f32 %v238_v12, %v9221_v55  ;;  %12033 = vst [vmem:[#allocation16_spill] sm:$0xff] %v9263_v8  ;;  %v9277_v45 = vsub.f32 %v237_v44, %v9241_v50  ;;  %v9309_v12 = vand.u32 4294901760, %v233_v2 }
 0x1c0   :  { %3274 = vmatpush.msra.mxu0 %v9185_v17  ;;  %3220 = vmatpush.msrb.mxu2 %v3040_v21  ;;  %v9270_v21 = vand.u32 4294901760, %v235_v52  ;;  %v1450_v7 = vadd.f32 %v9103_v16, %v1405_v13  ;;  %v3335_v41 = vsub.f32 %v9225_v53, %v11725_v39  ;;  %v9291_v16 = vsub.f32 %v236_v22, %v9263_v8 }
 0x1c1   :  { %3259 = vmatpush.msrb.mxu3 %v8967_v5  ;;  %3222 = vmatmul.f32.vlgmr.msrb.gmra.mxu2 %v8969_v18  ;;  %v9296_v3 = vpop.f32.mrf.mxu2  ;;  %v3330_v31 = vand.u32 4294901760, %v3329_v54  ;;  %12036 = vst [vmem:[#allocation21_spill] sm:$0xff] %v9309_v12  ;;  %v9318_v36 = vpop.f32.mrf.mxu3  ;;  %v9322_v22 = vand.u32 4294901760, %v232_v48 }
 0x1c2   :  { %3276 = vmatpush.msra.mxu0 %v9196_v57  ;;  %3427 = vmatpush.msra.mxu2 %v9199_v56  ;;  %12034 = vst [vmem:[#allocation20_spill] sm:$0xff] %v9270_v21  ;;  %v9301_v38 = vsub.f32 %v235_v52, %v9270_v21  ;;  %v1559_v25 = vadd.f32 %v9114_v24, %v1450_v7  ;;  %v3336_v44 = vand.u32 4294901760, %v3335_v41  ;;  %v11718_v24 = vand.u32 4294901760, %v9291_v16  ;;  %v9331_v54 = vpop.f32.mrf.mxu0 }
 0x1c3   :  { %3141 = vmatpush.msrb.mxu1 %v8967_v5  ;;  %3261 = vmatpush.msrb.mxu3 %v8987_v29  ;;  %v11720_v5 = vand.u32 4294901760, %v9255_v9 }
 0x1c4   :  { %3263 = vmatmul.f32.vlgmr.msrb.gmra.mxu3 %v8969_v18  ;;  %3278 = vmatpush.msra.mxu0 %v9215_v34  ;;  %v1368_v18 = vadd.f32 %v9123_v40, %v1295_v51  ;;  %v3341_v40 = vsub.f32 %v9244_v62, %v11723_v42  ;;  %v1617_v52 = vadd.f32 %v9153_v63, %v1559_v25  ;;  %v11722_v13 = vand.u32 4294901760, %v9301_v38 }
 0x1c5   :  { %3430 = vmatpush.msra.mxu2 %v9210_v15  ;;  %3485 = vmatpush.msra.mxu3 %v9178_v32  ;;  %v3347_v33 = vsub.f32 %v9255_v9, %v11720_v5  ;;  %v9341_v63 = vsub.f32 %v233_v2, %v9309_v12  ;;  %v9346_v25 = vand.u32 4294901760, %v83_v47  ;;  %v3359_v2 = vsub.f32 %v9291_v16, %v11718_v24 }
 0x1c6   :  { %3143 = vmatpush.msrb.mxu1 %v8987_v29  ;;  %3108 = vmatmul.f32.gmra.mxu0 %v9065_v28  ;;  %v11719_v29 = vand.u32 4294901760, %v9277_v45  ;;  %v1409_v30 = vadd.f32 %v9139_v58, %v1368_v18  ;;  %v9326_v58 = vsub.f32 %v234_v14, %v9288_v1  ;;  %v3342_v51 = vand.u32 4294901760, %v3341_v40 }
 0x1c7   :  { %3147 = vmatmul.f32.vlgmr.msrb.gmra.mxu1 %v2933_v46  ;;  %3280 = vmatpush.msra.mxu0 %v9221_v55  ;;  %v231_v46 = vld [vmem:[#allocation5 + $0x420] sm:$0xff]  ;;  %v1661_v41 = vadd.f32 %v9171_v59, %v1617_v52  ;;  %v3348_v18 = vand.u32 4294901760, %v3347_v33  ;;  %v9353_v40 = vand.u32 4294901760, %v230_v10  ;;  %v9357_v59 = vsub.f32 %v232_v48, %v9322_v22 }
 0x1c8   :  { %3325 = vmatpush.msra.mxu1 %v3324_v6  ;;  %3433 = vmatpush.msra.mxu2 %v9225_v53  ;;  %v3353_v14 = vsub.f32 %v9277_v45, %v11719_v29  ;;  %v9338_v7 = vand.u32 4294901760, %v231_v46  ;;  %v1458_v6 = vadd.f32 %v9141_v27, %v1409_v30  ;;  %v11721_v27 = vand.u32 4294901760, %v9326_v58  ;;  %v9373_v29 = vpop.f32.mrf.mxu1 }
 0x1c9   :  { %3487 = vmatpush.msra.mxu3 %v9185_v17  ;;  %3282 = vmatpush.msra.mxu0 %v9241_v50  ;;  %12038 = vst [vmem:[#allocation27_spill] sm:$0xff] %v9353_v40  ;;  %v3365_v30 = vsub.f32 %v9301_v38, %v11722_v13  ;;  %v11724_v52 = vand.u32 4294901760, %v9341_v63  ;;  %v9375_v5 = vpop.f32.mrf.mxu2 }
 0x1ca   :  { %3331 = vmatpush.msra.mxu1 %v3330_v31  ;;  %3436 = vmatpush.msra.mxu2 %v9244_v62  ;;  %12037 = vst [vmem:[#allocation18_spill] sm:$0xff] %v9338_v7  ;;  %v229_v31 = vld [vmem:[#allocation5 + $0x410] sm:$0xff]  ;;  %v9369_v24 = vsub.f32 %v231_v46, %v9338_v7  ;;  %v1563_v48 = vadd.f32 %v9151_v49, %v1458_v6  ;;  %v3360_v46 = vand.u32 4294901760, %v3359_v2 }
 0x1cb   :  { %3489 = vmatpush.msra.mxu3 %v9196_v57  ;;  %3226 = vmatmul.f32.gmra.mxu2 %v9041_v61  ;;  %12039 = vst [vmem:[#allocation29_spill] sm:$0xff] %v9357_v59  ;;  %v9365_v33 = vand.u32 4294901760, %v229_v31  ;;  %v3371_v49 = vsub.f32 %v9326_v58, %v11721_v27  ;;  %v9389_v6 = vsub.f32 %v230_v10, %v9353_v40 }
 0x1cc   :  { %3284 = vmatpush.msra.mxu0 %v9263_v8  ;;  %3337 = vmatpush.msra.mxu1 %v3336_v44  ;;  %v3354_v44 = vand.u32 4294901760, %v3353_v14  ;;  %v9381_v14 = vsub.f32 %v83_v47, %v9346_v25  ;;  %v1622_v28 = vadd.f32 %v9202_v0, %v1563_v48  ;;  %v258_v47 = vld [vmem:[#allocation5 + $0x4f8] sm:$0xff]  ;;  %v3377_v10 = vsub.f32 %v9341_v63, %v11724_v52  ;;  %v227_v0 = vld [vmem:[#allocation5 + $0x400] sm:$0xff] }
 0x1cd   :  { %3439 = vmatpush.msra.mxu2 %v9255_v9  ;;  %3491 = vmatpush.msra.mxu3 %v9215_v34  ;;  %v11729_v48 = vand.u32 4294901760, %v9369_v24  ;;  %v9406_v27 = vsub.f32 %v229_v31, %v9365_v33  ;;  %v3372_v52 = vand.u32 4294901760, %v3371_v49  ;;  %v9418_v35 = vand.u32 4294901760, %v258_v47 }
 0x1ce   :  { %3267 = vmatmul.f32.gmra.mxu3 %v9041_v61  ;;  %3286 = vmatpush.msra.mxu0 %v9270_v21  ;;  %v1736_v61 = vadd.f32 %v9173_v60, %v1661_v41  ;;  %v11727_v60 = vand.u32 4294901760, %v9357_v59  ;;  %v9394_v41 = vpop.f32.mrf.mxu3  ;;  %v1667_v42 = vadd.f32 %v9230_v11, %v1622_v28  ;;  %v9423_v11 = vand.u32 4294901760, %v227_v0 }
 0x1cf   :  { %3343 = vmatpush.msra.mxu1 %v3342_v51  ;;  %3442 = vmatpush.msra.mxu2 %v9277_v45  ;;  %v228_v51 = vld [vmem:[#allocation5 + $0x408] sm:$0xff]  ;;  %v3389_v49 = vsub.f32 %v9369_v24, %v11729_v48 }
 0x1d0   :  { %3493 = vmatpush.msra.mxu3 %v9221_v55  ;;  %3153 = vmatmul.f32.gmra.mxu1 %v2941_v43  ;;  %v3366_v43 = vand.u32 4294901760, %v3365_v30  ;;  %v9402_v2 = vand.u32 4294901760, %v228_v51  ;;  %v95_v30 = vld [vmem:[#allocation2 + $0xa0] sm:$0xff]  ;;  %v1777_v13 = vadd.f32 %v9188_v4, %v1736_v61  ;;  %v3383_v31 = vsub.f32 %v9357_v59, %v11727_v60  ;;  %12041 = vst [vmem:[#allocation25_spill] sm:$0xff] %v9423_v11  ;;  %v257_v61 = vld [vmem:[#allocation5 + $0x4f0] sm:$0xff]  ;;  %v9437_v39 = vpop.f32.mrf.mxu1 }
 0x1d1   :  { %3288 = vmatpush.msra.mxu0 %v9288_v1  ;;  %3349 = vmatpush.msra.mxu1 %v3348_v18  ;;  %v9396_v18 = vpop.f32.mrf.mxu0  ;;  %v9425_v28 = vand.u32 4294901760, %v95_v30 }
 0x1d2   :  { %3445 = vmatpush.msra.mxu2 %v9291_v16  ;;  %3495 = vmatpush.msra.mxu3 %v9241_v50  ;;  %12040 = vst [vmem:[#allocation19_spill] sm:$0xff] %v9402_v2  ;;  %v1822_v4 = vadd.f32 %v9259_v37, %v1777_v13  ;;  %v9432_v60 = vsub.f32 %v228_v51, %v9402_v2  ;;  %v256_v51 = vld [vmem:[#allocation5 + $0x4e8] sm:$0xff]  ;;  %v3384_v48 = vand.u32 4294901760, %v3383_v31 }
 0x1d3   :  { %3290 = vmatpush.msra.mxu0 %v9309_v12  ;;  %3355 = vmatpush.msra.mxu1 %v3354_v44  ;;  %v1740_v13 = vadd.f32 %v9232_v23, %v1667_v42  ;;  %v9439_v44 = vpop.f32.mrf.mxu2  ;;  %v12043_v23 = vand.u32 4294901760, %v9389_v6  ;;  %v9461_v37 = vsub.f32 %v95_v30, %v9425_v28 }
 0x1d4   :  { %3448 = vmatpush.msra.mxu2 %v9301_v38  ;;  %3497 = vmatpush.msra.mxu3 %v9263_v8  ;;  %v1931_v20 = vadd.f32 %v9294_v19, %v1822_v4  ;;  %v9451_v19 = vsub.f32 %v258_v47, %v9418_v35  ;;  %v9453_v4 = vand.u32 4294901760, %v257_v61  ;;  %v3390_v47 = vand.u32 4294901760, %v3389_v49 }
 0x1d5   :  { %3292 = vmatpush.msra.mxu0 %v9322_v22  ;;  %3361 = vmatpush.msra.mxu1 %v3360_v46  ;;  %v3378_v46 = vand.u32 4294901760, %v3377_v10  ;;  %v3395_v42 = vsub.f32 %v9389_v6, %v12043_v23  ;;  %v12045_v23 = vand.u32 4294901760, %v9406_v27 }
 0x1d6   :  { %3451 = vmatpush.msra.mxu2 %v9326_v58  ;;  %3499 = vmatpush.msra.mxu3 %v9270_v21  ;;  %12044 = vst [vmem:[#allocation31_spill] sm:$0xff] %v9451_v19  ;;  %v9463_v31 = vpop.f32.mrf.mxu3  ;;  %v1989_v30 = vadd.f32 %v9296_v3, %v1931_v20  ;;  %v9481_v21 = vsub.f32 %v257_v61, %v9453_v4  ;;  %v252_v3 = vld [vmem:[#allocation5 + $0x4c8] sm:$0xff] }
 0x1d7   :  { %3294 = vmatpush.msra.mxu0 %v9338_v7  ;;  %3367 = vmatpush.msra.mxu1 %v3366_v43  ;;  %v12042_v43 = vand.u32 4294901760, %v9381_v14  ;;  %v3396_v49 = vand.u32 4294901760, %v3395_v42 }
 0x1d8   :  { %3454 = vmatpush.msra.mxu2 %v9341_v63  ;;  %3501 = vmatpush.msra.mxu3 %v9288_v1  ;;  %v3401_v1 = vsub.f32 %v9406_v27, %v12045_v23 }
 0x1d9   :  { %v3306_v10 = vsub.f32 %v9381_v14, %v12042_v43  ;;  %3296 = vmatpush.msra.mxu0 %v9353_v40  ;;  %3373 = vmatpush.msra.mxu1 %v3372_v52  ;;  %v9458_v43 = vsub.f32 %v227_v0, %v9423_v11  ;;  %v255_v52 = vld [vmem:[#allocation5 + $0x4e0] sm:$0xff]  ;;  %v1781_v0 = vadd.f32 %v9257_v26, %v1740_v13 }
 0x1da   :  { %3457 = vmatpush.msra.mxu2 %v9357_v59  ;;  %3503 = vmatpush.msra.mxu3 %v9309_v12  ;;  %v9470_v12 = vand.u32 4294901760, %v256_v51  ;;  %v254_v59 = vld [vmem:[#allocation5 + $0x4d8] sm:$0xff]  ;;  %v9483_v26 = vand.u32 4294901760, %v255_v52  ;;  %v2033_v13 = vadd.f32 %v9318_v36, %v1989_v30  ;;  %v12050_v30 = vand.u32 4294901760, %v9461_v37 }
 0x1db   :  { %3298 = vmatpush.msra.mxu0 %v9365_v33  ;;  %3379 = vmatpush.msra.mxu1 %v3378_v46  ;;  %v3307_v8 = vand.u32 4294901760, %v3306_v10  ;;  %v9476_v46 = vpop.f32.mrf.mxu0  ;;  %v1830_v20 = vadd.f32 %v9331_v54, %v1781_v0  ;;  %v12046_v10 = vand.u32 4294901760, %v9432_v60  ;;  %v9497_v54 = vand.u32 4294901760, %v254_v59  ;;  %v253_v0 = vld [vmem:[#allocation5 + $0x4d0] sm:$0xff] }
 0x1dc   :  { %3460 = vmatpush.msra.mxu2 %v9369_v24  ;;  %3505 = vmatpush.msra.mxu3 %v9322_v22  ;;  %v9495_v42 = vsub.f32 %v256_v51, %v9470_v12 }
 0x1dd   :  { %3300 = vmatpush.msra.mxu0 %v9402_v2  ;;  %3385 = vmatpush.msra.mxu1 %v3384_v48  ;;  %v3402_v48 = vand.u32 4294901760, %v3401_v1  ;;  %v3407_v61 = vsub.f32 %v9432_v60, %v12046_v10  ;;  %v1935_v23 = vadd.f32 %v9373_v29, %v1830_v20  ;;  %v12047_v1 = vand.u32 4294901760, %v9451_v19  ;;  %v9512_v29 = vpop.f32.mrf.mxu2 }
 0x1de   :  { %3463 = vmatpush.msra.mxu2 %v9389_v6  ;;  %3507 = vmatpush.msra.mxu3 %v9338_v7  ;;  %v9508_v10 = vsub.f32 %v255_v52, %v9483_v26  ;;  %v9510_v7 = vpop.f32.mrf.mxu1  ;;  %v12048_v20 = vand.u32 4294901760, %v9199_v56  ;;  %v9523_v52 = vand.u32 4294901760, %v253_v0 }
 0x1df   :  { %3302 = vmatpush.msra.mxu0 %v9423_v11  ;;  %3391 = vmatpush.msra.mxu1 %v3390_v47  ;;  %v3695_v47 = vsub.f32 %v9451_v19, %v12047_v1  ;;  %v2108_v1 = vadd.f32 %v9396_v18, %v2033_v13  ;;  %v3408_v51 = vand.u32 4294901760, %v3407_v61  ;;  %v251_v19 = vld [vmem:[#allocation5 + $0x4c0] sm:$0xff]  ;;  %v9538_v13 = vpop.f32.mrf.mxu3  ;;  %v12052_v61 = vand.u32 4294901760, %v9481_v21 }
 0x1e0   :  { %3466 = vmatpush.msra.mxu2 %v9406_v27  ;;  %3509 = vmatpush.msra.mxu3 %v9353_v40  ;;  %v12051_v40 = vand.u32 4294901760, %v9210_v15  ;;  %v9550_v56 = vsub.f32 %v253_v0, %v9523_v52  ;;  %v12057_v15 = vand.u32 4294901760, %v9508_v10 }
 0x1e1   :  { %3308 = vmatmul.f32.vlgmr.msra.gmra.mxu0 %v3307_v8  ;;  %3397 = vmatpush.msra.mxu1 %v3396_v49  ;;  %v12049_v8 = vand.u32 4294901760, %v9458_v43  ;;  %v3314_v49 = vsub.f32 %v9461_v37, %v12050_v30  ;;  %v9535_v30 = vand.u32 4294901760, %v252_v3  ;;  %v2149_v18 = vadd.f32 %v9437_v39, %v2108_v1 }
 0x1e2   :  { %3532 = vmatpush.msrb.mxu0 %v12048_v20  ;;  %3469 = vmatpush.msra.mxu2 %v9432_v60  ;;  %v9529_v20 = vsub.f32 %v254_v59, %v9497_v54  ;;  %v3696_v59 = vand.u32 4294901760, %v3695_v47  ;;  %v12054_v47 = vand.u32 4294901760, %v9495_v42 }
 0x1e3   :  { %v3413_v36 = vsub.f32 %v9458_v43, %v12049_v8  ;;  %3511 = vmatpush.msra.mxu3 %v9365_v33  ;;  %3403 = vmatpush.msra.mxu1 %v3402_v48  ;;  %v1994_v8 = vadd.f32 %v9375_v5, %v1935_v23  ;;  %v2360_v48 = vpop.f32.mrf.mxu0  ;;  %v3701_v5 = vsub.f32 %v9481_v21, %v12052_v61  ;;  %v12053_v23 = vand.u32 4294901760, %v9225_v53  ;;  %v249_v53 = vld [vmem:[#allocation5 + $0x4b0] sm:$0xff] }
 0x1e4   :  { %3536 = vmatpush.msrb.mxu0 %v12051_v40  ;;  %3472 = vmatpush.msra.mxu2 %v9458_v43  ;;  %v250_v40 = vld [vmem:[#allocation5 + $0x4b8] sm:$0xff]  ;;  %v3315_v1 = vand.u32 4294901760, %v3314_v49  ;;  %v3707_v61 = vsub.f32 %v9495_v42, %v12054_v47  ;;  %v9564_v0 = vsub.f32 %v252_v3, %v9535_v30 }
 0x1e5   :  { %3513 = vmatpush.msra.mxu3 %v9402_v2  ;;  %3475 = vmatmul.f32.vlgmr.msra.gmra.mxu2 %v9381_v14  ;;  %v3414_v39 = vand.u32 4294901760, %v3413_v36  ;;  %v9552_v2 = vand.u32 4294901760, %v251_v19  ;;  %v12056_v36 = vand.u32 4294901760, %v9244_v62  ;;  %v9566_v49 = vand.u32 4294901760, %v250_v40  ;;  %v9574_v3 = vpop.f32.mrf.mxu2 }
 0x1e6   :  { %3540 = vmatpush.msrb.mxu0 %v12053_v23  ;;  %3644 = vmatpush.msrb.mxu2 %v9418_v35  ;;  %v12055_v23 = vand.u32 4294901760, %v9381_v14  ;;  %v3702_v47 = vand.u32 4294901760, %v3701_v5  ;;  %v3713_v14 = vsub.f32 %v9508_v10, %v12057_v15  ;;  %v2404_v62 = vpop.f32.mrf.mxu1  ;;  %v12059_v5 = vand.u32 4294901760, %v9529_v20 }
 0x1e7   :  { %3409 = vmatpush.msra.mxu1 %v3408_v51  ;;  %3515 = vmatpush.msra.mxu3 %v9423_v11  ;;  %v2039_v51 = vadd.f32 %v9394_v41, %v1994_v8  ;;  %v2194_v11 = vadd.f32 %v9439_v44, %v2149_v18  ;;  %v9578_v41 = vsub.f32 %v251_v19, %v9552_v2  ;;  %v9580_v44 = vand.u32 4294901760, %v249_v53 }
 0x1e8   :  { %3519 = vmatmul.f32.vlgmr.msra.gmra.mxu3 %v12055_v23  ;;  %3544 = vmatpush.msrb.mxu0 %v12056_v36  ;;  %v248_v23 = vld [vmem:[#allocation5 + $0x4a8] sm:$0xff]  ;;  %v11742_v36 = vand.u32 4294901760, %v9550_v56  ;;  %v12058_v18 = vand.u32 4294901760, %v9255_v9  ;;  %v3719_v15 = vsub.f32 %v9529_v20, %v12059_v5  ;;  %v11741_v19 = vand.u32 4294901760, %v9564_v0  ;;  %v9601_v5 = vpop.f32.mrf.mxu3 }
 0x1e9   :  { %3646 = vmatpush.msrb.mxu2 %v9453_v4  ;;  %3697 = vmatpush.msrb.mxu3 %v3696_v59  ;;  %v2112_v8 = vadd.f32 %v9476_v46, %v2039_v51  ;;  %v3708_v59 = vand.u32 4294901760, %v3707_v61  ;;  %v9595_v46 = vand.u32 4294901760, %v248_v23  ;;  %v2303_v9 = vadd.f32 %v9463_v31, %v2194_v11 }
 0x1ea   :  { %3415 = vmatpush.msra.mxu1 %v3414_v39  ;;  %3316 = vmatmul.f32.gmra.mxu0 %v3315_v1  ;;  %v247_v39 = vld [vmem:[#allocation5 + $0x4a0] sm:$0xff]  ;;  %v9593_v1 = vsub.f32 %v250_v40, %v9566_v49  ;;  %v12060_v51 = vand.u32 4294901760, %v9277_v45  ;;  %v3725_v40 = vsub.f32 %v9550_v56, %v11742_v36  ;;  %v11743_v11 = vand.u32 4294901760, %v9578_v41 }
 0x1eb   :  { %3417 = vmatmul.f32.vlgmr.msra.gmra.mxu1 %v9346_v25  ;;  %3548 = vmatpush.msrb.mxu0 %v12058_v18  ;;  %v2153_v61 = vadd.f32 %v9510_v7, %v2112_v8  ;;  %v3714_v18 = vand.u32 4294901760, %v3713_v14  ;;  %v9610_v7 = vsub.f32 %v249_v53, %v9580_v44  ;;  %v9612_v31 = vand.u32 4294901760, %v247_v39 }
 0x1ec   :  { %3603 = vmatpush.msrb.mxu1 %v9178_v32  ;;  %3648 = vmatpush.msrb.mxu2 %v9470_v12  ;;  %v246_v32 = vld [vmem:[#allocation5 + $0x498] sm:$0xff]  ;;  %v2361_v45 = vadd.f32 %v2360_v48, %v2303_v9  ;;  %v3720_v14 = vand.u32 4294901760, %v3719_v15  ;;  %v3731_v8 = vsub.f32 %v9564_v0, %v11741_v19  ;;  %v11744_v53 = vand.u32 4294901760, %v9593_v1 }
 0x1ed   :  { %3703 = vmatpush.msrb.mxu3 %v3702_v47  ;;  %3552 = vmatpush.msrb.mxu0 %v12060_v51  ;;  %v2365_v47 = vpop.f32.mrf.mxu0  ;;  %v9623_v51 = vsub.f32 %v248_v23, %v9595_v46  ;;  %v9625_v48 = vand.u32 4294901760, %v246_v32  ;;  %v2202_v9 = vadd.f32 %v9512_v29, %v2153_v61  ;;  %v3737_v23 = vsub.f32 %v9578_v41, %v11743_v11  ;;  %v244_v29 = vld [vmem:[#allocation5 + $0x488] sm:$0xff] }
 0x1ee   :  { %3605 = vmatpush.msrb.mxu1 %v9185_v17  ;;  %3650 = vmatpush.msrb.mxu2 %v9483_v26  ;;  %v12061_v17 = vand.u32 4294901760, %v9291_v16  ;;  %v2405_v15 = vadd.f32 %v2404_v62, %v2361_v45  ;;  %v12063_v16 = vand.u32 4294901760, %v9301_v38  ;;  %v11745_v19 = vand.u32 4294901760, %v9610_v7  ;;  %v84_v62 = vld [vmem:[#allocation2 + $0x48] sm:$0xff]  ;;  %v2410_v38 = vpop.f32.mrf.mxu1 }
 0x1ef   :  { %3709 = vmatpush.msrb.mxu3 %v3708_v59  ;;  %3480 = vmatmul.f32.gmra.mxu2 %v9461_v37  ;;  %v245_v59 = vld [vmem:[#allocation5 + $0x490] sm:$0xff]  ;;  %v9638_v36 = vsub.f32 %v247_v39, %v9612_v31  ;;  %v3732_v61 = vand.u32 4294901760, %v3731_v8  ;;  %v3754_v39 = vand.u32 4294901760, %v9623_v51  ;;  %v9650_v45 = vsub.f32 %v246_v32, %v9625_v48 }
 0x1f0   :  { %3556 = vmatpush.msrb.mxu0 %v12061_v17  ;;  %3607 = vmatpush.msrb.mxu1 %v9196_v57  ;;  %v12062_v57 = vand.u32 4294901760, %v9461_v37  ;;  %v3726_v17 = vand.u32 4294901760, %v3725_v40  ;;  %v9642_v37 = vand.u32 4294901760, %v245_v59  ;;  %v3743_v40 = vsub.f32 %v9593_v1, %v11744_v53 }
 0x1f1   :  { %3652 = vmatpush.msrb.mxu2 %v9497_v54  ;;  %3715 = vmatpush.msrb.mxu3 %v3714_v18  ;;  %v2483_v18 = vpop.f32.mrf.mxu2  ;;  %v9658_v8 = vand.u32 4294901760, %v84_v62  ;;  %v2307_v11 = vadd.f32 %v9538_v13, %v2202_v9  ;;  %v3738_v53 = vand.u32 4294901760, %v3737_v23  ;;  %v3749_v32 = vsub.f32 %v9610_v7, %v11745_v19 }
 0x1f2   :  { %3525 = vmatmul.f32.gmra.mxu3 %v12062_v57  ;;  %3560 = vmatpush.msrb.mxu0 %v12063_v16  ;;  %v2480_v57 = vadd.f32 %v9574_v3, %v2405_v15  ;;  %v12064_v16 = vand.u32 4294901760, %v9326_v58  ;;  %v12065_v58 = vand.u32 4294901760, %v9341_v63  ;;  %v3755_v23 = vsub.f32 %v9623_v51, %v3754_v39 }
 0x1f3   :  { %3609 = vmatpush.msrb.mxu1 %v9215_v34  ;;  %3654 = vmatpush.msrb.mxu2 %v9523_v52  ;;  %v243_v34 = vld [vmem:[#allocation5 + $0x480] sm:$0xff]  ;;  %v2366_v9 = vadd.f32 %v2365_v47, %v2307_v11  ;;  %v11746_v63 = vand.u32 4294901760, %v9650_v45  ;;  %v9687_v11 = vsub.f32 %v84_v62, %v9658_v8 }
 0x1f4   :  { %3721 = vmatpush.msrb.mxu3 %v3720_v14  ;;  %3421 = vmatmul.f32.gmra.mxu1 %v9425_v28  ;;  %v9656_v14 = vand.u32 4294901760, %v244_v29  ;;  %v9672_v13 = vand.u32 4294901760, %v243_v34 }
 0x1f5   :  { %3564 = vmatpush.msrb.mxu0 %v12064_v16  ;;  %3611 = vmatpush.msrb.mxu1 %v9221_v55  ;;  %v2524_v55 = vpop.f32.mrf.mxu3  ;;  %v2565_v15 = vpop.f32.mrf.mxu0  ;;  %v9670_v16 = vsub.f32 %v245_v59, %v9642_v37  ;;  %v12068_v59 = vld [vmem:[#allocation16_spill] sm:$0xff]  ;;  %v2411_v47 = vadd.f32 %v2410_v38, %v2366_v9  ;;  %v3767_v38 = vsub.f32 %v9650_v45, %v11746_v63 }
 0x1f6   :  { %3656 = vmatpush.msrb.mxu2 %v9535_v30  ;;  %3727 = vmatpush.msrb.mxu3 %v3726_v17  ;;  %v3744_v17 = vand.u32 4294901760, %v3743_v40  ;;  %v9684_v3 = vsub.f32 %v244_v29, %v9656_v14  ;;  %v12069_v40 = vand.u32 4294901760, %v9638_v36  ;;  %v9698_v62 = vsub.f32 %v243_v34, %v9672_v13 }
 0x1f7   :  { %3568 = vmatpush.msrb.mxu0 %v12065_v58  ;;  %3613 = vmatpush.msrb.mxu1 %v9241_v50  ;;  %v2521_v50 = vadd.f32 %v9601_v5, %v2480_v57  ;;  %v12066_v58 = vld [vmem:[#allocation29_spill] sm:$0xff]  ;;  %v12070_v57 = vand.u32 4294901760, %v9369_v24  ;;  %v3772_v29 = vand.u32 4294901760, %v9670_v16  ;;  %v96_v24 = vld [vmem:[#allocation2 + $0xa8] sm:$0xff]  ;;  %v3677_v34 = vand.u32 4294901760, %v9687_v11 }
 0x1f8   :  { %3658 = vmatpush.msrb.mxu2 %v9552_v2  ;;  %3733 = vmatpush.msrb.mxu3 %v3732_v61  ;;  %v12067_v19 = vand.u32 4294901760, %v12066_v58  ;;  %v3750_v61 = vand.u32 4294901760, %v3749_v32  ;;  %v3761_v5 = vsub.f32 %v9638_v36, %v12069_v40  ;;  %v9717_v63 = vand.u32 4294901760, %v96_v24 }
 0x1f9   :  { %3615 = vmatpush.msrb.mxu1 %v12068_v59  ;;  %v2566_v58 = vadd.f32 %v2565_v15, %v2521_v50  ;;  %v12072_v59 = vand.u32 4294901760, %v9389_v6  ;;  %v12073_v15 = vld [vmem:[#allocation17_spill] sm:$0xff]  ;;  %v3778_v50 = vand.u32 4294901760, %v9684_v3  ;;  %v3773_v6 = vsub.f32 %v9670_v16, %v3772_v29 }
 0x1fa   :  { %3572 = vmatpush.msrb.mxu0 %v12067_v19  ;;  %3660 = vmatpush.msrb.mxu2 %v9566_v49  ;;  %v12071_v19 = vld [vmem:[#allocation20_spill] sm:$0xff] }
 0x1fb   :  { %3739 = vmatpush.msrb.mxu3 %v3738_v53  ;;  %3617 = vmatpush.msrb.mxu1 %v12071_v19  ;;  %v3756_v53 = vand.u32 4294901760, %v3755_v23  ;;  %v12074_v23 = vand.u32 4294901760, %v9406_v27  ;;  %v12075_v19 = vld [vmem:[#allocation21_spill] sm:$0xff]  ;;  %v3779_v27 = vsub.f32 %v9684_v3, %v3778_v50 }
 0x1fc   :  { %3576 = vmatpush.msrb.mxu0 %v12070_v57  ;;  %3662 = vmatpush.msrb.mxu2 %v9580_v44  ;;  %v2674_v32 = vpop.f32.mrf.mxu1  ;;  %v2732_v9 = vpop.f32.mrf.mxu2  ;;  %v2484_v57 = vadd.f32 %v2483_v18, %v2411_v47  ;;  %v3768_v18 = vand.u32 4294901760, %v3767_v38  ;;  %v12076_v47 = vand.u32 4294901760, %v9432_v60  ;;  %v12078_v60 = vand.u32 4294901760, %v9458_v43 }
 0x1fd   :  { %3745 = vmatpush.msrb.mxu3 %v3744_v17  ;;  %3619 = vmatpush.msrb.mxu1 %v12073_v15  ;;  %v2675_v40 = vadd.f32 %v2674_v32, %v2566_v58  ;;  %v3762_v17 = vand.u32 4294901760, %v3761_v5  ;;  %v2573_v5 = vpop.f32.mrf.mxu0  ;;  %v3780_v43 = vand.u32 4294901760, %v3779_v27 }
 0x1fe   :  { %3580 = vmatpush.msrb.mxu0 %v12072_v59  ;;  %3664 = vmatpush.msrb.mxu2 %v9595_v46  ;;  %v3784_v59 = vand.u32 4294901760, %v9698_v62 }
 0x1ff   :  { %3751 = vmatpush.msrb.mxu3 %v3750_v61  ;;  %3621 = vmatpush.msrb.mxu1 %v12075_v19  ;;  %v2733_v15 = vadd.f32 %v2732_v9, %v2675_v40  ;;  %v2776_v58 = vpop.f32.mrf.mxu3  ;;  %v3678_v61 = vsub.f32 %v9687_v11, %v3677_v34  ;;  %v2525_v9 = vadd.f32 %v2524_v55, %v2484_v57  ;;  %v12080_v57 = vld [vmem:[#allocation27_spill] sm:$0xff] }
 0x200   :  { %3584 = vmatpush.msrb.mxu0 %v12074_v23  ;;  %3666 = vmatpush.msrb.mxu2 %v9612_v31  ;;  %v3785_v38 = vsub.f32 %v9698_v62, %v3784_v59  ;;  %v9739_v40 = vsub.f32 %v96_v24, %v9717_v63  ;;  %v12081_v19 = vld [vmem:[#allocation31_spill] sm:$0xff] }
 0x201   :  { %3757 = vmatpush.msrb.mxu3 %v3756_v53  ;;  %3623 = vmatpush.msrb.mxu1 %v9322_v22  ;;  %v9729_v32 = vadd.f32 %v2776_v58, %v2733_v15  ;;  %v12079_v53 = vld [vmem:[#allocation18_spill] sm:$0xff]  ;;  %v3774_v22 = vand.u32 4294901760, %v3773_v6  ;;  %v2574_v55 = vadd.f32 %v2573_v5, %v2525_v9  ;;  %v12082_v27 = vand.u32 4294901760, %v12081_v19  ;;  %v12084_v5 = vld [vmem:[#allocation19_spill] sm:$0xff] }
 0x202   :  { %3588 = vmatpush.msrb.mxu0 %v12076_v47  ;;  %3668 = vmatpush.msrb.mxu2 %v9625_v48  ;;  %v3786_v24 = vand.u32 4294901760, %v3785_v38  ;;  %v3685_v58 = vand.u32 4294901760, %v9739_v40  ;;  %v12085_v9 = vand.u32 4294901760, %v9481_v21  ;;  %v266_v38 = vld [vmem:[#allocation5 + $0x538] sm:$0xff] }
 0x203   :  { %12077 = vst [vmem:[#allocation22_spill] sm:$0xff] %v9729_v32  ;;  %3763 = vmatpush.msrb.mxu3 %v3762_v17  ;;  %3625 = vmatpush.msrb.mxu1 %v12079_v53  ;;  %v3679_v17 = vand.u32 4294901760, %v3678_v61  ;;  %v280_v32 = vld [vmem:[#allocation5 + $0x5a8] sm:$0xff] }
 0x204   :  { %3592 = vmatpush.msrb.mxu0 %v12078_v60  ;;  %3670 = vmatpush.msrb.mxu2 %v9642_v37  ;;  %v12086_v60 = vld [vmem:[#allocation25_spill] sm:$0xff] }
 0x205   :  { %3769 = vmatpush.msrb.mxu3 %v3768_v18  ;;  %3594 = vmatmul.f32.vlgmr.msrb.gmra.mxu0 %v9346_v25  ;;  %v2678_v23 = vpop.f32.mrf.mxu1 }
 0x206   :  { %3627 = vmatpush.msrb.mxu1 %v12080_v57  ;;  %3799 = vmatpush.msra.mxu0 %v12081_v19  ;;  %v2679_v6 = vadd.f32 %v2678_v23, %v2574_v55  ;;  %v2737_v15 = vpop.f32.mrf.mxu2  ;;  %v265_v19 = vld [vmem:[#allocation5 + $0x530] sm:$0xff] }
 0x207   :  { %3672 = vmatpush.msrb.mxu2 %v9656_v14  ;;  %3775 = vmatpush.msrb.mxu3 %v3774_v22  ;;  %v12087_v22 = vand.u32 4294901760, %v9495_v42 }
 0x208   :  { %3629 = vmatpush.msrb.mxu1 %v9365_v33  ;;  %3802 = vmatpush.msra.mxu0 %v9481_v21  ;;  %v2738_v18 = vadd.f32 %v2737_v15, %v2679_v6  ;;  %v3686_v33 = vsub.f32 %v9739_v40, %v3685_v58  ;;  %v12088_v21 = vand.u32 4294901760, %v9508_v10 }
 0x209   :  { %3674 = vmatpush.msrb.mxu2 %v9672_v13  ;;  %3781 = vmatpush.msrb.mxu3 %v3780_v43  ;;  %v2782_v47 = vpop.f32.mrf.mxu3 }
 0x20a   :  { %3680 = vmatmul.f32.vlgmr.msrb.gmra.mxu2 %v3679_v17  ;;  %3805 = vmatpush.msra.mxu0 %v9495_v42  ;;  %v9753_v61 = vadd.f32 %v2782_v47, %v2738_v18  ;;  %v3687_v53 = vand.u32 4294901760, %v3686_v33  ;;  %v273_v42 = vld [vmem:[#allocation5 + $0x570] sm:$0xff]  ;;  %v9913_v47 = vand.u32 4294901760, %v265_v19 }
 0x20b   :  { %3904 = vmatpush.msra.mxu2 %v12082_v27  ;;  %3631 = vmatpush.msrb.mxu1 %v12084_v5 }
 0x20c   :  { %12083 = vst [vmem:[#allocation26_spill] sm:$0xff] %v9753_v61  ;;  %3787 = vmatpush.msrb.mxu3 %v3786_v24  ;;  %3808 = vmatpush.msra.mxu0 %v9508_v10  ;;  %v264_v24 = vld [vmem:[#allocation5 + $0x528] sm:$0xff] }
 0x20d   :  { %3789 = vmatmul.f32.vlgmr.msrb.gmra.mxu3 %v9658_v8  ;;  %3908 = vmatpush.msra.mxu2 %v12085_v9 }
 0x20e   :  { %3975 = vmatpush.msra.mxu3 %v9418_v35  ;;  %3633 = vmatpush.msrb.mxu1 %v12086_v60  ;;  %v85_v60 = vld [vmem:[#allocation2 + $0x50] sm:$0xff] }
 0x20f   :  { %3598 = vmatmul.f32.gmra.mxu0 %v9425_v28  ;;  %3635 = vmatmul.f32.vlgmr.msrb.gmra.mxu1 %v9346_v25  ;;  %v12090_v25 = vand.u32 4294901760, %v9550_v56 }
 0x210   :  { %3811 = vmatpush.msra.mxu0 %v9529_v20  ;;  %3857 = vmatpush.msra.mxu1 %v9418_v35  ;;  %v12089_v35 = vand.u32 4294901760, %v9529_v20 }
 0x211   :  { %3912 = vmatpush.msra.mxu2 %v12087_v22  ;;  %3977 = vmatpush.msra.mxu3 %v9453_v4  ;;  %v262_v22 = vld [vmem:[#allocation5 + $0x518] sm:$0xff] }
 0x212   :  { %3814 = vmatpush.msra.mxu0 %v9550_v56  ;;  %3859 = vmatpush.msra.mxu1 %v9453_v4  ;;  %v12092_v4 = vand.u32 4294901760, %v9578_v41  ;;  %v9816_v56 = vand.u32 4294901760, %v273_v42 }
 0x213   :  { %3916 = vmatpush.msra.mxu2 %v12088_v21  ;;  %3979 = vmatpush.msra.mxu3 %v9470_v12 }
 0x214   :  { %3688 = vmatmul.f32.gmra.mxu2 %v3687_v53  ;;  %3817 = vmatpush.msra.mxu0 %v9564_v0 }
 0x215   :  { %3861 = vmatpush.msra.mxu1 %v9470_v12  ;;  %3920 = vmatpush.msra.mxu2 %v12089_v35  ;;  %v12091_v12 = vand.u32 4294901760, %v9564_v0  ;;  %v271_v0 = vld [vmem:[#allocation5 + $0x560] sm:$0xff] }
 0x216   :  { %3981 = vmatpush.msra.mxu3 %v9483_v26  ;;  %3820 = vmatpush.msra.mxu0 %v9578_v41  ;;  %v12096_v41 = vand.u32 4294901760, %v9650_v45 }
 0x217   :  { %3793 = vmatmul.f32.gmra.mxu3 %v9717_v63  ;;  %3863 = vmatpush.msra.mxu1 %v9483_v26  ;;  %v12093_v26 = vand.u32 4294901760, %v9593_v1 }
 0x218   :  { %3924 = vmatpush.msra.mxu2 %v12090_v25  ;;  %3983 = vmatpush.msra.mxu3 %v9497_v54 }
 0x219   :  { %3639 = vmatmul.f32.gmra.mxu1 %v9425_v28  ;;  %3823 = vmatpush.msra.mxu0 %v9593_v1  ;;  %v274_v28 = vld [vmem:[#allocation5 + $0x578] sm:$0xff] }
 0x21a   :  { %3865 = vmatpush.msra.mxu1 %v9497_v54  ;;  %3928 = vmatpush.msra.mxu2 %v12091_v12  ;;  %v12094_v54 = vand.u32 4294901760, %v9610_v7  ;;  %v9809_v10 = vand.u32 4294901760, %v274_v28  ;;  %v9938_v12 = vsub.f32 %v265_v19, %v9913_v47 }
 0x21b   :  { %3985 = vmatpush.msra.mxu3 %v9523_v52  ;;  %3826 = vmatpush.msra.mxu0 %v9610_v7 }
 0x21c   :  { %3867 = vmatpush.msra.mxu1 %v9523_v52  ;;  %3932 = vmatpush.msra.mxu2 %v12092_v4  ;;  %v272_v52 = vld [vmem:[#allocation5 + $0x568] sm:$0xff] }
 0x21d   :  { %3987 = vmatpush.msra.mxu3 %v9535_v30  ;;  %3829 = vmatpush.msra.mxu0 %v9623_v51  ;;  %v9823_v20 = vand.u32 4294901760, %v272_v52  ;;  %v269_v51 = vld [vmem:[#allocation5 + $0x550] sm:$0xff] }
 0x21e   :  { %3869 = vmatpush.msra.mxu1 %v9535_v30  ;;  %3936 = vmatpush.msra.mxu2 %v12093_v26  ;;  %v9826_v30 = vsub.f32 %v274_v28, %v9809_v10  ;;  %v261_v28 = vld [vmem:[#allocation5 + $0x510] sm:$0xff]  ;;  %v9941_v26 = vand.u32 4294901760, %v85_v60 }
 0x21f   :  { %3989 = vmatpush.msra.mxu3 %v9552_v2  ;;  %3832 = vmatpush.msra.mxu0 %v9638_v36  ;;  %v9847_v7 = vsub.f32 %v272_v52, %v9823_v20 }
 0x220   :  { %3871 = vmatpush.msra.mxu1 %v9552_v2  ;;  %3940 = vmatpush.msra.mxu2 %v12094_v54  ;;  %v12095_v2 = vand.u32 4294901760, %v9638_v36  ;;  %v9834_v36 = vsub.f32 %v273_v42, %v9816_v56  ;;  %v9948_v54 = vand.u32 4294901760, %v262_v22 }
 0x221   :  { %3991 = vmatpush.msra.mxu3 %v9566_v49  ;;  %3835 = vmatpush.msra.mxu0 %v9650_v45  ;;  %v9857_v45 = vand.u32 4294901760, %v269_v51 }
 0x222   :  { %3873 = vmatpush.msra.mxu1 %v9566_v49  ;;  %3944 = vmatpush.msra.mxu2 %v3754_v39  ;;  %v270_v49 = vld [vmem:[#allocation5 + $0x558] sm:$0xff]  ;;  %v268_v39 = vld [vmem:[#allocation5 + $0x548] sm:$0xff] }
 0x223   :  { %3993 = vmatpush.msra.mxu3 %v9580_v44  ;;  %3838 = vmatpush.msra.mxu0 %v9670_v16  ;;  %v9843_v1 = vand.u32 4294901760, %v270_v49  ;;  %v9887_v57 = vsub.f32 %v269_v51, %v9857_v45  ;;  %v11749_v51 = vand.u32 4294901760, %v9938_v12 }
 0x224   :  { %3875 = vmatpush.msra.mxu1 %v9580_v44  ;;  %3948 = vmatpush.msra.mxu2 %v12095_v2  ;;  %v9838_v44 = vand.u32 4294901760, %v271_v0 }
 0x225   :  { %3995 = vmatpush.msra.mxu3 %v9595_v46  ;;  %3841 = vmatpush.msra.mxu0 %v9684_v3  ;;  %v4078_v3 = vand.u32 4294901760, %v9847_v7 }
 0x226   :  { %3877 = vmatpush.msra.mxu1 %v9595_v46  ;;  %3952 = vmatpush.msra.mxu2 %v12096_v41  ;;  %v4066_v46 = vand.u32 4294901760, %v9826_v30  ;;  %v9860_v16 = vsub.f32 %v271_v0, %v9838_v44  ;;  %v9960_v41 = vand.u32 4294901760, %v261_v28 }
 0x227   :  { %3997 = vmatpush.msra.mxu3 %v9612_v31  ;;  %3844 = vmatpush.msra.mxu0 %v9698_v62  ;;  %v4079_v17 = vsub.f32 %v9847_v7, %v4078_v3 }
 0x228   :  { %3879 = vmatpush.msra.mxu1 %v9612_v31  ;;  %3956 = vmatpush.msra.mxu2 %v3772_v29  ;;  %v4072_v31 = vand.u32 4294901760, %v9834_v36  ;;  %v267_v29 = vld [vmem:[#allocation5 + $0x540] sm:$0xff]  ;;  %v11757_v55 = vand.u32 4294901760, %v9860_v16 }
 0x229   :  { %3999 = vmatpush.msra.mxu3 %v9625_v48  ;;  %3847 = vmatmul.f32.vlgmr.msra.gmra.mxu0 %v9687_v11  ;;  %v4080_v27 = vand.u32 4294901760, %v4079_v17  ;;  %v263_v11 = vld [vmem:[#allocation5 + $0x520] sm:$0xff]  ;;  %v4121_v17 = vsub.f32 %v9938_v12, %v11749_v51 }
 0x22a   :  { %3881 = vmatpush.msra.mxu1 %v9625_v48  ;;  %4016 = vmatpush.msrb.mxu0 %v9809_v10  ;;  %v4067_v48 = vsub.f32 %v9826_v30, %v4066_v46  ;;  %v4073_v62 = vsub.f32 %v9834_v36, %v4072_v31  ;;  %v4085_v18 = vsub.f32 %v9860_v16, %v11757_v55  ;;  %v9935_v25 = vand.u32 4294901760, %v263_v11  ;;  %v285_v55 = vld [vmem:[#allocation5 + $0x5d0] sm:$0xff] }
 0x22b   :  { %3960 = vmatpush.msra.mxu2 %v3778_v50  ;;  %4001 = vmatpush.msra.mxu3 %v9642_v37  ;;  %v9870_v50 = vsub.f32 %v270_v49, %v9843_v1 }
 0x22c   :  { %3883 = vmatpush.msra.mxu1 %v9642_v37  ;;  %4018 = vmatpush.msrb.mxu0 %v9816_v56  ;;  %v9874_v37 = vand.u32 4294901760, %v268_v39  ;;  %v4068_v43 = vand.u32 4294901760, %v4067_v48  ;;  %v4086_v21 = vand.u32 4294901760, %v4085_v18  ;;  %v9990_v18 = vsub.f32 %v261_v28, %v9960_v41 }
 0x22d   :  { %3964 = vmatpush.msra.mxu2 %v3784_v59  ;;  %4003 = vmatpush.msra.mxu3 %v9656_v14  ;;  %v9881_v59 = vand.u32 4294901760, %v267_v29  ;;  %v11756_v23 = vand.u32 4294901760, %v9870_v50 }
 0x22e   :  { %3966 = vmatmul.f32.vlgmr.msra.gmra.mxu2 %v9658_v8  ;;  %4020 = vmatpush.msrb.mxu0 %v9823_v20  ;;  %v9900_v6 = vsub.f32 %v268_v39, %v9874_v37  ;;  %v9964_v39 = vsub.f32 %v263_v11, %v9935_v25 }
 0x22f   :  { %4171 = vmatpush.msrb.mxu2 %v9826_v30  ;;  %3885 = vmatpush.msra.mxu1 %v9656_v14  ;;  %v9897_v14 = vand.u32 4294901760, %v266_v38  ;;  %v9905_v15 = vsub.f32 %v267_v29, %v9881_v59  ;;  %v4091_v5 = vsub.f32 %v9870_v50, %v11756_v23  ;;  %v9970_v29 = vsub.f32 %v85_v60, %v9941_v26 }
 0x230   :  { %4005 = vmatpush.msra.mxu3 %v9672_v13  ;;  %4022 = vmatpush.msrb.mxu0 %v9838_v44  ;;  %v11753_v33 = vand.u32 4294901760, %v9900_v6 }
 0x231   :  { %4007 = vmatmul.f32.vlgmr.msra.gmra.mxu3 %v9658_v8  ;;  %4174 = vmatpush.msrb.mxu2 %v9834_v36  ;;  %v4074_v8 = vand.u32 4294901760, %v4073_v62  ;;  %v9926_v9 = vsub.f32 %v266_v38, %v9897_v14  ;;  %v11752_v53 = vand.u32 4294901760, %v9905_v15  ;;  %v4092_v4 = vand.u32 4294901760, %v4091_v5 }
 0x232   :  { %4229 = vmatpush.msrb.mxu3 %v9809_v10  ;;  %3887 = vmatpush.msra.mxu1 %v9672_v13  ;;  %v11755_v13 = vand.u32 4294901760, %v9887_v57  ;;  %v4103_v42 = vsub.f32 %v9900_v6, %v11753_v33  ;;  %v11760_v5 = vand.u32 4294901760, %v9970_v29 }
 0x233   :  { %3852 = vmatmul.f32.gmra.mxu0 %v9739_v40  ;;  %3891 = vmatmul.f32.vlgmr.msra.gmra.mxu1 %v3677_v34  ;;  %v9922_v34 = vand.u32 4294901760, %v264_v24  ;;  %v11750_v52 = vand.u32 4294901760, %v9926_v9  ;;  %v4109_v0 = vsub.f32 %v9905_v15, %v11752_v53 }
 0x234   :  { %4024 = vmatpush.msrb.mxu0 %v9843_v1  ;;  %4069 = vmatpush.msrb.mxu1 %v4068_v43  ;;  %v4097_v35 = vsub.f32 %v9887_v57, %v11755_v13  ;;  %v4104_v48 = vand.u32 4294901760, %v4103_v42  ;;  %v9978_v43 = vsub.f32 %v262_v22, %v9948_v54  ;;  %v4122_v42 = vand.u32 4294901760, %v4121_v17 }
 0x235   :  { %4177 = vmatpush.msrb.mxu2 %v9847_v7  ;;  %4231 = vmatpush.msrb.mxu3 %v9816_v56  ;;  %v9952_v2 = vsub.f32 %v264_v24, %v9922_v34  ;;  %v4115_v62 = vsub.f32 %v9926_v9, %v11750_v52  ;;  %v4110_v40 = vand.u32 4294901760, %v4109_v0  ;;  %v11748_v24 = vand.u32 4294901760, %v9964_v39  ;;  %v281_v7 = vld [vmem:[#allocation5 + $0x5b0] sm:$0xff] }
 0x236   :  { %4026 = vmatpush.msrb.mxu0 %v9857_v45  ;;  %4075 = vmatpush.msrb.mxu1 %v4074_v8  ;;  %v4098_v49 = vand.u32 4294901760, %v4097_v35  ;;  %v259_v8 = vld [vmem:[#allocation5 + $0x500] sm:$0xff]  ;;  %v11751_v22 = vand.u32 4294901760, %v9978_v43 }
 0x237   :  { %4180 = vmatpush.msrb.mxu2 %v9860_v16  ;;  %4233 = vmatpush.msrb.mxu3 %v9823_v20  ;;  %v11747_v38 = vand.u32 4294901760, %v9952_v2  ;;  %v4116_v11 = vand.u32 4294901760, %v4115_v62  ;;  %v10004_v35 = vand.u32 4294901760, %v259_v8  ;;  %v4133_v0 = vsub.f32 %v9964_v39, %v11748_v24 }
 0x238   :  { %3970 = vmatmul.f32.gmra.mxu2 %v9717_v63  ;;  %4028 = vmatpush.msrb.mxu0 %v9874_v37  ;;  %v4050_v62 = vsub.f32 %v9970_v29, %v11760_v5 }
 0x239   :  { %4081 = vmatpush.msrb.mxu1 %v4080_v27  ;;  %4183 = vmatpush.msrb.mxu2 %v9870_v50  ;;  %v97_v27 = vld [vmem:[#allocation2 + $0xb0] sm:$0xff]  ;;  %v4127_v60 = vsub.f32 %v9952_v2, %v11747_v38  ;;  %v288_v38 = vld [vmem:[#allocation5 + $0x5e8] sm:$0xff]  ;;  %v10033_v51 = vsub.f32 %v259_v8, %v10004_v35 }
 0x23a   :  { %4235 = vmatpush.msrb.mxu3 %v9838_v44  ;;  %4030 = vmatpush.msrb.mxu0 %v9881_v59  ;;  %v10006_v28 = vand.u32 4294901760, %v97_v27  ;;  %v10043_v53 = vand.u32 4294901760, %v288_v38  ;;  %v4051_v8 = vand.u32 4294901760, %v4050_v62 }
 0x23b   :  { %4011 = vmatmul.f32.gmra.mxu3 %v9717_v63  ;;  %4087 = vmatpush.msrb.mxu1 %v4086_v21  ;;  %v260_v63 = vld [vmem:[#allocation5 + $0x508] sm:$0xff]  ;;  %v11761_v13 = vand.u32 4294901760, %v10033_v51 }
 0x23c   :  { %4186 = vmatpush.msrb.mxu2 %v9887_v57  ;;  %4237 = vmatpush.msrb.mxu3 %v9843_v1  ;;  %v9986_v19 = vand.u32 4294901760, %v260_v63  ;;  %v10036_v52 = vsub.f32 %v97_v27, %v10006_v28  ;;  %v286_v27 = vld [vmem:[#allocation5 + $0x5d8] sm:$0xff] }
 0x23d   :  { %3897 = vmatmul.f32.gmra.mxu1 %v3685_v58  ;;  %4032 = vmatpush.msrb.mxu0 %v9897_v14  ;;  %v290_v58 = vld [vmem:[#allocation5 + $0x5f8] sm:$0xff]  ;;  %v10065_v23 = vand.u32 4294901760, %v286_v27 }
 0x23e   :  { %4093 = vmatpush.msrb.mxu1 %v4092_v4  ;;  %4189 = vmatpush.msrb.mxu2 %v9900_v6  ;;  %v10000_v21 = vand.u32 4294901760, %v290_v58  ;;  %v289_v4 = vld [vmem:[#allocation5 + $0x5f0] sm:$0xff]  ;;  %v11762_v62 = vand.u32 4294901760, %v10036_v52 }
 0x23f   :  { %4239 = vmatpush.msrb.mxu3 %v9857_v45  ;;  %4034 = vmatpush.msrb.mxu0 %v9913_v47  ;;  %v10028_v24 = vand.u32 4294901760, %v289_v4  ;;  %v10090_v30 = vsub.f32 %v286_v27, %v10065_v23 }
 0x240   :  { %4099 = vmatpush.msrb.mxu1 %v4098_v49  ;;  %4192 = vmatpush.msrb.mxu2 %v9905_v15  ;;  %v10013_v49 = vsub.f32 %v260_v63, %v9986_v19  ;;  %v4139_v63 = vsub.f32 %v9978_v43, %v11751_v22  ;;  %v10026_v17 = vsub.f32 %v290_v58, %v10000_v21 }
 0x241   :  { %4241 = vmatpush.msrb.mxu3 %v9874_v37  ;;  %4036 = vmatpush.msrb.mxu0 %v9922_v34 }
 0x242   :  { %4105 = vmatpush.msrb.mxu1 %v4104_v48  ;;  %4195 = vmatpush.msrb.mxu2 %v9926_v9  ;;  %v11754_v48 = vand.u32 4294901760, %v9990_v18  ;;  %v11758_v22 = vand.u32 4294901760, %v10013_v49  ;;  %v4140_v33 = vand.u32 4294901760, %v4139_v63 }
 0x243   :  { %4243 = vmatpush.msrb.mxu3 %v9881_v59  ;;  %4038 = vmatpush.msrb.mxu0 %v9935_v25 }
 0x244   :  { %4111 = vmatpush.msrb.mxu1 %v4110_v40  ;;  %4198 = vmatpush.msrb.mxu2 %v9938_v12  ;;  %v4128_v40 = vand.u32 4294901760, %v4127_v60  ;;  %v4134_v60 = vand.u32 4294901760, %v4133_v0  ;;  %v4145_v58 = vsub.f32 %v9990_v18, %v11754_v48  ;;  %v10050_v0 = vsub.f32 %v289_v4, %v10028_v24 }
 0x245   :  { %4245 = vmatpush.msrb.mxu3 %v9897_v14  ;;  %4040 = vmatpush.msrb.mxu0 %v9948_v54  ;;  %v4151_v63 = vsub.f32 %v10013_v49, %v11758_v22  ;;  %v10063_v4 = vsub.f32 %v288_v38, %v10043_v53  ;;  %v284_v38 = vld [vmem:[#allocation5 + $0x5c8] sm:$0xff] }
 0x246   :  { %4117 = vmatpush.msrb.mxu1 %v4116_v11  ;;  %4201 = vmatpush.msrb.mxu2 %v9952_v2  ;;  %v287_v11 = vld [vmem:[#allocation5 + $0x5e0] sm:$0xff] }
 0x247   :  { %4247 = vmatpush.msrb.mxu3 %v9913_v47  ;;  %4042 = vmatpush.msrb.mxu0 %v9960_v41  ;;  %v10052_v48 = vand.u32 4294901760, %v287_v11 }
 0x248   :  { %4123 = vmatpush.msrb.mxu1 %v4122_v42  ;;  %4204 = vmatpush.msrb.mxu2 %v9964_v39  ;;  %v11759_v42 = vand.u32 4294901760, %v10026_v17 }
 0x249   :  { %4249 = vmatpush.msrb.mxu3 %v9922_v34  ;;  %4044 = vmatpush.msrb.mxu0 %v9986_v19  ;;  %12097 = vst [vmem:[#allocation23_spill] sm:$0xff] %v10052_v48  ;;  %v10074_v22 = vsub.f32 %v287_v11, %v10052_v48  ;;  %v4152_v11 = vand.u32 4294901760, %v4151_v63  ;;  %v282_v63 = vld [vmem:[#allocation5 + $0x5b8] sm:$0xff] }
 0x24a   :  { %4129 = vmatpush.msrb.mxu1 %v4128_v40  ;;  %4207 = vmatpush.msrb.mxu2 %v9978_v43  ;;  %v4146_v40 = vand.u32 4294901760, %v4145_v58  ;;  %v11763_v58 = vand.u32 4294901760, %v10050_v0 }
 0x24b   :  { %4251 = vmatpush.msrb.mxu3 %v9935_v25  ;;  %4046 = vmatpush.msrb.mxu0 %v10004_v35 }
 0x24c   :  { %4135 = vmatpush.msrb.mxu1 %v4134_v60  ;;  %4210 = vmatpush.msrb.mxu2 %v9990_v18  ;;  %v4439_v60 = vsub.f32 %v10026_v17, %v11759_v42  ;;  %v10085_v42 = vand.u32 4294901760, %v285_v55 }
 0x24d   :  { %4253 = vmatpush.msrb.mxu3 %v9948_v54  ;;  %4052 = vmatmul.f32.vlgmr.msrb.gmra.mxu0 %v4051_v8  ;;  %v4157_v8 = vsub.f32 %v10033_v51, %v11761_v13  ;;  %v10095_v13 = vand.u32 4294901760, %v284_v38 }
 0x24e   :  { %4141 = vmatpush.msrb.mxu1 %v4140_v33  ;;  %4276 = vmatpush.msra.mxu0 %v4066_v46  ;;  %v4058_v33 = vsub.f32 %v10036_v52, %v11762_v62  ;;  %v283_v46 = vld [vmem:[#allocation5 + $0x5c0] sm:$0xff]  ;;  %v4440_v62 = vand.u32 4294901760, %v4439_v60  ;;  %v10107_v5 = vsub.f32 %v285_v55, %v10085_v42  ;;  %v12098_v60 = vand.u32 4294901760, %v10063_v4 }
 0x24f   :  { %4213 = vmatpush.msrb.mxu2 %v10013_v49  ;;  %4255 = vmatpush.msrb.mxu3 %v9960_v41  ;;  %v4158_v36 = vand.u32 4294901760, %v4157_v8  ;;  %v10109_v61 = vand.u32 4294901760, %v283_v46  ;;  %v12100_v8 = vand.u32 4294901760, %v9860_v16  ;;  %v10121_v55 = vsub.f32 %v284_v38, %v10095_v13 }
 0x250   :  { %4147 = vmatpush.msrb.mxu1 %v4146_v40  ;;  %4280 = vmatpush.msra.mxu0 %v4072_v31  ;;  %v4445_v40 = vsub.f32 %v10050_v0, %v11763_v58  ;;  %v4059_v31 = vand.u32 4294901760, %v4058_v33  ;;  %v4451_v58 = vsub.f32 %v10063_v4, %v12098_v60  ;;  %v10123_v33 = vand.u32 4294901760, %v282_v63 }
 0x251   :  { %4216 = vmatpush.msrb.mxu2 %v10033_v51  ;;  %4257 = vmatpush.msrb.mxu3 %v9986_v19  ;;  %v12101_v60 = vand.u32 4294901760, %v10074_v22  ;;  %v10131_v16 = vsub.f32 %v283_v46, %v10109_v61  ;;  %v10133_v38 = vand.u32 4294901760, %v281_v7 }
 0x252   :  { %4219 = vmatmul.f32.vlgmr.msrb.gmra.mxu2 %v9970_v29  ;;  %4284 = vmatpush.msra.mxu0 %v4078_v3  ;;  %v12099_v3 = vand.u32 4294901760, %v9970_v29  ;;  %v11764_v29 = vand.u32 4294901760, %v10107_v5 }
 0x253   :  { %4388 = vmatpush.msra.mxu2 %v10000_v21  ;;  %4153 = vmatpush.msrb.mxu1 %v4152_v11  ;;  %v4446_v11 = vand.u32 4294901760, %v4445_v40  ;;  %v4457_v27 = vsub.f32 %v10074_v22, %v12101_v60  ;;  %v12103_v40 = vand.u32 4294901760, %v10090_v30  ;;  %v279_v60 = vld [vmem:[#allocation5 + $0x5a0] sm:$0xff] }
 0x254   :  { %4259 = vmatpush.msrb.mxu3 %v10004_v35  ;;  %4288 = vmatpush.msra.mxu0 %v12100_v8  ;;  %v10160_v46 = vand.u32 4294901760, %v279_v60 }
 0x255   :  { %4263 = vmatmul.f32.vlgmr.msrb.gmra.mxu3 %v12099_v3  ;;  %4390 = vmatpush.msra.mxu2 %v10028_v24  ;;  %v12102_v3 = vand.u32 4294901760, %v9870_v50  ;;  %v4463_v8 = vsub.f32 %v10090_v30, %v12103_v40  ;;  %v12104_v50 = vand.u32 4294901760, %v9887_v57  ;;  %v11767_v40 = vand.u32 4294901760, %v10131_v16 }
 0x256   :  { %4441 = vmatpush.msra.mxu3 %v4440_v62  ;;  %4159 = vmatpush.msrb.mxu1 %v4158_v36  ;;  %v4452_v62 = vand.u32 4294901760, %v4451_v58  ;;  %v10145_v36 = vsub.f32 %v282_v63, %v10123_v33  ;;  %v4458_v58 = vand.u32 4294901760, %v4457_v27  ;;  %v10158_v63 = vsub.f32 %v281_v7, %v10133_v38 }
 0x257   :  { %4060 = vmatmul.f32.gmra.mxu0 %v4059_v31  ;;  %4161 = vmatmul.f32.vlgmr.msrb.gmra.mxu1 %v9941_v26  ;;  %v10147_v31 = vand.u32 4294901760, %v280_v32  ;;  %v4464_v57 = vand.u32 4294901760, %v4463_v8  ;;  %v12105_v27 = vand.u32 4294901760, %v9900_v6  ;;  %v12107_v6 = vand.u32 4294901760, %v10036_v52 }
 0x258   :  { %4292 = vmatpush.msra.mxu0 %v12102_v3  ;;  %4347 = vmatpush.msra.mxu1 %v9809_v10  ;;  %v278_v3 = vld [vmem:[#allocation5 + $0x598] sm:$0xff]  ;;  %v4469_v10 = vsub.f32 %v10107_v5, %v11764_v29 }
 0x259   :  { %4392 = vmatpush.msra.mxu2 %v10043_v53  ;;  %4447 = vmatpush.msra.mxu3 %v4446_v11  ;;  %v10171_v7 = vsub.f32 %v280_v32, %v10147_v31  ;;  %v10173_v29 = vand.u32 4294901760, %v278_v3  ;;  %v11768_v32 = vand.u32 4294901760, %v10158_v63 }
 0x25a   :  { %4296 = vmatpush.msra.mxu0 %v12104_v50  ;;  %4349 = vmatpush.msra.mxu1 %v9816_v56  ;;  %v12106_v56 = vand.u32 4294901760, %v10121_v55  ;;  %v4470_v8 = vand.u32 4294901760, %v4469_v10  ;;  %v276_v50 = vld [vmem:[#allocation5 + $0x588] sm:$0xff] }
 0x25b   :  { %4394 = vmatpush.msra.mxu2 %v10052_v48  ;;  %4453 = vmatpush.msra.mxu3 %v4452_v62  ;;  %v277_v62 = vld [vmem:[#allocation5 + $0x590] sm:$0xff]  ;;  %v86_v48 = vld [vmem:[#allocation2 + $0x58] sm:$0xff] }
 0x25c   :  { %4224 = vmatmul.f32.gmra.mxu2 %v10036_v52  ;;  %4300 = vmatpush.msra.mxu0 %v12105_v27  ;;  %v4475_v11 = vsub.f32 %v10121_v55, %v12106_v56  ;;  %v4481_v27 = vsub.f32 %v10131_v16, %v11767_v40  ;;  %v10185_v56 = vsub.f32 %v279_v60, %v10160_v46  ;;  %v10189_v52 = vand.u32 4294901760, %v277_v62 }
 0x25d   :  { %4351 = vmatpush.msra.mxu1 %v9823_v20  ;;  %4396 = vmatpush.msra.mxu2 %v10065_v23  ;;  %v12108_v20 = vand.u32 4294901760, %v9905_v15  ;;  %v10197_v60 = vsub.f32 %v278_v3, %v10173_v29  ;;  %v10202_v40 = vand.u32 4294901760, %v276_v50 }
 0x25e   :  { %4459 = vmatpush.msra.mxu3 %v4458_v58  ;;  %v4476_v15 = vand.u32 4294901760, %v4475_v11  ;;  %v12109_v58 = vand.u32 4294901760, %v10145_v36  ;;  %v4482_v11 = vand.u32 4294901760, %v4481_v27  ;;  %v4504_v3 = vand.u32 4294901760, %v10185_v56 }
 0x25f   :  { %4269 = vmatmul.f32.gmra.mxu3 %v12107_v6  ;;  %4304 = vmatpush.msra.mxu0 %v12108_v20  ;;  %v275_v20 = vld [vmem:[#allocation5 + $0x580] sm:$0xff]  ;;  %v12111_v6 = vand.u32 4294901760, %v9938_v12  ;;  %v12112_v27 = vand.u32 4294901760, %v10171_v7  ;;  %v12113_v12 = vand.u32 4294901760, %v9952_v2 }
 0x260   :  { %4353 = vmatpush.msra.mxu1 %v9838_v44  ;;  %4398 = vmatpush.msra.mxu2 %v10085_v42  ;;  %v4487_v10 = vsub.f32 %v10145_v36, %v12109_v58  ;;  %v12110_v44 = vand.u32 4294901760, %v9926_v9  ;;  %v4493_v58 = vsub.f32 %v10158_v63, %v11768_v32  ;;  %v10217_v9 = vand.u32 4294901760, %v275_v20 }
 0x261   :  { %4465 = vmatpush.msra.mxu3 %v4464_v57  ;;  %4165 = vmatmul.f32.gmra.mxu1 %v10006_v28  ;;  %v10204_v57 = vand.u32 4294901760, %v86_v48  ;;  %v4510_v32 = vand.u32 4294901760, %v10197_v60 }
 0x262   :  { %4308 = vmatpush.msra.mxu0 %v12110_v44  ;;  %4355 = vmatpush.msra.mxu1 %v9843_v1  ;;  %v10215_v1 = vsub.f32 %v277_v62, %v10189_v52  ;;  %v4499_v44 = vsub.f32 %v10171_v7, %v12112_v27  ;;  %v10242_v2 = vsub.f32 %v275_v20, %v10217_v9 }
 0x263   :  { %4400 = vmatpush.msra.mxu2 %v10095_v13  ;;  %4471 = vmatpush.msra.mxu3 %v4470_v8  ;;  %v4488_v8 = vand.u32 4294901760, %v4487_v10  ;;  %v10231_v62 = vsub.f32 %v86_v48, %v10204_v57  ;;  %v4505_v10 = vsub.f32 %v10185_v56, %v4504_v3 }
 0x264   :  { %4312 = vmatpush.msra.mxu0 %v12111_v6  ;;  %4357 = vmatpush.msra.mxu1 %v9857_v45  ;;  %v10228_v45 = vsub.f32 %v276_v50, %v10202_v40  ;;  %v12114_v6 = vand.u32 4294901760, %v9964_v39  ;;  %v4500_v48 = vand.u32 4294901760, %v4499_v44  ;;  %v4511_v50 = vsub.f32 %v10197_v60, %v4510_v32 }
 0x265   :  { %4402 = vmatpush.msra.mxu2 %v10109_v61  ;;  %4477 = vmatpush.msra.mxu3 %v4476_v15  ;;  %v4494_v15 = vand.u32 4294901760, %v4493_v58  ;;  %v12115_v58 = vand.u32 4294901760, %v9978_v43  ;;  %v4421_v39 = vand.u32 4294901760, %v10231_v62  ;;  %v4506_v20 = vand.u32 4294901760, %v4505_v10 }
 0x266   :  { %4316 = vmatpush.msra.mxu0 %v12113_v12  ;;  %4359 = vmatpush.msra.mxu1 %v9874_v37  ;;  %v4516_v37 = vand.u32 4294901760, %v10215_v1  ;;  %v4528_v27 = vand.u32 4294901760, %v10242_v2  ;;  %v4512_v44 = vand.u32 4294901760, %v4511_v50  ;;  %v12117_v12 = vand.u32 4294901760, %v10013_v49 }
 0x267   :  { %4404 = vmatpush.msra.mxu2 %v10123_v33  ;;  %4483 = vmatpush.msra.mxu3 %v4482_v11  ;;  %v98_v11 = vld [vmem:[#allocation2 + $0xb8] sm:$0xff]  ;;  %v12120_v50 = vand.u32 4294901760, %v10050_v0 }
 0x268   :  { %4320 = vmatpush.msra.mxu0 %v12114_v6  ;;  %4361 = vmatpush.msra.mxu1 %v9881_v59  ;;  %v4522_v59 = vand.u32 4294901760, %v10228_v45  ;;  %v4517_v43 = vsub.f32 %v10215_v1, %v4516_v37 }
 0x269   :  { %4406 = vmatpush.msra.mxu2 %v10133_v38  ;;  %4489 = vmatpush.msra.mxu3 %v4488_v8  ;;  %v12116_v8 = vand.u32 4294901760, %v9990_v18  ;;  %v4422_v18 = vsub.f32 %v10231_v62, %v4421_v39 }
 0x26a   :  { %4324 = vmatpush.msra.mxu0 %v12115_v58  ;;  %4363 = vmatpush.msra.mxu1 %v9897_v14  ;;  %v10261_v14 = vand.u32 4294901760, %v98_v11  ;;  %v4518_v49 = vand.u32 4294901760, %v4517_v43 }
 0x26b   :  { %4408 = vmatpush.msra.mxu2 %v10147_v31  ;;  %4495 = vmatpush.msra.mxu3 %v4494_v15  ;;  %v12118_v15 = vand.u32 4294901760, %v10033_v51  ;;  %v4423_v51 = vand.u32 4294901760, %v4422_v18 }
 0x26c   :  { %4328 = vmatpush.msra.mxu0 %v12116_v8  ;;  %4365 = vmatpush.msra.mxu1 %v9913_v47  ;;  %v4523_v47 = vsub.f32 %v10228_v45, %v4522_v59  ;;  %v10281_v10 = vsub.f32 %v98_v11, %v10261_v14 }
 0x26d   :  { %4410 = vmatpush.msra.mxu2 %v10160_v46  ;;  %4501 = vmatpush.msra.mxu3 %v4500_v48 }
 0x26e   :  { %4332 = vmatpush.msra.mxu0 %v12117_v12  ;;  %4367 = vmatpush.msra.mxu1 %v9922_v34  ;;  %v4529_v34 = vsub.f32 %v10242_v2, %v4528_v27  ;;  %v4524_v6 = vand.u32 4294901760, %v4523_v47  ;;  %v4429_v48 = vand.u32 4294901760, %v10281_v10 }
 0x26f   :  { %4412 = vmatpush.msra.mxu2 %v10173_v29  ;;  %4507 = vmatpush.msra.mxu3 %v4506_v20 }
 0x270   :  { %4336 = vmatpush.msra.mxu0 %v12118_v15  ;;  %4369 = vmatpush.msra.mxu1 %v9935_v25  ;;  %v4530_v25 = vand.u32 4294901760, %v4529_v34 }
 0x271   :  { %4414 = vmatpush.msra.mxu2 %v10189_v52  ;;  %4513 = vmatpush.msra.mxu3 %v4512_v44 }
 0x272   :  { %4338 = vmatmul.f32.vlgmr.msra.gmra.mxu0 %v9941_v26  ;;  %4371 = vmatpush.msra.mxu1 %v9948_v54  ;;  %v12119_v54 = vand.u32 4294901760, %v10026_v17 }
 0x273   :  { %4543 = vmatpush.msrb.mxu0 %v10026_v17  ;;  %4416 = vmatpush.msra.mxu2 %v10202_v40  ;;  %v12121_v17 = vand.u32 4294901760, %v10063_v4 }
 0x274   :  { %4519 = vmatpush.msra.mxu3 %v4518_v49  ;;  %4373 = vmatpush.msra.mxu1 %v9960_v41  ;;  %v4430_v41 = vsub.f32 %v10281_v10, %v4429_v48 }
 0x275   :  { %4546 = vmatpush.msrb.mxu0 %v10050_v0  ;;  %4418 = vmatpush.msra.mxu2 %v10217_v9 }
 0x276   :  { %4525 = vmatpush.msra.mxu3 %v4524_v6  ;;  %4424 = vmatmul.f32.vlgmr.msra.gmra.mxu2 %v4423_v51 }
 0x277   :  { %4549 = vmatpush.msrb.mxu0 %v10063_v4  ;;  %4648 = vmatpush.msrb.mxu2 %v12119_v54  ;;  %v3046_v4 = vpop.f32.mrf.mxu3 }
 0x278   :  { %4375 = vmatpush.msra.mxu1 %v9986_v19  ;;  %4531 = vmatpush.msra.mxu3 %v4530_v25  ;;  %v4431_v19 = vand.u32 4294901760, %v4430_v41 }
 0x279   :  { %4533 = vmatmul.f32.vlgmr.msra.gmra.mxu3 %v10204_v57  ;;  %4552 = vmatpush.msrb.mxu0 %v10074_v22 }
 0x27a   :  { %4652 = vmatpush.msrb.mxu2 %v12120_v50  ;;  %4719 = vmatpush.msrb.mxu3 %v10000_v21 }
 0x27b   :  { %4377 = vmatpush.msra.mxu1 %v10004_v35  ;;  %4342 = vmatmul.f32.gmra.mxu0 %v10006_v28  ;;  %v12122_v35 = vand.u32 4294901760, %v10074_v22  ;;  %v12129_v22 = vand.u32 4294901760, %v10158_v63 }
 0x27c   :  { %4379 = vmatmul.f32.vlgmr.msra.gmra.mxu1 %v9941_v26  ;;  %4555 = vmatpush.msrb.mxu0 %v10090_v30  ;;  %v12123_v26 = vand.u32 4294901760, %v10090_v30 }
 0x27d   :  { %4601 = vmatpush.msrb.mxu1 %v10000_v21  ;;  %4656 = vmatpush.msrb.mxu2 %v12121_v17  ;;  %v12124_v21 = vld [vmem:[#allocation23_spill] sm:$0xff] }
 0x27e   :  { %4721 = vmatpush.msrb.mxu3 %v10028_v24  ;;  %4558 = vmatpush.msrb.mxu0 %v10107_v5 }
 0x27f   :  { %4603 = vmatpush.msrb.mxu1 %v10028_v24  ;;  %4660 = vmatpush.msrb.mxu2 %v12122_v35  ;;  %v12125_v24 = vand.u32 4294901760, %v10107_v5  ;;  %v12127_v5 = vand.u32 4294901760, %v10131_v16 }
 0x280   :  { %4723 = vmatpush.msrb.mxu3 %v10043_v53  ;;  %4432 = vmatmul.f32.gmra.mxu2 %v4431_v19 }
 0x281   :  { %4561 = vmatpush.msrb.mxu0 %v10121_v55  ;;  %4605 = vmatpush.msrb.mxu1 %v10043_v53  ;;  %v12126_v53 = vand.u32 4294901760, %v10121_v55 }
 0x282   :  { %4664 = vmatpush.msrb.mxu2 %v12123_v26  ;;  %4725 = vmatpush.msrb.mxu3 %v12124_v21 }
 0x283   :  { %4537 = vmatmul.f32.gmra.mxu3 %v10261_v14  ;;  %4564 = vmatpush.msrb.mxu0 %v10131_v16 }
 0x284   :  { %4607 = vmatpush.msrb.mxu1 %v12124_v21  ;;  %4668 = vmatpush.msrb.mxu2 %v12125_v24 }
 0x285   :  { %4727 = vmatpush.msrb.mxu3 %v10065_v23  ;;  %4383 = vmatmul.f32.gmra.mxu1 %v10006_v28  ;;  %v2892_v28 = vpop.f32.mrf.mxu1 }
 0x286   :  { %4567 = vmatpush.msrb.mxu0 %v10145_v36  ;;  %4609 = vmatpush.msrb.mxu1 %v10065_v23  ;;  %v12128_v23 = vand.u32 4294901760, %v10145_v36 }
 0x287   :  { %4672 = vmatpush.msrb.mxu2 %v12126_v53  ;;  %4729 = vmatpush.msrb.mxu3 %v10085_v42 }
 0x288   :  { %4570 = vmatpush.msrb.mxu0 %v10158_v63  ;;  %4611 = vmatpush.msrb.mxu1 %v10085_v42  ;;  %v2937_v42 = vpop.f32.mrf.mxu2 }
 0x289   :  { %4676 = vmatpush.msrb.mxu2 %v12127_v5  ;;  %4731 = vmatpush.msrb.mxu3 %v10095_v13 }
 0x28a   :  { %4573 = vmatpush.msrb.mxu0 %v10171_v7  ;;  %4613 = vmatpush.msrb.mxu1 %v10095_v13  ;;  %v12130_v13 = vand.u32 4294901760, %v10171_v7 }
 0x28b   :  { %4680 = vmatpush.msrb.mxu2 %v12128_v23  ;;  %4733 = vmatpush.msrb.mxu3 %v10109_v61 }
 0x28c   :  { %4576 = vmatpush.msrb.mxu0 %v10185_v56  ;;  %4615 = vmatpush.msrb.mxu1 %v10109_v61  ;;  %v2851_v61 = vpop.f32.mrf.mxu0 }
 0x28d   :  { %4684 = vmatpush.msrb.mxu2 %v12129_v22  ;;  %4735 = vmatpush.msrb.mxu3 %v10123_v33  ;;  %v2896_v30 = vpop.f32.mrf.mxu1 }
 0x28e   :  { %4579 = vmatpush.msrb.mxu0 %v10197_v60  ;;  %4617 = vmatpush.msrb.mxu1 %v10123_v33  ;;  %v12131_v60 = vld [vmem:[#allocation22_spill] sm:$0xff] }
 0x28f   :  { %4688 = vmatpush.msrb.mxu2 %v12130_v13  ;;  %4737 = vmatpush.msrb.mxu3 %v10133_v38 }
 0x290   :  { %4582 = vmatpush.msrb.mxu0 %v10215_v1  ;;  %4619 = vmatpush.msrb.mxu1 %v10133_v38  ;;  %v2945_v33 = vpop.f32.mrf.mxu2 }
 0x291   :  { %4692 = vmatpush.msrb.mxu2 %v4504_v3  ;;  %4739 = vmatpush.msrb.mxu3 %v10147_v31 }
 0x292   :  { %4585 = vmatpush.msrb.mxu0 %v10228_v45  ;;  %4621 = vmatpush.msrb.mxu1 %v10147_v31 }
 0x293   :  { %4696 = vmatpush.msrb.mxu2 %v4510_v32  ;;  %4741 = vmatpush.msrb.mxu3 %v10160_v46 }
 0x294   :  { %4588 = vmatpush.msrb.mxu0 %v10242_v2  ;;  %4623 = vmatpush.msrb.mxu1 %v10160_v46  ;;  %v2855_v0 = vpop.f32.mrf.mxu0 }
 0x295   :  { %4700 = vmatpush.msrb.mxu2 %v4516_v37  ;;  %4743 = vmatpush.msrb.mxu3 %v10173_v29  ;;  %v3148_v16 = vpop.f32.mrf.mxu1  ;;  %v12132_v37 = vld [vmem:[#allocation26_spill] sm:$0xff] }
 0x296   :  { %4591 = vmatmul.f32.vlgmr.msrb.gmra.mxu0 %v10231_v62  ;;  %4625 = vmatpush.msrb.mxu1 %v10173_v29  ;;  %v3050_v29 = vpop.f32.mrf.mxu3  ;;  %v2856_v2 = vadd.f32 %v2855_v0, %v12132_v37 }
 0x297   :  { %4704 = vmatpush.msrb.mxu2 %v4522_v59  ;;  %4745 = vmatpush.msrb.mxu3 %v10189_v52 }
 0x298   :  { %4627 = vmatpush.msrb.mxu1 %v10189_v52  ;;  %v3223_v38 = vpop.f32.mrf.mxu2  ;;  %v2897_v59 = vadd.f32 %v2896_v30, %v2856_v2 }
 0x299   :  { %4708 = vmatpush.msrb.mxu2 %v4528_v27  ;;  %4747 = vmatpush.msrb.mxu3 %v10202_v40 }
 0x29a   :  { %4710 = vmatmul.f32.vlgmr.msrb.gmra.mxu2 %v10204_v57  ;;  %4629 = vmatpush.msrb.mxu1 %v10202_v40  ;;  %v2946_v43 = vadd.f32 %v2945_v33, %v2897_v59 }
 0x29b   :  { %4749 = vmatpush.msrb.mxu3 %v10217_v9 }
 0x29c   :  { %4751 = vmatmul.f32.vlgmr.msrb.gmra.mxu3 %v10204_v57  ;;  %4631 = vmatpush.msrb.mxu1 %v10217_v9  ;;  %v3104_v55 = vpop.f32.mrf.mxu0  ;;  %v2852_v57 = vadd.f32 %v2851_v61, %v12131_v60  ;;  %v3051_v12 = vadd.f32 %v3050_v29, %v2946_v43 }
 0x29d   :  { %4635 = vmatmul.f32.vlgmr.msrb.gmra.mxu1 %v4421_v39  ;;  %v3154_v31 = vpop.f32.mrf.mxu1 }
 0x29e   :  { %4596 = vmatmul.f32.gmra.mxu0 %v10281_v10  ;;  %v3264_v36 = vpop.f32.mrf.mxu3  ;;  %v2893_v1 = vadd.f32 %v2892_v28, %v2852_v57 }
 0x2a0   :  { %v3227_v63 = vpop.f32.mrf.mxu2  ;;  %v2938_v45 = vadd.f32 %v2937_v42, %v2893_v1 }
 0x2a2   :  { %4714 = vmatmul.f32.gmra.mxu2 %v10261_v14  ;;  %v3047_v58 = vadd.f32 %v3046_v4, %v2938_v45 }
 0x2a4   :  { %4755 = vmatmul.f32.gmra.mxu3 %v10261_v14  ;;  %v3109_v46 = vpop.f32.mrf.mxu0  ;;  %v3105_v20 = vadd.f32 %v3104_v55, %v3047_v58 }
 0x2a5   :  { %4641 = vmatmul.f32.gmra.mxu1 %v4429_v48  ;;  %v3418_v32 = vpop.f32.mrf.mxu1  ;;  %v3110_v15 = vadd.f32 %v3109_v46, %v3051_v12 }
 0x2a6   :  { %v3268_v7 = vpop.f32.mrf.mxu3  ;;  %v3149_v27 = vadd.f32 %v3148_v16, %v3105_v20 }
 0x2a7   :  { %v3155_v34 = vadd.f32 %v3154_v31, %v3110_v15 }
 0x2a8   :  { %v3476_v56 = vpop.f32.mrf.mxu2  ;;  %v3224_v47 = vadd.f32 %v3223_v38, %v3149_v27 }
 0x2a9   :  { %v3228_v25 = vadd.f32 %v3227_v63, %v3155_v34 }
 0x2aa   :  { %v3265_v49 = vadd.f32 %v3264_v36, %v3224_v47 }
 0x2ab   :  { %v3269_v50 = vadd.f32 %v3268_v7, %v3228_v25 }
 0x2ac   :  { %v3309_v40 = vpop.f32.mrf.mxu0 }
 0x2ad   :  { %v3422_v9 = vpop.f32.mrf.mxu1  ;;  %v3310_v6 = vadd.f32 %v3309_v40, %v3265_v49 }
 0x2ae   :  { %v3520_v3 = vpop.f32.mrf.mxu3 }
 0x2af   :  { %v3419_v48 = vadd.f32 %v3418_v32, %v3310_v6 }
 0x2b0   :  { %v3481_v11 = vpop.f32.mrf.mxu2 }
 0x2b1   :  { %v3477_v19 = vadd.f32 %v3476_v56, %v3419_v48 }
 0x2b3   :  { %v3521_v26 = vadd.f32 %v3520_v3, %v3477_v19  ;;  %v6898_v19 = vmov 2  }
 0x2b4   :  { %v3317_v52 = vpop.f32.mrf.mxu0  ;;  %6691 = vset.pattern.permute.xlu0 %v6898_v19 }
 0x2b5   :  { %v3636_v8 = vpop.f32.mrf.mxu1  ;;  %v3318_v35 = vadd.f32 %v3317_v52, %v3269_v50 }
 0x2b6   :  { %v3526_v39 = vpop.f32.mrf.mxu3 }
 0x2b7   :  { %v3423_v21 = vadd.f32 %v3422_v9, %v3318_v35 }
 0x2b8   :  { %v3681_v14 = vpop.f32.mrf.mxu2 }
 0x2b9   :  { %v3482_v22 = vadd.f32 %v3481_v11, %v3423_v21 }
 0x2bb   :  { %v3527_v28 = vadd.f32 %v3526_v39, %v3482_v22 }
 0x2bc   :  { %v3595_v62 = vpop.f32.mrf.mxu0 }
 0x2bd   :  { %v3640_v10 = vpop.f32.mrf.mxu1  ;;  %v3596_v5 = vadd.f32 %v3595_v62, %v3521_v26 }
 0x2be   :  { %v3790_v18 = vpop.f32.mrf.mxu3 }
 0x2bf   :  { %v3637_v13 = vadd.f32 %v3636_v8, %v3596_v5 }
 0x2c0   :  { %v3689_v54 = vpop.f32.mrf.mxu2 }
 0x2c1   :  { %v3682_v42 = vadd.f32 %v3681_v14, %v3637_v13 }
 0x2c3   :  { %v3791_v55 = vadd.f32 %v3790_v18, %v3682_v42 }
 0x2c4   :  { %v3599_v44 = vpop.f32.mrf.mxu0 }
 0x2c5   :  { %v3892_v17 = vpop.f32.mrf.mxu1  ;;  %v3600_v4 = vadd.f32 %v3599_v44, %v3527_v28 }
 0x2c6   :  { %v3794_v41 = vpop.f32.mrf.mxu3 }
 0x2c7   :  { %v3641_v33 = vadd.f32 %v3640_v10, %v3600_v4 }
 0x2c8   :  { %v3967_v24 = vpop.f32.mrf.mxu2 }
 0x2c9   :  { %v3690_v46 = vadd.f32 %v3689_v54, %v3641_v33 }
 0x2cb   :  { %v3795_v63 = vadd.f32 %v3794_v41, %v3690_v46 }
 0x2cc   :  { %v3848_v51 = vpop.f32.mrf.mxu0 }
 0x2cd   :  { %v3898_v61 = vpop.f32.mrf.mxu1  ;;  %v3849_v16 = vadd.f32 %v3848_v51, %v3791_v55 }
 0x2ce   :  { %v4008_v23 = vpop.f32.mrf.mxu3 }
 0x2cf   :  { %v3893_v36 = vadd.f32 %v3892_v17, %v3849_v16 }
 0x2d0   :  { %v3971_v30 = vpop.f32.mrf.mxu2 }
 0x2d1   :  { %v3968_v7 = vadd.f32 %v3967_v24, %v3893_v36 }
 0x2d3   :  { %v4009_v52 = vadd.f32 %v4008_v23, %v3968_v7 }
 0x2d4   :  { %v3853_v53 = vpop.f32.mrf.mxu0 }
 0x2d5   :  { %v4162_v38 = vpop.f32.mrf.mxu1  ;;  %v3854_v56 = vadd.f32 %v3853_v53, %v3795_v63 }
 0x2d6   :  { %v4012_v29 = vpop.f32.mrf.mxu3 }
 0x2d7   :  { %v3899_v60 = vadd.f32 %v3898_v61, %v3854_v56 }
 0x2d8   :  { %v4220_v31 = vpop.f32.mrf.mxu2 }
 0x2d9   :  { %v3972_v9 = vadd.f32 %v3971_v30, %v3899_v60 }
 0x2db   :  { %v4013_v2 = vadd.f32 %v4012_v29, %v3972_v9 }
 0x2dc   :  { %v4053_v0 = vpop.f32.mrf.mxu0 }
 0x2dd   :  { %v4054_v3 = vadd.f32 %v4053_v0, %v4009_v52 }
 0x2de   :  { %v4264_v32 = vpop.f32.mrf.mxu3  ;;  %v4166_v57 = vpop.f32.mrf.mxu1 }
 0x2df   :  { %v4163_v45 = vadd.f32 %v4162_v38, %v4054_v3 }
 0x2e0   :  { %v4225_v62 = vpop.f32.mrf.mxu2 }
 0x2e1   :  { %v4221_v11 = vadd.f32 %v4220_v31, %v4163_v45 }
 0x2e3   :  { %v4265_v39 = vadd.f32 %v4264_v32, %v4221_v11 }
 0x2e4   :  { %v4061_v40 = vpop.f32.mrf.mxu0 }
 0x2e5   :  { %v4062_v59 = vadd.f32 %v4061_v40, %v4013_v2 }
 0x2e6   :  { %v4270_v37 = vpop.f32.mrf.mxu3 }
 0x2e7   :  { %v4167_v20 = vadd.f32 %v4166_v57, %v4062_v59 }
 0x2e9   :  { %v4226_v44 = vadd.f32 %v4225_v62, %v4167_v20 }
 0x2eb   :  { %v4271_v18 = vadd.f32 %v4270_v37, %v4226_v44 }
 0x2ef   :  { %v4339_v1 = vpop.f32.mrf.mxu0 }
 0x2f0   :  { %v4340_v27 = vadd.f32 %v4339_v1, %v4265_v39 }
 0x2f8   :  { %v4343_v43 = vpop.f32.mrf.mxu0 }
 0x2f9   :  { %v4380_v58 = vpop.f32.mrf.mxu1  ;;  %v4425_v8 = vpop.f32.mrf.mxu2  ;;  %v4344_v34 = vadd.f32 %v4343_v43, %v4271_v18  ;;  %v4759_v18 = vld [vmem:[%s11613_s1] sm:$0xff] }
 0x2fa   :  { %v4381_v12 = vadd.f32 %v4380_v58, %v4340_v27  ;;  %vm4763_vm1 = vcmp.eq.f32.partialorder %v4759_v18, 0.0 }
 0x2fc   :  { %v4534_v14 = vpop.f32.mrf.mxu3  ;;  %v4426_v15 = vadd.f32 %v4425_v8, %v4381_v12 }
 0x2fe   :  { %v4535_v6 = vadd.f32 %v4534_v14, %v4426_v15 }
 0x302   :  { %v4384_v47 = vpop.f32.mrf.mxu1 }
 0x303   :  { %v4433_v10 = vpop.f32.mrf.mxu2  ;;  %v4385_v51 = vadd.f32 %v4384_v47, %v4344_v34 }
 0x305   :  { %v4434_v41 = vadd.f32 %v4433_v10, %v4385_v51 }
 0x306   :  { %v4538_v25 = vpop.f32.mrf.mxu3 }
 0x307   :  { %v4539_v21 = vadd.f32 %v4538_v25, %v4434_v41 }
 0x313   :  { %v4592_v49 = vpop.f32.mrf.mxu0 }
 0x314   :  { %v4593_v48 = vadd.f32 %v4592_v49, %v4535_v6  ;;  %v4761_v49 = vld [vmem:[%s11613_s1 + $0x10] sm:$0xff]  ;;  %v4760_v6 = vld [vmem:[%s11613_s1 + $0x8] sm:$0xff] }
 0x315   :  { %vm4764_vm3 = vcmp.eq.f32.partialorder %v4761_v49, 0.0  ;;  %vm4767_vm4 = vcmp.eq.f32.partialorder %v4760_v6, 0.0 }
 0x31a   :  { %v4636_v54 = vpop.f32.mrf.mxu1 }
 0x31b   :  { %v4637_v50 = vadd.f32 %v4636_v54, %v4593_v48  ;;  %v4597_v35 = vpop.f32.mrf.mxu0 }
 0x31c   :  { %v4598_v5 = vadd.f32 %v4597_v35, %v4539_v21  ;;  %v4762_v21 = vld [vmem:[%s11613_s1 + $0x18] sm:$0xff] }
 0x31d   :  { %v4711_v17 = vpop.f32.mrf.mxu2  ;;  %vm4768_vm5 = vcmp.eq.f32.partialorder %v4762_v21, 0.0 }
 0x31e   :  { %v4712_v26 = vadd.f32 %v4711_v17, %v4637_v50 }
 0x31f   :  { %v4752_v24 = vpop.f32.mrf.mxu3 }
 0x320   :  { %v4753_v53 = vadd.f32 %v4752_v24, %v4712_v26 }
 0x322   :  { %v4859_v23 = vsel %vm4858_vm0, %v4753_v53, -inf  ;;  %4771 = vrot.lane.b32.xlu0 %v4753_v53, %s6899_s3  ;;  %v4642_v22 = vpop.f32.mrf.mxu1  ;;  %v4765_v15 = vsel %vm4763_vm1, -10000.0, %v4753_v53 }
 0x323   :  { %v4860_v13 = vrot.slane %v4859_v23, 4  ;;  %v4643_v61 = vadd.f32 %v4642_v22, %v4598_v5  ;;  %v4780_v34 = vsel %vm4779_vm2, %v4765_v15, -inf }
 0x324   :  { %v4781_v10 = vrot.slane %v4780_v34, 4 }
 0x325   :  { %v4861_v28 = vmax.f32 %v4859_v23, %v4860_v13  ;;  %v4715_v42 = vpop.f32.mrf.mxu2 }
 0x326   :  { %v4716_v0 = vadd.f32 %v4715_v42, %v4643_v61  ;;  %v4782_v25 = vmax.f32 %v4780_v34, %v4781_v10 }
 0x327   :  { %v4862_v4 = vrot.slane %v4861_v28, 2  ;;  %v4756_v30 = vpop.f32.mrf.mxu3 }
 0x328   :  { %v4757_v55 = vadd.f32 %v4756_v30, %v4716_v0  ;;  %v4783_v50 = vrot.slane %v4782_v25, 2 }
 0x329   :  { %v4863_v33 = vmax.f32 %v4861_v28, %v4862_v4 }
 0x32a   :  { %v4866_v29 = vsel %vm4858_vm0, %v4757_v55, -inf  ;;  %4773 = vrot.lane.b32.xlu0 %v4757_v55, %s6899_s3  ;;  %v4766_v51 = vsel %vm4764_vm3, -10000.0, %v4757_v55  ;;  %v4784_v24 = vmax.f32 %v4782_v25, %v4783_v50 }
 0x32b   :  { %v4864_v16 = vrot.slane %v4863_v33, 1  ;;  %v4867_v38 = vrot.slane %v4866_v29, 4  ;;  %v4787_v48 = vsel %vm4779_vm2, %v4766_v51, -inf }
 0x32c   :  { %v4788_v17 = vrot.slane %v4787_v48, 4  ;;  %v4785_v13 = vrot.slane %v4784_v24, 1 }
 0x32d   :  { %v4865_v46 = vmax.f32 %v4863_v33, %v4864_v16  ;;  %v4868_v36 = vmax.f32 %v4866_v29, %v4867_v38 }
 0x32e   :  { %v4789_v5 = vmax.f32 %v4787_v48, %v4788_v17 }
 0x32f   :  { %v4873_v31 = vsub.f32 %v4753_v53, %v4865_v46  ;;  %v4869_v40 = vrot.slane %v4868_v36, 2 }
 0x330   :  { %v4790_v28 = vrot.slane %v4789_v5, 2 }
 0x331   :  { %v4875_v63 = vmul.f32 1.442695, %v4873_v31  ;;  %v4870_v7 = vmax.f32 %v4868_v36, %v4869_v40 }
 0x332   :  { %v4791_v29 = vmax.f32 %v4789_v5, %v4790_v28 }
 0x333   :  { %6695 = vpow2.f32 %v4875_v63  ;;  %v4871_v32 = vrot.slane %v4870_v7, 1 }
 0x334   :  { %v4792_v40 = vrot.slane %v4791_v29, 1 }
 0x335   :  { %v4872_v56 = vmax.f32 %v4870_v7, %v4871_v32 }
 0x337   :  { %v4874_v52 = vsub.f32 %v4757_v55, %v4872_v56  ;;  %v4786_v55 = vmax.f32 %v4784_v24, %v4785_v13 }
 0x339   :  { %v6696_v60 = vpop.eup %6695  ;;  %v4877_v57 = vmul.f32 1.442695, %v4874_v52  ;;  %v6900_v52 = vmov 0  }
 0x33a   :  { %v4879_v3 = vsel %vm4858_vm0, %v6696_v60, 0.0  ;;  %6690 = vset.pattern.permute.xlu2 %v6900_v52  ;;  %6689 = vset.pattern.permute.xlu1 %v6900_v52 }
 0x33b   :  { %6697 = vpow2.f32 %v4877_v57  ;;  %v4880_v1 = vrot.slane %v4879_v3, 4 }
 0x33d   :  { %v4881_v9 = vadd.f32 %v4880_v1, %v4879_v3 }
 0x33f   :  { %v4882_v45 = vrot.slane %v4881_v9, 2 }
 0x341   :  { %v6698_v62 = vpop.eup %6697  ;;  %v4883_v37 = vadd.f32 %v4882_v45, %v4881_v9 }
 0x342   :  { %v4886_v2 = vsel %vm4858_vm0, %v6698_v62, 0.0 }
 0x343   :  { %v4884_v11 = vrot.slane %v4883_v37, 1  ;;  %v4887_v58 = vrot.slane %v4886_v2, 4 }
 0x345   :  { %v4885_v59 = vadd.f32 %v4884_v11, %v4883_v37  ;;  %v4888_v39 = vadd.f32 %v4887_v58, %v4886_v2 }
 0x347   :  { %6699 = vrcp.f32 %v4885_v59  ;;  %v4889_v20 = vrot.slane %v4888_v39, 2 }
 0x349   :  { %v4890_v8 = vadd.f32 %v4889_v20, %v4888_v39 }
 0x34b   :  { %v4891_v43 = vrot.slane %v4890_v8, 1 }
 0x34d   :  { %v6700_v27 = vpop.eup %6699  ;;  %v4892_v14 = vadd.f32 %v4891_v43, %v4890_v8 }
 0x34e   :  { %v4895_v44 = vmul.f32 %v6700_v27, %v6696_v60  ;;  %v4793_v60 = vmax.f32 %v4791_v29, %v4792_v40 }
 0x34f   :  { %6701 = vrcp.f32 %v4892_v14 }
 0x350   :  { %5039 = vperm.xlu0 %6691, %v4895_v44  }
 0x355   :  { %v6702_v12 = vpop.eup %6701 }
 0x356   :  { %v10397_v47 = vmul.f32 %v6702_v12, %v6698_v62 }
 0x394   :  { %v4772_v54 = vpop.permute.xlu0 %4771 }
 0x395   :  { %v4777_v41 = vsel %vm4767_vm4, -10000.0, %v4772_v54  ;;  %v5126_v54 = vld [vmem:[#allocation7 + $0x78] sm:$0xff] }
 0x396   :  { %v4794_v35 = vsel %vm4779_vm2, %v4777_v41, -inf  ;;  %v10419_v17 = vand.u32 4294901760, %v5126_v54 }
 0x397   :  { %v4795_v26 = vrot.slane %v4794_v35, 4 }
 0x398   :  { %v10422_v24 = vsub.f32 %v5126_v54, %v10419_v17  ;;  %5393 = vmatpush.msra.mxu3 %v10419_v17  ;;  %5197 = vmatpush.msra.mxu0 %v10419_v17 }
 0x399   :  { %v4796_v53 = vmax.f32 %v4794_v35, %v4795_v26 }
 0x39a   :  { %5340 = vmatpush.msra.mxu2 %v10422_v24 }
 0x39b   :  { %v4797_v23 = vrot.slane %v4796_v53, 2 }
 0x39c   :  { %v4774_v22 = vpop.permute.xlu0 %4773 }
 0x39d   :  { %v4798_v61 = vmax.f32 %v4796_v53, %v4797_v23  ;;  %v4778_v42 = vsel %vm4768_vm5, -10000.0, %v4774_v22  ;;  %v5239_v23 = vand.u32 4294901760, %v10422_v24 }
 0x39e   :  { %v4801_v0 = vsel %vm4779_vm2, %v4778_v42, -inf }
 0x39f   :  { %v4799_v4 = vrot.slane %v4798_v61, 1  ;;  %v4802_v30 = vrot.slane %v4801_v0, 4 }
 0x3a1   :  { %v4800_v33 = vmax.f32 %v4798_v61, %v4799_v4  ;;  %v4803_v16 = vmax.f32 %v4801_v0, %v4802_v30  ;;  %v5240_v61 = vsub.f32 %v10422_v24, %v5239_v23  ;;  %v5140_v24 = vld [vmem:[#allocation7 + $0xe8] sm:$0xff] }
 0x3a3   :  { %v4808_v38 = vmax.f32 %v4786_v55, %v4800_v33  ;;  %v4804_v46 = vrot.slane %v4803_v16, 2  ;;  %v5241_v0 = vand.u32 4294901760, %v5240_v61  ;;  %v5115_v61 = vld [vmem:[#allocation7 + $0x20] sm:$0xff] }
 0x3a5   :  { %v4810_v36 = vsub.f32 %v4765_v15, %v4808_v38  ;;  %v4816_v31 = vsub.f32 %v4777_v41, %v4808_v38  ;;  %v4805_v63 = vmax.f32 %v4803_v16, %v4804_v46  ;;  %5242 = vmatpush.msra.mxu1 %v5241_v0  ;;  %v5125_v46 = vld [vmem:[#allocation7 + $0x70] sm:$0xff] }
 0x3a7   :  { %v4812_v7 = vmul.f32 1.442695, %v4810_v36  ;;  %v4818_v32 = vmul.f32 1.442695, %v4816_v31  ;;  %v4806_v56 = vrot.slane %v4805_v63, 1  ;;  %v10433_v36 = vand.u32 4294901760, %v5125_v46 }
 0x3a8   :  { %v5124_v31 = vld [vmem:[#allocation7 + $0x68] sm:$0xff] }
 0x3a9   :  { %6703 = vpow2.f32 %v4812_v7  ;;  %v4807_v57 = vmax.f32 %v4805_v63, %v4806_v56  ;;  %v10436_v40 = vsub.f32 %v5125_v46, %v10433_v36  ;;  %v10438_v63 = vand.u32 4294901760, %v5124_v31  ;;  %5395 = vmatpush.msra.mxu3 %v10433_v36  ;;  %5199 = vmatpush.msra.mxu0 %v10433_v36  ;;  %v5123_v7 = vld [vmem:[#allocation7 + $0x60] sm:$0xff]  ;;  %v5122_v56 = vld [vmem:[#allocation7 + $0x58] sm:$0xff] }
 0x3aa   :  { %6705 = vpow2.f32 %v4818_v32 }
 0x3ab   :  { %v4809_v3 = vmax.f32 %v4793_v60, %v4807_v57  ;;  %v5245_v32 = vand.u32 4294901760, %v10436_v40  ;;  %5343 = vmatpush.msra.mxu2 %v10436_v40  ;;  %5397 = vmatpush.msra.mxu3 %v10438_v63 }
 0x3ac   :  { %5201 = vmatpush.msra.mxu0 %v10438_v63 }
 0x3ad   :  { %v4811_v1 = vsub.f32 %v4766_v51, %v4809_v3  ;;  %v4817_v9 = vsub.f32 %v4778_v42, %v4809_v3  ;;  %v5246_v52 = vsub.f32 %v10436_v40, %v5245_v32  ;;  %v10459_v3 = vand.u32 4294901760, %v5122_v56  ;;  %v5139_v40 = vld [vmem:[#allocation7 + $0xe0] sm:$0xff] }
 0x3af   :  { %v6704_v45 = vpop.eup %6703  ;;  %v4814_v62 = vmul.f32 1.442695, %v4811_v1  ;;  %v4820_v37 = vmul.f32 1.442695, %v4817_v9  ;;  %v5247_v1 = vand.u32 4294901760, %v5246_v52 }
 0x3b0   :  { %v6706_v2 = vpop.eup %6705  ;;  %v4822_v11 = vsel %vm4779_vm2, %v6704_v45, 0.0 }
 0x3b1   :  { %v4823_v58 = vrot.slane %v4822_v11, 4  ;;  %v4836_v59 = vsel %vm4779_vm2, %v6706_v2, 0.0  ;;  %6707 = vpow2.f32 %v4814_v62  ;;  %v10468_v62 = vsub.f32 %v5122_v56, %v10459_v3  ;;  %5248 = vmatpush.msra.mxu1 %v5247_v1 }
 0x3b2   :  { %v4837_v39 = vrot.slane %v4836_v59, 4  ;;  %6709 = vpow2.f32 %v4820_v37  ;;  %v5121_v37 = vld [vmem:[#allocation7 + $0x50] sm:$0xff] }
 0x3b3   :  { %v4824_v20 = vadd.f32 %v4823_v58, %v4822_v11 }
 0x3b4   :  { %v4838_v8 = vadd.f32 %v4837_v39, %v4836_v59  ;;  %v5263_v59 = vand.u32 4294901760, %v10468_v62  ;;  %v5120_v39 = vld [vmem:[#allocation7 + $0x48] sm:$0xff] }
 0x3b5   :  { %v4825_v43 = vrot.slane %v4824_v20, 2 }
 0x3b6   :  { %v4839_v27 = vrot.slane %v4838_v8, 2 }
 0x3b7   :  { %v6708_v14 = vpop.eup %6707  ;;  %v4826_v44 = vadd.f32 %v4825_v43, %v4824_v20 }
 0x3b8   :  { %v6710_v12 = vpop.eup %6709  ;;  %v4840_v18 = vadd.f32 %v4839_v27, %v4838_v8  ;;  %v4829_v15 = vsel %vm4779_vm2, %v6708_v14, 0.0  ;;  %v10483_v8 = vand.u32 4294901760, %v5120_v39  ;;  %v5264_v27 = vsub.f32 %v10468_v62, %v5263_v59 }
 0x3b9   :  { %v4830_v49 = vrot.slane %v4829_v15, 4  ;;  %v4843_v34 = vsel %vm4779_vm2, %v6710_v12, 0.0  ;;  %v4827_v10 = vrot.slane %v4826_v44, 1 }
 0x3ba   :  { %v4844_v6 = vrot.slane %v4843_v34, 4  ;;  %v4841_v51 = vrot.slane %v4840_v18, 1 }
 0x3bb   :  { %v4831_v25 = vadd.f32 %v4830_v49, %v4829_v15  ;;  %v4828_v48 = vadd.f32 %v4827_v10, %v4826_v44  ;;  %v5265_v15 = vand.u32 4294901760, %v5264_v27  ;;  %v5118_v49 = vld [vmem:[#allocation7 + $0x38] sm:$0xff] }
 0x3bc   :  { %v4845_v41 = vadd.f32 %v4844_v6, %v4843_v34  ;;  %v4842_v50 = vadd.f32 %v4841_v51, %v4840_v18  ;;  %v10507_v51 = vand.u32 4294901760, %v5118_v49 }
 0x3bd   :  { %v4832_v35 = vrot.slane %v4831_v25, 2 }
 0x3be   :  { %v4846_v26 = vrot.slane %v4845_v41, 2  ;;  %v4850_v21 = vadd.f32 %v4842_v50, %v4828_v48  ;;  %v10516_v50 = vsub.f32 %v5118_v49, %v10507_v51 }
 0x3bf   :  { %v4833_v53 = vadd.f32 %v4832_v35, %v4831_v25  ;;  %v5117_v25 = vld [vmem:[#allocation7 + $0x30] sm:$0xff] }
 0x3c0   :  { %v4847_v5 = vadd.f32 %v4846_v26, %v4845_v41  ;;  %6711 = vrcp.f32 %v4850_v21  ;;  %v10520_v35 = vand.u32 4294901760, %v5117_v25  ;;  %v5116_v26 = vld [vmem:[#allocation7 + $0x28] sm:$0xff] }
 0x3c1   :  { %v4834_v22 = vrot.slane %v4833_v53, 1 }
 0x3c2   :  { %v4848_v13 = vrot.slane %v4847_v5, 1 }
 0x3c3   :  { %v4835_v28 = vadd.f32 %v4834_v22, %v4833_v53  ;;  %v10528_v22 = vand.u32 4294901760, %v5116_v26 }
 0x3c4   :  { %v4849_v42 = vadd.f32 %v4848_v13, %v4847_v5  ;;  %v11779_v5 = vand.u32 4294901760, %v10516_v50  ;;  %v10531_v13 = vsub.f32 %v5117_v25, %v10520_v35 }
 0x3c5   :  { %v10539_v0 = vsub.f32 %v5116_v26, %v10528_v22 }
 0x3c6   :  { %v6712_v4 = vpop.eup %6711  ;;  %v4851_v30 = vadd.f32 %v4849_v42, %v4835_v28  ;;  %v5288_v42 = vsub.f32 %v10516_v50, %v11779_v5 }
 0x3c7   :  { %v4856_v55 = vmul.f32 %v6712_v4, %v6706_v2  ;;  %v4854_v33 = vmul.f32 %v6712_v4, %v6704_v45  ;;  %v10472_v2 = vand.u32 4294901760, %v5121_v37  ;;  %v10541_v4 = vand.u32 4294901760, %v5115_v61 }
 0x3c8   :  { %6713 = vrcp.f32 %v4851_v30  ;;  %v11778_v30 = vand.u32 4294901760, %v10531_v13 }
 0x3c9   :  { %4965 = vperm.xlu2 %6690, %v4856_v55   ;;  %4899 = vperm.xlu1 %6689, %v4854_v33   ;;  %v10481_v20 = vsub.f32 %v5121_v37, %v10472_v2  ;;  %v5114_v55 = vld [vmem:[#allocation7 + $0x18] sm:$0xff]  ;;  %v5289_v33 = vand.u32 4294901760, %v5288_v42  ;;  %v5112_v37 = vld [vmem:[#allocation7 + $0x8] sm:$0xff] }
 0x3ca   :  { %v5294_v46 = vsub.f32 %v10531_v13, %v11778_v30  ;;  %v6716_v42 = vld [vmem:[#allocation2 + $0x48] sm:$0xff] }
 0x3cb   :  { %v5269_v44 = vand.u32 4294901760, %v10481_v20 }
 0x3cd   :  { %v5270_v34 = vsub.f32 %v10481_v20, %v5269_v44 }
 0x3ce   :  { %v6714_v29 = vpop.eup %6713 }
 0x3cf   :  { %v4857_v16 = vmul.f32 %v6714_v29, %v6710_v12  ;;  %v4855_v38 = vmul.f32 %v6714_v29, %v6708_v14  ;;  %v5119_v14 = vld [vmem:[#allocation7 + $0x40] sm:$0xff]  ;;  %v10492_v12 = vsub.f32 %v5120_v39, %v10483_v8  ;;  %v5271_v48 = vand.u32 4294901760, %v5270_v34 }
 0x3d0   :  { %v10495_v18 = vand.u32 4294901760, %v5119_v14  ;;  %v11777_v29 = vand.u32 4294901760, %v10539_v0 }
 0x3d1   :  { %4970 = vperm.xlu2 %6690, %v4857_v16   ;;  %4904 = vperm.xlu1 %6689, %v4855_v38   ;;  %v5275_v10 = vand.u32 4294901760, %v10492_v12  ;;  %v10548_v16 = vsub.f32 %v5115_v61, %v10541_v4  ;;  %v10550_v38 = vand.u32 4294901760, %v5114_v55 }
 0x3d2   :  { %v10504_v6 = vsub.f32 %v5119_v14, %v10495_v18  ;;  %v10581_v14 = vand.u32 4294901760, %v5112_v37 }
 0x3d3   :  { %v5276_v54 = vsub.f32 %v10492_v12, %v5275_v10  ;;  %v11775_v56 = vand.u32 4294901760, %v10548_v16  ;;  %v10563_v52 = vsub.f32 %v5114_v55, %v10550_v38 }
 0x3d4   :  { %v11780_v41 = vand.u32 4294901760, %v10504_v6 }
 0x3d5   :  { %v5277_v21 = vand.u32 4294901760, %v5276_v54  ;;  %v5306_v39 = vsub.f32 %v10548_v16, %v11775_v56  ;;  %v6715_v54 = vld [vmem:[#allocation2 + $0x40] sm:$0xff] }
 0x3d6   :  { %v5282_v53 = vsub.f32 %v10504_v6, %v11780_v41 }
 0x3d7   :  { %v5307_v49 = vand.u32 4294901760, %v5306_v39 }
 0x3d8   :  { %v5283_v28 = vand.u32 4294901760, %v5282_v53 }
 0x3d9   :  { %6692 = vset.pattern.permute.xlu1 %v6898_v19  ;;  %v10444_v19 = vsub.f32 %v5124_v31, %v10438_v63  ;;  %v5113_v31 = vld [vmem:[#allocation7 + $0x10] sm:$0xff] }
 0x3da   :  { %5044 = vperm.xlu1 %6692, %v10397_v47   ;;  %v10447_v47 = vand.u32 4294901760, %v5123_v7  ;;  %v10565_v1 = vand.u32 4294901760, %v5113_v31 }
 0x3db   :  { %v5251_v60 = vand.u32 4294901760, %v10444_v19  ;;  %5346 = vmatpush.msra.mxu2 %v10444_v19 }
 0x3dc   :  { %v10456_v57 = vsub.f32 %v5123_v7, %v10447_v47  ;;  %5399 = vmatpush.msra.mxu3 %v10447_v47  ;;  %5203 = vmatpush.msra.mxu0 %v10447_v47  ;;  %v5300_v7 = vsub.f32 %v10539_v0, %v11777_v29  ;;  %v10577_v27 = vsub.f32 %v5113_v31, %v10565_v1 }
 0x3dd   :  { %v5252_v9 = vsub.f32 %v10444_v19, %v5251_v60 }
 0x3de   :  { %v5257_v45 = vand.u32 4294901760, %v10456_v57  ;;  %5349 = vmatpush.msra.mxu2 %v10456_v57  ;;  %5401 = vmatpush.msra.mxu3 %v10459_v3  ;;  %v11772_v25 = vand.u32 4294901760, %v10577_v27 }
 0x3df   :  { %5205 = vmatpush.msra.mxu0 %v10459_v3  ;;  %v5253_v11 = vand.u32 4294901760, %v5252_v9  ;;  %v5295_v9 = vand.u32 4294901760, %v5294_v46 }
 0x3e0   :  { %v5258_v58 = vsub.f32 %v10456_v57, %v5257_v45  ;;  %5352 = vmatpush.msra.mxu2 %v10468_v62  ;;  %5403 = vmatpush.msra.mxu3 %v10472_v2  ;;  %v5318_v61 = vsub.f32 %v10577_v27, %v11772_v25 }
 0x3e1   :  { %5207 = vmatpush.msra.mxu0 %v10472_v2  ;;  %5254 = vmatpush.msra.mxu1 %v5253_v11  ;;  %v10570_v11 = vpop.permute.xlu0 %5039 }
 0x3e2   :  { %v5259_v43 = vand.u32 4294901760, %v5258_v58  ;;  %5355 = vmatpush.msra.mxu2 %v10481_v20  ;;  %5405 = vmatpush.msra.mxu3 %v10483_v8  ;;  %v5301_v58 = vand.u32 4294901760, %v5300_v7  ;;  %v5047_v26 = vmul.f32 %v6715_v54, %v10570_v11  ;;  %v5048_v55 = vmul.f32 %v6716_v42, %v10570_v11  ;;  %v5142_v7 = vld [vmem:[#allocation7 + $0xf8] sm:$0xff] }
 0x3e3   :  { %5209 = vmatpush.msra.mxu0 %v10483_v8  ;;  %v5319_v46 = vand.u32 4294901760, %v5318_v61  ;;  %v5141_v61 = vld [vmem:[#allocation7 + $0xf0] sm:$0xff] }
 0x3e4   :  { %5260 = vmatpush.msra.mxu1 %v5259_v43  ;;  %5358 = vmatpush.msra.mxu2 %v10492_v12  ;;  %v11773_v43 = vand.u32 4294901760, %v10563_v52 }
 0x3e5   :  { %5407 = vmatpush.msra.mxu3 %v10495_v18  ;;  %5211 = vmatpush.msra.mxu0 %v10495_v18 }
 0x3e6   :  { %5266 = vmatpush.msra.mxu1 %v5265_v15  ;;  %5361 = vmatpush.msra.mxu2 %v10504_v6  ;;  %v5111_v15 = vld [vmem:[#allocation7] sm:$0xff]  ;;  %v5312_v34 = vsub.f32 %v10563_v52, %v11773_v43 }
 0x3e7   :  { %5409 = vmatpush.msra.mxu3 %v10507_v51  ;;  %5213 = vmatpush.msra.mxu0 %v10507_v51 }
 0x3e8   :  { %5272 = vmatpush.msra.mxu1 %v5271_v48  ;;  %5364 = vmatpush.msra.mxu2 %v10516_v50  ;;  %v10587_v48 = vand.u32 4294901760, %v5111_v15  ;;  %v5313_v53 = vand.u32 4294901760, %v5312_v34  ;;  %v5061_v34 = vrot.slane %v5048_v55, 4 }
 0x3e9   :  { %5411 = vmatpush.msra.mxu3 %v10520_v35  ;;  %5215 = vmatpush.msra.mxu0 %v10520_v35 }
 0x3ea   :  { %5278 = vmatpush.msra.mxu1 %v5277_v21  ;;  %5367 = vmatpush.msra.mxu2 %v10531_v13  ;;  %v10593_v21 = vsub.f32 %v5112_v37, %v10581_v14 }
 0x3eb   :  { %5413 = vmatpush.msra.mxu3 %v10528_v22  ;;  %5217 = vmatpush.msra.mxu0 %v10528_v22 }
 0x3ec   :  { %5284 = vmatpush.msra.mxu1 %v5283_v28  ;;  %5370 = vmatpush.msra.mxu2 %v10539_v0  ;;  %v10600_v28 = vsub.f32 %v5111_v15, %v10587_v48  ;;  %v10615_v15 = vand.u32 4294901760, %v5142_v7 }
 0x3ed   :  { %5415 = vmatpush.msra.mxu3 %v10541_v4  ;;  %5219 = vmatpush.msra.mxu0 %v10541_v4 }
 0x3ee   :  { %5290 = vmatpush.msra.mxu1 %v5289_v33  ;;  %5373 = vmatpush.msra.mxu2 %v10548_v16  ;;  %v11769_v33 = vand.u32 4294901760, %v10593_v21  ;;  %v11770_v31 = vand.u32 4294901760, %v10600_v28 }
 0x3ef   :  { %5417 = vmatpush.msra.mxu3 %v10550_v38  ;;  %5221 = vmatpush.msra.mxu0 %v10550_v38 }
 0x3f0   :  { %5296 = vmatpush.msra.mxu1 %v5295_v9  ;;  %5376 = vmatpush.msra.mxu2 %v10563_v52  ;;  %v6717_v9 = vld [vmem:[#allocation2 + $0x58] sm:$0xff]  ;;  %v5324_v39 = vsub.f32 %v10593_v21, %v11769_v33 }
 0x3f1   :  { %5419 = vmatpush.msra.mxu3 %v10565_v1  ;;  %5223 = vmatpush.msra.mxu0 %v10565_v1  ;;  %v5050_v37 = vmul.f32 %v6717_v9, %v10570_v11  ;;  %v10626_v9 = vand.u32 4294901760, %v5141_v61 }
 0x3f2   :  { %5302 = vmatpush.msra.mxu1 %v5301_v58  ;;  %5379 = vmatpush.msra.mxu2 %v10577_v27  ;;  %v5055_v58 = vrot.slane %v5047_v26, 4  ;;  %v5325_v54 = vand.u32 4294901760, %v5324_v39  ;;  %v5062_v39 = vadd.f32 %v5061_v34, %v5048_v55  ;;  %v6718_v55 = vld [vmem:[#allocation2 + $0x20] sm:$0xff] }
 0x3f3   :  { %5421 = vmatpush.msra.mxu3 %v10581_v14  ;;  %5225 = vmatpush.msra.mxu0 %v10581_v14 }
 0x3f4   :  { %5308 = vmatpush.msra.mxu1 %v5307_v49  ;;  %5382 = vmatpush.msra.mxu2 %v10593_v21  ;;  %v5330_v49 = vsub.f32 %v10600_v28, %v11770_v31  ;;  %v5056_v33 = vadd.f32 %v5055_v58, %v5047_v26  ;;  %v5073_v31 = vrot.slane %v5050_v37, 4  ;;  %v5063_v57 = vrot.slane %v5062_v39, 2 }
 0x3f5   :  { %5423 = vmatpush.msra.mxu3 %v10587_v48  ;;  %5227 = vmatpush.msra.mxu0 %v10587_v48 }
 0x3f6   :  { %5314 = vmatpush.msra.mxu1 %v5313_v53  ;;  %5385 = vmatpush.msra.mxu2 %v10600_v28  ;;  %v10624_v53 = vsub.f32 %v5142_v7, %v10615_v15  ;;  %v5331_v42 = vand.u32 4294901760, %v5330_v49  ;;  %v10635_v7 = vsub.f32 %v5141_v61, %v10626_v9  ;;  %v10645_v49 = vand.u32 4294901760, %v5139_v40  ;;  %v6719_v61 = vld [vmem:[#allocation2 + $0x28] sm:$0xff] }
 0x3f7   :  { %5434 = vmatpush.msrb.mxu0 %v5239_v23  ;;  %v5057_v19 = vrot.slane %v5056_v33, 2 }
 0x3f8   :  { %5320 = vmatpush.msra.mxu1 %v5319_v46  ;;  %5538 = vmatpush.msrb.mxu2 %v10615_v15  ;;  %v11771_v23 = vand.u32 4294901760, %v10624_v53  ;;  %v10632_v46 = vand.u32 4294901760, %v5140_v24  ;;  %v11774_v58 = vand.u32 4294901760, %v10635_v7 }
 0x3f9   :  { %5438 = vmatpush.msrb.mxu0 %v5245_v32 }
 0x3fa   :  { %5326 = vmatpush.msra.mxu1 %v5325_v54  ;;  %5540 = vmatpush.msrb.mxu2 %v10626_v9  ;;  %v5581_v26 = vsub.f32 %v10624_v53, %v11771_v23  ;;  %v10648_v54 = vsub.f32 %v5140_v24, %v10632_v46  ;;  %v6720_v23 = vld [vmem:[#allocation2 + $0x38] sm:$0xff]  ;;  %v5587_v24 = vsub.f32 %v10635_v7, %v11774_v58 }
 0x3fb   :  { %5442 = vmatpush.msrb.mxu0 %v5251_v60  ;;  %v5074_v60 = vadd.f32 %v5073_v31, %v5050_v37  ;;  %v5058_v58 = vadd.f32 %v5057_v19, %v5056_v33  ;;  %v6722_v33 = vld [vmem:[#allocation2 + $0x30] sm:$0xff] }
 0x3fc   :  { %5332 = vmatpush.msra.mxu1 %v5331_v42  ;;  %5542 = vmatpush.msrb.mxu2 %v10632_v46  ;;  %v5582_v43 = vand.u32 4294901760, %v5581_v26  ;;  %v11776_v31 = vand.u32 4294901760, %v10648_v54  ;;  %v5137_v26 = vld [vmem:[#allocation7 + $0xd0] sm:$0xff] }
 0x3fd   :  { %5446 = vmatpush.msrb.mxu0 %v5257_v45  ;;  %v5588_v45 = vand.u32 4294901760, %v5587_v24  ;;  %v5075_v56 = vrot.slane %v5074_v60, 2  ;;  %v5136_v24 = vld [vmem:[#allocation7 + $0xc8] sm:$0xff] }
 0x3fe   :  { %5501 = vmatpush.msrb.mxu1 %v10419_v17  ;;  %v5138_v17 = vld [vmem:[#allocation7 + $0xd8] sm:$0xff]  ;;  %5544 = vmatpush.msrb.mxu2 %v10645_v49  ;;  %v10682_v30 = vand.u32 4294901760, %v5136_v24 }
 0x3ff   :  { %v10658_v37 = vand.u32 4294901760, %v5138_v17  ;;  %5450 = vmatpush.msrb.mxu0 %v5263_v59  ;;  %5583 = vmatpush.msrb.mxu3 %v5582_v43 }
 0x400   :  { %5503 = vmatpush.msrb.mxu1 %v10433_v36  ;;  %v5593_v36 = vsub.f32 %v10648_v54, %v11776_v31  ;;  %12133 = vst [vmem:[#allocation24_spill] sm:$0xff] %v10682_v30 }
 0x401   :  { %5546 = vmatpush.msrb.mxu2 %v10658_v37  ;;  %5589 = vmatpush.msrb.mxu3 %v5588_v45  ;;  %v10676_v29 = vsub.f32 %v5138_v17, %v10658_v37 }
 0x402   :  { %5505 = vmatpush.msrb.mxu1 %v10438_v63  ;;  %v5594_v43 = vand.u32 4294901760, %v5593_v36  ;;  %5454 = vmatpush.msrb.mxu0 %v5269_v44  ;;  %v5076_v36 = vadd.f32 %v5075_v56, %v5074_v60  ;;  %v6724_v60 = vld [vmem:[#allocation2 + $0x88] sm:$0xff] }
 0x404   :  { %5507 = vmatpush.msrb.mxu1 %v10447_v47  ;;  %5595 = vmatpush.msrb.mxu3 %v5594_v43  ;;  %v5059_v47 = vrot.slane %v5058_v58, 1 }
 0x405   :  { %5458 = vmatpush.msrb.mxu0 %v5275_v10 }
 0x406   :  { %5509 = vmatpush.msrb.mxu1 %v10459_v3  ;;  %v11784_v3 = vand.u32 4294901760, %v10676_v29 }
 0x408   :  { %5511 = vmatpush.msrb.mxu1 %v10472_v2 }
 0x40a   :  { %5513 = vmatpush.msrb.mxu1 %v10483_v8  ;;  %v5605_v8 = vsub.f32 %v10676_v29, %v11784_v3  ;;  %v6729_v3 = vld [vmem:[#allocation2 + $0x18] sm:$0xff] }
 0x40c   :  { %5515 = vmatpush.msrb.mxu1 %v10495_v18  ;;  %v5134_v18 = vld [vmem:[#allocation7 + $0xb8] sm:$0xff] }
 0x40e   :  { %5517 = vmatpush.msrb.mxu1 %v10507_v51 }
 0x410   :  { %5519 = vmatpush.msrb.mxu1 %v10520_v35 }
 0x412   :  { %5521 = vmatpush.msrb.mxu1 %v10528_v22 }
 0x414   :  { %5523 = vmatpush.msrb.mxu1 %v10541_v4 }
 0x416   :  { %5525 = vmatpush.msrb.mxu1 %v10550_v38 }
 0x418   :  { %5527 = vmatpush.msrb.mxu1 %v10565_v1 }
 0x41a   :  { %5529 = vmatpush.msrb.mxu1 %v10581_v14 }
 0x41c   :  { %5531 = vmatpush.msrb.mxu1 %v10587_v48 }
 0x423   :  { %v4966_v32 = vpop.permute.xlu2 %4965 }
 0x424   :  { %v4973_v34 = vmul.f32 %v6718_v55, %v4966_v32  ;;  %v4974_v42 = vmul.f32 %v6719_v61, %v4966_v32  ;;  %v4976_v25 = vmul.f32 %v6720_v23, %v4966_v32  ;;  %v10667_v23 = vsub.f32 %v5139_v40, %v10645_v49  ;;  %v6721_v55 = vld [vmem:[#allocation2 + $0x50] sm:$0xff] }
 0x425   :  { %v5049_v61 = vmul.f32 %v6721_v55, %v10570_v11  ;;  %v10673_v40 = vand.u32 4294901760, %v5137_v26  ;;  %v5064_v11 = vadd.f32 %v5063_v57, %v5062_v39  ;;  %v4975_v19 = vmul.f32 %v6722_v33, %v4966_v32  ;;  %v6723_v32 = vld [vmem:[#allocation2 + $0x80] sm:$0xff] }
 0x426   :  { %v4981_v62 = vrot.slane %v4973_v34, 4  ;;  %v4987_v59 = vrot.slane %v4974_v42, 4  ;;  %v4999_v63 = vrot.slane %v4976_v25, 4  ;;  %v11785_v31 = vand.u32 4294901760, %v10667_v23 }
 0x427   :  { %v5067_v45 = vrot.slane %v5049_v61, 4  ;;  %5548 = vmatpush.msrb.mxu2 %v10673_v40  ;;  %v10691_v44 = vsub.f32 %v5137_v26, %v10673_v40  ;;  %v5065_v56 = vrot.slane %v5064_v11, 1  ;;  %v4993_v39 = vrot.slane %v4975_v19, 4 }
 0x428   :  { %v4982_v5 = vadd.f32 %v4981_v62, %v4973_v34  ;;  %v4988_v17 = vadd.f32 %v4987_v59, %v4974_v42  ;;  %v5000_v41 = vadd.f32 %v4999_v63, %v4976_v25  ;;  %v5599_v20 = vsub.f32 %v10667_v23, %v11785_v31  ;;  %v5135_v34 = vld [vmem:[#allocation7 + $0xc0] sm:$0xff]  ;;  %v6725_v63 = vld [vmem:[#allocation2 + $0x98] sm:$0xff] }
 0x429   :  { %5550 = vmatpush.msrb.mxu2 %v10682_v30  ;;  %12134 = vst [vmem:[#allocation32_spill] sm:$0xff] %v10691_v44  ;;  %v10696_v42 = vadd.f32 %v5059_v47, %v5058_v58  ;;  %v10698_v57 = vadd.f32 %v5067_v45, %v5049_v61  ;;  %v5077_v62 = vrot.slane %v5076_v36, 1  ;;  %v12135_v26 = vand.u32 4294901760, %v10504_v6 }
 0x42a   :  { %v4983_v59 = vrot.slane %v4982_v5, 2  ;;  %v4989_v12 = vrot.slane %v4988_v17, 2  ;;  %v5001_v10 = vrot.slane %v5000_v41, 2  ;;  %v5600_v33 = vand.u32 4294901760, %v5599_v20 }
 0x42b   :  { %v4971_v55 = vpop.permute.xlu2 %4970  ;;  %5462 = vmatpush.msrb.mxu0 %v12135_v26  ;;  %v11783_v58 = vand.u32 4294901760, %v10691_v44  ;;  %v10707_v61 = vand.u32 4294901760, %v5135_v34  ;;  %v12137_v47 = vand.u32 4294901760, %v10516_v50  ;;  %v10711_v6 = vadd.f32 %v5065_v56, %v5064_v11 }
 0x42c   :  { %v4977_v25 = vmul.f32 %v6723_v32, %v4971_v55  ;;  %v4978_v2 = vmul.f32 %v6724_v60, %v4971_v55  ;;  %v4980_v43 = vmul.f32 %v6725_v63, %v4971_v55  ;;  %v10713_v45 = vadd.f32 %v4993_v39, %v4975_v19  ;;  %5601 = vmatpush.msrb.mxu3 %v5600_v33 }
 0x42d   :  { %12136 = vst [vmem:[#allocation28_spill] sm:$0xff] %v10707_v61  ;;  %5466 = vmatpush.msrb.mxu0 %v12137_v47  ;;  %v10716_v20 = vadd.f32 %v5077_v62, %v5076_v36  ;;  %v5606_v26 = vand.u32 4294901760, %v5605_v8  ;;  %v5611_v63 = vsub.f32 %v10691_v44, %v11783_v58  ;;  %5552 = vmatpush.msrb.mxu2 %v10707_v61  ;;  %v5133_v36 = vld [vmem:[#allocation7 + $0xb0] sm:$0xff]  ;;  %v10733_v33 = vand.u32 4294901760, %v5134_v18 }
 0x42e   :  { %v5005_v32 = vrot.slane %v4977_v25, 4  ;;  %v5011_v60 = vrot.slane %v4978_v2, 4  ;;  %v10723_v50 = vsub.f32 %v5136_v24, %v10682_v30  ;;  %v10725_v11 = vadd.f32 %v4983_v59, %v4982_v5 }
 0x42f   :  { %v10727_v19 = vadd.f32 %v4989_v12, %v4988_v17  ;;  %v10729_v56 = vadd.f32 %v5001_v10, %v5000_v41  ;;  %v5023_v51 = vrot.slane %v4980_v43, 4  ;;  %5607 = vmatpush.msrb.mxu3 %v5606_v26  ;;  %v5612_v39 = vand.u32 4294901760, %v5611_v63  ;;  %12139 = vst [vmem:[#allocation33_spill] sm:$0xff] %v10733_v33  ;;  %v6726_v41 = vld [vmem:[#allocation2 + $0x90] sm:$0xff]  ;;  %v5132_v12 = vld [vmem:[#allocation7 + $0xa8] sm:$0xff]  ;;  %5554 = vmatpush.msrb.mxu2 %v10733_v33 }
 0x430   :  { %12138 = vst [vmem:[#allocation34_spill] sm:$0xff] %v10723_v50  ;;  %v11782_v62 = vand.u32 4294901760, %v10723_v50  ;;  %v10736_v8 = vsub.f32 %v5135_v34, %v10707_v61  ;;  %v12141_v5 = vand.u32 4294901760, %v10531_v13  ;;  %v4979_v17 = vmul.f32 %v6726_v41, %v4971_v55 }
 0x431   :  { %v10741_v59 = vadd.f32 %v5005_v32, %v4977_v25  ;;  %v10743_v35 = vadd.f32 %v5011_v60, %v4978_v2  ;;  %5613 = vmatpush.msrb.mxu3 %v5612_v39  ;;  %v10751_v10 = vand.u32 4294901760, %v5133_v36  ;;  %v10754_v55 = vsub.f32 %v5134_v18, %v10733_v33  ;;  %v10762_v32 = vld [vmem:[#allocation7 + $0xa0] sm:$0xff]  ;;  %v10794_v2 = vld [vmem:[#allocation7 + $0x90] sm:$0xff] }
 0x432   :  { %12140 = vst [vmem:[#allocation35_spill] sm:$0xff] %v10736_v8  ;;  %5470 = vmatpush.msrb.mxu0 %v12141_v5  ;;  %v5617_v34 = vsub.f32 %v10723_v50, %v11782_v62  ;;  %v11781_v13 = vand.u32 4294901760, %v10736_v8  ;;  %v10759_v47 = vadd.f32 %v5023_v51, %v4980_v43  ;;  %v10769_v63 = vand.u32 4294901760, %v5132_v12  ;;  %v6728_v62 = vld [vmem:[#allocation2 + $0x8] sm:$0xff] }
 0x433   :  { %12142 = vst [vmem:[#allocation30_spill] sm:$0xff] %v10751_v10  ;;  %5556 = vmatpush.msrb.mxu2 %v10751_v10  ;;  %v11786_v18 = vand.u32 4294901760, %v10754_v55  ;;  %v12145_v39 = vand.u32 4294901760, %v10539_v0  ;;  %v5007_v43 = vrot.slane %v10741_v59, 2  ;;  %v5013_v4 = vrot.slane %v10743_v35, 2 }
 0x434   :  { %12143 = vst [vmem:[#allocation38_spill] sm:$0xff] %v10754_v55  ;;  %v5618_v60 = vand.u32 4294901760, %v5617_v34  ;;  %v5623_v26 = vsub.f32 %v10736_v8, %v11781_v13  ;;  %v5017_v51 = vrot.slane %v4979_v17, 4  ;;  %v10776_v41 = vsub.f32 %v5133_v36, %v10751_v10  ;;  %v6727_v34 = vld [vmem:[#allocation2] sm:$0xff] }
 0x435   :  { %12144 = vst [vmem:[#allocation36_spill] sm:$0xff] %v10769_v63  ;;  %5474 = vmatpush.msrb.mxu0 %v12145_v39  ;;  %v10780_v0 = vand.u32 4294901760, %v10762_v32  ;;  %v10782_v39 = vld [vmem:[#allocation7 + $0x98] sm:$0xff]  ;;  %v5629_v36 = vsub.f32 %v10754_v55, %v11786_v18  ;;  %5558 = vmatpush.msrb.mxu2 %v10769_v63 }
 0x436   :  { %12146 = vst [vmem:[#allocation39_spill] sm:$0xff] %v10776_v41  ;;  %5619 = vmatpush.msrb.mxu3 %v5618_v60  ;;  %v5624_v24 = vand.u32 4294901760, %v5623_v26  ;;  %v11795_v38 = vand.u32 4294901760, %v10776_v41  ;;  %v12149_v26 = vand.u32 4294901760, %v10548_v16  ;;  %v6730_v16 = vld [vmem:[#allocation2 + $0x10] sm:$0xff] }
 0x437   :  { %12147 = vst [vmem:[#allocation37_spill] sm:$0xff] %v10780_v0  ;;  %v5630_v18 = vand.u32 4294901760, %v5629_v36  ;;  %5560 = vmatpush.msrb.mxu2 %v10780_v0 }
 0x438   :  { %5478 = vmatpush.msrb.mxu0 %v12149_v26  ;;  %5625 = vmatpush.msrb.mxu3 %v5624_v24  ;;  %v5635_v25 = vsub.f32 %v10776_v41, %v11795_v38  ;;  %v10812_v38 = vand.u32 4294901760, %v10794_v2  ;;  %v10814_v41 = vld [vmem:[#allocation7 + $0x88] sm:$0xff] }
 0x43a   :  { %5631 = vmatpush.msrb.mxu3 %v5630_v18  ;;  %v5636_v36 = vand.u32 4294901760, %v5635_v25  ;;  %v12151_v25 = vrot.slane %v10725_v11, 1  ;;  %v12152_v18 = vrot.slane %v10727_v19, 1 }
 0x43b   :  { %v4900_v5 = vpop.permute.xlu1 %4899 }
 0x43c   :  { %v4907_v13 = vmul.f32 %v6727_v34, %v4900_v5  ;;  %v4908_v58 = vmul.f32 %v6728_v62, %v4900_v5  ;;  %v4910_v31 = vmul.f32 %v6729_v3, %v4900_v5  ;;  %v10790_v34 = vsub.f32 %v5132_v12, %v10769_v63  ;;  %5637 = vmatpush.msrb.mxu3 %v5636_v36 }
 0x43d   :  { %v5025_v3 = vrot.slane %v10759_v47, 2  ;;  %v10804_v12 = vand.u32 4294901760, %v10782_v39  ;;  %v5018_v63 = vadd.f32 %v5017_v51, %v4979_v17  ;;  %v4909_v24 = vmul.f32 %v6730_v16, %v4900_v5  ;;  %v6732_v16 = vld [vmem:[#allocation2 + $0x68] sm:$0xff] }
 0x43e   :  { %12148 = vst [vmem:[#allocation40_spill] sm:$0xff] %v10790_v34  ;;  %v4915_v62 = vrot.slane %v4907_v13, 4  ;;  %v4921_v60 = vrot.slane %v4908_v58, 4  ;;  %v4933_v22 = vrot.slane %v4910_v31, 4  ;;  %v11798_v1 = vand.u32 4294901760, %v10790_v34 }
 0x43f   :  { %5562 = vmatpush.msrb.mxu2 %v10804_v12  ;;  %v10829_v51 = vadd.f32 %v12152_v18, %v10727_v19  ;;  %v10834_v5 = vand.u32 4294901760, %v10814_v41 }
 0x440   :  { %v4916_v55 = vadd.f32 %v4915_v62, %v4907_v13  ;;  %v4922_v10 = vadd.f32 %v4921_v60, %v4908_v58  ;;  %v4934_v8 = vadd.f32 %v4933_v22, %v4910_v31  ;;  %v5641_v26 = vsub.f32 %v10790_v34, %v11798_v1  ;;  %v6731_v60 = vld [vmem:[#allocation2 + $0x60] sm:$0xff] }
 0x441   :  { %v5008_v58 = vadd.f32 %v5007_v43, %v10741_v59  ;;  %v5014_v31 = vadd.f32 %v5013_v4, %v10743_v35  ;;  %v12150_v13 = vand.u32 4294901760, %v10563_v52  ;;  %v10824_v22 = vadd.f32 %v12151_v25, %v10725_v11  ;;  %5564 = vmatpush.msrb.mxu2 %v10812_v38 }
 0x442   :  { %v4917_v14 = vrot.slane %v4916_v55, 2  ;;  %v4923_v17 = vrot.slane %v4922_v10, 2  ;;  %v5026_v59 = vadd.f32 %v5025_v3, %v10759_v47  ;;  %v5642_v43 = vand.u32 4294901760, %v5641_v26  ;;  %v6733_v47 = vld [vmem:[#allocation2 + $0x78] sm:$0xff] }
 0x443   :  { %5482 = vmatpush.msrb.mxu0 %v12150_v13  ;;  %v4905_v35 = vpop.permute.xlu1 %4904  ;;  %v4935_v4 = vrot.slane %v4934_v8, 2  ;;  %v12153_v11 = vand.u32 4294901760, %v10577_v27  ;;  %v4927_v62 = vrot.slane %v4909_v24, 4  ;;  %v5009_v36 = vrot.slane %v5008_v58, 1  ;;  %5566 = vmatpush.msrb.mxu2 %v10834_v5 }
 0x444   :  { %v4918_v48 = vadd.f32 %v4917_v14, %v4916_v55  ;;  %v4924_v52 = vadd.f32 %v4923_v17, %v4922_v10  ;;  %v4911_v19 = vmul.f32 %v6731_v60, %v4905_v35  ;;  %v4912_v13 = vmul.f32 %v6732_v16, %v4905_v35  ;;  %5643 = vmatpush.msrb.mxu3 %v5642_v43  ;;  %v6734_v55 = vld [vmem:[#allocation2 + $0x70] sm:$0xff] }
 0x445   :  { %5486 = vmatpush.msrb.mxu0 %v12153_v11  ;;  %v4914_v3 = vmul.f32 %v6733_v47, %v4905_v35  ;;  %v5015_v26 = vrot.slane %v5014_v31, 1  ;;  %v5019_v25 = vrot.slane %v5018_v63, 2  ;;  %v4913_v10 = vmul.f32 %v6734_v55, %v4905_v35 }
 0x446   :  { %v12154_v14 = vand.u32 4294901760, %v10593_v21  ;;  %v4939_v27 = vrot.slane %v4911_v19, 4  ;;  %v4945_v17 = vrot.slane %v4912_v13, 4  ;;  %v10843_v11 = vsub.f32 %v10762_v32, %v10780_v0 }
 0x447   :  { %v4957_v18 = vrot.slane %v4914_v3, 4  ;;  %v5027_v60 = vrot.slane %v5026_v59, 1  ;;  %v4919_v16 = vrot.slane %v4918_v48, 1  ;;  %v4925_v43 = vrot.slane %v4924_v52, 1 }
 0x448   :  { %5490 = vmatpush.msrb.mxu0 %v12154_v14  ;;  %v4936_v47 = vadd.f32 %v4935_v4, %v4934_v8  ;;  %v12155_v1 = vand.u32 4294901760, %v10600_v28  ;;  %v4928_v35 = vadd.f32 %v4927_v62, %v4909_v24  ;;  %v4940_v55 = vadd.f32 %v4939_v27, %v4911_v19 }
 0x449   :  { %v4946_v34 = vadd.f32 %v4945_v17, %v4912_v13  ;;  %v4958_v33 = vadd.f32 %v4957_v18, %v4914_v3  ;;  %v12156_v21 = vrot.slane %v10729_v56, 1  ;;  %v10850_v50 = vadd.f32 %v5009_v36, %v5008_v58  ;;  %v6736_v17 = vld [vmem:[#allocation2 + $0xa8] sm:$0xff] }
 0x44a   :  { %5494 = vmatpush.msrb.mxu0 %v12155_v1  ;;  %v10852_v61 = vadd.f32 %v5019_v25, %v5018_v63  ;;  %v4951_v32 = vrot.slane %v4913_v10, 4  ;;  %v4941_v0 = vrot.slane %v4940_v55, 2  ;;  %v5646_v8 = vand.u32 4294901760, %v10843_v11  ;;  %v6735_v25 = vld [vmem:[#allocation2 + $0xa0] sm:$0xff] }
 0x44b   :  { %v5004_v14 = vadd.f32 %v12156_v21, %v10729_v56  ;;  %v4947_v44 = vrot.slane %v4946_v34, 2  ;;  %v4959_v30 = vrot.slane %v4958_v33, 2  ;;  %v10855_v28 = vadd.f32 %v5015_v26, %v5014_v31  ;;  %v6737_v26 = vld [vmem:[#allocation2 + $0xb0] sm:$0xff] }
 0x44c   :  { %v4920_v1 = vadd.f32 %v4919_v16, %v4918_v48  ;;  %v4926_v24 = vadd.f32 %v4925_v43, %v4924_v52  ;;  %v4937_v4 = vrot.slane %v4936_v47, 1  ;;  %v5045_v62 = vpop.permute.xlu1 %5044  ;;  %v10857_v19 = vadd.f32 %v5027_v60, %v5026_v59  ;;  %v6738_v52 = vld [vmem:[#allocation2 + $0xb8] sm:$0xff] }
 0x44d   :  { %v4929_v13 = vrot.slane %v4928_v35, 2  ;;  %v4942_v56 = vadd.f32 %v4941_v0, %v4940_v55  ;;  %v10861_v63 = vsub.f32 %v10782_v39, %v10804_v12  ;;  %v4948_v58 = vadd.f32 %v4947_v44, %v4946_v34 }
 0x44e   :  { %v4952_v3 = vadd.f32 %v4951_v32, %v4913_v10  ;;  %v4960_v36 = vadd.f32 %v4959_v30, %v4958_v33  ;;  %v5051_v27 = vmul.f32 %v6735_v25, %v5045_v62  ;;  %v5052_v31 = vmul.f32 %v6736_v17, %v5045_v62 }
 0x44f   :  { %v5053_v48 = vmul.f32 %v6737_v26, %v5045_v62  ;;  %v5054_v18 = vmul.f32 %v6738_v52, %v5045_v62  ;;  %v5647_v59 = vsub.f32 %v10843_v11, %v5646_v8  ;;  %v4938_v0 = vadd.f32 %v4937_v4, %v4936_v47 }
 0x450   :  { %v10867_v60 = vadd.f32 %v10824_v22, %v4920_v1  ;;  %v10870_v44 = vadd.f32 %v10829_v51, %v4926_v24  ;;  %v5079_v30 = vrot.slane %v5051_v27, 4  ;;  %v4943_v33 = vrot.slane %v4942_v56, 1 }
 0x451   :  { %v5085_v39 = vrot.slane %v5052_v31, 4  ;;  %v5097_v34 = vrot.slane %v5054_v18, 4  ;;  %v5652_v10 = vand.u32 4294901760, %v10861_v63  ;;  %v4949_v16 = vrot.slane %v4948_v58, 1 }
 0x452   :  { %v4953_v43 = vrot.slane %v4952_v3, 2  ;;  %v4961_v55 = vrot.slane %v4960_v36, 1  ;;  %v5080_v21 = vadd.f32 %v5079_v30, %v5051_v27  ;;  %v10873_v32 = vadd.f32 %v4929_v13, %v4928_v35  ;;  %v5127_v27 = vld [vmem:[#allocation7 + $0x80] sm:$0xff] }
 0x453   :  { %v5086_v62 = vadd.f32 %v5085_v39, %v5052_v31  ;;  %v5091_v47 = vrot.slane %v5053_v48, 4  ;;  %v5098_v4 = vadd.f32 %v5097_v34, %v5054_v18  ;;  %v10875_v22 = vadd.f32 %v5004_v14, %v4938_v0 }
 0x454   :  { %v5103_v51 = vadd.f32 %v10696_v42, %v10867_v60  ;;  %v5104_v1 = vadd.f32 %v10711_v6, %v10870_v44  ;;  %v5081_v24 = vrot.slane %v5080_v21, 2  ;;  %v4944_v25 = vadd.f32 %v4943_v33, %v4942_v56 }
 0x455   :  { %v5087_v17 = vrot.slane %v5086_v62, 2  ;;  %v5099_v26 = vrot.slane %v5098_v4, 2  ;;  %v5648_v52 = vand.u32 4294901760, %v5647_v59  ;;  %v4950_v35 = vadd.f32 %v4949_v16, %v4948_v58 }
 0x456   :  { %v4954_v13 = vadd.f32 %v4953_v43, %v4952_v3  ;;  %v4962_v31 = vadd.f32 %v4961_v55, %v4960_v36  ;;  %v5082_v30 = vadd.f32 %v5081_v24, %v5080_v21  ;;  %v5092_v14 = vadd.f32 %v5091_v47, %v5053_v48 }
 0x457   :  { %v5088_v18 = vadd.f32 %v5087_v17, %v5086_v62  ;;  %v5100_v0 = vadd.f32 %v5099_v26, %v5098_v4  ;;  %5649 = vmatpush.msrb.mxu3 %v5648_v52  ;;  %v5653_v39 = vsub.f32 %v10861_v63, %v5652_v10  ;;  %v10886_v56 = vsub.f32 %v10794_v2, %v10812_v38 }
 0x458   :  { %v5083_v34 = vrot.slane %v5082_v30, 1  ;;  %v10888_v33 = vand.u32 4294901760, %v5127_v27  ;;  %v10892_v58 = vsub.f32 %v10814_v41, %v10834_v5  ;;  %v10895_v3 = vadd.f32 %v10850_v50, %v4944_v25 }
 0x459   :  { %v5089_v36 = vrot.slane %v5088_v18, 1  ;;  %v5101_v48 = vrot.slane %v5100_v0, 1  ;;  %v5654_v59 = vand.u32 4294901760, %v5653_v39  ;;  %v5658_v43 = vand.u32 4294901760, %v10886_v56 }
 0x45a   :  { %v10897_v16 = vadd.f32 %v5083_v34, %v5082_v30  ;;  %5568 = vmatpush.msrb.mxu2 %v10888_v33  ;;  %v11813_v2 = vand.u32 4294901760, %v10892_v58  ;;  %v10903_v55 = vsub.f32 %v5127_v27, %v10888_v33  ;;  %v10906_v41 = vadd.f32 %v10855_v28, %v4950_v35 }
 0x45b   :  { %v10909_v50 = vadd.f32 %v10857_v19, %v4962_v31  ;;  %v10911_v21 = vadd.f32 %v5089_v36, %v5088_v18  ;;  %v10913_v62 = vadd.f32 %v5101_v48, %v5100_v0  ;;  %5655 = vmatpush.msrb.mxu3 %v5654_v59  ;;  %v5093_v47 = vrot.slane %v5092_v14, 2 }
 0x45c   :  { %v5107_v4 = vadd.f32 %v10897_v16, %v10895_v3  ;;  %v5659_v24 = vsub.f32 %v10886_v56, %v5658_v43  ;;  %v5665_v28 = vsub.f32 %v10892_v58, %v11813_v2  ;;  %v5106_v19 = vadd.f32 %v10716_v20, %v10875_v22 }
 0x45d   :  { %v5108_v25 = vadd.f32 %v10911_v21, %v10906_v41  ;;  %v5110_v17 = vadd.f32 %v10913_v62, %v10909_v50  ;;  %v5670_v26 = vand.u32 4294901760, %v10903_v55  ;;  %v5069_v52 = vrot.slane %v10698_v57, 2 }
 0x45e   :  { %v12157_v27 = vrot.slane %v10713_v45, 2  ;;  %v5660_v31 = vand.u32 4294901760, %v5659_v24  ;;  %v5188_v30 = vsel %vm5187_vm6, %v5107_v4, %v5103_v51  ;;  %v4955_v18 = vrot.slane %v4954_v13, 1 }
 0x45f   :  { %v5189_v0 = vsel %vm5187_vm6, %v5108_v25, %v5104_v1  ;;  %v10937_v39 = vsel %vm5187_vm6, %v5110_v17, %v5106_v19  ;;  %v10939_v34 = vand.u32 4294901760, %v5188_v30  ;;  %v5094_v36 = vadd.f32 %v5093_v47, %v5092_v14 }
 0x460   :  { %v4996_v35 = vadd.f32 %v12157_v27, %v10713_v45  ;;  %v10941_v48 = vand.u32 4294901760, %v5189_v0  ;;  %5661 = vmatpush.msrb.mxu3 %v5660_v31  ;;  %v5666_v59 = vand.u32 4294901760, %v5665_v28  ;;  %v5021_v2 = vrot.slane %v10852_v61, 1 }
 0x461   :  { %v4931_v45 = vrot.slane %v10873_v32, 1  ;;  %5334 = vmatmul.f32.vlgmr.msra.gmra.mxu1 %v10939_v34  ;;  %v5229_v51 = vsub.f32 %v5188_v30, %v10939_v34  ;;  %v5671_v1 = vsub.f32 %v10903_v55, %v5670_v26  ;;  %v5070_v4 = vadd.f32 %v5069_v52, %v10698_v57 }
 0x462   :  { %5734 = vmatpush.msra.mxu1 %v10615_v15  ;;  %5667 = vmatpush.msrb.mxu3 %v5666_v59  ;;  %v10953_v14 = vsub.f32 %v5189_v0, %v10941_v48  ;;  %v4997_v47 = vrot.slane %v4996_v35, 1  ;;  %v4956_v24 = vadd.f32 %v4955_v18, %v4954_v13  ;;  %v5095_v25 = vrot.slane %v5094_v36, 1 }
 0x463   :  { %5388 = vmatmul.f32.vlgmr.msra.gmra.mxu2 %v5229_v51  ;;  %v5672_v28 = vand.u32 4294901760, %v5671_v1  ;;  %v5230_v19 = vand.u32 4294901760, %v5229_v51  ;;  %v12158_v17 = vand.u32 4294901760, %v10624_v53  ;;  %v5022_v57 = vadd.f32 %v5021_v2, %v10852_v61 }
 0x464   :  { %5736 = vmatpush.msra.mxu1 %v10626_v9  ;;  %v5571_v27 = vand.u32 4294901760, %v10953_v14  ;;  %v4932_v52 = vadd.f32 %v4931_v45, %v10873_v32  ;;  %v5071_v30 = vrot.slane %v5070_v4, 1  ;;  %v4998_v13 = vadd.f32 %v4997_v47, %v4996_v35 }
 0x465   :  { %5775 = vmatpush.msra.mxu2 %v12158_v17  ;;  %5673 = vmatpush.msrb.mxu3 %v5672_v28  ;;  %v5231_v31 = vsub.f32 %v5229_v51, %v5230_v19  ;;  %v10962_v18 = vadd.f32 %v5022_v57, %v4956_v24  ;;  %v12159_v0 = vand.u32 4294901760, %v10635_v7  ;;  %v10970_v32 = vadd.f32 %v5095_v25, %v5094_v36  ;;  %v5158_v28 = vld [vmem:[#allocation7 + $0x178] sm:$0xff]  ;;  %v5157_v17 = vld [vmem:[#allocation7 + $0x170] sm:$0xff] }
 0x466   :  { %5427 = vmatmul.f32.vlgmr.msra.gmra.mxu3 %v5230_v19  ;;  %5738 = vmatpush.msra.mxu1 %v10632_v46  ;;  %v5572_v61 = vsub.f32 %v10953_v14, %v5571_v27  ;;  %v10973_v2 = vadd.f32 %v4998_v13, %v4932_v52  ;;  %v12160_v35 = vand.u32 4294901760, %v10648_v54  ;;  %v10978_v45 = vadd.f32 %v5071_v30, %v5070_v4  ;;  %v12163_v25 = vld [vmem:[#allocation24_spill] sm:$0xff]  ;;  %v5156_v30 = vld [vmem:[#allocation7 + $0x168] sm:$0xff] }
 0x467   :  { %5779 = vmatpush.msra.mxu2 %v12159_v0  ;;  %5842 = vmatpush.msra.mxu3 %v10615_v15  ;;  %v5232_v59 = vand.u32 4294901760, %v5231_v31  ;;  %v6572_v15 = vrot.slane %v10906_v41, 6  ;;  %v6573_v51 = vrot.slane %v10962_v18, 4  ;;  %v6574_v36 = vrot.slane %v10909_v50, 2  ;;  %v12166_v31 = vld [vmem:[#allocation28_spill] sm:$0xff] }
 0x468   :  { %5740 = vmatpush.msra.mxu1 %v10645_v49  ;;  %v5573_v1 = vand.u32 4294901760, %v5572_v61  ;;  %v6609_v47 = vrot.slane %v10911_v21, 6  ;;  %v6611_v4 = vrot.slane %v10913_v62, 2  ;;  %v12161_v24 = vand.u32 4294901760, %v10667_v23 }
 0x469   :  { %5783 = vmatpush.msra.mxu2 %v12160_v35  ;;  %5844 = vmatpush.msra.mxu3 %v10626_v9  ;;  %v6610_v9 = vrot.slane %v10970_v32, 4  ;;  %v6569_v41 = vrot.slane %v10870_v44, 6  ;;  %v6570_v50 = vrot.slane %v10973_v2, 4  ;;  %v6606_v21 = vrot.slane %v10711_v6, 6  ;;  %v12170_v35 = vld [vmem:[#allocation35_spill] sm:$0xff] }
 0x46a   :  { %5233 = vmatmul.f32.vlgmr.msra.gmra.mxu0 %v5232_v59  ;;  %5533 = vmatmul.f32.vlgmr.msrb.gmra.mxu1 %v10939_v34  ;;  %v12162_v62 = vand.u32 4294901760, %v10676_v29  ;;  %v6608_v44 = vrot.slane %v10716_v20, 2  ;;  %v6615_v6 = vsel %vm6575_vm7, %v10897_v16, %v6609_v47  ;;  %v12164_v20 = vld [vmem:[#allocation32_spill] sm:$0xff] }
 0x46b   :  { %5681 = vmatpush.msra.mxu0 %v10624_v53  ;;  %5742 = vmatpush.msra.mxu1 %v10658_v37  ;;  %v6571_v53 = vrot.slane %v10875_v22, 2  ;;  %v6582_v22 = vsel %vm6577_vm8, %v6573_v51, %v6574_v36  ;;  %v6616_v19 = vsel %vm6577_vm8, %v6610_v9, %v6611_v4  ;;  %v6612_v52 = vsel %vm6575_vm7, %v10696_v42, %v6606_v21  ;;  %v12169_v42 = vld [vmem:[#allocation33_spill] sm:$0xff]  ;;  %v12175_v21 = vld [vmem:[#allocation36_spill] sm:$0xff] }
 0x46c   :  { %5787 = vmatpush.msra.mxu2 %v12161_v24  ;;  %5846 = vmatpush.msra.mxu3 %v10632_v46  ;;  %v6607_v46 = vrot.slane %v10978_v45, 4  ;;  %v6617_v61 = vsel %vm6579_vm9, %v6615_v6, %v6616_v19  ;;  %v5155_v36 = vld [vmem:[#allocation7 + $0x160] sm:$0xff] }
 0x46d   :  { %5574 = vmatmul.f32.vlgmr.msrb.gmra.mxu2 %v5573_v1  ;;  %5684 = vmatpush.msra.mxu0 %v10635_v7  ;;  %v6581_v7 = vsel %vm6575_vm7, %v10895_v3, %v6572_v15  ;;  %v6576_v3 = vsel %vm6575_vm7, %v10867_v60, %v6569_v41  ;;  %v6578_v16 = vsel %vm6577_vm8, %v6570_v50, %v6571_v53  ;;  %v11029_v60 = vand.u32 4294901760, %v5157_v17  ;;  %v5154_v41 = vld [vmem:[#allocation7 + $0x158] sm:$0xff] }
 0x46e   :  { %5744 = vmatpush.msra.mxu1 %v10673_v40  ;;  %5791 = vmatpush.msra.mxu2 %v12162_v62  ;;  %v6583_v57 = vsel %vm6579_vm9, %v6581_v7, %v6582_v22  ;;  %v6613_v13 = vsel %vm6577_vm8, %v6607_v46, %v6608_v44  ;;  %v12171_v15 = vand.u32 4294901760, %v12170_v35  ;;  %v6620_v47 = vrot.slane %v6617_v61, 7  ;;  %v5153_v22 = vld [vmem:[#allocation7 + $0x150] sm:$0xff] }
 0x46f   :  { %5848 = vmatpush.msra.mxu3 %v10645_v49  ;;  %5687 = vmatpush.msra.mxu0 %v10648_v54  ;;  %v12165_v49 = vand.u32 4294901760, %v12164_v20  ;;  %v11015_v54 = vand.u32 4294901760, %v5158_v28  ;;  %v6588_v59 = vrot.slane %v6583_v57, 7  ;;  %v6614_v9 = vsel %vm6579_vm9, %v6612_v52, %v6613_v13  ;;  %v5151_v13 = vld [vmem:[#allocation7 + $0x140] sm:$0xff] }
 0x470   :  { %5675 = vmatmul.f32.vlgmr.msrb.gmra.mxu3 %v10941_v48  ;;  %5746 = vmatpush.msra.mxu1 %v12163_v25  ;;  %v11051_v24 = vsub.f32 %v5157_v17, %v11029_v60  ;;  %v6621_v53 = vsel %vm5187_vm6, %v6620_v47, %v6614_v9  ;;  %v11057_v62 = vand.u32 4294901760, %v5155_v36  ;;  %v11070_v17 = vand.u32 4294901760, %v5154_v41 }
 0x471   :  { %5795 = vmatpush.msra.mxu2 %v12165_v49  ;;  %5850 = vmatpush.msra.mxu3 %v10658_v37  ;;  %v12167_v37 = vld [vmem:[#allocation34_spill] sm:$0xff]  ;;  %v11039_v51 = vsub.f32 %v5158_v28, %v11015_v54  ;;  %v12176_v28 = vld [vmem:[#allocation39_spill] sm:$0xff]  ;;  %v6622_v19 = vsel %vm6590_vm10, %v6620_v47, %v6621_v53  ;;  %v12179_v49 = vld [vmem:[#allocation40_spill] sm:$0xff] }
 0x472   :  { %5690 = vmatpush.msra.mxu0 %v10667_v23  ;;  %5748 = vmatpush.msra.mxu1 %v12166_v31  ;;  %v12168_v0 = vand.u32 4294901760, %v12167_v37  ;;  %v6580_v23 = vsel %vm6579_vm9, %v6576_v3, %v6578_v16  ;;  %v12177_v46 = vand.u32 4294901760, %v12176_v28  ;;  %v12180_v3 = vand.u32 4294901760, %v12179_v49 }
 0x473   :  { %5852 = vmatpush.msra.mxu3 %v10673_v40  ;;  %5496 = vmatmul.f32.vlgmr.msrb.gmra.mxu0 %v10939_v34  ;;  %v11041_v40 = vand.u32 4294901760, %v5156_v30  ;;  %v6589_v1 = vsel %vm5187_vm6, %v6588_v59, %v6580_v23  ;;  %v12172_v34 = vld [vmem:[#allocation30_spill] sm:$0xff]  ;;  %v11832_v44 = vand.u32 4294901760, %v11039_v51  ;;  %v11830_v16 = vand.u32 4294901760, %v11051_v24 }
 0x474   :  { %5799 = vmatpush.msra.mxu2 %v12168_v0  ;;  %5750 = vmatpush.msra.mxu1 %v12169_v42  ;;  %v6591_v50 = vsel %vm6590_vm10, %v6588_v59, %v6589_v1  ;;  %v6623_v52 = vsel %vm6592_vm11, %v6620_v47, %v6622_v19  ;;  %v11106_v23 = vand.u32 4294901760, %v5151_v13 }
 0x475   :  { %5693 = vmatpush.msra.mxu0 %v10676_v29  ;;  %5854 = vmatpush.msra.mxu3 %v12163_v25  ;;  %v12173_v29 = vld [vmem:[#allocation38_spill] sm:$0xff]  ;;  %v11064_v7 = vsub.f32 %v5156_v30, %v11041_v40  ;;  %v6593_v6 = vsel %vm6592_vm11, %v6588_v59, %v6591_v50  ;;  %v12178_v25 = vld [vmem:[#allocation37_spill] sm:$0xff]  ;;  %v11083_v30 = vand.u32 4294901760, %v5153_v22  ;;  %v6624_v61 = vsel %vm6594_vm12, %v6620_v47, %v6623_v52 }
 0x476   :  { %5803 = vmatpush.msra.mxu2 %v12171_v15  ;;  %5752 = vmatpush.msra.mxu1 %v12172_v34  ;;  %v12174_v4 = vand.u32 4294901760, %v12173_v29  ;;  %v6595_v57 = vsel %vm6594_vm12, %v6588_v59, %v6593_v6  ;;  %6626 = vst [vmem:[#allocation11] sm:$0xff] %v6624_v61  ;;  %v5148_v50 = vld [vmem:[#allocation7 + $0x128] sm:$0xff]  ;;  %v5146_v6 = vld [vmem:[#allocation7 + $0x118] sm:$0xff] }
 0x477   :  { %5696 = vmatpush.msra.mxu0 %v12164_v20  ;;  %5856 = vmatpush.msra.mxu3 %v12166_v31  ;;  %v5152_v20 = vld [vmem:[#allocation7 + $0x148] sm:$0xff]  ;;  %v11081_v31 = vsub.f32 %v5155_v36, %v11057_v62  ;;  %6597 = vst [vmem:[#allocation9] sm:$0xff] %v6595_v57  ;;  %v11829_v0 = vand.u32 4294901760, %v11064_v7  ;;  %v11112_v36 = vsub.f32 %v5153_v22, %v11083_v30  ;;  %v11154_v22 = vand.u32 4294901760, %v5148_v50 }
 0x478   :  { %5807 = vmatpush.msra.mxu2 %v12174_v4  ;;  %5754 = vmatpush.msra.mxu1 %v12175_v21  ;;  %v11092_v59 = vand.u32 4294901760, %v5152_v20  ;;  %v11178_v52 = vand.u32 4294901760, %v5146_v6  ;;  %6648 = dma.vmem_to_hbm [thread:$0]  %s6644_s12, 128, %s6646_s10, [#allocation10]  }
 0x479   :  { %5699 = vmatpush.msra.mxu0 %v12167_v37  ;;  %5858 = vmatpush.msra.mxu3 %v12169_v42  ;;  %v5922_v37 = vsub.f32 %v11039_v51, %v11832_v44  ;;  %v11098_v42 = vsub.f32 %v5154_v41, %v11070_v17  ;;  %v11827_v15 = vand.u32 4294901760, %v11081_v31  ;;  %v5934_v1 = vsub.f32 %v11064_v7, %v11829_v0  ;;  %6659 = dma.vmem_to_hbm [thread:$0]  %s6655_s17, 128, %s6657_s15, [#allocation10]  }
 0x47a   :  { %5811 = vmatpush.msra.mxu2 %v12177_v46  ;;  %5756 = vmatpush.msra.mxu1 %v12178_v25  ;;  %v11121_v47 = vsub.f32 %v5152_v20, %v11092_v59  ;;  %v11132_v41 = vsub.f32 %v5151_v13, %v11106_v23  ;;  %v11825_v53 = vand.u32 4294901760, %v11112_v36  ;;  %v5147_v46 = vld [vmem:[#allocation7 + $0x120] sm:$0xff]  ;;  %v11176_v57 = vsub.f32 %v5148_v50, %v11154_v22  ;;  %v5144_v13 = vld [vmem:[#allocation7 + $0x108] sm:$0xff] }
 0x47b   :  { %5702 = vmatpush.msra.mxu0 %v12170_v35  ;;  %5860 = vmatpush.msra.mxu3 %v12172_v34  ;;  %v5150_v35 = vld [vmem:[#allocation7 + $0x138] sm:$0xff]  ;;  %v5149_v34 = vld [vmem:[#allocation7 + $0x130] sm:$0xff]  ;;  %v11826_v9 = vand.u32 4294901760, %v11098_v42 }
 0x47c   :  { %5815 = vmatpush.msra.mxu2 %v12180_v3  ;;  %5758 = vmatpush.msra.mxu1 %v10804_v12 }
 0x47d   :  { %5705 = vmatpush.msra.mxu0 %v12173_v29  ;;  %5862 = vmatpush.msra.mxu3 %v12175_v21  ;;  %v11126_v29 = vand.u32 4294901760, %v5150_v35  ;;  %v5935_v21 = vand.u32 4294901760, %v5934_v1  ;;  %v11819_v1 = vand.u32 4294901760, %v11176_v57 }
 0x47e   :  { %5819 = vmatpush.msra.mxu2 %v5646_v8  ;;  %5760 = vmatpush.msra.mxu1 %v10812_v38  ;;  %v5928_v8 = vsub.f32 %v11051_v24, %v11830_v16 }
 0x47f   :  { %5708 = vmatpush.msra.mxu0 %v12176_v28  ;;  %5864 = vmatpush.msra.mxu3 %v12178_v25  ;;  %v11824_v28 = vand.u32 4294901760, %v11121_v47  ;;  %v11166_v25 = vand.u32 4294901760, %v5147_v46 }
 0x480   :  { %5823 = vmatpush.msra.mxu2 %v5652_v10  ;;  %5762 = vmatpush.msra.mxu1 %v10834_v5  ;;  %v5923_v10 = vand.u32 4294901760, %v5922_v37  ;;  %v5929_v4 = vand.u32 4294901760, %v5928_v8 }
 0x481   :  { %5711 = vmatpush.msra.mxu0 %v12179_v49  ;;  %5866 = vmatpush.msra.mxu3 %v10804_v12  ;;  %v5940_v12 = vsub.f32 %v11081_v31, %v11827_v15  ;;  %v5958_v20 = vsub.f32 %v11121_v47, %v11824_v28  ;;  %v5145_v49 = vld [vmem:[#allocation7 + $0x110] sm:$0xff]  ;;  %v11188_v61 = vsub.f32 %v5147_v46, %v11166_v25  ;;  %v5166_v28 = vld [vmem:[#allocation7 + $0x1b8] sm:$0xff] }
 0x482   :  { %5827 = vmatpush.msra.mxu2 %v5658_v43  ;;  %5764 = vmatpush.msra.mxu1 %v10888_v33  ;;  %v12181_v43 = vand.u32 4294901760, %v10892_v58  ;;  %v11190_v8 = vand.u32 4294901760, %v5145_v49  ;;  %v5982_v46 = vsub.f32 %v11176_v57, %v11819_v1  ;;  %v11344_v16 = vand.u32 4294901760, %v5166_v28 }
 0x483   :  { %5714 = vmatpush.msra.mxu0 %v10843_v11  ;;  %5868 = vmatpush.msra.mxu3 %v10812_v38  ;;  %v11141_v11 = vand.u32 4294901760, %v5149_v34  ;;  %v5946_v38 = vsub.f32 %v11098_v42, %v11826_v9 }
 0x484   :  { %5831 = vmatpush.msra.mxu2 %v12181_v43  ;;  %5768 = vmatmul.f32.vlgmr.msra.gmra.mxu1 %v5571_v27  ;;  %v11152_v27 = vsub.f32 %v5150_v35, %v11126_v29  ;;  %v5143_v35 = vld [vmem:[#allocation7 + $0x100] sm:$0xff]  ;;  %v11202_v43 = vand.u32 4294901760, %v5144_v13  ;;  %v11212_v50 = vsub.f32 %v5145_v49, %v11190_v8 }
 0x485   :  { %5924 = vmatpush.msrb.mxu1 %v5923_v10  ;;  %5717 = vmatpush.msra.mxu0 %v10861_v63  ;;  %v11823_v63 = vand.u32 4294901760, %v11132_v41  ;;  %v11164_v19 = vsub.f32 %v5149_v34, %v11141_v11  ;;  %v11200_v34 = vsub.f32 %v5146_v6, %v11178_v52 }
 0x486   :  { %5835 = vmatpush.msra.mxu2 %v5670_v26  ;;  %5870 = vmatpush.msra.mxu3 %v10834_v5  ;;  %v5941_v5 = vand.u32 4294901760, %v5940_v12  ;;  %v5952_v26 = vsub.f32 %v11112_v36, %v11825_v53  ;;  %v11821_v3 = vand.u32 4294901760, %v11152_v27  ;;  %v11214_v12 = vand.u32 4294901760, %v5143_v35 }
 0x487   :  { %5837 = vmatmul.f32.vlgmr.msra.gmra.mxu2 %v10941_v48  ;;  %5930 = vmatpush.msrb.mxu1 %v5929_v4  ;;  %v11820_v37 = vand.u32 4294901760, %v11164_v19  ;;  %v11818_v4 = vand.u32 4294901760, %v11188_v61  ;;  %v11224_v6 = vsub.f32 %v5144_v13, %v11202_v43 }
 0x488   :  { %6022 = vmatpush.msrb.mxu2 %v11039_v51  ;;  %5720 = vmatpush.msra.mxu0 %v10886_v56  ;;  %v5947_v56 = vand.u32 4294901760, %v5946_v38  ;;  %v5970_v10 = vsub.f32 %v11152_v27, %v11821_v3  ;;  %v11817_v38 = vand.u32 4294901760, %v11200_v34  ;;  %v11234_v49 = vsub.f32 %v5143_v35, %v11214_v12  ;;  %v5167_v3 = vld [vmem:[#allocation7 + $0x1c0] sm:$0xff] }
 0x489   :  { %5872 = vmatpush.msra.mxu3 %v10888_v33  ;;  %5936 = vmatpush.msrb.mxu1 %v5935_v21  ;;  %v5964_v33 = vsub.f32 %v11132_v41, %v11823_v63  ;;  %v5105_v35 = vadd.f32 %v10978_v45, %v10973_v2 }
 0x48a   :  { %5874 = vmatmul.f32.vlgmr.msra.gmra.mxu3 %v10941_v48  ;;  %6025 = vmatpush.msrb.mxu2 %v11051_v24  ;;  %v5953_v48 = vand.u32 4294901760, %v5952_v26  ;;  %v5971_v21 = vand.u32 4294901760, %v5970_v10  ;;  %v5988_v26 = vsub.f32 %v11188_v61, %v11818_v4  ;;  %v5994_v13 = vsub.f32 %v11200_v34, %v11817_v38  ;;  %v5169_v38 = vld [vmem:[#allocation7 + $0x1d0] sm:$0xff] }
 0x48b   :  { %6075 = vmatpush.msrb.mxu3 %v11015_v54  ;;  %5723 = vmatpush.msra.mxu0 %v10892_v58  ;;  %v5959_v58 = vand.u32 4294901760, %v5958_v20  ;;  %v11816_v20 = vand.u32 4294901760, %v11212_v50  ;;  %v11815_v10 = vand.u32 4294901760, %v11234_v49  ;;  %v11302_v1 = vand.u32 4294901760, %v5169_v38 }
 0x48c   :  { %5942 = vmatpush.msrb.mxu1 %v5941_v5  ;;  %6028 = vmatpush.msrb.mxu2 %v11064_v7  ;;  %v5995_v2 = vand.u32 4294901760, %v5994_v13 }
 0x48d   :  { %6077 = vmatpush.msrb.mxu3 %v11029_v60  ;;  %5726 = vmatpush.msra.mxu0 %v10903_v55  ;;  %v5965_v55 = vand.u32 4294901760, %v5964_v33  ;;  %v5983_v33 = vand.u32 4294901760, %v5982_v46  ;;  %v11327_v63 = vsub.f32 %v5169_v38, %v11302_v1 }
 0x48e   :  { %5729 = vmatmul.f32.vlgmr.msra.gmra.mxu0 %v10953_v14  ;;  %5948 = vmatpush.msrb.mxu1 %v5947_v56  ;;  %v5976_v14 = vsub.f32 %v11164_v19, %v11820_v37  ;;  %v5109_v56 = vadd.f32 %v10970_v32, %v10962_v18  ;;  %v5989_v18 = vand.u32 4294901760, %v5988_v26  ;;  %v6000_v32 = vsub.f32 %v11212_v50, %v11816_v20 }
 0x48f   :  { %5879 = vmatpush.msrb.mxu0 %v11015_v54  ;;  %6031 = vmatpush.msrb.mxu2 %v11081_v31  ;;  %12184 = vst [vmem:[#allocation20_spill] sm:$0xff] %v11327_v63 }
 0x490   :  { %6079 = vmatpush.msrb.mxu3 %v11041_v40  ;;  %5954 = vmatpush.msrb.mxu1 %v5953_v48  ;;  %v5977_v5 = vand.u32 4294901760, %v5976_v14  ;;  %v11814_v48 = vand.u32 4294901760, %v11224_v6  ;;  %v6001_v26 = vand.u32 4294901760, %v6000_v32 }
 0x491   :  { %5881 = vmatpush.msrb.mxu0 %v11029_v60  ;;  %6034 = vmatpush.msrb.mxu2 %v11098_v42 }
 0x492   :  { %6081 = vmatpush.msrb.mxu3 %v11057_v62  ;;  %5960 = vmatpush.msrb.mxu1 %v5959_v58  ;;  %v5174_v58 = vld [vmem:[#allocation7 + $0x1f8] sm:$0xff]  ;;  %v6006_v45 = vsub.f32 %v11224_v6, %v11814_v48 }
 0x493   :  { %5883 = vmatpush.msrb.mxu0 %v11041_v40  ;;  %6037 = vmatpush.msrb.mxu2 %v11112_v36  ;;  %v11256_v14 = vand.u32 4294901760, %v5174_v58 }
 0x494   :  { %6083 = vmatpush.msrb.mxu3 %v11070_v17  ;;  %5966 = vmatpush.msrb.mxu1 %v5965_v55  ;;  %v5173_v55 = vld [vmem:[#allocation7 + $0x1f0] sm:$0xff]  ;;  %v6007_v48 = vand.u32 4294901760, %v6006_v45 }
 0x495   :  { %5885 = vmatpush.msrb.mxu0 %v11057_v62  ;;  %6040 = vmatpush.msrb.mxu2 %v11121_v47  ;;  %v11265_v46 = vand.u32 4294901760, %v5173_v55  ;;  %v11276_v13 = vsub.f32 %v5174_v58, %v11256_v14 }
 0x496   :  { %6085 = vmatpush.msrb.mxu3 %v11083_v30  ;;  %5972 = vmatpush.msrb.mxu1 %v5971_v21  ;;  %v5190_v21 = vsel %vm5187_vm6, %v5109_v56, %v5105_v35  ;;  %v5171_v35 = vld [vmem:[#allocation7 + $0x1e0] sm:$0xff] }
 0x497   :  { %5887 = vmatpush.msrb.mxu0 %v11070_v17  ;;  %6043 = vmatpush.msrb.mxu2 %v11132_v41  ;;  %v11273_v56 = vand.u32 4294901760, %v5190_v21  ;;  %v11284_v32 = vsub.f32 %v5173_v55, %v11265_v46  ;;  %v11287_v20 = vand.u32 4294901760, %v5171_v35  ;;  %v11822_v45 = vand.u32 4294901760, %v11276_v13 }
 0x498   :  { %6087 = vmatpush.msrb.mxu3 %v11092_v59  ;;  %5978 = vmatpush.msrb.mxu1 %v5977_v5  ;;  %v5172_v5 = vld [vmem:[#allocation7 + $0x1e8] sm:$0xff] }
 0x499   :  { %5889 = vmatpush.msrb.mxu0 %v11083_v30  ;;  %6046 = vmatpush.msrb.mxu2 %v11152_v27 }
 0x49a   :  { %6089 = vmatpush.msrb.mxu3 %v11106_v23  ;;  %5984 = vmatpush.msrb.mxu1 %v5983_v33  ;;  %v6012_v33 = vsub.f32 %v11234_v49, %v11815_v10  ;;  %v5170_v10 = vld [vmem:[#allocation7 + $0x1d8] sm:$0xff] }
 0x49b   :  { %5891 = vmatpush.msrb.mxu0 %v11092_v59  ;;  %6049 = vmatpush.msrb.mxu2 %v11164_v19  ;;  %v11297_v4 = vand.u32 4294901760, %v5170_v10 }
 0x49c   :  { %6091 = vmatpush.msrb.mxu3 %v11126_v29  ;;  %5990 = vmatpush.msrb.mxu1 %v5989_v18  ;;  %v11279_v18 = vand.u32 4294901760, %v5172_v5  ;;  %v6013_v58 = vand.u32 4294901760, %v6012_v33  ;;  %v11828_v33 = vand.u32 4294901760, %v11284_v32 }
 0x49d   :  { %5893 = vmatpush.msrb.mxu0 %v11106_v23  ;;  %6052 = vmatpush.msrb.mxu2 %v11176_v57 }
 0x49e   :  { %6093 = vmatpush.msrb.mxu3 %v11141_v11  ;;  %5996 = vmatpush.msrb.mxu1 %v5995_v2  ;;  %v5911_v2 = vsub.f32 %v5190_v21, %v11273_v56  ;;  %v11295_v55 = vsub.f32 %v5172_v5, %v11279_v18  ;;  %v11306_v21 = vsub.f32 %v5171_v35, %v11287_v20 }
 0x49f   :  { %5895 = vmatpush.msrb.mxu0 %v11126_v29  ;;  %6055 = vmatpush.msrb.mxu2 %v11188_v61  ;;  %v6263_v5 = vsub.f32 %v11276_v13, %v11822_v45  ;;  %v11319_v35 = vsub.f32 %v5170_v10, %v11297_v4  ;;  %v6269_v45 = vsub.f32 %v11284_v32, %v11828_v33  ;;  %v11332_v10 = vand.u32 4294901760, %v5167_v3  ;;  %v5165_v33 = vld [vmem:[#allocation7 + $0x1b0] sm:$0xff] }
 0x4a0   :  { %6095 = vmatpush.msrb.mxu3 %v11154_v22  ;;  %6002 = vmatpush.msrb.mxu1 %v6001_v26  ;;  %v5168_v26 = vld [vmem:[#allocation7 + $0x1c8] sm:$0xff]  ;;  %12182 = vst [vmem:[#allocation29_spill] sm:$0xff] %v11306_v21  ;;  %v11833_v53 = vand.u32 4294901760, %v11306_v21  ;;  %v11356_v44 = vand.u32 4294901760, %v5165_v33 }
 0x4a1   :  { %5897 = vmatpush.msrb.mxu0 %v11141_v11  ;;  %6058 = vmatpush.msrb.mxu2 %v11200_v34  ;;  %v11313_v37 = vand.u32 4294901760, %v5168_v26  ;;  %12183 = vst [vmem:[#allocation16_spill] sm:$0xff] %v11319_v35  ;;  %v11836_v0 = vand.u32 4294901760, %v11319_v35 }
 0x4a2   :  { %6097 = vmatpush.msrb.mxu3 %v11166_v25  ;;  %6008 = vmatpush.msrb.mxu1 %v6007_v48  ;;  %v5912_v48 = vand.u32 4294901760, %v5911_v2 }
 0x4a3   :  { %5899 = vmatpush.msrb.mxu0 %v11154_v22  ;;  %6061 = vmatpush.msrb.mxu2 %v11212_v50  ;;  %v11336_v15 = vsub.f32 %v5168_v26, %v11313_v37  ;;  %v5164_v26 = vld [vmem:[#allocation7 + $0x1a8] sm:$0xff] }
 0x4a4   :  { %6099 = vmatpush.msrb.mxu3 %v11178_v52  ;;  %6014 = vmatpush.msrb.mxu1 %v6013_v58  ;;  %v11831_v58 = vand.u32 4294901760, %v11295_v55  ;;  %v5913_v9 = vsub.f32 %v5911_v2, %v5912_v48 }
 0x4a5   :  { %5901 = vmatpush.msrb.mxu0 %v11166_v25  ;;  %6064 = vmatpush.msrb.mxu2 %v11224_v6 }
 0x4a6   :  { %6101 = vmatpush.msrb.mxu3 %v11190_v8  ;;  %6016 = vmatmul.f32.vlgmr.msrb.gmra.mxu1 %v11273_v56  ;;  %v6275_v38 = vsub.f32 %v11295_v55, %v11831_v58  ;;  %v11354_v58 = vsub.f32 %v5167_v3, %v11332_v10  ;;  %v11366_v3 = vsub.f32 %v5166_v28, %v11344_v16 }
 0x4a7   :  { %6183 = vmatpush.msra.mxu1 %v11015_v54  ;;  %5903 = vmatpush.msrb.mxu0 %v11178_v52  ;;  %v6264_v54 = vand.u32 4294901760, %v6263_v5  ;;  %v6281_v5 = vsub.f32 %v11306_v21, %v11833_v53  ;;  %v6287_v53 = vsub.f32 %v11319_v35, %v11836_v0  ;;  %v11368_v21 = vand.u32 4294901760, %v5164_v26 }
 0x4a8   :  { %6067 = vmatpush.msrb.mxu2 %v11234_v49  ;;  %6103 = vmatpush.msrb.mxu3 %v11202_v43  ;;  %v11377_v0 = vsub.f32 %v5165_v33, %v11356_v44  ;;  %v12187_v35 = vand.u32 4294901760, %v11336_v15 }
 0x4a9   :  { %6070 = vmatmul.f32.vlgmr.msrb.gmra.mxu2 %v5911_v2  ;;  %6185 = vmatpush.msra.mxu1 %v11029_v60  ;;  %v6270_v60 = vand.u32 4294901760, %v6269_v45  ;;  %v5163_v2 = vld [vmem:[#allocation7 + $0x1a0] sm:$0xff]  ;;  %v11390_v33 = vsub.f32 %v5164_v26, %v11368_v21 }
 0x4aa   :  { %6220 = vmatpush.msra.mxu2 %v11256_v14  ;;  %5905 = vmatpush.msrb.mxu0 %v11190_v8  ;;  %v11379_v28 = vand.u32 4294901760, %v5163_v2 }
 0x4ab   :  { %6105 = vmatpush.msrb.mxu3 %v11214_v12  ;;  %6187 = vmatpush.msra.mxu1 %v11041_v40  ;;  %v5914_v40 = vand.u32 4294901760, %v5913_v9  ;;  %v12185_v9 = vand.u32 4294901760, %v11327_v63 }
 0x4ac   :  { %6109 = vmatmul.f32.vlgmr.msrb.gmra.mxu3 %v5912_v48  ;;  %6222 = vmatpush.msra.mxu2 %v11265_v46  ;;  %v6276_v48 = vand.u32 4294901760, %v6275_v38  ;;  %v6282_v38 = vand.u32 4294901760, %v6281_v5  ;;  %v6310_v5 = vand.u32 4294901760, %v11366_v3  ;;  %v11403_v26 = vsub.f32 %v5163_v2, %v11379_v28 }
 0x4ad   :  { %6265 = vmatpush.msra.mxu3 %v6264_v54  ;;  %5907 = vmatpush.msrb.mxu0 %v11202_v43  ;;  %v6293_v54 = vsub.f32 %v11327_v63, %v12185_v9  ;;  %v6299_v9 = vsub.f32 %v11336_v15, %v12187_v35  ;;  %v5160_v63 = vld [vmem:[#allocation7 + $0x188] sm:$0xff]  ;;  %v6316_v35 = vand.u32 4294901760, %v11377_v0 }
 0x4ae   :  { %6189 = vmatpush.msra.mxu1 %v11057_v62  ;;  %6224 = vmatpush.msra.mxu2 %v11279_v18  ;;  %v5162_v62 = vld [vmem:[#allocation7 + $0x198] sm:$0xff] }
 0x4af   :  { %6271 = vmatpush.msra.mxu3 %v6270_v60  ;;  %5909 = vmatpush.msrb.mxu0 %v11214_v12  ;;  %v12186_v60 = vand.u32 4294901760, %v11039_v51  ;;  %v11392_v45 = vand.u32 4294901760, %v5162_v62  ;;  %v12188_v51 = vand.u32 4294901760, %v11051_v24  ;;  %v12190_v24 = vand.u32 4294901760, %v11064_v7 }
 0x4b0   :  { %5915 = vmatmul.f32.vlgmr.msrb.gmra.mxu0 %v5914_v40  ;;  %6191 = vmatpush.msra.mxu1 %v11070_v17  ;;  %v5161_v40 = vld [vmem:[#allocation7 + $0x190] sm:$0xff]  ;;  %v6288_v17 = vand.u32 4294901760, %v6287_v53  ;;  %v12191_v7 = vand.u32 4294901760, %v11081_v31  ;;  %v12192_v31 = vand.u32 4294901760, %v11098_v42  ;;  %v12193_v42 = vand.u32 4294901760, %v11112_v36 }
 0x4b1   :  { %6116 = vmatpush.msra.mxu0 %v12186_v60  ;;  %6226 = vmatpush.msra.mxu2 %v11287_v20  ;;  %v6294_v60 = vand.u32 4294901760, %v6293_v54  ;;  %v6300_v54 = vand.u32 4294901760, %v6299_v9  ;;  %v11416_v2 = vsub.f32 %v5162_v62, %v11392_v45  ;;  %v6317_v9 = vsub.f32 %v11377_v0, %v6316_v35 }
 0x4b2   :  { %6277 = vmatpush.msra.mxu3 %v6276_v48  ;;  %6193 = vmatpush.msra.mxu1 %v11083_v30  ;;  %v12189_v30 = vand.u32 4294901760, %v11354_v58  ;;  %v11405_v48 = vand.u32 4294901760, %v5161_v40 }
 0x4b3   :  { %6120 = vmatpush.msra.mxu0 %v12188_v51  ;;  %6228 = vmatpush.msra.mxu2 %v11297_v4  ;;  %v11418_v51 = vand.u32 4294901760, %v5160_v63 }
 0x4b4   :  { %6283 = vmatpush.msra.mxu3 %v6282_v38  ;;  %6195 = vmatpush.msra.mxu1 %v11092_v59  ;;  %v6305_v53 = vsub.f32 %v11354_v58, %v12189_v30  ;;  %v6311_v59 = vsub.f32 %v11366_v3, %v6310_v5  ;;  %v6322_v38 = vand.u32 4294901760, %v11390_v33  ;;  %v5159_v30 = vld [vmem:[#allocation7 + $0x180] sm:$0xff]  ;;  %v11429_v62 = vsub.f32 %v5161_v40, %v11405_v48 }
 0x4b5   :  { %6124 = vmatpush.msra.mxu0 %v12190_v24  ;;  %6230 = vmatpush.msra.mxu2 %v11302_v1  ;;  %v11432_v24 = vand.u32 4294901760, %v10937_v39  ;;  %v6334_v40 = vand.u32 4294901760, %v11416_v2 }
 0x4b6   :  { %6289 = vmatpush.msra.mxu3 %v6288_v17  ;;  %6197 = vmatpush.msra.mxu1 %v11106_v23  ;;  %v6306_v23 = vand.u32 4294901760, %v6305_v53  ;;  %v6328_v17 = vand.u32 4294901760, %v11403_v26  ;;  %v6323_v53 = vsub.f32 %v11390_v33, %v6322_v38 }
 0x4b7   :  { %6128 = vmatpush.msra.mxu0 %v12191_v7  ;;  %6232 = vmatpush.msra.mxu2 %v11313_v37  ;;  %v11445_v7 = vsub.f32 %v5160_v63, %v11418_v51  ;;  %v11460_v36 = vsub.f32 %v10937_v39, %v11432_v24 }
 0x4b8   :  { %6295 = vmatpush.msra.mxu3 %v6294_v60  ;;  %6199 = vmatpush.msra.mxu1 %v11126_v29  ;;  %v11437_v60 = vand.u32 4294901760, %v5159_v30  ;;  %v6312_v29 = vand.u32 4294901760, %v6311_v59  ;;  %v6340_v59 = vand.u32 4294901760, %v11429_v62 }
 0x4b9   :  { %6132 = vmatpush.msra.mxu0 %v12192_v31  ;;  %6234 = vmatpush.msra.mxu2 %v11332_v10  ;;  %v12194_v31 = vand.u32 4294901760, %v11121_v47  ;;  %v6346_v47 = vand.u32 4294901760, %v11445_v7 }
 0x4ba   :  { %6301 = vmatpush.msra.mxu3 %v6300_v54  ;;  %6201 = vmatpush.msra.mxu1 %v11141_v11  ;;  %v6318_v54 = vand.u32 4294901760, %v6317_v9  ;;  %v6329_v11 = vsub.f32 %v11403_v26, %v6328_v17  ;;  %v11463_v63 = vsub.f32 %v5159_v30, %v11437_v60  ;;  %v12195_v9 = vand.u32 4294901760, %v11132_v41 }
 0x4bb   :  { %6136 = vmatpush.msra.mxu0 %v12193_v42  ;;  %6236 = vmatpush.msra.mxu2 %v11344_v16  ;;  %v12196_v30 = vand.u32 4294901760, %v11152_v27  ;;  %v12197_v42 = vand.u32 4294901760, %v11164_v19 }
 0x4bc   :  { %6307 = vmatpush.msra.mxu3 %v6306_v23  ;;  %6203 = vmatpush.msra.mxu1 %v11154_v22  ;;  %v6324_v22 = vand.u32 4294901760, %v6323_v53  ;;  %v6335_v23 = vsub.f32 %v11416_v2, %v6334_v40  ;;  %v6330_v39 = vand.u32 4294901760, %v6329_v11  ;;  %v6352_v41 = vand.u32 4294901760, %v11463_v63 }
 0x4bd   :  { %6140 = vmatpush.msra.mxu0 %v12194_v31  ;;  %6238 = vmatpush.msra.mxu2 %v11356_v44 }
 0x4be   :  { %6313 = vmatpush.msra.mxu3 %v6312_v29  ;;  %6205 = vmatpush.msra.mxu1 %v11166_v25  ;;  %v6341_v25 = vsub.f32 %v11429_v62, %v6340_v59  ;;  %v6253_v29 = vand.u32 4294901760, %v11460_v36  ;;  %v6336_v53 = vand.u32 4294901760, %v6335_v23  ;;  %v6353_v19 = vsub.f32 %v11463_v63, %v6352_v41 }
 0x4bf   :  { %6144 = vmatpush.msra.mxu0 %v12195_v9  ;;  %6240 = vmatpush.msra.mxu2 %v11368_v21  ;;  %v12204_v23 = vand.u32 4294901760, %v11224_v6  ;;  %v12205_v9 = vand.u32 4294901760, %v11295_v55  ;;  %v12209_v6 = vld [vmem:[#allocation16_spill] sm:$0xff] }
 0x4c0   :  { %6319 = vmatpush.msra.mxu3 %v6318_v54  ;;  %6207 = vmatpush.msra.mxu1 %v11178_v52  ;;  %v6347_v52 = vsub.f32 %v11445_v7, %v6346_v47  ;;  %v6342_v27 = vand.u32 4294901760, %v6341_v25  ;;  %v12198_v54 = vand.u32 4294901760, %v11176_v57  ;;  %v12200_v57 = vand.u32 4294901760, %v11200_v34 }
 0x4c1   :  { %6148 = vmatpush.msra.mxu0 %v12196_v30  ;;  %6242 = vmatpush.msra.mxu2 %v11379_v28  ;;  %v12203_v34 = vand.u32 4294901760, %v11284_v32 }
 0x4c2   :  { %6325 = vmatpush.msra.mxu3 %v6324_v22  ;;  %6209 = vmatpush.msra.mxu1 %v11190_v8  ;;  %v6254_v8 = vsub.f32 %v11460_v36, %v6253_v29  ;;  %v6348_v11 = vand.u32 4294901760, %v6347_v52  ;;  %v6354_v22 = vand.u32 4294901760, %v6353_v19 }
 0x4c3   :  { %6152 = vmatpush.msra.mxu0 %v12197_v42  ;;  %6244 = vmatpush.msra.mxu2 %v11392_v45 }
 0x4c4   :  { %6331 = vmatpush.msra.mxu3 %v6330_v39  ;;  %6211 = vmatpush.msra.mxu1 %v11202_v43  ;;  %v12199_v43 = vand.u32 4294901760, %v11188_v61  ;;  %v6255_v31 = vand.u32 4294901760, %v6254_v8  ;;  %v12201_v61 = vand.u32 4294901760, %v11276_v13 }
 0x4c5   :  { %6156 = vmatpush.msra.mxu0 %v12198_v54  ;;  %6246 = vmatpush.msra.mxu2 %v11405_v48 }
 0x4c6   :  { %6337 = vmatpush.msra.mxu3 %v6336_v53  ;;  %6213 = vmatpush.msra.mxu1 %v11214_v12  ;;  %v12202_v12 = vand.u32 4294901760, %v11212_v50  ;;  %v12206_v50 = vand.u32 4294901760, %v11234_v49  ;;  %v12211_v49 = vld [vmem:[#allocation20_spill] sm:$0xff] }
 0x4c7   :  { %6160 = vmatpush.msra.mxu0 %v12199_v43  ;;  %6248 = vmatpush.msra.mxu2 %v11418_v51 }
 0x4c8   :  { %6343 = vmatpush.msra.mxu3 %v6342_v27  ;;  %6215 = vmatmul.f32.vlgmr.msra.gmra.mxu1 %v11273_v56 }
 0x4c9   :  { %6416 = vmatpush.msrb.mxu1 %v11256_v14  ;;  %6164 = vmatpush.msra.mxu0 %v12200_v57 }
 0x4ca   :  { %6250 = vmatpush.msra.mxu2 %v11437_v60  ;;  %6349 = vmatpush.msra.mxu3 %v6348_v11 }
 0x4cb   :  { %6256 = vmatmul.f32.vlgmr.msra.gmra.mxu2 %v6255_v31  ;;  %6418 = vmatpush.msrb.mxu1 %v11265_v46 }
 0x4cc   :  { %6457 = vmatpush.msrb.mxu2 %v12201_v61  ;;  %6168 = vmatpush.msra.mxu0 %v12202_v12 }
 0x4cd   :  { %6355 = vmatpush.msra.mxu3 %v6354_v22  ;;  %6420 = vmatpush.msrb.mxu1 %v11279_v18 }
 0x4ce   :  { %6357 = vmatmul.f32.vlgmr.msra.gmra.mxu3 %v11432_v24  ;;  %6461 = vmatpush.msrb.mxu2 %v12203_v34 }
 0x4cf   :  { %6524 = vmatpush.msrb.mxu3 %v11256_v14  ;;  %6172 = vmatpush.msra.mxu0 %v12204_v23  ;;  %v12207_v14 = vld [vmem:[#allocation29_spill] sm:$0xff] }
 0x4d0   :  { %6422 = vmatpush.msrb.mxu1 %v11287_v20  ;;  %6465 = vmatpush.msrb.mxu2 %v12205_v9  ;;  %v12208_v39 = vand.u32 4294901760, %v12207_v14 }
 0x4d1   :  { %6526 = vmatpush.msrb.mxu3 %v11265_v46  ;;  %6176 = vmatpush.msra.mxu0 %v12206_v50  ;;  %v12210_v46 = vand.u32 4294901760, %v12209_v6 }
 0x4d2   :  { %6178 = vmatmul.f32.vlgmr.msra.gmra.mxu0 %v11273_v56  ;;  %6424 = vmatpush.msrb.mxu1 %v11297_v4  ;;  %v12212_v56 = vand.u32 4294901760, %v12211_v49 }
 0x4d3   :  { %6363 = vmatpush.msrb.mxu0 %v11276_v13  ;;  %6469 = vmatpush.msrb.mxu2 %v12208_v39  ;;  %v12213_v13 = vand.u32 4294901760, %v11336_v15 }
 0x4d4   :  { %6528 = vmatpush.msrb.mxu3 %v11279_v18  ;;  %6426 = vmatpush.msrb.mxu1 %v11302_v1 }
 0x4d5   :  { %6366 = vmatpush.msrb.mxu0 %v11284_v32  ;;  %6473 = vmatpush.msrb.mxu2 %v12210_v46 }
 0x4d6   :  { %6530 = vmatpush.msrb.mxu3 %v11287_v20  ;;  %6428 = vmatpush.msrb.mxu1 %v11313_v37  ;;  %v12214_v20 = vand.u32 4294901760, %v11354_v58 }
 0x4d7   :  { %6369 = vmatpush.msrb.mxu0 %v11295_v55  ;;  %6477 = vmatpush.msrb.mxu2 %v12212_v56 }
 0x4d8   :  { %6532 = vmatpush.msrb.mxu3 %v11297_v4  ;;  %6430 = vmatpush.msrb.mxu1 %v11332_v10 }
 0x4d9   :  { %6372 = vmatpush.msrb.mxu0 %v12207_v14  ;;  %6481 = vmatpush.msrb.mxu2 %v12213_v13 }
 0x4da   :  { %6534 = vmatpush.msrb.mxu3 %v11302_v1  ;;  %6432 = vmatpush.msrb.mxu1 %v11344_v16 }
 0x4db   :  { %6375 = vmatpush.msrb.mxu0 %v12209_v6  ;;  %6485 = vmatpush.msrb.mxu2 %v12214_v20 }
 0x4dc   :  { %6536 = vmatpush.msrb.mxu3 %v11313_v37  ;;  %6434 = vmatpush.msrb.mxu1 %v11356_v44 }
 0x4dd   :  { %6378 = vmatpush.msrb.mxu0 %v12211_v49  ;;  %6489 = vmatpush.msrb.mxu2 %v6310_v5 }
 0x4de   :  { %6538 = vmatpush.msrb.mxu3 %v11332_v10  ;;  %6436 = vmatpush.msrb.mxu1 %v11368_v21 }
 0x4df   :  { %6381 = vmatpush.msrb.mxu0 %v11336_v15  ;;  %6493 = vmatpush.msrb.mxu2 %v6316_v35  ;;  %v5335_v15 = vpop.f32.mrf.mxu1 }
 0x4e0   :  { %6540 = vmatpush.msrb.mxu3 %v11344_v16  ;;  %6438 = vmatpush.msrb.mxu1 %v11379_v28 }
 0x4e1   :  { %6384 = vmatpush.msrb.mxu0 %v11354_v58  ;;  %6497 = vmatpush.msrb.mxu2 %v6322_v38 }
 0x4e2   :  { %6542 = vmatpush.msrb.mxu3 %v11356_v44  ;;  %6440 = vmatpush.msrb.mxu1 %v11392_v45  ;;  %v6694_v44 = vld [vmem:[%s11617_s5] ss:$0 sm:$0xff]  ;;  %s6903_s5 = smov [#allocation8]  }
 0x4e3   :  { %6387 = vmatpush.msrb.mxu0 %v11366_v3  ;;  %6501 = vmatpush.msrb.mxu2 %v6328_v17  ;;  %s6632_s7 = sshll.u32 %s6903_s5, 4  ;;  %s6633_s7 = int_to_ptr.vmem [resolvable:$true] %s6632_s7 }
 0x4e4   :  { %6544 = vmatpush.msrb.mxu3 %v11368_v21  ;;  %6442 = vmatpush.msrb.mxu1 %v11405_v48 }
 0x4e5   :  { %6390 = vmatpush.msrb.mxu0 %v11377_v0  ;;  %6505 = vmatpush.msrb.mxu2 %v6334_v40 }
 0x4e6   :  { %6546 = vmatpush.msrb.mxu3 %v11379_v28  ;;  %6444 = vmatpush.msrb.mxu1 %v11418_v51  ;;  %v5389_v1 = vpop.f32.mrf.mxu2 }
 0x4e7   :  { %6393 = vmatpush.msrb.mxu0 %v11390_v33  ;;  %6509 = vmatpush.msrb.mxu2 %v6340_v59  ;;  %v5234_v16 = vpop.f32.mrf.mxu0  ;;  %v5534_v58 = vpop.f32.mrf.mxu1 }
 0x4e8   :  { %6548 = vmatpush.msrb.mxu3 %v11392_v45  ;;  %6446 = vmatpush.msrb.mxu1 %v11437_v60  ;;  %v5235_v0 = vadd.f32 %v6694_v44, %v5234_v16 }
 0x4e9   :  { %6396 = vmatpush.msrb.mxu0 %v11403_v26  ;;  %6513 = vmatpush.msrb.mxu2 %v6346_v47  ;;  %v5428_v18 = vpop.f32.mrf.mxu3 }
 0x4ea   :  { %6550 = vmatpush.msrb.mxu3 %v11405_v48  ;;  %6450 = vmatmul.f32.vlgmr.msrb.gmra.mxu1 %v6253_v29  ;;  %v5336_v37 = vadd.f32 %v5335_v15, %v5235_v0 }
 0x4eb   :  { %6399 = vmatpush.msrb.mxu0 %v11416_v2  ;;  %6517 = vmatpush.msrb.mxu2 %v6352_v41 }
 0x4ec   :  { %6552 = vmatpush.msrb.mxu3 %v11418_v51  ;;  %6519 = vmatmul.f32.vlgmr.msrb.gmra.mxu2 %v11432_v24  ;;  %v5390_v4 = vadd.f32 %v5389_v1, %v5336_v37 }
 0x4ed   :  { %6402 = vmatpush.msrb.mxu0 %v11429_v62 }
 0x4ee   :  { %6554 = vmatpush.msrb.mxu3 %v11437_v60  ;;  %v5429_v32 = vadd.f32 %v5428_v18, %v5390_v4 }
 0x4ef   :  { %6556 = vmatmul.f32.vlgmr.msrb.gmra.mxu3 %v11432_v24  ;;  %6405 = vmatpush.msrb.mxu0 %v11445_v7 }
 0x4f0   :  { %v5497_v55 = vpop.f32.mrf.mxu0  ;;  %v5575_v45 = vpop.f32.mrf.mxu2 }
 0x4f1   :  { %6408 = vmatpush.msrb.mxu0 %v11463_v63  ;;  %v5498_v21 = vadd.f32 %v5497_v55, %v5429_v32 }
 0x4f2   :  { %6411 = vmatmul.f32.vlgmr.msrb.gmra.mxu0 %v11460_v36 }
 0x4f3   :  { %v5535_v10 = vadd.f32 %v5534_v58, %v5498_v21  ;;  %v5676_v28 = vpop.f32.mrf.mxu3 }
 0x4f5   :  { %v5576_v3 = vadd.f32 %v5575_v45, %v5535_v10 }
 0x4f7   :  { %v5677_v33 = vadd.f32 %v5676_v28, %v5576_v3 }
 0x501   :  { %v5769_v26 = vpop.f32.mrf.mxu1 }
 0x50a   :  { %v5838_v38 = vpop.f32.mrf.mxu2 }
 0x50b   :  { %v5730_v5 = vpop.f32.mrf.mxu0 }
 0x50c   :  { %v5731_v35 = vadd.f32 %v5730_v5, %v5677_v33 }
 0x50d   :  { %v5875_v51 = vpop.f32.mrf.mxu3 }
 0x50e   :  { %v5770_v48 = vadd.f32 %v5769_v26, %v5731_v35 }
 0x510   :  { %v5839_v2 = vadd.f32 %v5838_v38, %v5770_v48 }
 0x512   :  { %v5876_v62 = vadd.f32 %v5875_v51, %v5839_v2 }
 0x523   :  { %v6017_v60 = vpop.f32.mrf.mxu1 }
 0x52c   :  { %v6071_v7 = vpop.f32.mrf.mxu2 }
 0x52d   :  { %v5916_v17 = vpop.f32.mrf.mxu0 }
 0x52e   :  { %v5917_v24 = vadd.f32 %v5916_v17, %v5876_v62 }
 0x52f   :  { %v6110_v36 = vpop.f32.mrf.mxu3 }
 0x530   :  { %v6018_v40 = vadd.f32 %v6017_v60, %v5917_v24 }
 0x532   :  { %v6072_v59 = vadd.f32 %v6071_v7, %v6018_v40 }
 0x534   :  { %v6111_v47 = vadd.f32 %v6110_v36, %v6072_v59 }
 0x545   :  { %v6216_v30 = vpop.f32.mrf.mxu1 }
 0x54e   :  { %v6257_v41 = vpop.f32.mrf.mxu2 }
 0x54f   :  { %v6179_v63 = vpop.f32.mrf.mxu0 }
 0x550   :  { %v6180_v25 = vadd.f32 %v6179_v63, %v6111_v47 }
 0x551   :  { %v6358_v52 = vpop.f32.mrf.mxu3 }
 0x552   :  { %v6217_v29 = vadd.f32 %v6216_v30, %v6180_v25 }
 0x554   :  { %v6258_v53 = vadd.f32 %v6257_v41, %v6217_v29 }
 0x556   :  { %v6359_v42 = vadd.f32 %v6358_v52, %v6258_v53 }
 0x567   :  { %v6451_v8 = vpop.f32.mrf.mxu1 }
 0x56f   :  { %v6412_v27 = vpop.f32.mrf.mxu0  ;;  %v6520_v11 = vpop.f32.mrf.mxu2 }
 0x570   :  { %v6413_v54 = vadd.f32 %v6412_v27, %v6359_v42 }
 0x572   :  { %v6452_v19 = vadd.f32 %v6451_v8, %v6413_v54  ;;  %v6557_v57 = vpop.f32.mrf.mxu3 }
 0x574   :  { %v6521_v43 = vadd.f32 %v6520_v11, %v6452_v19 }
 0x576   :  { %v6558_v31 = vadd.f32 %v6557_v57, %v6521_v43 }
 0x578   :  { %6560 = vst [vmem:[#allocation8] sm:$0x3] %v6558_v31 }
 0x579   :  { %6637 = dma.vmem_to_hbm [thread:$0]  %s6633_s7, 32, %s6635_s20, [#allocation4]  }
 0x57a   :  { %6887 = dma.done.wait [#allocation4], 32  }
 0x57b   :  { %6888 = vsyncadd [#allocation4], 4294967264 }
 0x57c   :  { %6889 = dma.done.wait [#allocation10], 256  }
 0x57d   :  { %6890 = vsyncadd [#allocation10], 4294967040 }
 0x57e   :  { %6672 = vsyncpa [#allocation3], 1 }
 0x57f   :  { %6673 = vsyncpa [#allocation6], 1 }
 0x580   :  { %6674 = vsyncpa [#allocation4], 1 }
 0x581   :  { %6675 = vsyncpa [#allocation10], 1 }

</bundles_post_ra>
